<compile_context>
chip_gen: v6e
topology: v6e:2x2x1
jax: 0.10.0
libtpu: 0.0.40
codegen_flags: <defaults>
</compile_context>

<pallas_src>
import jax
import jax.numpy as jnp
from jax.experimental import pallas as pl
from jax.experimental.pallas import tpu as pltpu

_NEG = jnp.finfo(jnp.float32).min  # acts as the -inf pad of nn.MaxPool2d


# ---------------------------------------------------------------------------
# In-kernel helpers
# ---------------------------------------------------------------------------
def _lrelu(x, slope=0.1):
    # nn.LeakyReLU(negative_slope=0.1)
    return jnp.where(x >= 0, x, slope * x)


def _dot(a, b):
    # bf16 MXU matmul, f32 accumulation.
    return jnp.dot(a.astype(jnp.bfloat16), b.astype(jnp.bfloat16),
                   preferred_element_type=jnp.float32)


def _pool_max_avg(v, scr_m, scr_s):
    """3x3, stride-2, pad-1 max & avg pooling of v (Hin, Win, C), Hin/Win even.

    scr_m / scr_s are VMEM scratch refs of shape (Hin+1, Win+1, C) used as the
    padded copies (-inf pad for max, 0 pad for avg; avg divides by 9, matching
    AvgPool2d's default count_include_pad=True)."""
    Hin, Win, C = v.shape
    Ho, Wo = Hin // 2, Win // 2
    scr_m[...] = jnp.full(scr_m.shape, _NEG, jnp.float32)
    scr_s[...] = jnp.zeros(scr_s.shape, jnp.float32)
    scr_m[pl.ds(1, Hin), pl.ds(1, Win), :] = v
    scr_s[pl.ds(1, Hin), pl.ds(1, Win), :] = v
    mx = jnp.full((Ho, Wo, C), _NEG, jnp.float32)
    sm = jnp.zeros((Ho, Wo, C), jnp.float32)
    for dy in range(3):
        for dx in range(3):
            mx = jnp.maximum(mx, scr_m[pl.ds(dy, Ho, 2), pl.ds(dx, Wo, 2), :])
            sm = sm + scr_s[pl.ds(dy, Ho, 2), pl.ds(dx, Wo, 2), :]
    return mx, sm * (1.0 / 9.0)


def _conv3x3(v, w9_ref, scr):
    """3x3 'same' conv of v (Hh, Ww, Cin) with w9_ref (9, Cin, Cout).

    scr is a VMEM scratch (Hh+2, Ww+2, Cin) used as the zero-padded copy.
    Returns the (Hh*Ww, Cout) f32 result (bias NOT added)."""
    Hh, Ww, Cin = v.shape
    Cout = w9_ref.shape[-1]
    scr[...] = jnp.zeros(scr.shape, jnp.float32)
    scr[pl.ds(1, Hh), pl.ds(1, Ww), :] = v
    w = w9_ref[...]                                   # (9, Cin, Cout)
    acc = jnp.zeros((Hh * Ww, Cout), jnp.float32)
    for k in range(9):
        dy, dx = k // 3, k % 3
        xs = scr[pl.ds(dy, Hh), pl.ds(dx, Ww), :].reshape(Hh * Ww, Cin)
        acc = acc + _dot(xs, w[k])
    return acc


def _up2_planes(v, scr):
    """x2 bilinear upsample (align_corners=False) of v (Hh, Ww, C).

    Returns the four parity planes (v00, v01, v10, v11) such that
    out[2i+pi, 2j+pj] = v<pi><pj>[i, j].  scr is a VMEM scratch
    (Hh+2, Ww+2, C) holding the edge-replicated copy (PyTorch clamps source
    coordinates at the border).  Only dense / unit-stride ref slices are used
    (no strided or integer-indexed stores)."""
    Hh, Ww, C = v.shape
    scr[pl.ds(1, Hh), pl.ds(1, Ww), :] = v
    scr[pl.ds(0, 1), pl.ds(1, Ww), :] = v[0:1]
    scr[pl.ds(Hh + 1, 1), pl.ds(1, Ww), :] = v[Hh - 1:Hh]
    scr[:, pl.ds(0, 1), :] = scr[:, pl.ds(1, 1), :]
    scr[:, pl.ds(Ww + 1, 1), :] = scr[:, pl.ds(Ww, 1), :]

    c = scr[pl.ds(1, Hh), pl.ds(1, Ww), :]
    up = scr[pl.ds(0, Hh), pl.ds(1, Ww), :]
    dn = scr[pl.ds(2, Hh), pl.ds(1, Ww), :]
    lf = scr[pl.ds(1, Hh), pl.ds(0, Ww), :]
    rt = scr[pl.ds(1, Hh), pl.ds(2, Ww), :]
    ul = scr[pl.ds(0, Hh), pl.ds(0, Ww), :]
    ur = scr[pl.ds(0, Hh), pl.ds(2, Ww), :]
    dl = scr[pl.ds(2, Hh), pl.ds(0, Ww), :]
    dr = scr[pl.ds(2, Hh), pl.ds(2, Ww), :]

    p0, p1 = 0.75, 0.25
    v00 = p0 * (p0 * c + p1 * lf) + p1 * (p0 * up + p1 * ul)
    v01 = p0 * (p0 * c + p1 * rt) + p1 * (p0 * up + p1 * ur)
    v10 = p0 * (p0 * c + p1 * lf) + p1 * (p0 * dn + p1 * dl)
    v11 = p0 * (p0 * c + p1 * rt) + p1 * (p0 * dn + p1 * dr)
    return v00, v01, v10, v11


# ---------------------------------------------------------------------------
# Pallas kernels (one per resolution stage, gridded over batch)
# ---------------------------------------------------------------------------
def _head_kernel(x_ref, w1_ref, b1_ref, w2m_ref, w2a_ref, b2_ref,
                 wl1_ref, bl1_ref, att2_ref, attl_ref, scr_m, scr_s):
    """sAtt_1 (1x1+lrelu) -> max/avg pool -> sAtt_2 (1x1+lrelu) -> sAtt_L1."""
    _, H, W, C = x_ref.shape
    H2, W2 = H // 2, W // 2
    att1 = _lrelu(_dot(x_ref[0].reshape(H * W, C), w1_ref[...]) + b1_ref[...])
    mx, av = _pool_max_avg(att1.reshape(H, W, C), scr_m, scr_s)
    # cat([max, avg], dim=channel) @ W2  ==  max @ W2[:C] + avg @ W2[C:]
    att2 = _lrelu(_dot(mx.reshape(H2 * W2, C), w2m_ref[...])
                  + _dot(av.reshape(H2 * W2, C), w2a_ref[...]) + b2_ref[...])
    attl = _lrelu(_dot(att2, wl1_ref[...]) + bl1_ref[...])
    att2_ref[...] = att2.reshape(1, H2, W2, C)
    attl_ref[...] = attl.reshape(1, H2, W2, C)


def _low_kernel(attl_ref, wl2m_ref, wl2a_ref, bl2_ref, wl3_ref, bl3_ref,
                o00_ref, o01_ref, o10_ref, o11_ref,
                scr_m, scr_s, scr_cv, scr_up):
    """max/avg pool -> sAtt_L2 (3x3 on concat) -> sAtt_L3 (3x3) -> x2 upsample
    (emitted as four parity planes)."""
    _, H2, W2, C = attl_ref.shape
    H4, W4 = H2 // 2, W2 // 2
    mx, av = _pool_max_avg(attl_ref[0], scr_m, scr_s)
    acc = _conv3x3(mx, wl2m_ref, scr_cv) + _conv3x3(av, wl2a_ref, scr_cv)
    attl2 = _lrelu(acc + bl2_ref[...])
    attl3 = _lrelu(_conv3x3(attl2.reshape(H4, W4, C), wl3_ref, scr_cv)
                   + bl3_ref[...])
    v00, v01, v10, v11 = _up2_planes(attl3.reshape(H4, W4, C), scr_up)
    o00_ref[...] = v00.reshape(1, H4, W4, C)
    o01_ref[...] = v01.reshape(1, H4, W4, C)
    o10_ref[...] = v10.reshape(1, H4, W4, C)
    o11_ref[...] = v11.reshape(1, H4, W4, C)


def _mid_kernel(att2_ref, attlup_ref, w3_ref, b3_ref, w4_ref, b4_ref,
                o00_ref, o01_ref, o10_ref, o11_ref, scr_cv, scr_up):
    """sAtt_3 (3x3+lrelu) -> + att_L -> sAtt_4 (1x1+lrelu) -> x2 upsample
    (emitted as four parity planes)."""
    _, H2, W2, C = att2_ref.shape
    a = _lrelu(_conv3x3(att2_ref[0], w3_ref, scr_cv) + b3_ref[...])
    a = a + attlup_ref[0].reshape(H2 * W2, C)
    a = _lrelu(_dot(a, w4_ref[...]) + b4_ref[...])
    v00, v01, v10, v11 = _up2_planes(a.reshape(H2, W2, C), scr_up)
    o00_ref[...] = v00.reshape(1, H2, W2, C)
    o01_ref[...] = v01.reshape(1, H2, W2, C)
    o10_ref[...] = v10.reshape(1, H2, W2, C)
    o11_ref[...] = v11.reshape(1, H2, W2, C)


def _tail_kernel(x_ref, att_ref, w5_ref, b5_ref, wa1_ref, ba1_ref,
                 wa2_ref, ba2_ref, out_ref, scr_cv):
    """sAtt_5 (3x3) -> att_add (two 1x1) -> sigmoid -> x*att*2 + att_add."""
    _, H, W, C = x_ref.shape
    att5 = _conv3x3(att_ref[0], w5_ref, scr_cv) + b5_ref[...]       # no act
    add = _dot(_lrelu(_dot(att5, wa1_ref[...]) + ba1_ref[...]),
               wa2_ref[...]) + ba2_ref[...]
    out = x_ref[0].reshape(H * W, C) * jax.nn.sigmoid(att5) * 2.0 + add
    out_ref[...] = out.reshape(1, H, W, C)


# ---------------------------------------------------------------------------
# pallas_call wrappers
# ---------------------------------------------------------------------------
def _img_spec(H, W, C):
    return pl.BlockSpec((1, H, W, C), lambda b: (b, 0, 0, 0))


def _full_spec(shape):
    n = len(shape)
    return pl.BlockSpec(shape, lambda *_: (0,) * n)


_PARALLEL = pltpu.CompilerParams(dimension_semantics=("parallel",))


def _interleave2x2(p00, p01, p10, p11):
    """Wrapper-side (XLA) spatial interleave of the four x2-upsample parity
    planes: out[b, 2i+pi, 2j+pj, c] = p<pi><pj>[b, i, j, c]."""
    B, Hh, Ww, C = p00.shape
    row0 = jnp.stack([p00, p01], axis=3)            # (B, Hh, Ww, 2, C)
    row1 = jnp.stack([p10, p11], axis=3)
    full = jnp.stack([row0, row1], axis=2)          # (B, Hh, 2, Ww, 2, C)
    return full.reshape(B, 2 * Hh, 2 * Ww, C)


def _head(x, p):
    B, H, W, C = x.shape
    H2, W2 = H // 2, W // 2
    return pl.pallas_call(
        _head_kernel,
        grid=(B,),
        in_specs=[
            _img_spec(H, W, C),
            _full_spec((C, C)), _full_spec((1, C)),
            _full_spec((C, C)), _full_spec((C, C)), _full_spec((1, C)),
            _full_spec((C, C)), _full_spec((1, C)),
        ],
        out_specs=[_img_spec(H2, W2, C), _img_spec(H2, W2, C)],
        out_shape=[jax.ShapeDtypeStruct((B, H2, W2, C), jnp.float32),
                   jax.ShapeDtypeStruct((B, H2, W2, C), jnp.float32)],
        scratch_shapes=[pltpu.VMEM((H + 1, W + 1, C), jnp.float32),
                        pltpu.VMEM((H + 1, W + 1, C), jnp.float32)],
        compiler_params=_PARALLEL,
    )(x, p["w1"], p["b1"], p["w2m"], p["w2a"], p["b2"], p["wl1"], p["bl1"])


def _low(attl, p):
    B, H2, W2, C = attl.shape
    H4, W4 = H2 // 2, W2 // 2
    planes = pl.pallas_call(
        _low_kernel,
        grid=(B,),
        in_specs=[
            _img_spec(H2, W2, C),
            _full_spec((9, C, C)), _full_spec((9, C, C)), _full_spec((1, C)),
            _full_spec((9, C, C)), _full_spec((1, C)),
        ],
        out_specs=[_img_spec(H4, W4, C)] * 4,
        out_shape=[jax.ShapeDtypeStruct((B, H4, W4, C), jnp.float32)] * 4,
        scratch_shapes=[pltpu.VMEM((H2 + 1, W2 + 1, C), jnp.float32),
                        pltpu.VMEM((H2 + 1, W2 + 1, C), jnp.float32),
                        pltpu.VMEM((H4 + 2, W4 + 2, C), jnp.float32),
                        pltpu.VMEM((H4 + 2, W4 + 2, C), jnp.float32)],
        compiler_params=_PARALLEL,
    )(attl, p["wl2m"], p["wl2a"], p["bl2"], p["wl3"], p["bl3"])
    return _interleave2x2(*planes)                   # (B, H2, W2, C)


def _mid(att2, attl_up, p):
    B, H2, W2, C = att2.shape
    planes = pl.pallas_call(
        _mid_kernel,
        grid=(B,),
        in_specs=[
            _img_spec(H2, W2, C), _img_spec(H2, W2, C),
            _full_spec((9, C, C)), _full_spec((1, C)),
            _full_spec((C, C)), _full_spec((1, C)),
        ],
        out_specs=[_img_spec(H2, W2, C)] * 4,
        out_shape=[jax.ShapeDtypeStruct((B, H2, W2, C), jnp.float32)] * 4,
        scratch_shapes=[pltpu.VMEM((H2 + 2, W2 + 2, C), jnp.float32),
                        pltpu.VMEM((H2 + 2, W2 + 2, C), jnp.float32)],
        compiler_params=_PARALLEL,
    )(att2, attl_up, p["w3"], p["b3"], p["w4"], p["b4"])
    return _interleave2x2(*planes)                   # (B, H, W, C)


def _tail(x, att_full, p):
    B, H, W, C = x.shape
    return pl.pallas_call(
        _tail_kernel,
        grid=(B,),
        in_specs=[
            _img_spec(H, W, C), _img_spec(H, W, C),
            _full_spec((9, C, C)), _full_spec((1, C)),
            _full_spec((C, C)), _full_spec((1, C)),
            _full_spec((C, C)), _full_spec((1, C)),
        ],
        out_specs=_img_spec(H, W, C),
        out_shape=jax.ShapeDtypeStruct((B, H, W, C), jnp.float32),
        scratch_shapes=[pltpu.VMEM((H + 2, W + 2, C), jnp.float32)],
        compiler_params=_PARALLEL,
    )(x, att_full, p["w5"], p["b5"], p["wa1"], p["ba1"], p["wa2"], p["ba2"])


# ---------------------------------------------------------------------------
# Parameters (deterministic synthetic init; conv weights stored channels-last,
# 3x3 weights flattened to (9, Cin, Cout), cat-convs pre-split into halves)
# ---------------------------------------------------------------------------
def init_params(nf, key):
    ks = jax.random.split(key, 22)
    C = nf

    def w(k, shape, fan_in):
        return jax.random.normal(k, shape, jnp.float32) * (1.0 / fan_in) ** 0.5

    def b(k, n):
        return 0.1 * jax.random.normal(k, (1, n), jnp.float32)

    return {
        "w1": w(ks[0], (C, C), C), "b1": b(ks[1], C),                       # sAtt_1
        "w2m": w(ks[2], (C, C), 2 * C),                                     # sAtt_2 (max half)
        "w2a": w(ks[3], (C, C), 2 * C), "b2": b(ks[4], C),                  # sAtt_2 (avg half)
        "wl1": w(ks[5], (C, C), C), "bl1": b(ks[6], C),                     # sAtt_L1
        "wl2m": w(ks[7], (9, C, C), 9 * 2 * C),                             # sAtt_L2 (max half)
        "wl2a": w(ks[8], (9, C, C), 9 * 2 * C), "bl2": b(ks[9], C),         # sAtt_L2 (avg half)
        "wl3": w(ks[10], (9, C, C), 9 * C), "bl3": b(ks[11], C),            # sAtt_L3
        "w3": w(ks[12], (9, C, C), 9 * C), "b3": b(ks[13], C),              # sAtt_3
        "w4": w(ks[14], (C, C), C), "b4": b(ks[15], C),                     # sAtt_4
        "w5": w(ks[16], (9, C, C), 9 * C), "b5": b(ks[17], C),              # sAtt_5
        "wa1": w(ks[18], (C, C), C), "ba1": b(ks[19], C),                   # sAtt_add_1
        "wa2": w(ks[20], (C, C), C), "ba2": b(ks[21], C),                   # sAtt_add_2
    }


# ---------------------------------------------------------------------------
# Forward pass (matches Attention.forward)
# ---------------------------------------------------------------------------
def attention_forward(x_nchw, p):
    B, C, H, W = x_nchw.shape
    assert H % 4 == 0 and W % 4 == 0, "H and W must be divisible by 4"
    x = jnp.transpose(x_nchw, (0, 2, 3, 1))            # NHWC
    att2, attl = _head(x, p)                           # (B, H/2, W/2, C) x 2
    attl_up = _low(attl, p)                            # (B, H/2, W/2, C)
    att_full = _mid(att2, attl_up, p)                  # (B, H, W, C)
    out = _tail(x, att_full, p)                        # (B, H, W, C)
    return jnp.transpose(out, (0, 3, 1, 2))            # back to NCHW


if __name__ == "__main__":
    nf = 32
    B, H, W = 2, 16, 16
    key = jax.random.PRNGKey(0)
    kx, kp = jax.random.split(key)
    x = jax.random.normal(kx, (B, nf, H, W), jnp.float32)
    params = init_params(nf, kp)

    out = jax.jit(attention_forward)(x, params)
    jax.block_until_ready(out)
    assert out.shape == (B, nf, H, W) and out.dtype == jnp.float32
    assert bool(jnp.all(jnp.isfinite(out)))
    print("KERNEL_OK")
</pallas_src>

<mosaic_0001>
module attributes {stable_mosaic.version = 11 : i64} {
  func.func @_head_kernel(%arg0: i32, %arg1: memref<1x16x16x32xf32, #tpu.memory_space<vmem>>, %arg2: memref<32x32xf32, #tpu.memory_space<vmem>>, %arg3: memref<1x32xf32, #tpu.memory_space<vmem>>, %arg4: memref<32x32xf32, #tpu.memory_space<vmem>>, %arg5: memref<32x32xf32, #tpu.memory_space<vmem>>, %arg6: memref<1x32xf32, #tpu.memory_space<vmem>>, %arg7: memref<32x32xf32, #tpu.memory_space<vmem>>, %arg8: memref<1x32xf32, #tpu.memory_space<vmem>>, %arg9: memref<1x8x8x32xf32, #tpu.memory_space<vmem>>, %arg10: memref<1x8x8x32xf32, #tpu.memory_space<vmem>>, %arg11: memref<17x17x32xf32, #tpu.memory_space<vmem>>, %arg12: memref<17x17x32xf32, #tpu.memory_space<vmem>>) attributes {dimension_semantics = [#tpu.dimension_semantics<parallel>], iteration_bounds = array<i64: 2>, scalar_prefetch = 0 : i64, scratch_operands = 2 : i64, tpu.core_type = #tpu.core_type<tc>, window_params = [{transform_indices = @transform_0, window_bounds = array<i64: 1, 16, 16, 32>}, {pipeline_mode = #tpu.pipeline_mode<synchronous>, transform_indices = @transform_1, window_bounds = array<i64: 32, 32>}, {pipeline_mode = #tpu.pipeline_mode<synchronous>, transform_indices = @transform_2, window_bounds = array<i64: 1, 32>}, {pipeline_mode = #tpu.pipeline_mode<synchronous>, transform_indices = @transform_3, window_bounds = array<i64: 32, 32>}, {pipeline_mode = #tpu.pipeline_mode<synchronous>, transform_indices = @transform_4, window_bounds = array<i64: 32, 32>}, {pipeline_mode = #tpu.pipeline_mode<synchronous>, transform_indices = @transform_5, window_bounds = array<i64: 1, 32>}, {pipeline_mode = #tpu.pipeline_mode<synchronous>, transform_indices = @transform_6, window_bounds = array<i64: 32, 32>}, {pipeline_mode = #tpu.pipeline_mode<synchronous>, transform_indices = @transform_7, window_bounds = array<i64: 1, 32>}, {transform_indices = @transform_8, window_bounds = array<i64: 1, 8, 8, 32>}, {transform_indices = @transform_9, window_bounds = array<i64: 1, 8, 8, 32>}]} {
    %c0 = arith.constant 0 : index
    %c0_0 = arith.constant 0 : index
    %c0_1 = arith.constant 0 : index
    %c0_2 = arith.constant 0 : index
    %0 = vector.load %arg1[%c0, %c0_0, %c0_1, %c0_2] : memref<1x16x16x32xf32, #tpu.memory_space<vmem>>, vector<1x16x16x32xf32>
    %1 = vector.shape_cast %0 : vector<1x16x16x32xf32> to vector<16x16x32xf32>
    %2 = vector.shape_cast %1 : vector<16x16x32xf32> to vector<256x32xf32>
    %c0_3 = arith.constant 0 : index
    %c0_4 = arith.constant 0 : index
    %3 = vector.load %arg2[%c0_3, %c0_4] : memref<32x32xf32, #tpu.memory_space<vmem>>, vector<32x32xf32>
    %4 = arith.truncf %2 : vector<256x32xf32> to vector<256x32xbf16>
    %5 = arith.truncf %3 : vector<32x32xf32> to vector<32x32xbf16>
    %cst = arith.constant dense<0.000000e+00> : vector<256x32xf32>
    %6 = tpu.matmul %4, %5, %cst {dimension_numbers = #tpu.dot_dimension_numbers<[1], [0], [0], [1], [0, 0, 1, 1], [], []>} : vector<256x32xbf16>, vector<32x32xbf16>, vector<256x32xf32> -> vector<256x32xf32>
    %c0_5 = arith.constant 0 : index
    %c0_6 = arith.constant 0 : index
    %7 = vector.load %arg3[%c0_5, %c0_6] : memref<1x32xf32, #tpu.memory_space<vmem>>, vector<1x32xf32>
    %8 = vector.broadcast %7 : vector<1x32xf32> to vector<256x32xf32>
    %9 = arith.addf %6, %8 : vector<256x32xf32>
    %cst_7 = arith.constant 0.000000e+00 : f32
    %10 = vector.broadcast %cst_7 : f32 to vector<256x32xf32>
    %11 = arith.cmpf oge, %9, %10 : vector<256x32xf32>
    %cst_8 = arith.constant 1.000000e-01 : f32
    %12 = vector.broadcast %cst_8 : f32 to vector<256x32xf32>
    %13 = arith.mulf %12, %9 : vector<256x32xf32>
    %14 = arith.select %11, %9, %13 : vector<256x32xi1>, vector<256x32xf32>
    %15 = vector.shape_cast %14 : vector<256x32xf32> to vector<16x16x32xf32>
    %cst_9 = arith.constant -3.40282347E+38 : f32
    %16 = vector.broadcast %cst_9 : f32 to vector<17x17x32xf32>
    %c0_10 = arith.constant 0 : index
    %c0_11 = arith.constant 0 : index
    %c0_12 = arith.constant 0 : index
    %17 = vector.load %arg11[%c0_10, %c0_11, %c0_12] : memref<17x17x32xf32, #tpu.memory_space<vmem>>, vector<17x17x32xf32>
    tpu.vector_store %arg11[%c0_10, %c0_11, %c0_12], %16 {strides = array<i32>} : memref<17x17x32xf32, #tpu.memory_space<vmem>>, vector<17x17x32xf32>,
    %cst_13 = arith.constant 0.000000e+00 : f32
    %18 = vector.broadcast %cst_13 : f32 to vector<17x17x32xf32>
    %c0_14 = arith.constant 0 : index
    %c0_15 = arith.constant 0 : index
    %c0_16 = arith.constant 0 : index
    %19 = vector.load %arg12[%c0_14, %c0_15, %c0_16] : memref<17x17x32xf32, #tpu.memory_space<vmem>>, vector<17x17x32xf32>
    tpu.vector_store %arg12[%c0_14, %c0_15, %c0_16], %18 {strides = array<i32>} : memref<17x17x32xf32, #tpu.memory_space<vmem>>, vector<17x17x32xf32>,
    %c1 = arith.constant 1 : index
    %c1_17 = arith.constant 1 : index
    %c0_18 = arith.constant 0 : index
    %20 = vector.load %arg11[%c1, %c1_17, %c0_18] : memref<17x17x32xf32, #tpu.memory_space<vmem>>, vector<16x16x32xf32>
    tpu.vector_store %arg11[%c1, %c1_17, %c0_18], %15 {strides = array<i32>} : memref<17x17x32xf32, #tpu.memory_space<vmem>>, vector<16x16x32xf32>,
    %c1_19 = arith.constant 1 : index
    %c1_20 = arith.constant 1 : index
    %c0_21 = arith.constant 0 : index
    %21 = vector.load %arg12[%c1_19, %c1_20, %c0_21] : memref<17x17x32xf32, #tpu.memory_space<vmem>>, vector<16x16x32xf32>
    tpu.vector_store %arg12[%c1_19, %c1_20, %c0_21], %15 {strides = array<i32>} : memref<17x17x32xf32, #tpu.memory_space<vmem>>, vector<16x16x32xf32>,
    %cst_22 = arith.constant -3.40282347E+38 : f32
    %22 = vector.broadcast %cst_22 : f32 to vector<8x8x32xf32>
    %cst_23 = arith.constant 0.000000e+00 : f32
    %23 = vector.broadcast %cst_23 : f32 to vector<8x8x32xf32>
    %c0_24 = arith.constant 0 : index
    %c0_25 = arith.constant 0 : index
    %c0_26 = arith.constant 0 : index
    %24 = tpu.strided_load %arg11[%c0_24, %c0_25, %c0_26] {strides = array<i32: 2, 2, 1>} : memref<17x17x32xf32, #tpu.memory_space<vmem>>, vector<8x8x32xf32>
    %25 = arith.maximumf %22, %24 : vector<8x8x32xf32>
    %c0_27 = arith.constant 0 : index
    %c0_28 = arith.constant 0 : index
    %c0_29 = arith.constant 0 : index
    %26 = tpu.strided_load %arg12[%c0_27, %c0_28, %c0_29] {strides = array<i32: 2, 2, 1>} : memref<17x17x32xf32, #tpu.memory_space<vmem>>, vector<8x8x32xf32>
    %27 = arith.addf %23, %26 : vector<8x8x32xf32>
    %c0_30 = arith.constant 0 : index
    %c1_31 = arith.constant 1 : index
    %c0_32 = arith.constant 0 : index
    %28 = tpu.strided_load %arg11[%c0_30, %c1_31, %c0_32] {strides = array<i32: 2, 2, 1>} : memref<17x17x32xf32, #tpu.memory_space<vmem>>, vector<8x8x32xf32>
    %29 = arith.maximumf %25, %28 : vector<8x8x32xf32>
    %c0_33 = arith.constant 0 : index
    %c1_34 = arith.constant 1 : index
    %c0_35 = arith.constant 0 : index
    %30 = tpu.strided_load %arg12[%c0_33, %c1_34, %c0_35] {strides = array<i32: 2, 2, 1>} : memref<17x17x32xf32, #tpu.memory_space<vmem>>, vector<8x8x32xf32>
    %31 = arith.addf %27, %30 : vector<8x8x32xf32>
    %c0_36 = arith.constant 0 : index
    %c2 = arith.constant 2 : index
    %c0_37 = arith.constant 0 : index
    %32 = tpu.strided_load %arg11[%c0_36, %c2, %c0_37] {strides = array<i32: 2, 2, 1>} : memref<17x17x32xf32, #tpu.memory_space<vmem>>, vector<8x8x32xf32>
    %33 = arith.maximumf %29, %32 : vector<8x8x32xf32>
    %c0_38 = arith.constant 0 : index
    %c2_39 = arith.constant 2 : index
    %c0_40 = arith.constant 0 : index
    %34 = tpu.strided_load %arg12[%c0_38, %c2_39, %c0_40] {strides = array<i32: 2, 2, 1>} : memref<17x17x32xf32, #tpu.memory_space<vmem>>, vector<8x8x32xf32>
    %35 = arith.addf %31, %34 : vector<8x8x32xf32>
    %c1_41 = arith.constant 1 : index
    %c0_42 = arith.constant 0 : index
    %c0_43 = arith.constant 0 : index
    %36 = tpu.strided_load %arg11[%c1_41, %c0_42, %c0_43] {strides = array<i32: 2, 2, 1>} : memref<17x17x32xf32, #tpu.memory_space<vmem>>, vector<8x8x32xf32>
    %37 = arith.maximumf %33, %36 : vector<8x8x32xf32>
    %c1_44 = arith.constant 1 : index
    %c0_45 = arith.constant 0 : index
    %c0_46 = arith.constant 0 : index
    %38 = tpu.strided_load %arg12[%c1_44, %c0_45, %c0_46] {strides = array<i32: 2, 2, 1>} : memref<17x17x32xf32, #tpu.memory_space<vmem>>, vector<8x8x32xf32>
    %39 = arith.addf %35, %38 : vector<8x8x32xf32>
    %c1_47 = arith.constant 1 : index
    %c1_48 = arith.constant 1 : index
    %c0_49 = arith.constant 0 : index
    %40 = tpu.strided_load %arg11[%c1_47, %c1_48, %c0_49] {strides = array<i32: 2, 2, 1>} : memref<17x17x32xf32, #tpu.memory_space<vmem>>, vector<8x8x32xf32>
    %41 = arith.maximumf %37, %40 : vector<8x8x32xf32>
    %c1_50 = arith.constant 1 : index
    %c1_51 = arith.constant 1 : index
    %c0_52 = arith.constant 0 : index
    %42 = tpu.strided_load %arg12[%c1_50, %c1_51, %c0_52] {strides = array<i32: 2, 2, 1>} : memref<17x17x32xf32, #tpu.memory_space<vmem>>, vector<8x8x32xf32>
    %43 = arith.addf %39, %42 : vector<8x8x32xf32>
    %c1_53 = arith.constant 1 : index
    %c2_54 = arith.constant 2 : index
    %c0_55 = arith.constant 0 : index
    %44 = tpu.strided_load %arg11[%c1_53, %c2_54, %c0_55] {strides = array<i32: 2, 2, 1>} : memref<17x17x32xf32, #tpu.memory_space<vmem>>, vector<8x8x32xf32>
    %45 = arith.maximumf %41, %44 : vector<8x8x32xf32>
    %c1_56 = arith.constant 1 : index
    %c2_57 = arith.constant 2 : index
    %c0_58 = arith.constant 0 : index
    %46 = tpu.strided_load %arg12[%c1_56, %c2_57, %c0_58] {strides = array<i32: 2, 2, 1>} : memref<17x17x32xf32, #tpu.memory_space<vmem>>, vector<8x8x32xf32>
    %47 = arith.addf %43, %46 : vector<8x8x32xf32>
    %c2_59 = arith.constant 2 : index
    %c0_60 = arith.constant 0 : index
    %c0_61 = arith.constant 0 : index
    %48 = tpu.strided_load %arg11[%c2_59, %c0_60, %c0_61] {strides = array<i32: 2, 2, 1>} : memref<17x17x32xf32, #tpu.memory_space<vmem>>, vector<8x8x32xf32>
    %49 = arith.maximumf %45, %48 : vector<8x8x32xf32>
    %c2_62 = arith.constant 2 : index
    %c0_63 = arith.constant 0 : index
    %c0_64 = arith.constant 0 : index
    %50 = tpu.strided_load %arg12[%c2_62, %c0_63, %c0_64] {strides = array<i32: 2, 2, 1>} : memref<17x17x32xf32, #tpu.memory_space<vmem>>, vector<8x8x32xf32>
    %51 = arith.addf %47, %50 : vector<8x8x32xf32>
    %c2_65 = arith.constant 2 : index
    %c1_66 = arith.constant 1 : index
    %c0_67 = arith.constant 0 : index
    %52 = tpu.strided_load %arg11[%c2_65, %c1_66, %c0_67] {strides = array<i32: 2, 2, 1>} : memref<17x17x32xf32, #tpu.memory_space<vmem>>, vector<8x8x32xf32>
    %53 = arith.maximumf %49, %52 : vector<8x8x32xf32>
    %c2_68 = arith.constant 2 : index
    %c1_69 = arith.constant 1 : index
    %c0_70 = arith.constant 0 : index
    %54 = tpu.strided_load %arg12[%c2_68, %c1_69, %c0_70] {strides = array<i32: 2, 2, 1>} : memref<17x17x32xf32, #tpu.memory_space<vmem>>, vector<8x8x32xf32>
    %55 = arith.addf %51, %54 : vector<8x8x32xf32>
    %c2_71 = arith.constant 2 : index
    %c2_72 = arith.constant 2 : index
    %c0_73 = arith.constant 0 : index
    %56 = tpu.strided_load %arg11[%c2_71, %c2_72, %c0_73] {strides = array<i32: 2, 2, 1>} : memref<17x17x32xf32, #tpu.memory_space<vmem>>, vector<8x8x32xf32>
    %57 = arith.maximumf %53, %56 : vector<8x8x32xf32>
    %c2_74 = arith.constant 2 : index
    %c2_75 = arith.constant 2 : index
    %c0_76 = arith.constant 0 : index
    %58 = tpu.strided_load %arg12[%c2_74, %c2_75, %c0_76] {strides = array<i32: 2, 2, 1>} : memref<17x17x32xf32, #tpu.memory_space<vmem>>, vector<8x8x32xf32>
    %59 = arith.addf %55, %58 : vector<8x8x32xf32>
    %cst_77 = arith.constant 0.111111112 : f32
    %60 = vector.broadcast %cst_77 : f32 to vector<8x8x32xf32>
    %61 = arith.mulf %59, %60 : vector<8x8x32xf32>
    %62 = vector.shape_cast %57 : vector<8x8x32xf32> to vector<64x32xf32>
    %c0_78 = arith.constant 0 : index
    %c0_79 = arith.constant 0 : index
    %63 = vector.load %arg4[%c0_78, %c0_79] : memref<32x32xf32, #tpu.memory_space<vmem>>, vector<32x32xf32>
    %64 = arith.truncf %62 : vector<64x32xf32> to vector<64x32xbf16>
    %65 = arith.truncf %63 : vector<32x32xf32> to vector<32x32xbf16>
    %cst_80 = arith.constant dense<0.000000e+00> : vector<64x32xf32>
    %66 = tpu.matmul %64, %65, %cst_80 {dimension_numbers = #tpu.dot_dimension_numbers<[1], [0], [0], [1], [0, 0, 1, 1], [], []>} : vector<64x32xbf16>, vector<32x32xbf16>, vector<64x32xf32> -> vector<64x32xf32>
    %67 = vector.shape_cast %61 : vector<8x8x32xf32> to vector<64x32xf32>
    %c0_81 = arith.constant 0 : index
    %c0_82 = arith.constant 0 : index
    %68 = vector.load %arg5[%c0_81, %c0_82] : memref<32x32xf32, #tpu.memory_space<vmem>>, vector<32x32xf32>
    %69 = arith.truncf %67 : vector<64x32xf32> to vector<64x32xbf16>
    %70 = arith.truncf %68 : vector<32x32xf32> to vector<32x32xbf16>
    %cst_83 = arith.constant dense<0.000000e+00> : vector<64x32xf32>
    %71 = tpu.matmul %69, %70, %cst_83 {dimension_numbers = #tpu.dot_dimension_numbers<[1], [0], [0], [1], [0, 0, 1, 1], [], []>} : vector<64x32xbf16>, vector<32x32xbf16>, vector<64x32xf32> -> vector<64x32xf32>
    %72 = arith.addf %66, %71 : vector<64x32xf32>
    %c0_84 = arith.constant 0 : index
    %c0_85 = arith.constant 0 : index
    %73 = vector.load %arg6[%c0_84, %c0_85] : memref<1x32xf32, #tpu.memory_space<vmem>>, vector<1x32xf32>
    %74 = vector.broadcast %73 : vector<1x32xf32> to vector<64x32xf32>
    %75 = arith.addf %72, %74 : vector<64x32xf32>
    %cst_86 = arith.constant 0.000000e+00 : f32
    %76 = vector.broadcast %cst_86 : f32 to vector<64x32xf32>
    %77 = arith.cmpf oge, %75, %76 : vector<64x32xf32>
    %cst_87 = arith.constant 1.000000e-01 : f32
    %78 = vector.broadcast %cst_87 : f32 to vector<64x32xf32>
    %79 = arith.mulf %78, %75 : vector<64x32xf32>
    %80 = arith.select %77, %75, %79 : vector<64x32xi1>, vector<64x32xf32>
    %c0_88 = arith.constant 0 : index
    %c0_89 = arith.constant 0 : index
    %81 = vector.load %arg7[%c0_88, %c0_89] : memref<32x32xf32, #tpu.memory_space<vmem>>, vector<32x32xf32>
    %82 = arith.truncf %80 : vector<64x32xf32> to vector<64x32xbf16>
    %83 = arith.truncf %81 : vector<32x32xf32> to vector<32x32xbf16>
    %cst_90 = arith.constant dense<0.000000e+00> : vector<64x32xf32>
    %84 = tpu.matmul %82, %83, %cst_90 {dimension_numbers = #tpu.dot_dimension_numbers<[1], [0], [0], [1], [0, 0, 1, 1], [], []>} : vector<64x32xbf16>, vector<32x32xbf16>, vector<64x32xf32> -> vector<64x32xf32>
    %c0_91 = arith.constant 0 : index
    %c0_92 = arith.constant 0 : index
    %85 = vector.load %arg8[%c0_91, %c0_92] : memref<1x32xf32, #tpu.memory_space<vmem>>, vector<1x32xf32>
    %86 = vector.broadcast %85 : vector<1x32xf32> to vector<64x32xf32>
    %87 = arith.addf %84, %86 : vector<64x32xf32>
    %cst_93 = arith.constant 0.000000e+00 : f32
    %88 = vector.broadcast %cst_93 : f32 to vector<64x32xf32>
    %89 = arith.cmpf oge, %87, %88 : vector<64x32xf32>
    %cst_94 = arith.constant 1.000000e-01 : f32
    %90 = vector.broadcast %cst_94 : f32 to vector<64x32xf32>
    %91 = arith.mulf %90, %87 : vector<64x32xf32>
    %92 = arith.select %89, %87, %91 : vector<64x32xi1>, vector<64x32xf32>
    %93 = vector.shape_cast %80 : vector<64x32xf32> to vector<1x8x8x32xf32>
    %c0_95 = arith.constant 0 : index
    %c0_96 = arith.constant 0 : index
    %c0_97 = arith.constant 0 : index
    %c0_98 = arith.constant 0 : index
    %94 = vector.load %arg9[%c0_95, %c0_96, %c0_97, %c0_98] : memref<1x8x8x32xf32, #tpu.memory_space<vmem>>, vector<1x8x8x32xf32>
    tpu.vector_store %arg9[%c0_95, %c0_96, %c0_97, %c0_98], %93 {strides = array<i32>} : memref<1x8x8x32xf32, #tpu.memory_space<vmem>>, vector<1x8x8x32xf32>,
    %95 = vector.shape_cast %92 : vector<64x32xf32> to vector<1x8x8x32xf32>
    %c0_99 = arith.constant 0 : index
    %c0_100 = arith.constant 0 : index
    %c0_101 = arith.constant 0 : index
    %c0_102 = arith.constant 0 : index
    %96 = vector.load %arg10[%c0_99, %c0_100, %c0_101, %c0_102] : memref<1x8x8x32xf32, #tpu.memory_space<vmem>>, vector<1x8x8x32xf32>
    tpu.vector_store %arg10[%c0_99, %c0_100, %c0_101, %c0_102], %95 {strides = array<i32>} : memref<1x8x8x32xf32, #tpu.memory_space<vmem>>, vector<1x8x8x32xf32>,
    return
  }
  func.func @transform_0(%arg0: i32) -> (i32, i32, i32, i32) {
    %c0_i32 = arith.constant 0 : i32
    %c0_i32_0 = arith.constant 0 : i32
    %c0_i32_1 = arith.constant 0 : i32
    %c0_i32_2 = arith.constant 0 : i32
    return %arg0, %c0_i32, %c0_i32_0, %c0_i32_1 : i32, i32, i32, i32
  }
  func.func @transform_1(%arg0: i32) -> (i32, i32) {
    %c0_i32 = arith.constant 0 : i32
    %c0_i32_0 = arith.constant 0 : i32
    %c0_i32_1 = arith.constant 0 : i32
    return %c0_i32, %c0_i32_0 : i32, i32
  }
  func.func @transform_2(%arg0: i32) -> (i32, i32) {
    %c0_i32 = arith.constant 0 : i32
    %c0_i32_0 = arith.constant 0 : i32
    %c0_i32_1 = arith.constant 0 : i32
    return %c0_i32, %c0_i32_0 : i32, i32
  }
  func.func @transform_3(%arg0: i32) -> (i32, i32) {
    %c0_i32 = arith.constant 0 : i32
    %c0_i32_0 = arith.constant 0 : i32
    %c0_i32_1 = arith.constant 0 : i32
    return %c0_i32, %c0_i32_0 : i32, i32
  }
  func.func @transform_4(%arg0: i32) -> (i32, i32) {
    %c0_i32 = arith.constant 0 : i32
    %c0_i32_0 = arith.constant 0 : i32
    %c0_i32_1 = arith.constant 0 : i32
    return %c0_i32, %c0_i32_0 : i32, i32
  }
  func.func @transform_5(%arg0: i32) -> (i32, i32) {
    %c0_i32 = arith.constant 0 : i32
    %c0_i32_0 = arith.constant 0 : i32
    %c0_i32_1 = arith.constant 0 : i32
    return %c0_i32, %c0_i32_0 : i32, i32
  }
  func.func @transform_6(%arg0: i32) -> (i32, i32) {
    %c0_i32 = arith.constant 0 : i32
    %c0_i32_0 = arith.constant 0 : i32
    %c0_i32_1 = arith.constant 0 : i32
    return %c0_i32, %c0_i32_0 : i32, i32
  }
  func.func @transform_7(%arg0: i32) -> (i32, i32) {
    %c0_i32 = arith.constant 0 : i32
    %c0_i32_0 = arith.constant 0 : i32
    %c0_i32_1 = arith.constant 0 : i32
    return %c0_i32, %c0_i32_0 : i32, i32
  }
  func.func @transform_8(%arg0: i32) -> (i32, i32, i32, i32) {
    %c0_i32 = arith.constant 0 : i32
    %c0_i32_0 = arith.constant 0 : i32
    %c0_i32_1 = arith.constant 0 : i32
    %c0_i32_2 = arith.constant 0 : i32
    return %arg0, %c0_i32, %c0_i32_0, %c0_i32_1 : i32, i32, i32, i32
  }
  func.func @transform_9(%arg0: i32) -> (i32, i32, i32, i32) {
    %c0_i32 = arith.constant 0 : i32
    %c0_i32_0 = arith.constant 0 : i32
    %c0_i32_1 = arith.constant 0 : i32
    %c0_i32_2 = arith.constant 0 : i32
    return %arg0, %c0_i32, %c0_i32_0, %c0_i32_1 : i32, i32, i32, i32
  }
}

module attributes {stable_mosaic.version = 11 : i64} {
  func.func @_low_kernel(%arg0: i32, %arg1: memref<1x8x8x32xf32, #tpu.memory_space<vmem>>, %arg2: memref<9x32x32xf32, #tpu.memory_space<vmem>>, %arg3: memref<9x32x32xf32, #tpu.memory_space<vmem>>, %arg4: memref<1x32xf32, #tpu.memory_space<vmem>>, %arg5: memref<9x32x32xf32, #tpu.memory_space<vmem>>, %arg6: memref<1x32xf32, #tpu.memory_space<vmem>>, %arg7: memref<1x4x4x32xf32, #tpu.memory_space<vmem>>, %arg8: memref<1x4x4x32xf32, #tpu.memory_space<vmem>>, %arg9: memref<1x4x4x32xf32, #tpu.memory_space<vmem>>, %arg10: memref<1x4x4x32xf32, #tpu.memory_space<vmem>>, %arg11: memref<9x9x32xf32, #tpu.memory_space<vmem>>, %arg12: memref<9x9x32xf32, #tpu.memory_space<vmem>>, %arg13: memref<6x6x32xf32, #tpu.memory_space<vmem>>, %arg14: memref<6x6x32xf32, #tpu.memory_space<vmem>>) attributes {dimension_semantics = [#tpu.dimension_semantics<parallel>], iteration_bounds = array<i64: 2>, scalar_prefetch = 0 : i64, scratch_operands = 4 : i64, tpu.core_type = #tpu.core_type<tc>, window_params = [{transform_indices = @transform_0, window_bounds = array<i64: 1, 8, 8, 32>}, {pipeline_mode = #tpu.pipeline_mode<synchronous>, transform_indices = @transform_1, window_bounds = array<i64: 9, 32, 32>}, {pipeline_mode = #tpu.pipeline_mode<synchronous>, transform_indices = @transform_2, window_bounds = array<i64: 9, 32, 32>}, {pipeline_mode = #tpu.pipeline_mode<synchronous>, transform_indices = @transform_3, window_bounds = array<i64: 1, 32>}, {pipeline_mode = #tpu.pipeline_mode<synchronous>, transform_indices = @transform_4, window_bounds = array<i64: 9, 32, 32>}, {pipeline_mode = #tpu.pipeline_mode<synchronous>, transform_indices = @transform_5, window_bounds = array<i64: 1, 32>}, {transform_indices = @transform_6, window_bounds = array<i64: 1, 4, 4, 32>}, {transform_indices = @transform_7, window_bounds = array<i64: 1, 4, 4, 32>}, {transform_indices = @transform_8, window_bounds = array<i64: 1, 4, 4, 32>}, {transform_indices = @transform_9, window_bounds = array<i64: 1, 4, 4, 32>}]} {
    %c0 = arith.constant 0 : index
    %c0_0 = arith.constant 0 : index
    %c0_1 = arith.constant 0 : index
    %c0_2 = arith.constant 0 : index
    %0 = vector.load %arg1[%c0, %c0_0, %c0_1, %c0_2] : memref<1x8x8x32xf32, #tpu.memory_space<vmem>>, vector<1x8x8x32xf32>
    %1 = vector.shape_cast %0 : vector<1x8x8x32xf32> to vector<8x8x32xf32>
    %cst = arith.constant -3.40282347E+38 : f32
    %2 = vector.broadcast %cst : f32 to vector<9x9x32xf32>
    %c0_3 = arith.constant 0 : index
    %c0_4 = arith.constant 0 : index
    %c0_5 = arith.constant 0 : index
    %3 = vector.load %arg11[%c0_3, %c0_4, %c0_5] : memref<9x9x32xf32, #tpu.memory_space<vmem>>, vector<9x9x32xf32>
    tpu.vector_store %arg11[%c0_3, %c0_4, %c0_5], %2 {strides = array<i32>} : memref<9x9x32xf32, #tpu.memory_space<vmem>>, vector<9x9x32xf32>,
    %cst_6 = arith.constant 0.000000e+00 : f32
    %4 = vector.broadcast %cst_6 : f32 to vector<9x9x32xf32>
    %c0_7 = arith.constant 0 : index
    %c0_8 = arith.constant 0 : index
    %c0_9 = arith.constant 0 : index
    %5 = vector.load %arg12[%c0_7, %c0_8, %c0_9] : memref<9x9x32xf32, #tpu.memory_space<vmem>>, vector<9x9x32xf32>
    tpu.vector_store %arg12[%c0_7, %c0_8, %c0_9], %4 {strides = array<i32>} : memref<9x9x32xf32, #tpu.memory_space<vmem>>, vector<9x9x32xf32>,
    %c1 = arith.constant 1 : index
    %c1_10 = arith.constant 1 : index
    %c0_11 = arith.constant 0 : index
    %6 = vector.load %arg11[%c1, %c1_10, %c0_11] : memref<9x9x32xf32, #tpu.memory_space<vmem>>, vector<8x8x32xf32>
    tpu.vector_store %arg11[%c1, %c1_10, %c0_11], %1 {strides = array<i32>} : memref<9x9x32xf32, #tpu.memory_space<vmem>>, vector<8x8x32xf32>,
    %c1_12 = arith.constant 1 : index
    %c1_13 = arith.constant 1 : index
    %c0_14 = arith.constant 0 : index
    %7 = vector.load %arg12[%c1_12, %c1_13, %c0_14] : memref<9x9x32xf32, #tpu.memory_space<vmem>>, vector<8x8x32xf32>
    tpu.vector_store %arg12[%c1_12, %c1_13, %c0_14], %1 {strides = array<i32>} : memref<9x9x32xf32, #tpu.memory_space<vmem>>, vector<8x8x32xf32>,
    %cst_15 = arith.constant -3.40282347E+38 : f32
    %8 = vector.broadcast %cst_15 : f32 to vector<4x4x32xf32>
    %cst_16 = arith.constant 0.000000e+00 : f32
    %9 = vector.broadcast %cst_16 : f32 to vector<4x4x32xf32>
    %c0_17 = arith.constant 0 : index
    %c0_18 = arith.constant 0 : index
    %c0_19 = arith.constant 0 : index
    %10 = tpu.strided_load %arg11[%c0_17, %c0_18, %c0_19] {strides = array<i32: 2, 2, 1>} : memref<9x9x32xf32, #tpu.memory_space<vmem>>, vector<4x4x32xf32>
    %11 = arith.maximumf %8, %10 : vector<4x4x32xf32>
    %c0_20 = arith.constant 0 : index
    %c0_21 = arith.constant 0 : index
    %c0_22 = arith.constant 0 : index
    %12 = tpu.strided_load %arg12[%c0_20, %c0_21, %c0_22] {strides = array<i32: 2, 2, 1>} : memref<9x9x32xf32, #tpu.memory_space<vmem>>, vector<4x4x32xf32>
    %13 = arith.addf %9, %12 : vector<4x4x32xf32>
    %c0_23 = arith.constant 0 : index
    %c1_24 = arith.constant 1 : index
    %c0_25 = arith.constant 0 : index
    %14 = tpu.strided_load %arg11[%c0_23, %c1_24, %c0_25] {strides = array<i32: 2, 2, 1>} : memref<9x9x32xf32, #tpu.memory_space<vmem>>, vector<4x4x32xf32>
    %15 = arith.maximumf %11, %14 : vector<4x4x32xf32>
    %c0_26 = arith.constant 0 : index
    %c1_27 = arith.constant 1 : index
    %c0_28 = arith.constant 0 : index
    %16 = tpu.strided_load %arg12[%c0_26, %c1_27, %c0_28] {strides = array<i32: 2, 2, 1>} : memref<9x9x32xf32, #tpu.memory_space<vmem>>, vector<4x4x32xf32>
    %17 = arith.addf %13, %16 : vector<4x4x32xf32>
    %c0_29 = arith.constant 0 : index
    %c2 = arith.constant 2 : index
    %c0_30 = arith.constant 0 : index
    %18 = tpu.strided_load %arg11[%c0_29, %c2, %c0_30] {strides = array<i32: 2, 2, 1>} : memref<9x9x32xf32, #tpu.memory_space<vmem>>, vector<4x4x32xf32>
    %19 = arith.maximumf %15, %18 : vector<4x4x32xf32>
    %c0_31 = arith.constant 0 : index
    %c2_32 = arith.constant 2 : index
    %c0_33 = arith.constant 0 : index
    %20 = tpu.strided_load %arg12[%c0_31, %c2_32, %c0_33] {strides = array<i32: 2, 2, 1>} : memref<9x9x32xf32, #tpu.memory_space<vmem>>, vector<4x4x32xf32>
    %21 = arith.addf %17, %20 : vector<4x4x32xf32>
    %c1_34 = arith.constant 1 : index
    %c0_35 = arith.constant 0 : index
    %c0_36 = arith.constant 0 : index
    %22 = tpu.strided_load %arg11[%c1_34, %c0_35, %c0_36] {strides = array<i32: 2, 2, 1>} : memref<9x9x32xf32, #tpu.memory_space<vmem>>, vector<4x4x32xf32>
    %23 = arith.maximumf %19, %22 : vector<4x4x32xf32>
    %c1_37 = arith.constant 1 : index
    %c0_38 = arith.constant 0 : index
    %c0_39 = arith.constant 0 : index
    %24 = tpu.strided_load %arg12[%c1_37, %c0_38, %c0_39] {strides = array<i32: 2, 2, 1>} : memref<9x9x32xf32, #tpu.memory_space<vmem>>, vector<4x4x32xf32>
    %25 = arith.addf %21, %24 : vector<4x4x32xf32>
    %c1_40 = arith.constant 1 : index
    %c1_41 = arith.constant 1 : index
    %c0_42 = arith.constant 0 : index
    %26 = tpu.strided_load %arg11[%c1_40, %c1_41, %c0_42] {strides = array<i32: 2, 2, 1>} : memref<9x9x32xf32, #tpu.memory_space<vmem>>, vector<4x4x32xf32>
    %27 = arith.maximumf %23, %26 : vector<4x4x32xf32>
    %c1_43 = arith.constant 1 : index
    %c1_44 = arith.constant 1 : index
    %c0_45 = arith.constant 0 : index
    %28 = tpu.strided_load %arg12[%c1_43, %c1_44, %c0_45] {strides = array<i32: 2, 2, 1>} : memref<9x9x32xf32, #tpu.memory_space<vmem>>, vector<4x4x32xf32>
    %29 = arith.addf %25, %28 : vector<4x4x32xf32>
    %c1_46 = arith.constant 1 : index
    %c2_47 = arith.constant 2 : index
    %c0_48 = arith.constant 0 : index
    %30 = tpu.strided_load %arg11[%c1_46, %c2_47, %c0_48] {strides = array<i32: 2, 2, 1>} : memref<9x9x32xf32, #tpu.memory_space<vmem>>, vector<4x4x32xf32>
    %31 = arith.maximumf %27, %30 : vector<4x4x32xf32>
    %c1_49 = arith.constant 1 : index
    %c2_50 = arith.constant 2 : index
    %c0_51 = arith.constant 0 : index
    %32 = tpu.strided_load %arg12[%c1_49, %c2_50, %c0_51] {strides = array<i32: 2, 2, 1>} : memref<9x9x32xf32, #tpu.memory_space<vmem>>, vector<4x4x32xf32>
    %33 = arith.addf %29, %32 : vector<4x4x32xf32>
    %c2_52 = arith.constant 2 : index
    %c0_53 = arith.constant 0 : index
    %c0_54 = arith.constant 0 : index
    %34 = tpu.strided_load %arg11[%c2_52, %c0_53, %c0_54] {strides = array<i32: 2, 2, 1>} : memref<9x9x32xf32, #tpu.memory_space<vmem>>, vector<4x4x32xf32>
    %35 = arith.maximumf %31, %34 : vector<4x4x32xf32>
    %c2_55 = arith.constant 2 : index
    %c0_56 = arith.constant 0 : index
    %c0_57 = arith.constant 0 : index
    %36 = tpu.strided_load %arg12[%c2_55, %c0_56, %c0_57] {strides = array<i32: 2, 2, 1>} : memref<9x9x32xf32, #tpu.memory_space<vmem>>, vector<4x4x32xf32>
    %37 = arith.addf %33, %36 : vector<4x4x32xf32>
    %c2_58 = arith.constant 2 : index
    %c1_59 = arith.constant 1 : index
    %c0_60 = arith.constant 0 : index
    %38 = tpu.strided_load %arg11[%c2_58, %c1_59, %c0_60] {strides = array<i32: 2, 2, 1>} : memref<9x9x32xf32, #tpu.memory_space<vmem>>, vector<4x4x32xf32>
    %39 = arith.maximumf %35, %38 : vector<4x4x32xf32>
    %c2_61 = arith.constant 2 : index
    %c1_62 = arith.constant 1 : index
    %c0_63 = arith.constant 0 : index
    %40 = tpu.strided_load %arg12[%c2_61, %c1_62, %c0_63] {strides = array<i32: 2, 2, 1>} : memref<9x9x32xf32, #tpu.memory_space<vmem>>, vector<4x4x32xf32>
    %41 = arith.addf %37, %40 : vector<4x4x32xf32>
    %c2_64 = arith.constant 2 : index
    %c2_65 = arith.constant 2 : index
    %c0_66 = arith.constant 0 : index
    %42 = tpu.strided_load %arg11[%c2_64, %c2_65, %c0_66] {strides = array<i32: 2, 2, 1>} : memref<9x9x32xf32, #tpu.memory_space<vmem>>, vector<4x4x32xf32>
    %43 = arith.maximumf %39, %42 : vector<4x4x32xf32>
    %c2_67 = arith.constant 2 : index
    %c2_68 = arith.constant 2 : index
    %c0_69 = arith.constant 0 : index
    %44 = tpu.strided_load %arg12[%c2_67, %c2_68, %c0_69] {strides = array<i32: 2, 2, 1>} : memref<9x9x32xf32, #tpu.memory_space<vmem>>, vector<4x4x32xf32>
    %45 = arith.addf %41, %44 : vector<4x4x32xf32>
    %cst_70 = arith.constant 0.111111112 : f32
    %46 = vector.broadcast %cst_70 : f32 to vector<4x4x32xf32>
    %47 = arith.mulf %45, %46 : vector<4x4x32xf32>
    %cst_71 = arith.constant 0.000000e+00 : f32
    %48 = vector.broadcast %cst_71 : f32 to vector<6x6x32xf32>
    %c0_72 = arith.constant 0 : index
    %c0_73 = arith.constant 0 : index
    %c0_74 = arith.constant 0 : index
    %49 = vector.load %arg13[%c0_72, %c0_73, %c0_74] : memref<6x6x32xf32, #tpu.memory_space<vmem>>, vector<6x6x32xf32>
    tpu.vector_store %arg13[%c0_72, %c0_73, %c0_74], %48 {strides = array<i32>} : memref<6x6x32xf32, #tpu.memory_space<vmem>>, vector<6x6x32xf32>,
    %c1_75 = arith.constant 1 : index
    %c1_76 = arith.constant 1 : index
    %c0_77 = arith.constant 0 : index
    %50 = vector.load %arg13[%c1_75, %c1_76, %c0_77] : memref<6x6x32xf32, #tpu.memory_space<vmem>>, vector<4x4x32xf32>
    tpu.vector_store %arg13[%c1_75, %c1_76, %c0_77], %43 {strides = array<i32>} : memref<6x6x32xf32, #tpu.memory_space<vmem>>, vector<4x4x32xf32>,
    %c0_78 = arith.constant 0 : index
    %c0_79 = arith.constant 0 : index
    %c0_80 = arith.constant 0 : index
    %51 = vector.load %arg2[%c0_78, %c0_79, %c0_80] : memref<9x32x32xf32, #tpu.memory_space<vmem>>, vector<9x32x32xf32>
    %cst_81 = arith.constant 0.000000e+00 : f32
    %52 = vector.broadcast %cst_81 : f32 to vector<16x32xf32>
    %c0_82 = arith.constant 0 : index
    %c0_83 = arith.constant 0 : index
    %c0_84 = arith.constant 0 : index
    %53 = vector.load %arg13[%c0_82, %c0_83, %c0_84] : memref<6x6x32xf32, #tpu.memory_space<vmem>>, vector<4x4x32xf32>
    %54 = vector.shape_cast %53 : vector<4x4x32xf32> to vector<16x32xf32>
    %55 = vector.extract_strided_slice %51 {offsets = [0, 0, 0], sizes = [1, 32, 32], strides = [1, 1, 1]} : vector<9x32x32xf32> to vector<1x32x32xf32>
    %56 = vector.shape_cast %55 : vector<1x32x32xf32> to vector<32x32xf32>
    %57 = arith.truncf %54 : vector<16x32xf32> to vector<16x32xbf16>
    %58 = arith.truncf %56 : vector<32x32xf32> to vector<32x32xbf16>
    %cst_85 = arith.constant dense<0.000000e+00> : vector<16x32xf32>
    %59 = tpu.matmul %57, %58, %cst_85 {dimension_numbers = #tpu.dot_dimension_numbers<[1], [0], [0], [1], [0, 0, 1, 1], [], []>} : vector<16x32xbf16>, vector<32x32xbf16>, vector<16x32xf32> -> vector<16x32xf32>
    %60 = arith.addf %52, %59 : vector<16x32xf32>
    %c0_86 = arith.constant 0 : index
    %c1_87 = arith.constant 1 : index
    %c0_88 = arith.constant 0 : index
    %61 = vector.load %arg13[%c0_86, %c1_87, %c0_88] : memref<6x6x32xf32, #tpu.memory_space<vmem>>, vector<4x4x32xf32>
    %62 = vector.shape_cast %61 : vector<4x4x32xf32> to vector<16x32xf32>
    %63 = vector.extract_strided_slice %51 {offsets = [1, 0, 0], sizes = [1, 32, 32], strides = [1, 1, 1]} : vector<9x32x32xf32> to vector<1x32x32xf32>
    %64 = vector.shape_cast %63 : vector<1x32x32xf32> to vector<32x32xf32>
    %65 = arith.truncf %62 : vector<16x32xf32> to vector<16x32xbf16>
    %66 = arith.truncf %64 : vector<32x32xf32> to vector<32x32xbf16>
    %cst_89 = arith.constant dense<0.000000e+00> : vector<16x32xf32>
    %67 = tpu.matmul %65, %66, %cst_89 {dimension_numbers = #tpu.dot_dimension_numbers<[1], [0], [0], [1], [0, 0, 1, 1], [], []>} : vector<16x32xbf16>, vector<32x32xbf16>, vector<16x32xf32> -> vector<16x32xf32>
    %68 = arith.addf %60, %67 : vector<16x32xf32>
    %c0_90 = arith.constant 0 : index
    %c2_91 = arith.constant 2 : index
    %c0_92 = arith.constant 0 : index
    %69 = vector.load %arg13[%c0_90, %c2_91, %c0_92] : memref<6x6x32xf32, #tpu.memory_space<vmem>>, vector<4x4x32xf32>
    %70 = vector.shape_cast %69 : vector<4x4x32xf32> to vector<16x32xf32>
    %71 = vector.extract_strided_slice %51 {offsets = [2, 0, 0], sizes = [1, 32, 32], strides = [1, 1, 1]} : vector<9x32x32xf32> to vector<1x32x32xf32>
    %72 = vector.shape_cast %71 : vector<1x32x32xf32> to vector<32x32xf32>
    %73 = arith.truncf %70 : vector<16x32xf32> to vector<16x32xbf16>
    %74 = arith.truncf %72 : vector<32x32xf32> to vector<32x32xbf16>
    %cst_93 = arith.constant dense<0.000000e+00> : vector<16x32xf32>
    %75 = tpu.matmul %73, %74, %cst_93 {dimension_numbers = #tpu.dot_dimension_numbers<[1], [0], [0], [1], [0, 0, 1, 1], [], []>} : vector<16x32xbf16>, vector<32x32xbf16>, vector<16x32xf32> -> vector<16x32xf32>
    %76 = arith.addf %68, %75 : vector<16x32xf32>
    %c1_94 = arith.constant 1 : index
    %c0_95 = arith.constant 0 : index
    %c0_96 = arith.constant 0 : index
    %77 = vector.load %arg13[%c1_94, %c0_95, %c0_96] : memref<6x6x32xf32, #tpu.memory_space<vmem>>, vector<4x4x32xf32>
    %78 = vector.shape_cast %77 : vector<4x4x32xf32> to vector<16x32xf32>
    %79 = vector.extract_strided_slice %51 {offsets = [3, 0, 0], sizes = [1, 32, 32], strides = [1, 1, 1]} : vector<9x32x32xf32> to vector<1x32x32xf32>
    %80 = vector.shape_cast %79 : vector<1x32x32xf32> to vector<32x32xf32>
    %81 = arith.truncf %78 : vector<16x32xf32> to vector<16x32xbf16>
    %82 = arith.truncf %80 : vector<32x32xf32> to vector<32x32xbf16>
    %cst_97 = arith.constant dense<0.000000e+00> : vector<16x32xf32>
    %83 = tpu.matmul %81, %82, %cst_97 {dimension_numbers = #tpu.dot_dimension_numbers<[1], [0], [0], [1], [0, 0, 1, 1], [], []>} : vector<16x32xbf16>, vector<32x32xbf16>, vector<16x32xf32> -> vector<16x32xf32>
    %84 = arith.addf %76, %83 : vector<16x32xf32>
    %c1_98 = arith.constant 1 : index
    %c1_99 = arith.constant 1 : index
    %c0_100 = arith.constant 0 : index
    %85 = vector.load %arg13[%c1_98, %c1_99, %c0_100] : memref<6x6x32xf32, #tpu.memory_space<vmem>>, vector<4x4x32xf32>
    %86 = vector.shape_cast %85 : vector<4x4x32xf32> to vector<16x32xf32>
    %87 = vector.extract_strided_slice %51 {offsets = [4, 0, 0], sizes = [1, 32, 32], strides = [1, 1, 1]} : vector<9x32x32xf32> to vector<1x32x32xf32>
    %88 = vector.shape_cast %87 : vector<1x32x32xf32> to vector<32x32xf32>
    %89 = arith.truncf %86 : vector<16x32xf32> to vector<16x32xbf16>
    %90 = arith.truncf %88 : vector<32x32xf32> to vector<32x32xbf16>
    %cst_101 = arith.constant dense<0.000000e+00> : vector<16x32xf32>
    %91 = tpu.matmul %89, %90, %cst_101 {dimension_numbers = #tpu.dot_dimension_numbers<[1], [0], [0], [1], [0, 0, 1, 1], [], []>} : vector<16x32xbf16>, vector<32x32xbf16>, vector<16x32xf32> -> vector<16x32xf32>
    %92 = arith.addf %84, %91 : vector<16x32xf32>
    %c1_102 = arith.constant 1 : index
    %c2_103 = arith.constant 2 : index
    %c0_104 = arith.constant 0 : index
    %93 = vector.load %arg13[%c1_102, %c2_103, %c0_104] : memref<6x6x32xf32, #tpu.memory_space<vmem>>, vector<4x4x32xf32>
    %94 = vector.shape_cast %93 : vector<4x4x32xf32> to vector<16x32xf32>
    %95 = vector.extract_strided_slice %51 {offsets = [5, 0, 0], sizes = [1, 32, 32], strides = [1, 1, 1]} : vector<9x32x32xf32> to vector<1x32x32xf32>
    %96 = vector.shape_cast %95 : vector<1x32x32xf32> to vector<32x32xf32>
    %97 = arith.truncf %94 : vector<16x32xf32> to vector<16x32xbf16>
    %98 = arith.truncf %96 : vector<32x32xf32> to vector<32x32xbf16>
    %cst_105 = arith.constant dense<0.000000e+00> : vector<16x32xf32>
    %99 = tpu.matmul %97, %98, %cst_105 {dimension_numbers = #tpu.dot_dimension_numbers<[1], [0], [0], [1], [0, 0, 1, 1], [], []>} : vector<16x32xbf16>, vector<32x32xbf16>, vector<16x32xf32> -> vector<16x32xf32>
    %100 = arith.addf %92, %99 : vector<16x32xf32>
    %c2_106 = arith.constant 2 : index
    %c0_107 = arith.constant 0 : index
    %c0_108 = arith.constant 0 : index
    %101 = vector.load %arg13[%c2_106, %c0_107, %c0_108] : memref<6x6x32xf32, #tpu.memory_space<vmem>>, vector<4x4x32xf32>
    %102 = vector.shape_cast %101 : vector<4x4x32xf32> to vector<16x32xf32>
    %103 = vector.extract_strided_slice %51 {offsets = [6, 0, 0], sizes = [1, 32, 32], strides = [1, 1, 1]} : vector<9x32x32xf32> to vector<1x32x32xf32>
    %104 = vector.shape_cast %103 : vector<1x32x32xf32> to vector<32x32xf32>
    %105 = arith.truncf %102 : vector<16x32xf32> to vector<16x32xbf16>
    %106 = arith.truncf %104 : vector<32x32xf32> to vector<32x32xbf16>
    %cst_109 = arith.constant dense<0.000000e+00> : vector<16x32xf32>
    %107 = tpu.matmul %105, %106, %cst_109 {dimension_numbers = #tpu.dot_dimension_numbers<[1], [0], [0], [1], [0, 0, 1, 1], [], []>} : vector<16x32xbf16>, vector<32x32xbf16>, vector<16x32xf32> -> vector<16x32xf32>
    %108 = arith.addf %100, %107 : vector<16x32xf32>
    %c2_110 = arith.constant 2 : index
    %c1_111 = arith.constant 1 : index
    %c0_112 = arith.constant 0 : index
    %109 = vector.load %arg13[%c2_110, %c1_111, %c0_112] : memref<6x6x32xf32, #tpu.memory_space<vmem>>, vector<4x4x32xf32>
    %110 = vector.shape_cast %109 : vector<4x4x32xf32> to vector<16x32xf32>
    %111 = vector.extract_strided_slice %51 {offsets = [7, 0, 0], sizes = [1, 32, 32], strides = [1, 1, 1]} : vector<9x32x32xf32> to vector<1x32x32xf32>
    %112 = vector.shape_cast %111 : vector<1x32x32xf32> to vector<32x32xf32>
    %113 = arith.truncf %110 : vector<16x32xf32> to vector<16x32xbf16>
    %114 = arith.truncf %112 : vector<32x32xf32> to vector<32x32xbf16>
    %cst_113 = arith.constant dense<0.000000e+00> : vector<16x32xf32>
    %115 = tpu.matmul %113, %114, %cst_113 {dimension_numbers = #tpu.dot_dimension_numbers<[1], [0], [0], [1], [0, 0, 1, 1], [], []>} : vector<16x32xbf16>, vector<32x32xbf16>, vector<16x32xf32> -> vector<16x32xf32>
    %116 = arith.addf %108, %115 : vector<16x32xf32>
    %c2_114 = arith.constant 2 : index
    %c2_115 = arith.constant 2 : index
    %c0_116 = arith.constant 0 : index
    %117 = vector.load %arg13[%c2_114, %c2_115, %c0_116] : memref<6x6x32xf32, #tpu.memory_space<vmem>>, vector<4x4x32xf32>
    %118 = vector.shape_cast %117 : vector<4x4x32xf32> to vector<16x32xf32>
    %119 = vector.extract_strided_slice %51 {offsets = [8, 0, 0], sizes = [1, 32, 32], strides = [1, 1, 1]} : vector<9x32x32xf32> to vector<1x32x32xf32>
    %120 = vector.shape_cast %119 : vector<1x32x32xf32> to vector<32x32xf32>
    %121 = arith.truncf %118 : vector<16x32xf32> to vector<16x32xbf16>
    %122 = arith.truncf %120 : vector<32x32xf32> to vector<32x32xbf16>
    %cst_117 = arith.constant dense<0.000000e+00> : vector<16x32xf32>
    %123 = tpu.matmul %121, %122, %cst_117 {dimension_numbers = #tpu.dot_dimension_numbers<[1], [0], [0], [1], [0, 0, 1, 1], [], []>} : vector<16x32xbf16>, vector<32x32xbf16>, vector<16x32xf32> -> vector<16x32xf32>
    %124 = arith.addf %116, %123 : vector<16x32xf32>
    %cst_118 = arith.constant 0.000000e+00 : f32
    %125 = vector.broadcast %cst_118 : f32 to vector<6x6x32xf32>
    %c0_119 = arith.constant 0 : index
    %c0_120 = arith.constant 0 : index
    %c0_121 = arith.constant 0 : index
    %126 = vector.load %arg13[%c0_119, %c0_120, %c0_121] : memref<6x6x32xf32, #tpu.memory_space<vmem>>, vector<6x6x32xf32>
    tpu.vector_store %arg13[%c0_119, %c0_120, %c0_121], %125 {strides = array<i32>} : memref<6x6x32xf32, #tpu.memory_space<vmem>>, vector<6x6x32xf32>,
    %c1_122 = arith.constant 1 : index
    %c1_123 = arith.constant 1 : index
    %c0_124 = arith.constant 0 : index
    %127 = vector.load %arg13[%c1_122, %c1_123, %c0_124] : memref<6x6x32xf32, #tpu.memory_space<vmem>>, vector<4x4x32xf32>
    tpu.vector_store %arg13[%c1_122, %c1_123, %c0_124], %47 {strides = array<i32>} : memref<6x6x32xf32, #tpu.memory_space<vmem>>, vector<4x4x32xf32>,
    %c0_125 = arith.constant 0 : index
    %c0_126 = arith.constant 0 : index
    %c0_127 = arith.constant 0 : index
    %128 = vector.load %arg3[%c0_125, %c0_126, %c0_127] : memref<9x32x32xf32, #tpu.memory_space<vmem>>, vector<9x32x32xf32>
    %cst_128 = arith.constant 0.000000e+00 : f32
    %129 = vector.broadcast %cst_128 : f32 to vector<16x32xf32>
    %c0_129 = arith.constant 0 : index
    %c0_130 = arith.constant 0 : index
    %c0_131 = arith.constant 0 : index
    %130 = vector.load %arg13[%c0_129, %c0_130, %c0_131] : memref<6x6x32xf32, #tpu.memory_space<vmem>>, vector<4x4x32xf32>
    %131 = vector.shape_cast %130 : vector<4x4x32xf32> to vector<16x32xf32>
    %132 = vector.extract_strided_slice %128 {offsets = [0, 0, 0], sizes = [1, 32, 32], strides = [1, 1, 1]} : vector<9x32x32xf32> to vector<1x32x32xf32>
    %133 = vector.shape_cast %132 : vector<1x32x32xf32> to vector<32x32xf32>
    %134 = arith.truncf %131 : vector<16x32xf32> to vector<16x32xbf16>
    %135 = arith.truncf %133 : vector<32x32xf32> to vector<32x32xbf16>
    %cst_132 = arith.constant dense<0.000000e+00> : vector<16x32xf32>
    %136 = tpu.matmul %134, %135, %cst_132 {dimension_numbers = #tpu.dot_dimension_numbers<[1], [0], [0], [1], [0, 0, 1, 1], [], []>} : vector<16x32xbf16>, vector<32x32xbf16>, vector<16x32xf32> -> vector<16x32xf32>
    %137 = arith.addf %129, %136 : vector<16x32xf32>
    %c0_133 = arith.constant 0 : index
    %c1_134 = arith.constant 1 : index
    %c0_135 = arith.constant 0 : index
    %138 = vector.load %arg13[%c0_133, %c1_134, %c0_135] : memref<6x6x32xf32, #tpu.memory_space<vmem>>, vector<4x4x32xf32>
    %139 = vector.shape_cast %138 : vector<4x4x32xf32> to vector<16x32xf32>
    %140 = vector.extract_strided_slice %128 {offsets = [1, 0, 0], sizes = [1, 32, 32], strides = [1, 1, 1]} : vector<9x32x32xf32> to vector<1x32x32xf32>
    %141 = vector.shape_cast %140 : vector<1x32x32xf32> to vector<32x32xf32>
    %142 = arith.truncf %139 : vector<16x32xf32> to vector<16x32xbf16>
    %143 = arith.truncf %141 : vector<32x32xf32> to vector<32x32xbf16>
    %cst_136 = arith.constant dense<0.000000e+00> : vector<16x32xf32>
    %144 = tpu.matmul %142, %143, %cst_136 {dimension_numbers = #tpu.dot_dimension_numbers<[1], [0], [0], [1], [0, 0, 1, 1], [], []>} : vector<16x32xbf16>, vector<32x32xbf16>, vector<16x32xf32> -> vector<16x32xf32>
    %145 = arith.addf %137, %144 : vector<16x32xf32>
    %c0_137 = arith.constant 0 : index
    %c2_138 = arith.constant 2 : index
    %c0_139 = arith.constant 0 : index
    %146 = vector.load %arg13[%c0_137, %c2_138, %c0_139] : memref<6x6x32xf32, #tpu.memory_space<vmem>>, vector<4x4x32xf32>
    %147 = vector.shape_cast %146 : vector<4x4x32xf32> to vector<16x32xf32>
    %148 = vector.extract_strided_slice %128 {offsets = [2, 0, 0], sizes = [1, 32, 32], strides = [1, 1, 1]} : vector<9x32x32xf32> to vector<1x32x32xf32>
    %149 = vector.shape_cast %148 : vector<1x32x32xf32> to vector<32x32xf32>
    %150 = arith.truncf %147 : vector<16x32xf32> to vector<16x32xbf16>
    %151 = arith.truncf %149 : vector<32x32xf32> to vector<32x32xbf16>
    %cst_140 = arith.constant dense<0.000000e+00> : vector<16x32xf32>
    %152 = tpu.matmul %150, %151, %cst_140 {dimension_numbers = #tpu.dot_dimension_numbers<[1], [0], [0], [1], [0, 0, 1, 1], [], []>} : vector<16x32xbf16>, vector<32x32xbf16>, vector<16x32xf32> -> vector<16x32xf32>
    %153 = arith.addf %145, %152 : vector<16x32xf32>
    %c1_141 = arith.constant 1 : index
    %c0_142 = arith.constant 0 : index
    %c0_143 = arith.constant 0 : index
    %154 = vector.load %arg13[%c1_141, %c0_142, %c0_143] : memref<6x6x32xf32, #tpu.memory_space<vmem>>, vector<4x4x32xf32>
    %155 = vector.shape_cast %154 : vector<4x4x32xf32> to vector<16x32xf32>
    %156 = vector.extract_strided_slice %128 {offsets = [3, 0, 0], sizes = [1, 32, 32], strides = [1, 1, 1]} : vector<9x32x32xf32> to vector<1x32x32xf32>
    %157 = vector.shape_cast %156 : vector<1x32x32xf32> to vector<32x32xf32>
    %158 = arith.truncf %155 : vector<16x32xf32> to vector<16x32xbf16>
    %159 = arith.truncf %157 : vector<32x32xf32> to vector<32x32xbf16>
    %cst_144 = arith.constant dense<0.000000e+00> : vector<16x32xf32>
    %160 = tpu.matmul %158, %159, %cst_144 {dimension_numbers = #tpu.dot_dimension_numbers<[1], [0], [0], [1], [0, 0, 1, 1], [], []>} : vector<16x32xbf16>, vector<32x32xbf16>, vector<16x32xf32> -> vector<16x32xf32>
    %161 = arith.addf %153, %160 : vector<16x32xf32>
    %c1_145 = arith.constant 1 : index
    %c1_146 = arith.constant 1 : index
    %c0_147 = arith.constant 0 : index
    %162 = vector.load %arg13[%c1_145, %c1_146, %c0_147] : memref<6x6x32xf32, #tpu.memory_space<vmem>>, vector<4x4x32xf32>
    %163 = vector.shape_cast %162 : vector<4x4x32xf32> to vector<16x32xf32>
    %164 = vector.extract_strided_slice %128 {offsets = [4, 0, 0], sizes = [1, 32, 32], strides = [1, 1, 1]} : vector<9x32x32xf32> to vector<1x32x32xf32>
    %165 = vector.shape_cast %164 : vector<1x32x32xf32> to vector<32x32xf32>
    %166 = arith.truncf %163 : vector<16x32xf32> to vector<16x32xbf16>
    %167 = arith.truncf %165 : vector<32x32xf32> to vector<32x32xbf16>
    %cst_148 = arith.constant dense<0.000000e+00> : vector<16x32xf32>
    %168 = tpu.matmul %166, %167, %cst_148 {dimension_numbers = #tpu.dot_dimension_numbers<[1], [0], [0], [1], [0, 0, 1, 1], [], []>} : vector<16x32xbf16>, vector<32x32xbf16>, vector<16x32xf32> -> vector<16x32xf32>
    %169 = arith.addf %161, %168 : vector<16x32xf32>
    %c1_149 = arith.constant 1 : index
    %c2_150 = arith.constant 2 : index
    %c0_151 = arith.constant 0 : index
    %170 = vector.load %arg13[%c1_149, %c2_150, %c0_151] : memref<6x6x32xf32, #tpu.memory_space<vmem>>, vector<4x4x32xf32>
    %171 = vector.shape_cast %170 : vector<4x4x32xf32> to vector<16x32xf32>
    %172 = vector.extract_strided_slice %128 {offsets = [5, 0, 0], sizes = [1, 32, 32], strides = [1, 1, 1]} : vector<9x32x32xf32> to vector<1x32x32xf32>
    %173 = vector.shape_cast %172 : vector<1x32x32xf32> to vector<32x32xf32>
    %174 = arith.truncf %171 : vector<16x32xf32> to vector<16x32xbf16>
    %175 = arith.truncf %173 : vector<32x32xf32> to vector<32x32xbf16>
    %cst_152 = arith.constant dense<0.000000e+00> : vector<16x32xf32>
    %176 = tpu.matmul %174, %175, %cst_152 {dimension_numbers = #tpu.dot_dimension_numbers<[1], [0], [0], [1], [0, 0, 1, 1], [], []>} : vector<16x32xbf16>, vector<32x32xbf16>, vector<16x32xf32> -> vector<16x32xf32>
    %177 = arith.addf %169, %176 : vector<16x32xf32>
    %c2_153 = arith.constant 2 : index
    %c0_154 = arith.constant 0 : index
    %c0_155 = arith.constant 0 : index
    %178 = vector.load %arg13[%c2_153, %c0_154, %c0_155] : memref<6x6x32xf32, #tpu.memory_space<vmem>>, vector<4x4x32xf32>
    %179 = vector.shape_cast %178 : vector<4x4x32xf32> to vector<16x32xf32>
    %180 = vector.extract_strided_slice %128 {offsets = [6, 0, 0], sizes = [1, 32, 32], strides = [1, 1, 1]} : vector<9x32x32xf32> to vector<1x32x32xf32>
    %181 = vector.shape_cast %180 : vector<1x32x32xf32> to vector<32x32xf32>
    %182 = arith.truncf %179 : vector<16x32xf32> to vector<16x32xbf16>
    %183 = arith.truncf %181 : vector<32x32xf32> to vector<32x32xbf16>
    %cst_156 = arith.constant dense<0.000000e+00> : vector<16x32xf32>
    %184 = tpu.matmul %182, %183, %cst_156 {dimension_numbers = #tpu.dot_dimension_numbers<[1], [0], [0], [1], [0, 0, 1, 1], [], []>} : vector<16x32xbf16>, vector<32x32xbf16>, vector<16x32xf32> -> vector<16x32xf32>
    %185 = arith.addf %177, %184 : vector<16x32xf32>
    %c2_157 = arith.constant 2 : index
    %c1_158 = arith.constant 1 : index
    %c0_159 = arith.constant 0 : index
    %186 = vector.load %arg13[%c2_157, %c1_158, %c0_159] : memref<6x6x32xf32, #tpu.memory_space<vmem>>, vector<4x4x32xf32>
    %187 = vector.shape_cast %186 : vector<4x4x32xf32> to vector<16x32xf32>
    %188 = vector.extract_strided_slice %128 {offsets = [7, 0, 0], sizes = [1, 32, 32], strides = [1, 1, 1]} : vector<9x32x32xf32> to vector<1x32x32xf32>
    %189 = vector.shape_cast %188 : vector<1x32x32xf32> to vector<32x32xf32>
    %190 = arith.truncf %187 : vector<16x32xf32> to vector<16x32xbf16>
    %191 = arith.truncf %189 : vector<32x32xf32> to vector<32x32xbf16>
    %cst_160 = arith.constant dense<0.000000e+00> : vector<16x32xf32>
    %192 = tpu.matmul %190, %191, %cst_160 {dimension_numbers = #tpu.dot_dimension_numbers<[1], [0], [0], [1], [0, 0, 1, 1], [], []>} : vector<16x32xbf16>, vector<32x32xbf16>, vector<16x32xf32> -> vector<16x32xf32>
    %193 = arith.addf %185, %192 : vector<16x32xf32>
    %c2_161 = arith.constant 2 : index
    %c2_162 = arith.constant 2 : index
    %c0_163 = arith.constant 0 : index
    %194 = vector.load %arg13[%c2_161, %c2_162, %c0_163] : memref<6x6x32xf32, #tpu.memory_space<vmem>>, vector<4x4x32xf32>
    %195 = vector.shape_cast %194 : vector<4x4x32xf32> to vector<16x32xf32>
    %196 = vector.extract_strided_slice %128 {offsets = [8, 0, 0], sizes = [1, 32, 32], strides = [1, 1, 1]} : vector<9x32x32xf32> to vector<1x32x32xf32>
    %197 = vector.shape_cast %196 : vector<1x32x32xf32> to vector<32x32xf32>
    %198 = arith.truncf %195 : vector<16x32xf32> to vector<16x32xbf16>
    %199 = arith.truncf %197 : vector<32x32xf32> to vector<32x32xbf16>
    %cst_164 = arith.constant dense<0.000000e+00> : vector<16x32xf32>
    %200 = tpu.matmul %198, %199, %cst_164 {dimension_numbers = #tpu.dot_dimension_numbers<[1], [0], [0], [1], [0, 0, 1, 1], [], []>} : vector<16x32xbf16>, vector<32x32xbf16>, vector<16x32xf32> -> vector<16x32xf32>
    %201 = arith.addf %193, %200 : vector<16x32xf32>
    %202 = arith.addf %124, %201 : vector<16x32xf32>
    %c0_165 = arith.constant 0 : index
    %c0_166 = arith.constant 0 : index
    %203 = vector.load %arg4[%c0_165, %c0_166] : memref<1x32xf32, #tpu.memory_space<vmem>>, vector<1x32xf32>
    %204 = vector.broadcast %203 : vector<1x32xf32> to vector<16x32xf32>
    %205 = arith.addf %202, %204 : vector<16x32xf32>
    %cst_167 = arith.constant 0.000000e+00 : f32
    %206 = vector.broadcast %cst_167 : f32 to vector<16x32xf32>
    %207 = arith.cmpf oge, %205, %206 : vector<16x32xf32>
    %cst_168 = arith.constant 1.000000e-01 : f32
    %208 = vector.broadcast %cst_168 : f32 to vector<16x32xf32>
    %209 = arith.mulf %208, %205 : vector<16x32xf32>
    %210 = arith.select %207, %205, %209 : vector<16x32xi1>, vector<16x32xf32>
    %211 = vector.shape_cast %210 : vector<16x32xf32> to vector<4x4x32xf32>
    %cst_169 = arith.constant 0.000000e+00 : f32
    %212 = vector.broadcast %cst_169 : f32 to vector<6x6x32xf32>
    %c0_170 = arith.constant 0 : index
    %c0_171 = arith.constant 0 : index
    %c0_172 = arith.constant 0 : index
    %213 = vector.load %arg13[%c0_170, %c0_171, %c0_172] : memref<6x6x32xf32, #tpu.memory_space<vmem>>, vector<6x6x32xf32>
    tpu.vector_store %arg13[%c0_170, %c0_171, %c0_172], %212 {strides = array<i32>} : memref<6x6x32xf32, #tpu.memory_space<vmem>>, vector<6x6x32xf32>,
    %c1_173 = arith.constant 1 : index
    %c1_174 = arith.constant 1 : index
    %c0_175 = arith.constant 0 : index
    %214 = vector.load %arg13[%c1_173, %c1_174, %c0_175] : memref<6x6x32xf32, #tpu.memory_space<vmem>>, vector<4x4x32xf32>
    tpu.vector_store %arg13[%c1_173, %c1_174, %c0_175], %211 {strides = array<i32>} : memref<6x6x32xf32, #tpu.memory_space<vmem>>, vector<4x4x32xf32>,
    %c0_176 = arith.constant 0 : index
    %c0_177 = arith.constant 0 : index
    %c0_178 = arith.constant 0 : index
    %215 = vector.load %arg5[%c0_176, %c0_177, %c0_178] : memref<9x32x32xf32, #tpu.memory_space<vmem>>, vector<9x32x32xf32>
    %cst_179 = arith.constant 0.000000e+00 : f32
    %216 = vector.broadcast %cst_179 : f32 to vector<16x32xf32>
    %c0_180 = arith.constant 0 : index
    %c0_181 = arith.constant 0 : index
    %c0_182 = arith.constant 0 : index
    %217 = vector.load %arg13[%c0_180, %c0_181, %c0_182] : memref<6x6x32xf32, #tpu.memory_space<vmem>>, vector<4x4x32xf32>
    %218 = vector.shape_cast %217 : vector<4x4x32xf32> to vector<16x32xf32>
    %219 = vector.extract_strided_slice %215 {offsets = [0, 0, 0], sizes = [1, 32, 32], strides = [1, 1, 1]} : vector<9x32x32xf32> to vector<1x32x32xf32>
    %220 = vector.shape_cast %219 : vector<1x32x32xf32> to vector<32x32xf32>
    %221 = arith.truncf %218 : vector<16x32xf32> to vector<16x32xbf16>
    %222 = arith.truncf %220 : vector<32x32xf32> to vector<32x32xbf16>
    %cst_183 = arith.constant dense<0.000000e+00> : vector<16x32xf32>
    %223 = tpu.matmul %221, %222, %cst_183 {dimension_numbers = #tpu.dot_dimension_numbers<[1], [0], [0], [1], [0, 0, 1, 1], [], []>} : vector<16x32xbf16>, vector<32x32xbf16>, vector<16x32xf32> -> vector<16x32xf32>
    %224 = arith.addf %216, %223 : vector<16x32xf32>
    %c0_184 = arith.constant 0 : index
    %c1_185 = arith.constant 1 : index
    %c0_186 = arith.constant 0 : index
    %225 = vector.load %arg13[%c0_184, %c1_185, %c0_186] : memref<6x6x32xf32, #tpu.memory_space<vmem>>, vector<4x4x32xf32>
    %226 = vector.shape_cast %225 : vector<4x4x32xf32> to vector<16x32xf32>
    %227 = vector.extract_strided_slice %215 {offsets = [1, 0, 0], sizes = [1, 32, 32], strides = [1, 1, 1]} : vector<9x32x32xf32> to vector<1x32x32xf32>
    %228 = vector.shape_cast %227 : vector<1x32x32xf32> to vector<32x32xf32>
    %229 = arith.truncf %226 : vector<16x32xf32> to vector<16x32xbf16>
    %230 = arith.truncf %228 : vector<32x32xf32> to vector<32x32xbf16>
    %cst_187 = arith.constant dense<0.000000e+00> : vector<16x32xf32>
    %231 = tpu.matmul %229, %230, %cst_187 {dimension_numbers = #tpu.dot_dimension_numbers<[1], [0], [0], [1], [0, 0, 1, 1], [], []>} : vector<16x32xbf16>, vector<32x32xbf16>, vector<16x32xf32> -> vector<16x32xf32>
    %232 = arith.addf %224, %231 : vector<16x32xf32>
    %c0_188 = arith.constant 0 : index
    %c2_189 = arith.constant 2 : index
    %c0_190 = arith.constant 0 : index
    %233 = vector.load %arg13[%c0_188, %c2_189, %c0_190] : memref<6x6x32xf32, #tpu.memory_space<vmem>>, vector<4x4x32xf32>
    %234 = vector.shape_cast %233 : vector<4x4x32xf32> to vector<16x32xf32>
    %235 = vector.extract_strided_slice %215 {offsets = [2, 0, 0], sizes = [1, 32, 32], strides = [1, 1, 1]} : vector<9x32x32xf32> to vector<1x32x32xf32>
    %236 = vector.shape_cast %235 : vector<1x32x32xf32> to vector<32x32xf32>
    %237 = arith.truncf %234 : vector<16x32xf32> to vector<16x32xbf16>
    %238 = arith.truncf %236 : vector<32x32xf32> to vector<32x32xbf16>
    %cst_191 = arith.constant dense<0.000000e+00> : vector<16x32xf32>
    %239 = tpu.matmul %237, %238, %cst_191 {dimension_numbers = #tpu.dot_dimension_numbers<[1], [0], [0], [1], [0, 0, 1, 1], [], []>} : vector<16x32xbf16>, vector<32x32xbf16>, vector<16x32xf32> -> vector<16x32xf32>
    %240 = arith.addf %232, %239 : vector<16x32xf32>
    %c1_192 = arith.constant 1 : index
    %c0_193 = arith.constant 0 : index
    %c0_194 = arith.constant 0 : index
    %241 = vector.load %arg13[%c1_192, %c0_193, %c0_194] : memref<6x6x32xf32, #tpu.memory_space<vmem>>, vector<4x4x32xf32>
    %242 = vector.shape_cast %241 : vector<4x4x32xf32> to vector<16x32xf32>
    %243 = vector.extract_strided_slice %215 {offsets = [3, 0, 0], sizes = [1, 32, 32], strides = [1, 1, 1]} : vector<9x32x32xf32> to vector<1x32x32xf32>
    %244 = vector.shape_cast %243 : vector<1x32x32xf32> to vector<32x32xf32>
    %245 = arith.truncf %242 : vector<16x32xf32> to vector<16x32xbf16>
    %246 = arith.truncf %244 : vector<32x32xf32> to vector<32x32xbf16>
    %cst_195 = arith.constant dense<0.000000e+00> : vector<16x32xf32>
    %247 = tpu.matmul %245, %246, %cst_195 {dimension_numbers = #tpu.dot_dimension_numbers<[1], [0], [0], [1], [0, 0, 1, 1], [], []>} : vector<16x32xbf16>, vector<32x32xbf16>, vector<16x32xf32> -> vector<16x32xf32>
    %248 = arith.addf %240, %247 : vector<16x32xf32>
    %c1_196 = arith.constant 1 : index
    %c1_197 = arith.constant 1 : index
    %c0_198 = arith.constant 0 : index
    %249 = vector.load %arg13[%c1_196, %c1_197, %c0_198] : memref<6x6x32xf32, #tpu.memory_space<vmem>>, vector<4x4x32xf32>
    %250 = vector.shape_cast %249 : vector<4x4x32xf32> to vector<16x32xf32>
    %251 = vector.extract_strided_slice %215 {offsets = [4, 0, 0], sizes = [1, 32, 32], strides = [1, 1, 1]} : vector<9x32x32xf32> to vector<1x32x32xf32>
    %252 = vector.shape_cast %251 : vector<1x32x32xf32> to vector<32x32xf32>
    %253 = arith.truncf %250 : vector<16x32xf32> to vector<16x32xbf16>
    %254 = arith.truncf %252 : vector<32x32xf32> to vector<32x32xbf16>
    %cst_199 = arith.constant dense<0.000000e+00> : vector<16x32xf32>
    %255 = tpu.matmul %253, %254, %cst_199 {dimension_numbers = #tpu.dot_dimension_numbers<[1], [0], [0], [1], [0, 0, 1, 1], [], []>} : vector<16x32xbf16>, vector<32x32xbf16>, vector<16x32xf32> -> vector<16x32xf32>
    %256 = arith.addf %248, %255 : vector<16x32xf32>
    %c1_200 = arith.constant 1 : index
    %c2_201 = arith.constant 2 : index
    %c0_202 = arith.constant 0 : index
    %257 = vector.load %arg13[%c1_200, %c2_201, %c0_202] : memref<6x6x32xf32, #tpu.memory_space<vmem>>, vector<4x4x32xf32>
    %258 = vector.shape_cast %257 : vector<4x4x32xf32> to vector<16x32xf32>
    %259 = vector.extract_strided_slice %215 {offsets = [5, 0, 0], sizes = [1, 32, 32], strides = [1, 1, 1]} : vector<9x32x32xf32> to vector<1x32x32xf32>
    %260 = vector.shape_cast %259 : vector<1x32x32xf32> to vector<32x32xf32>
    %261 = arith.truncf %258 : vector<16x32xf32> to vector<16x32xbf16>
    %262 = arith.truncf %260 : vector<32x32xf32> to vector<32x32xbf16>
    %cst_203 = arith.constant dense<0.000000e+00> : vector<16x32xf32>
    %263 = tpu.matmul %261, %262, %cst_203 {dimension_numbers = #tpu.dot_dimension_numbers<[1], [0], [0], [1], [0, 0, 1, 1], [], []>} : vector<16x32xbf16>, vector<32x32xbf16>, vector<16x32xf32> -> vector<16x32xf32>
    %264 = arith.addf %256, %263 : vector<16x32xf32>
    %c2_204 = arith.constant 2 : index
    %c0_205 = arith.constant 0 : index
    %c0_206 = arith.constant 0 : index
    %265 = vector.load %arg13[%c2_204, %c0_205, %c0_206] : memref<6x6x32xf32, #tpu.memory_space<vmem>>, vector<4x4x32xf32>
    %266 = vector.shape_cast %265 : vector<4x4x32xf32> to vector<16x32xf32>
    %267 = vector.extract_strided_slice %215 {offsets = [6, 0, 0], sizes = [1, 32, 32], strides = [1, 1, 1]} : vector<9x32x32xf32> to vector<1x32x32xf32>
    %268 = vector.shape_cast %267 : vector<1x32x32xf32> to vector<32x32xf32>
    %269 = arith.truncf %266 : vector<16x32xf32> to vector<16x32xbf16>
    %270 = arith.truncf %268 : vector<32x32xf32> to vector<32x32xbf16>
    %cst_207 = arith.constant dense<0.000000e+00> : vector<16x32xf32>
    %271 = tpu.matmul %269, %270, %cst_207 {dimension_numbers = #tpu.dot_dimension_numbers<[1], [0], [0], [1], [0, 0, 1, 1], [], []>} : vector<16x32xbf16>, vector<32x32xbf16>, vector<16x32xf32> -> vector<16x32xf32>
    %272 = arith.addf %264, %271 : vector<16x32xf32>
    %c2_208 = arith.constant 2 : index
    %c1_209 = arith.constant 1 : index
    %c0_210 = arith.constant 0 : index
    %273 = vector.load %arg13[%c2_208, %c1_209, %c0_210] : memref<6x6x32xf32, #tpu.memory_space<vmem>>, vector<4x4x32xf32>
    %274 = vector.shape_cast %273 : vector<4x4x32xf32> to vector<16x32xf32>
    %275 = vector.extract_strided_slice %215 {offsets = [7, 0, 0], sizes = [1, 32, 32], strides = [1, 1, 1]} : vector<9x32x32xf32> to vector<1x32x32xf32>
    %276 = vector.shape_cast %275 : vector<1x32x32xf32> to vector<32x32xf32>
    %277 = arith.truncf %274 : vector<16x32xf32> to vector<16x32xbf16>
    %278 = arith.truncf %276 : vector<32x32xf32> to vector<32x32xbf16>
    %cst_211 = arith.constant dense<0.000000e+00> : vector<16x32xf32>
    %279 = tpu.matmul %277, %278, %cst_211 {dimension_numbers = #tpu.dot_dimension_numbers<[1], [0], [0], [1], [0, 0, 1, 1], [], []>} : vector<16x32xbf16>, vector<32x32xbf16>, vector<16x32xf32> -> vector<16x32xf32>
    %280 = arith.addf %272, %279 : vector<16x32xf32>
    %c2_212 = arith.constant 2 : index
    %c2_213 = arith.constant 2 : index
    %c0_214 = arith.constant 0 : index
    %281 = vector.load %arg13[%c2_212, %c2_213, %c0_214] : memref<6x6x32xf32, #tpu.memory_space<vmem>>, vector<4x4x32xf32>
    %282 = vector.shape_cast %281 : vector<4x4x32xf32> to vector<16x32xf32>
    %283 = vector.extract_strided_slice %215 {offsets = [8, 0, 0], sizes = [1, 32, 32], strides = [1, 1, 1]} : vector<9x32x32xf32> to vector<1x32x32xf32>
    %284 = vector.shape_cast %283 : vector<1x32x32xf32> to vector<32x32xf32>
    %285 = arith.truncf %282 : vector<16x32xf32> to vector<16x32xbf16>
    %286 = arith.truncf %284 : vector<32x32xf32> to vector<32x32xbf16>
    %cst_215 = arith.constant dense<0.000000e+00> : vector<16x32xf32>
    %287 = tpu.matmul %285, %286, %cst_215 {dimension_numbers = #tpu.dot_dimension_numbers<[1], [0], [0], [1], [0, 0, 1, 1], [], []>} : vector<16x32xbf16>, vector<32x32xbf16>, vector<16x32xf32> -> vector<16x32xf32>
    %288 = arith.addf %280, %287 : vector<16x32xf32>
    %c0_216 = arith.constant 0 : index
    %c0_217 = arith.constant 0 : index
    %289 = vector.load %arg6[%c0_216, %c0_217] : memref<1x32xf32, #tpu.memory_space<vmem>>, vector<1x32xf32>
    %290 = vector.broadcast %289 : vector<1x32xf32> to vector<16x32xf32>
    %291 = arith.addf %288, %290 : vector<16x32xf32>
    %cst_218 = arith.constant 0.000000e+00 : f32
    %292 = vector.broadcast %cst_218 : f32 to vector<16x32xf32>
    %293 = arith.cmpf oge, %291, %292 : vector<16x32xf32>
    %cst_219 = arith.constant 1.000000e-01 : f32
    %294 = vector.broadcast %cst_219 : f32 to vector<16x32xf32>
    %295 = arith.mulf %294, %291 : vector<16x32xf32>
    %296 = arith.select %293, %291, %295 : vector<16x32xi1>, vector<16x32xf32>
    %297 = vector.shape_cast %296 : vector<16x32xf32> to vector<4x4x32xf32>
    %c1_220 = arith.constant 1 : index
    %c1_221 = arith.constant 1 : index
    %c0_222 = arith.constant 0 : index
    %298 = vector.load %arg14[%c1_220, %c1_221, %c0_222] : memref<6x6x32xf32, #tpu.memory_space<vmem>>, vector<4x4x32xf32>
    tpu.vector_store %arg14[%c1_220, %c1_221, %c0_222], %297 {strides = array<i32>} : memref<6x6x32xf32, #tpu.memory_space<vmem>>, vector<4x4x32xf32>,
    %299 = vector.extract_strided_slice %297 {offsets = [0, 0, 0], sizes = [1, 4, 32], strides = [1, 1, 1]} : vector<4x4x32xf32> to vector<1x4x32xf32>
    %c0_223 = arith.constant 0 : index
    %c1_224 = arith.constant 1 : index
    %c0_225 = arith.constant 0 : index
    %300 = vector.load %arg14[%c0_223, %c1_224, %c0_225] : memref<6x6x32xf32, #tpu.memory_space<vmem>>, vector<1x4x32xf32>
    tpu.vector_store %arg14[%c0_223, %c1_224, %c0_225], %299 {strides = array<i32>} : memref<6x6x32xf32, #tpu.memory_space<vmem>>, vector<1x4x32xf32>,
    %301 = vector.extract_strided_slice %297 {offsets = [3, 0, 0], sizes = [1, 4, 32], strides = [1, 1, 1]} : vector<4x4x32xf32> to vector<1x4x32xf32>
    %c5 = arith.constant 5 : index
    %c1_226 = arith.constant 1 : index
    %c0_227 = arith.constant 0 : index
    %302 = vector.load %arg14[%c5, %c1_226, %c0_227] : memref<6x6x32xf32, #tpu.memory_space<vmem>>, vector<1x4x32xf32>
    tpu.vector_store %arg14[%c5, %c1_226, %c0_227], %301 {strides = array<i32>} : memref<6x6x32xf32, #tpu.memory_space<vmem>>, vector<1x4x32xf32>,
    %c0_228 = arith.constant 0 : index
    %c1_229 = arith.constant 1 : index
    %c0_230 = arith.constant 0 : index
    %303 = vector.load %arg14[%c0_228, %c1_229, %c0_230] : memref<6x6x32xf32, #tpu.memory_space<vmem>>, vector<6x1x32xf32>
    %c0_231 = arith.constant 0 : index
    %c0_232 = arith.constant 0 : index
    %c0_233 = arith.constant 0 : index
    %304 = vector.load %arg14[%c0_231, %c0_232, %c0_233] : memref<6x6x32xf32, #tpu.memory_space<vmem>>, vector<6x1x32xf32>
    tpu.vector_store %arg14[%c0_231, %c0_232, %c0_233], %303 {strides = array<i32>} : memref<6x6x32xf32, #tpu.memory_space<vmem>>, vector<6x1x32xf32>,
    %c0_234 = arith.constant 0 : index
    %c4 = arith.constant 4 : index
    %c0_235 = arith.constant 0 : index
    %305 = vector.load %arg14[%c0_234, %c4, %c0_235] : memref<6x6x32xf32, #tpu.memory_space<vmem>>, vector<6x1x32xf32>
    %c0_236 = arith.constant 0 : index
    %c5_237 = arith.constant 5 : index
    %c0_238 = arith.constant 0 : index
    %306 = vector.load %arg14[%c0_236, %c5_237, %c0_238] : memref<6x6x32xf32, #tpu.memory_space<vmem>>, vector<6x1x32xf32>
    tpu.vector_store %arg14[%c0_236, %c5_237, %c0_238], %305 {strides = array<i32>} : memref<6x6x32xf32, #tpu.memory_space<vmem>>, vector<6x1x32xf32>,
    %c1_239 = arith.constant 1 : index
    %c1_240 = arith.constant 1 : index
    %c0_241 = arith.constant 0 : index
    %307 = vector.load %arg14[%c1_239, %c1_240, %c0_241] : memref<6x6x32xf32, #tpu.memory_space<vmem>>, vector<4x4x32xf32>
    %c0_242 = arith.constant 0 : index
    %c1_243 = arith.constant 1 : index
    %c0_244 = arith.constant 0 : index
    %308 = vector.load %arg14[%c0_242, %c1_243, %c0_244] : memref<6x6x32xf32, #tpu.memory_space<vmem>>, vector<4x4x32xf32>
    %c2_245 = arith.constant 2 : index
    %c1_246 = arith.constant 1 : index
    %c0_247 = arith.constant 0 : index
    %309 = vector.load %arg14[%c2_245, %c1_246, %c0_247] : memref<6x6x32xf32, #tpu.memory_space<vmem>>, vector<4x4x32xf32>
    %c1_248 = arith.constant 1 : index
    %c0_249 = arith.constant 0 : index
    %c0_250 = arith.constant 0 : index
    %310 = vector.load %arg14[%c1_248, %c0_249, %c0_250] : memref<6x6x32xf32, #tpu.memory_space<vmem>>, vector<4x4x32xf32>
    %c1_251 = arith.constant 1 : index
    %c2_252 = arith.constant 2 : index
    %c0_253 = arith.constant 0 : index
    %311 = vector.load %arg14[%c1_251, %c2_252, %c0_253] : memref<6x6x32xf32, #tpu.memory_space<vmem>>, vector<4x4x32xf32>
    %c0_254 = arith.constant 0 : index
    %c0_255 = arith.constant 0 : index
    %c0_256 = arith.constant 0 : index
    %312 = vector.load %arg14[%c0_254, %c0_255, %c0_256] : memref<6x6x32xf32, #tpu.memory_space<vmem>>, vector<4x4x32xf32>
    %c0_257 = arith.constant 0 : index
    %c2_258 = arith.constant 2 : index
    %c0_259 = arith.constant 0 : index
    %313 = vector.load %arg14[%c0_257, %c2_258, %c0_259] : memref<6x6x32xf32, #tpu.memory_space<vmem>>, vector<4x4x32xf32>
    %c2_260 = arith.constant 2 : index
    %c0_261 = arith.constant 0 : index
    %c0_262 = arith.constant 0 : index
    %314 = vector.load %arg14[%c2_260, %c0_261, %c0_262] : memref<6x6x32xf32, #tpu.memory_space<vmem>>, vector<4x4x32xf32>
    %c2_263 = arith.constant 2 : index
    %c2_264 = arith.constant 2 : index
    %c0_265 = arith.constant 0 : index
    %315 = vector.load %arg14[%c2_263, %c2_264, %c0_265] : memref<6x6x32xf32, #tpu.memory_space<vmem>>, vector<4x4x32xf32>
    %cst_266 = arith.constant 7.500000e-01 : f32
    %316 = vector.broadcast %cst_266 : f32 to vector<4x4x32xf32>
    %317 = arith.mulf %316, %307 : vector<4x4x32xf32>
    %cst_267 = arith.constant 2.500000e-01 : f32
    %318 = vector.broadcast %cst_267 : f32 to vector<4x4x32xf32>
    %319 = arith.mulf %318, %310 : vector<4x4x32xf32>
    %320 = arith.addf %317, %319 : vector<4x4x32xf32>
    %cst_268 = arith.constant 7.500000e-01 : f32
    %321 = vector.broadcast %cst_268 : f32 to vector<4x4x32xf32>
    %322 = arith.mulf %321, %320 : vector<4x4x32xf32>
    %cst_269 = arith.constant 7.500000e-01 : f32
    %323 = vector.broadcast %cst_269 : f32 to vector<4x4x32xf32>
    %324 = arith.mulf %323, %308 : vector<4x4x32xf32>
    %cst_270 = arith.constant 2.500000e-01 : f32
    %325 = vector.broadcast %cst_270 : f32 to vector<4x4x32xf32>
    %326 = arith.mulf %325, %312 : vector<4x4x32xf32>
    %327 = arith.addf %324, %326 : vector<4x4x32xf32>
    %cst_271 = arith.constant 2.500000e-01 : f32
    %328 = vector.broadcast %cst_271 : f32 to vector<4x4x32xf32>
    %329 = arith.mulf %328, %327 : vector<4x4x32xf32>
    %330 = arith.addf %322, %329 : vector<4x4x32xf32>
    %cst_272 = arith.constant 7.500000e-01 : f32
    %331 = vector.broadcast %cst_272 : f32 to vector<4x4x32xf32>
    %332 = arith.mulf %331, %307 : vector<4x4x32xf32>
    %cst_273 = arith.constant 2.500000e-01 : f32
    %333 = vector.broadcast %cst_273 : f32 to vector<4x4x32xf32>
    %334 = arith.mulf %333, %311 : vector<4x4x32xf32>
    %335 = arith.addf %332, %334 : vector<4x4x32xf32>
    %cst_274 = arith.constant 7.500000e-01 : f32
    %336 = vector.broadcast %cst_274 : f32 to vector<4x4x32xf32>
    %337 = arith.mulf %336, %335 : vector<4x4x32xf32>
    %cst_275 = arith.constant 7.500000e-01 : f32
    %338 = vector.broadcast %cst_275 : f32 to vector<4x4x32xf32>
    %339 = arith.mulf %338, %308 : vector<4x4x32xf32>
    %cst_276 = arith.constant 2.500000e-01 : f32
    %340 = vector.broadcast %cst_276 : f32 to vector<4x4x32xf32>
    %341 = arith.mulf %340, %313 : vector<4x4x32xf32>
    %342 = arith.addf %339, %341 : vector<4x4x32xf32>
    %cst_277 = arith.constant 2.500000e-01 : f32
    %343 = vector.broadcast %cst_277 : f32 to vector<4x4x32xf32>
    %344 = arith.mulf %343, %342 : vector<4x4x32xf32>
    %345 = arith.addf %337, %344 : vector<4x4x32xf32>
    %cst_278 = arith.constant 7.500000e-01 : f32
    %346 = vector.broadcast %cst_278 : f32 to vector<4x4x32xf32>
    %347 = arith.mulf %346, %307 : vector<4x4x32xf32>
    %cst_279 = arith.constant 2.500000e-01 : f32
    %348 = vector.broadcast %cst_279 : f32 to vector<4x4x32xf32>
    %349 = arith.mulf %348, %310 : vector<4x4x32xf32>
    %350 = arith.addf %347, %349 : vector<4x4x32xf32>
    %cst_280 = arith.constant 7.500000e-01 : f32
    %351 = vector.broadcast %cst_280 : f32 to vector<4x4x32xf32>
    %352 = arith.mulf %351, %350 : vector<4x4x32xf32>
    %cst_281 = arith.constant 7.500000e-01 : f32
    %353 = vector.broadcast %cst_281 : f32 to vector<4x4x32xf32>
    %354 = arith.mulf %353, %309 : vector<4x4x32xf32>
    %cst_282 = arith.constant 2.500000e-01 : f32
    %355 = vector.broadcast %cst_282 : f32 to vector<4x4x32xf32>
    %356 = arith.mulf %355, %314 : vector<4x4x32xf32>
    %357 = arith.addf %354, %356 : vector<4x4x32xf32>
    %cst_283 = arith.constant 2.500000e-01 : f32
    %358 = vector.broadcast %cst_283 : f32 to vector<4x4x32xf32>
    %359 = arith.mulf %358, %357 : vector<4x4x32xf32>
    %360 = arith.addf %352, %359 : vector<4x4x32xf32>
    %cst_284 = arith.constant 7.500000e-01 : f32
    %361 = vector.broadcast %cst_284 : f32 to vector<4x4x32xf32>
    %362 = arith.mulf %361, %307 : vector<4x4x32xf32>
    %cst_285 = arith.constant 2.500000e-01 : f32
    %363 = vector.broadcast %cst_285 : f32 to vector<4x4x32xf32>
    %364 = arith.mulf %363, %311 : vector<4x4x32xf32>
    %365 = arith.addf %362, %364 : vector<4x4x32xf32>
    %cst_286 = arith.constant 7.500000e-01 : f32
    %366 = vector.broadcast %cst_286 : f32 to vector<4x4x32xf32>
    %367 = arith.mulf %366, %365 : vector<4x4x32xf32>
    %cst_287 = arith.constant 7.500000e-01 : f32
    %368 = vector.broadcast %cst_287 : f32 to vector<4x4x32xf32>
    %369 = arith.mulf %368, %309 : vector<4x4x32xf32>
    %cst_288 = arith.constant 2.500000e-01 : f32
    %370 = vector.broadcast %cst_288 : f32 to vector<4x4x32xf32>
    %371 = arith.mulf %370, %315 : vector<4x4x32xf32>
    %372 = arith.addf %369, %371 : vector<4x4x32xf32>
    %cst_289 = arith.constant 2.500000e-01 : f32
    %373 = vector.broadcast %cst_289 : f32 to vector<4x4x32xf32>
    %374 = arith.mulf %373, %372 : vector<4x4x32xf32>
    %375 = arith.addf %367, %374 : vector<4x4x32xf32>
    %376 = vector.shape_cast %330 : vector<4x4x32xf32> to vector<1x4x4x32xf32>
    %c0_290 = arith.constant 0 : index
    %c0_291 = arith.constant 0 : index
    %c0_292 = arith.constant 0 : index
    %c0_293 = arith.constant 0 : index
    %377 = vector.load %arg7[%c0_290, %c0_291, %c0_292, %c0_293] : memref<1x4x4x32xf32, #tpu.memory_space<vmem>>, vector<1x4x4x32xf32>
    tpu.vector_store %arg7[%c0_290, %c0_291, %c0_292, %c0_293], %376 {strides = array<i32>} : memref<1x4x4x32xf32, #tpu.memory_space<vmem>>, vector<1x4x4x32xf32>,
    %378 = vector.shape_cast %345 : vector<4x4x32xf32> to vector<1x4x4x32xf32>
    %c0_294 = arith.constant 0 : index
    %c0_295 = arith.constant 0 : index
    %c0_296 = arith.constant 0 : index
    %c0_297 = arith.constant 0 : index
    %379 = vector.load %arg8[%c0_294, %c0_295, %c0_296, %c0_297] : memref<1x4x4x32xf32, #tpu.memory_space<vmem>>, vector<1x4x4x32xf32>
    tpu.vector_store %arg8[%c0_294, %c0_295, %c0_296, %c0_297], %378 {strides = array<i32>} : memref<1x4x4x32xf32, #tpu.memory_space<vmem>>, vector<1x4x4x32xf32>,
    %380 = vector.shape_cast %360 : vector<4x4x32xf32> to vector<1x4x4x32xf32>
    %c0_298 = arith.constant 0 : index
    %c0_299 = arith.constant 0 : index
    %c0_300 = arith.constant 0 : index
    %c0_301 = arith.constant 0 : index
    %381 = vector.load %arg9[%c0_298, %c0_299, %c0_300, %c0_301] : memref<1x4x4x32xf32, #tpu.memory_space<vmem>>, vector<1x4x4x32xf32>
    tpu.vector_store %arg9[%c0_298, %c0_299, %c0_300, %c0_301], %380 {strides = array<i32>} : memref<1x4x4x32xf32, #tpu.memory_space<vmem>>, vector<1x4x4x32xf32>,
    %382 = vector.shape_cast %375 : vector<4x4x32xf32> to vector<1x4x4x32xf32>
    %c0_302 = arith.constant 0 : index
    %c0_303 = arith.constant 0 : index
    %c0_304 = arith.constant 0 : index
    %c0_305 = arith.constant 0 : index
    %383 = vector.load %arg10[%c0_302, %c0_303, %c0_304, %c0_305] : memref<1x4x4x32xf32, #tpu.memory_space<vmem>>, vector<1x4x4x32xf32>
    tpu.vector_store %arg10[%c0_302, %c0_303, %c0_304, %c0_305], %382 {strides = array<i32>} : memref<1x4x4x32xf32, #tpu.memory_space<vmem>>, vector<1x4x4x32xf32>,
    return
  }
  func.func @transform_0(%arg0: i32) -> (i32, i32, i32, i32) {
    %c0_i32 = arith.constant 0 : i32
    %c0_i32_0 = arith.constant 0 : i32
    %c0_i32_1 = arith.constant 0 : i32
    %c0_i32_2 = arith.constant 0 : i32
    return %arg0, %c0_i32, %c0_i32_0, %c0_i32_1 : i32, i32, i32, i32
  }
  func.func @transform_1(%arg0: i32) -> (i32, i32, i32) {
    %c0_i32 = arith.constant 0 : i32
    %c0_i32_0 = arith.constant 0 : i32
    %c0_i32_1 = arith.constant 0 : i32
    %c0_i32_2 = arith.constant 0 : i32
    return %c0_i32, %c0_i32_0, %c0_i32_1 : i32, i32, i32
  }
  func.func @transform_2(%arg0: i32) -> (i32, i32, i32) {
    %c0_i32 = arith.constant 0 : i32
    %c0_i32_0 = arith.constant 0 : i32
    %c0_i32_1 = arith.constant 0 : i32
    %c0_i32_2 = arith.constant 0 : i32
    return %c0_i32, %c0_i32_0, %c0_i32_1 : i32, i32, i32
  }
  func.func @transform_3(%arg0: i32) -> (i32, i32) {
    %c0_i32 = arith.constant 0 : i32
    %c0_i32_0 = arith.constant 0 : i32
    %c0_i32_1 = arith.constant 0 : i32
    return %c0_i32, %c0_i32_0 : i32, i32
  }
  func.func @transform_4(%arg0: i32) -> (i32, i32, i32) {
    %c0_i32 = arith.constant 0 : i32
    %c0_i32_0 = arith.constant 0 : i32
    %c0_i32_1 = arith.constant 0 : i32
    %c0_i32_2 = arith.constant 0 : i32
    return %c0_i32, %c0_i32_0, %c0_i32_1 : i32, i32, i32
  }
  func.func @transform_5(%arg0: i32) -> (i32, i32) {
    %c0_i32 = arith.constant 0 : i32
    %c0_i32_0 = arith.constant 0 : i32
    %c0_i32_1 = arith.constant 0 : i32
    return %c0_i32, %c0_i32_0 : i32, i32
  }
  func.func @transform_6(%arg0: i32) -> (i32, i32, i32, i32) {
    %c0_i32 = arith.constant 0 : i32
    %c0_i32_0 = arith.constant 0 : i32
    %c0_i32_1 = arith.constant 0 : i32
    %c0_i32_2 = arith.constant 0 : i32
    return %arg0, %c0_i32, %c0_i32_0, %c0_i32_1 : i32, i32, i32, i32
  }
  func.func @transform_7(%arg0: i32) -> (i32, i32, i32, i32) {
    %c0_i32 = arith.constant 0 : i32
    %c0_i32_0 = arith.constant 0 : i32
    %c0_i32_1 = arith.constant 0 : i32
    %c0_i32_2 = arith.constant 0 : i32
    return %arg0, %c0_i32, %c0_i32_0, %c0_i32_1 : i32, i32, i32, i32
  }
  func.func @transform_8(%arg0: i32) -> (i32, i32, i32, i32) {
    %c0_i32 = arith.constant 0 : i32
    %c0_i32_0 = arith.constant 0 : i32
    %c0_i32_1 = arith.constant 0 : i32
    %c0_i32_2 = arith.constant 0 : i32
    return %arg0, %c0_i32, %c0_i32_0, %c0_i32_1 : i32, i32, i32, i32
  }
  func.func @transform_9(%arg0: i32) -> (i32, i32, i32, i32) {
    %c0_i32 = arith.constant 0 : i32
    %c0_i32_0 = arith.constant 0 : i32
    %c0_i32_1 = arith.constant 0 : i32
    %c0_i32_2 = arith.constant 0 : i32
    return %arg0, %c0_i32, %c0_i32_0, %c0_i32_1 : i32, i32, i32, i32
  }
}

module attributes {stable_mosaic.version = 11 : i64} {
  func.func @_mid_kernel(%arg0: i32, %arg1: memref<1x8x8x32xf32, #tpu.memory_space<vmem>>, %arg2: memref<1x8x8x32xf32, #tpu.memory_space<vmem>>, %arg3: memref<9x32x32xf32, #tpu.memory_space<vmem>>, %arg4: memref<1x32xf32, #tpu.memory_space<vmem>>, %arg5: memref<32x32xf32, #tpu.memory_space<vmem>>, %arg6: memref<1x32xf32, #tpu.memory_space<vmem>>, %arg7: memref<1x8x8x32xf32, #tpu.memory_space<vmem>>, %arg8: memref<1x8x8x32xf32, #tpu.memory_space<vmem>>, %arg9: memref<1x8x8x32xf32, #tpu.memory_space<vmem>>, %arg10: memref<1x8x8x32xf32, #tpu.memory_space<vmem>>, %arg11: memref<10x10x32xf32, #tpu.memory_space<vmem>>, %arg12: memref<10x10x32xf32, #tpu.memory_space<vmem>>) attributes {dimension_semantics = [#tpu.dimension_semantics<parallel>], iteration_bounds = array<i64: 2>, scalar_prefetch = 0 : i64, scratch_operands = 2 : i64, tpu.core_type = #tpu.core_type<tc>, window_params = [{transform_indices = @transform_0, window_bounds = array<i64: 1, 8, 8, 32>}, {transform_indices = @transform_1, window_bounds = array<i64: 1, 8, 8, 32>}, {pipeline_mode = #tpu.pipeline_mode<synchronous>, transform_indices = @transform_2, window_bounds = array<i64: 9, 32, 32>}, {pipeline_mode = #tpu.pipeline_mode<synchronous>, transform_indices = @transform_3, window_bounds = array<i64: 1, 32>}, {pipeline_mode = #tpu.pipeline_mode<synchronous>, transform_indices = @transform_4, window_bounds = array<i64: 32, 32>}, {pipeline_mode = #tpu.pipeline_mode<synchronous>, transform_indices = @transform_5, window_bounds = array<i64: 1, 32>}, {transform_indices = @transform_6, window_bounds = array<i64: 1, 8, 8, 32>}, {transform_indices = @transform_7, window_bounds = array<i64: 1, 8, 8, 32>}, {transform_indices = @transform_8, window_bounds = array<i64: 1, 8, 8, 32>}, {transform_indices = @transform_9, window_bounds = array<i64: 1, 8, 8, 32>}]} {
    %c0 = arith.constant 0 : index
    %c0_0 = arith.constant 0 : index
    %c0_1 = arith.constant 0 : index
    %c0_2 = arith.constant 0 : index
    %0 = vector.load %arg1[%c0, %c0_0, %c0_1, %c0_2] : memref<1x8x8x32xf32, #tpu.memory_space<vmem>>, vector<1x8x8x32xf32>
    %1 = vector.shape_cast %0 : vector<1x8x8x32xf32> to vector<8x8x32xf32>
    %cst = arith.constant 0.000000e+00 : f32
    %2 = vector.broadcast %cst : f32 to vector<10x10x32xf32>
    %c0_3 = arith.constant 0 : index
    %c0_4 = arith.constant 0 : index
    %c0_5 = arith.constant 0 : index
    %3 = vector.load %arg11[%c0_3, %c0_4, %c0_5] : memref<10x10x32xf32, #tpu.memory_space<vmem>>, vector<10x10x32xf32>
    tpu.vector_store %arg11[%c0_3, %c0_4, %c0_5], %2 {strides = array<i32>} : memref<10x10x32xf32, #tpu.memory_space<vmem>>, vector<10x10x32xf32>,
    %c1 = arith.constant 1 : index
    %c1_6 = arith.constant 1 : index
    %c0_7 = arith.constant 0 : index
    %4 = vector.load %arg11[%c1, %c1_6, %c0_7] : memref<10x10x32xf32, #tpu.memory_space<vmem>>, vector<8x8x32xf32>
    tpu.vector_store %arg11[%c1, %c1_6, %c0_7], %1 {strides = array<i32>} : memref<10x10x32xf32, #tpu.memory_space<vmem>>, vector<8x8x32xf32>,
    %c0_8 = arith.constant 0 : index
    %c0_9 = arith.constant 0 : index
    %c0_10 = arith.constant 0 : index
    %5 = vector.load %arg3[%c0_8, %c0_9, %c0_10] : memref<9x32x32xf32, #tpu.memory_space<vmem>>, vector<9x32x32xf32>
    %cst_11 = arith.constant 0.000000e+00 : f32
    %6 = vector.broadcast %cst_11 : f32 to vector<64x32xf32>
    %c0_12 = arith.constant 0 : index
    %c0_13 = arith.constant 0 : index
    %c0_14 = arith.constant 0 : index
    %7 = vector.load %arg11[%c0_12, %c0_13, %c0_14] : memref<10x10x32xf32, #tpu.memory_space<vmem>>, vector<8x8x32xf32>
    %8 = vector.shape_cast %7 : vector<8x8x32xf32> to vector<64x32xf32>
    %9 = vector.extract_strided_slice %5 {offsets = [0, 0, 0], sizes = [1, 32, 32], strides = [1, 1, 1]} : vector<9x32x32xf32> to vector<1x32x32xf32>
    %10 = vector.shape_cast %9 : vector<1x32x32xf32> to vector<32x32xf32>
    %11 = arith.truncf %8 : vector<64x32xf32> to vector<64x32xbf16>
    %12 = arith.truncf %10 : vector<32x32xf32> to vector<32x32xbf16>
    %cst_15 = arith.constant dense<0.000000e+00> : vector<64x32xf32>
    %13 = tpu.matmul %11, %12, %cst_15 {dimension_numbers = #tpu.dot_dimension_numbers<[1], [0], [0], [1], [0, 0, 1, 1], [], []>} : vector<64x32xbf16>, vector<32x32xbf16>, vector<64x32xf32> -> vector<64x32xf32>
    %14 = arith.addf %6, %13 : vector<64x32xf32>
    %c0_16 = arith.constant 0 : index
    %c1_17 = arith.constant 1 : index
    %c0_18 = arith.constant 0 : index
    %15 = vector.load %arg11[%c0_16, %c1_17, %c0_18] : memref<10x10x32xf32, #tpu.memory_space<vmem>>, vector<8x8x32xf32>
    %16 = vector.shape_cast %15 : vector<8x8x32xf32> to vector<64x32xf32>
    %17 = vector.extract_strided_slice %5 {offsets = [1, 0, 0], sizes = [1, 32, 32], strides = [1, 1, 1]} : vector<9x32x32xf32> to vector<1x32x32xf32>
    %18 = vector.shape_cast %17 : vector<1x32x32xf32> to vector<32x32xf32>
    %19 = arith.truncf %16 : vector<64x32xf32> to vector<64x32xbf16>
    %20 = arith.truncf %18 : vector<32x32xf32> to vector<32x32xbf16>
    %cst_19 = arith.constant dense<0.000000e+00> : vector<64x32xf32>
    %21 = tpu.matmul %19, %20, %cst_19 {dimension_numbers = #tpu.dot_dimension_numbers<[1], [0], [0], [1], [0, 0, 1, 1], [], []>} : vector<64x32xbf16>, vector<32x32xbf16>, vector<64x32xf32> -> vector<64x32xf32>
    %22 = arith.addf %14, %21 : vector<64x32xf32>
    %c0_20 = arith.constant 0 : index
    %c2 = arith.constant 2 : index
    %c0_21 = arith.constant 0 : index
    %23 = vector.load %arg11[%c0_20, %c2, %c0_21] : memref<10x10x32xf32, #tpu.memory_space<vmem>>, vector<8x8x32xf32>
    %24 = vector.shape_cast %23 : vector<8x8x32xf32> to vector<64x32xf32>
    %25 = vector.extract_strided_slice %5 {offsets = [2, 0, 0], sizes = [1, 32, 32], strides = [1, 1, 1]} : vector<9x32x32xf32> to vector<1x32x32xf32>
    %26 = vector.shape_cast %25 : vector<1x32x32xf32> to vector<32x32xf32>
    %27 = arith.truncf %24 : vector<64x32xf32> to vector<64x32xbf16>
    %28 = arith.truncf %26 : vector<32x32xf32> to vector<32x32xbf16>
    %cst_22 = arith.constant dense<0.000000e+00> : vector<64x32xf32>
    %29 = tpu.matmul %27, %28, %cst_22 {dimension_numbers = #tpu.dot_dimension_numbers<[1], [0], [0], [1], [0, 0, 1, 1], [], []>} : vector<64x32xbf16>, vector<32x32xbf16>, vector<64x32xf32> -> vector<64x32xf32>
    %30 = arith.addf %22, %29 : vector<64x32xf32>
    %c1_23 = arith.constant 1 : index
    %c0_24 = arith.constant 0 : index
    %c0_25 = arith.constant 0 : index
    %31 = vector.load %arg11[%c1_23, %c0_24, %c0_25] : memref<10x10x32xf32, #tpu.memory_space<vmem>>, vector<8x8x32xf32>
    %32 = vector.shape_cast %31 : vector<8x8x32xf32> to vector<64x32xf32>
    %33 = vector.extract_strided_slice %5 {offsets = [3, 0, 0], sizes = [1, 32, 32], strides = [1, 1, 1]} : vector<9x32x32xf32> to vector<1x32x32xf32>
    %34 = vector.shape_cast %33 : vector<1x32x32xf32> to vector<32x32xf32>
    %35 = arith.truncf %32 : vector<64x32xf32> to vector<64x32xbf16>
    %36 = arith.truncf %34 : vector<32x32xf32> to vector<32x32xbf16>
    %cst_26 = arith.constant dense<0.000000e+00> : vector<64x32xf32>
    %37 = tpu.matmul %35, %36, %cst_26 {dimension_numbers = #tpu.dot_dimension_numbers<[1], [0], [0], [1], [0, 0, 1, 1], [], []>} : vector<64x32xbf16>, vector<32x32xbf16>, vector<64x32xf32> -> vector<64x32xf32>
    %38 = arith.addf %30, %37 : vector<64x32xf32>
    %c1_27 = arith.constant 1 : index
    %c1_28 = arith.constant 1 : index
    %c0_29 = arith.constant 0 : index
    %39 = vector.load %arg11[%c1_27, %c1_28, %c0_29] : memref<10x10x32xf32, #tpu.memory_space<vmem>>, vector<8x8x32xf32>
    %40 = vector.shape_cast %39 : vector<8x8x32xf32> to vector<64x32xf32>
    %41 = vector.extract_strided_slice %5 {offsets = [4, 0, 0], sizes = [1, 32, 32], strides = [1, 1, 1]} : vector<9x32x32xf32> to vector<1x32x32xf32>
    %42 = vector.shape_cast %41 : vector<1x32x32xf32> to vector<32x32xf32>
    %43 = arith.truncf %40 : vector<64x32xf32> to vector<64x32xbf16>
    %44 = arith.truncf %42 : vector<32x32xf32> to vector<32x32xbf16>
    %cst_30 = arith.constant dense<0.000000e+00> : vector<64x32xf32>
    %45 = tpu.matmul %43, %44, %cst_30 {dimension_numbers = #tpu.dot_dimension_numbers<[1], [0], [0], [1], [0, 0, 1, 1], [], []>} : vector<64x32xbf16>, vector<32x32xbf16>, vector<64x32xf32> -> vector<64x32xf32>
    %46 = arith.addf %38, %45 : vector<64x32xf32>
    %c1_31 = arith.constant 1 : index
    %c2_32 = arith.constant 2 : index
    %c0_33 = arith.constant 0 : index
    %47 = vector.load %arg11[%c1_31, %c2_32, %c0_33] : memref<10x10x32xf32, #tpu.memory_space<vmem>>, vector<8x8x32xf32>
    %48 = vector.shape_cast %47 : vector<8x8x32xf32> to vector<64x32xf32>
    %49 = vector.extract_strided_slice %5 {offsets = [5, 0, 0], sizes = [1, 32, 32], strides = [1, 1, 1]} : vector<9x32x32xf32> to vector<1x32x32xf32>
    %50 = vector.shape_cast %49 : vector<1x32x32xf32> to vector<32x32xf32>
    %51 = arith.truncf %48 : vector<64x32xf32> to vector<64x32xbf16>
    %52 = arith.truncf %50 : vector<32x32xf32> to vector<32x32xbf16>
    %cst_34 = arith.constant dense<0.000000e+00> : vector<64x32xf32>
    %53 = tpu.matmul %51, %52, %cst_34 {dimension_numbers = #tpu.dot_dimension_numbers<[1], [0], [0], [1], [0, 0, 1, 1], [], []>} : vector<64x32xbf16>, vector<32x32xbf16>, vector<64x32xf32> -> vector<64x32xf32>
    %54 = arith.addf %46, %53 : vector<64x32xf32>
    %c2_35 = arith.constant 2 : index
    %c0_36 = arith.constant 0 : index
    %c0_37 = arith.constant 0 : index
    %55 = vector.load %arg11[%c2_35, %c0_36, %c0_37] : memref<10x10x32xf32, #tpu.memory_space<vmem>>, vector<8x8x32xf32>
    %56 = vector.shape_cast %55 : vector<8x8x32xf32> to vector<64x32xf32>
    %57 = vector.extract_strided_slice %5 {offsets = [6, 0, 0], sizes = [1, 32, 32], strides = [1, 1, 1]} : vector<9x32x32xf32> to vector<1x32x32xf32>
    %58 = vector.shape_cast %57 : vector<1x32x32xf32> to vector<32x32xf32>
    %59 = arith.truncf %56 : vector<64x32xf32> to vector<64x32xbf16>
    %60 = arith.truncf %58 : vector<32x32xf32> to vector<32x32xbf16>
    %cst_38 = arith.constant dense<0.000000e+00> : vector<64x32xf32>
    %61 = tpu.matmul %59, %60, %cst_38 {dimension_numbers = #tpu.dot_dimension_numbers<[1], [0], [0], [1], [0, 0, 1, 1], [], []>} : vector<64x32xbf16>, vector<32x32xbf16>, vector<64x32xf32> -> vector<64x32xf32>
    %62 = arith.addf %54, %61 : vector<64x32xf32>
    %c2_39 = arith.constant 2 : index
    %c1_40 = arith.constant 1 : index
    %c0_41 = arith.constant 0 : index
    %63 = vector.load %arg11[%c2_39, %c1_40, %c0_41] : memref<10x10x32xf32, #tpu.memory_space<vmem>>, vector<8x8x32xf32>
    %64 = vector.shape_cast %63 : vector<8x8x32xf32> to vector<64x32xf32>
    %65 = vector.extract_strided_slice %5 {offsets = [7, 0, 0], sizes = [1, 32, 32], strides = [1, 1, 1]} : vector<9x32x32xf32> to vector<1x32x32xf32>
    %66 = vector.shape_cast %65 : vector<1x32x32xf32> to vector<32x32xf32>
    %67 = arith.truncf %64 : vector<64x32xf32> to vector<64x32xbf16>
    %68 = arith.truncf %66 : vector<32x32xf32> to vector<32x32xbf16>
    %cst_42 = arith.constant dense<0.000000e+00> : vector<64x32xf32>
    %69 = tpu.matmul %67, %68, %cst_42 {dimension_numbers = #tpu.dot_dimension_numbers<[1], [0], [0], [1], [0, 0, 1, 1], [], []>} : vector<64x32xbf16>, vector<32x32xbf16>, vector<64x32xf32> -> vector<64x32xf32>
    %70 = arith.addf %62, %69 : vector<64x32xf32>
    %c2_43 = arith.constant 2 : index
    %c2_44 = arith.constant 2 : index
    %c0_45 = arith.constant 0 : index
    %71 = vector.load %arg11[%c2_43, %c2_44, %c0_45] : memref<10x10x32xf32, #tpu.memory_space<vmem>>, vector<8x8x32xf32>
    %72 = vector.shape_cast %71 : vector<8x8x32xf32> to vector<64x32xf32>
    %73 = vector.extract_strided_slice %5 {offsets = [8, 0, 0], sizes = [1, 32, 32], strides = [1, 1, 1]} : vector<9x32x32xf32> to vector<1x32x32xf32>
    %74 = vector.shape_cast %73 : vector<1x32x32xf32> to vector<32x32xf32>
    %75 = arith.truncf %72 : vector<64x32xf32> to vector<64x32xbf16>
    %76 = arith.truncf %74 : vector<32x32xf32> to vector<32x32xbf16>
    %cst_46 = arith.constant dense<0.000000e+00> : vector<64x32xf32>
    %77 = tpu.matmul %75, %76, %cst_46 {dimension_numbers = #tpu.dot_dimension_numbers<[1], [0], [0], [1], [0, 0, 1, 1], [], []>} : vector<64x32xbf16>, vector<32x32xbf16>, vector<64x32xf32> -> vector<64x32xf32>
    %78 = arith.addf %70, %77 : vector<64x32xf32>
    %c0_47 = arith.constant 0 : index
    %c0_48 = arith.constant 0 : index
    %79 = vector.load %arg4[%c0_47, %c0_48] : memref<1x32xf32, #tpu.memory_space<vmem>>, vector<1x32xf32>
    %80 = vector.broadcast %79 : vector<1x32xf32> to vector<64x32xf32>
    %81 = arith.addf %78, %80 : vector<64x32xf32>
    %cst_49 = arith.constant 0.000000e+00 : f32
    %82 = vector.broadcast %cst_49 : f32 to vector<64x32xf32>
    %83 = arith.cmpf oge, %81, %82 : vector<64x32xf32>
    %cst_50 = arith.constant 1.000000e-01 : f32
    %84 = vector.broadcast %cst_50 : f32 to vector<64x32xf32>
    %85 = arith.mulf %84, %81 : vector<64x32xf32>
    %86 = arith.select %83, %81, %85 : vector<64x32xi1>, vector<64x32xf32>
    %c0_51 = arith.constant 0 : index
    %c0_52 = arith.constant 0 : index
    %c0_53 = arith.constant 0 : index
    %c0_54 = arith.constant 0 : index
    %87 = vector.load %arg2[%c0_51, %c0_52, %c0_53, %c0_54] : memref<1x8x8x32xf32, #tpu.memory_space<vmem>>, vector<1x8x8x32xf32>
    %88 = vector.shape_cast %87 : vector<1x8x8x32xf32> to vector<8x8x32xf32>
    %89 = vector.shape_cast %88 : vector<8x8x32xf32> to vector<64x32xf32>
    %90 = arith.addf %86, %89 : vector<64x32xf32>
    %c0_55 = arith.constant 0 : index
    %c0_56 = arith.constant 0 : index
    %91 = vector.load %arg5[%c0_55, %c0_56] : memref<32x32xf32, #tpu.memory_space<vmem>>, vector<32x32xf32>
    %92 = arith.truncf %90 : vector<64x32xf32> to vector<64x32xbf16>
    %93 = arith.truncf %91 : vector<32x32xf32> to vector<32x32xbf16>
    %cst_57 = arith.constant dense<0.000000e+00> : vector<64x32xf32>
    %94 = tpu.matmul %92, %93, %cst_57 {dimension_numbers = #tpu.dot_dimension_numbers<[1], [0], [0], [1], [0, 0, 1, 1], [], []>} : vector<64x32xbf16>, vector<32x32xbf16>, vector<64x32xf32> -> vector<64x32xf32>
    %c0_58 = arith.constant 0 : index
    %c0_59 = arith.constant 0 : index
    %95 = vector.load %arg6[%c0_58, %c0_59] : memref<1x32xf32, #tpu.memory_space<vmem>>, vector<1x32xf32>
    %96 = vector.broadcast %95 : vector<1x32xf32> to vector<64x32xf32>
    %97 = arith.addf %94, %96 : vector<64x32xf32>
    %cst_60 = arith.constant 0.000000e+00 : f32
    %98 = vector.broadcast %cst_60 : f32 to vector<64x32xf32>
    %99 = arith.cmpf oge, %97, %98 : vector<64x32xf32>
    %cst_61 = arith.constant 1.000000e-01 : f32
    %100 = vector.broadcast %cst_61 : f32 to vector<64x32xf32>
    %101 = arith.mulf %100, %97 : vector<64x32xf32>
    %102 = arith.select %99, %97, %101 : vector<64x32xi1>, vector<64x32xf32>
    %103 = vector.shape_cast %102 : vector<64x32xf32> to vector<8x8x32xf32>
    %c1_62 = arith.constant 1 : index
    %c1_63 = arith.constant 1 : index
    %c0_64 = arith.constant 0 : index
    %104 = vector.load %arg12[%c1_62, %c1_63, %c0_64] : memref<10x10x32xf32, #tpu.memory_space<vmem>>, vector<8x8x32xf32>
    tpu.vector_store %arg12[%c1_62, %c1_63, %c0_64], %103 {strides = array<i32>} : memref<10x10x32xf32, #tpu.memory_space<vmem>>, vector<8x8x32xf32>,
    %105 = vector.extract_strided_slice %103 {offsets = [0, 0, 0], sizes = [1, 8, 32], strides = [1, 1, 1]} : vector<8x8x32xf32> to vector<1x8x32xf32>
    %c0_65 = arith.constant 0 : index
    %c1_66 = arith.constant 1 : index
    %c0_67 = arith.constant 0 : index
    %106 = vector.load %arg12[%c0_65, %c1_66, %c0_67] : memref<10x10x32xf32, #tpu.memory_space<vmem>>, vector<1x8x32xf32>
    tpu.vector_store %arg12[%c0_65, %c1_66, %c0_67], %105 {strides = array<i32>} : memref<10x10x32xf32, #tpu.memory_space<vmem>>, vector<1x8x32xf32>,
    %107 = vector.extract_strided_slice %103 {offsets = [7, 0, 0], sizes = [1, 8, 32], strides = [1, 1, 1]} : vector<8x8x32xf32> to vector<1x8x32xf32>
    %c9 = arith.constant 9 : index
    %c1_68 = arith.constant 1 : index
    %c0_69 = arith.constant 0 : index
    %108 = vector.load %arg12[%c9, %c1_68, %c0_69] : memref<10x10x32xf32, #tpu.memory_space<vmem>>, vector<1x8x32xf32>
    tpu.vector_store %arg12[%c9, %c1_68, %c0_69], %107 {strides = array<i32>} : memref<10x10x32xf32, #tpu.memory_space<vmem>>, vector<1x8x32xf32>,
    %c0_70 = arith.constant 0 : index
    %c1_71 = arith.constant 1 : index
    %c0_72 = arith.constant 0 : index
    %109 = vector.load %arg12[%c0_70, %c1_71, %c0_72] : memref<10x10x32xf32, #tpu.memory_space<vmem>>, vector<10x1x32xf32>
    %c0_73 = arith.constant 0 : index
    %c0_74 = arith.constant 0 : index
    %c0_75 = arith.constant 0 : index
    %110 = vector.load %arg12[%c0_73, %c0_74, %c0_75] : memref<10x10x32xf32, #tpu.memory_space<vmem>>, vector<10x1x32xf32>
    tpu.vector_store %arg12[%c0_73, %c0_74, %c0_75], %109 {strides = array<i32>} : memref<10x10x32xf32, #tpu.memory_space<vmem>>, vector<10x1x32xf32>,
    %c0_76 = arith.constant 0 : index
    %c8 = arith.constant 8 : index
    %c0_77 = arith.constant 0 : index
    %111 = vector.load %arg12[%c0_76, %c8, %c0_77] : memref<10x10x32xf32, #tpu.memory_space<vmem>>, vector<10x1x32xf32>
    %c0_78 = arith.constant 0 : index
    %c9_79 = arith.constant 9 : index
    %c0_80 = arith.constant 0 : index
    %112 = vector.load %arg12[%c0_78, %c9_79, %c0_80] : memref<10x10x32xf32, #tpu.memory_space<vmem>>, vector<10x1x32xf32>
    tpu.vector_store %arg12[%c0_78, %c9_79, %c0_80], %111 {strides = array<i32>} : memref<10x10x32xf32, #tpu.memory_space<vmem>>, vector<10x1x32xf32>,
    %c1_81 = arith.constant 1 : index
    %c1_82 = arith.constant 1 : index
    %c0_83 = arith.constant 0 : index
    %113 = vector.load %arg12[%c1_81, %c1_82, %c0_83] : memref<10x10x32xf32, #tpu.memory_space<vmem>>, vector<8x8x32xf32>
    %c0_84 = arith.constant 0 : index
    %c1_85 = arith.constant 1 : index
    %c0_86 = arith.constant 0 : index
    %114 = vector.load %arg12[%c0_84, %c1_85, %c0_86] : memref<10x10x32xf32, #tpu.memory_space<vmem>>, vector<8x8x32xf32>
    %c2_87 = arith.constant 2 : index
    %c1_88 = arith.constant 1 : index
    %c0_89 = arith.constant 0 : index
    %115 = vector.load %arg12[%c2_87, %c1_88, %c0_89] : memref<10x10x32xf32, #tpu.memory_space<vmem>>, vector<8x8x32xf32>
    %c1_90 = arith.constant 1 : index
    %c0_91 = arith.constant 0 : index
    %c0_92 = arith.constant 0 : index
    %116 = vector.load %arg12[%c1_90, %c0_91, %c0_92] : memref<10x10x32xf32, #tpu.memory_space<vmem>>, vector<8x8x32xf32>
    %c1_93 = arith.constant 1 : index
    %c2_94 = arith.constant 2 : index
    %c0_95 = arith.constant 0 : index
    %117 = vector.load %arg12[%c1_93, %c2_94, %c0_95] : memref<10x10x32xf32, #tpu.memory_space<vmem>>, vector<8x8x32xf32>
    %c0_96 = arith.constant 0 : index
    %c0_97 = arith.constant 0 : index
    %c0_98 = arith.constant 0 : index
    %118 = vector.load %arg12[%c0_96, %c0_97, %c0_98] : memref<10x10x32xf32, #tpu.memory_space<vmem>>, vector<8x8x32xf32>
    %c0_99 = arith.constant 0 : index
    %c2_100 = arith.constant 2 : index
    %c0_101 = arith.constant 0 : index
    %119 = vector.load %arg12[%c0_99, %c2_100, %c0_101] : memref<10x10x32xf32, #tpu.memory_space<vmem>>, vector<8x8x32xf32>
    %c2_102 = arith.constant 2 : index
    %c0_103 = arith.constant 0 : index
    %c0_104 = arith.constant 0 : index
    %120 = vector.load %arg12[%c2_102, %c0_103, %c0_104] : memref<10x10x32xf32, #tpu.memory_space<vmem>>, vector<8x8x32xf32>
    %c2_105 = arith.constant 2 : index
    %c2_106 = arith.constant 2 : index
    %c0_107 = arith.constant 0 : index
    %121 = vector.load %arg12[%c2_105, %c2_106, %c0_107] : memref<10x10x32xf32, #tpu.memory_space<vmem>>, vector<8x8x32xf32>
    %cst_108 = arith.constant 7.500000e-01 : f32
    %122 = vector.broadcast %cst_108 : f32 to vector<8x8x32xf32>
    %123 = arith.mulf %122, %113 : vector<8x8x32xf32>
    %cst_109 = arith.constant 2.500000e-01 : f32
    %124 = vector.broadcast %cst_109 : f32 to vector<8x8x32xf32>
    %125 = arith.mulf %124, %116 : vector<8x8x32xf32>
    %126 = arith.addf %123, %125 : vector<8x8x32xf32>
    %cst_110 = arith.constant 7.500000e-01 : f32
    %127 = vector.broadcast %cst_110 : f32 to vector<8x8x32xf32>
    %128 = arith.mulf %127, %126 : vector<8x8x32xf32>
    %cst_111 = arith.constant 7.500000e-01 : f32
    %129 = vector.broadcast %cst_111 : f32 to vector<8x8x32xf32>
    %130 = arith.mulf %129, %114 : vector<8x8x32xf32>
    %cst_112 = arith.constant 2.500000e-01 : f32
    %131 = vector.broadcast %cst_112 : f32 to vector<8x8x32xf32>
    %132 = arith.mulf %131, %118 : vector<8x8x32xf32>
    %133 = arith.addf %130, %132 : vector<8x8x32xf32>
    %cst_113 = arith.constant 2.500000e-01 : f32
    %134 = vector.broadcast %cst_113 : f32 to vector<8x8x32xf32>
    %135 = arith.mulf %134, %133 : vector<8x8x32xf32>
    %136 = arith.addf %128, %135 : vector<8x8x32xf32>
    %cst_114 = arith.constant 7.500000e-01 : f32
    %137 = vector.broadcast %cst_114 : f32 to vector<8x8x32xf32>
    %138 = arith.mulf %137, %113 : vector<8x8x32xf32>
    %cst_115 = arith.constant 2.500000e-01 : f32
    %139 = vector.broadcast %cst_115 : f32 to vector<8x8x32xf32>
    %140 = arith.mulf %139, %117 : vector<8x8x32xf32>
    %141 = arith.addf %138, %140 : vector<8x8x32xf32>
    %cst_116 = arith.constant 7.500000e-01 : f32
    %142 = vector.broadcast %cst_116 : f32 to vector<8x8x32xf32>
    %143 = arith.mulf %142, %141 : vector<8x8x32xf32>
    %cst_117 = arith.constant 7.500000e-01 : f32
    %144 = vector.broadcast %cst_117 : f32 to vector<8x8x32xf32>
    %145 = arith.mulf %144, %114 : vector<8x8x32xf32>
    %cst_118 = arith.constant 2.500000e-01 : f32
    %146 = vector.broadcast %cst_118 : f32 to vector<8x8x32xf32>
    %147 = arith.mulf %146, %119 : vector<8x8x32xf32>
    %148 = arith.addf %145, %147 : vector<8x8x32xf32>
    %cst_119 = arith.constant 2.500000e-01 : f32
    %149 = vector.broadcast %cst_119 : f32 to vector<8x8x32xf32>
    %150 = arith.mulf %149, %148 : vector<8x8x32xf32>
    %151 = arith.addf %143, %150 : vector<8x8x32xf32>
    %cst_120 = arith.constant 7.500000e-01 : f32
    %152 = vector.broadcast %cst_120 : f32 to vector<8x8x32xf32>
    %153 = arith.mulf %152, %113 : vector<8x8x32xf32>
    %cst_121 = arith.constant 2.500000e-01 : f32
    %154 = vector.broadcast %cst_121 : f32 to vector<8x8x32xf32>
    %155 = arith.mulf %154, %116 : vector<8x8x32xf32>
    %156 = arith.addf %153, %155 : vector<8x8x32xf32>
    %cst_122 = arith.constant 7.500000e-01 : f32
    %157 = vector.broadcast %cst_122 : f32 to vector<8x8x32xf32>
    %158 = arith.mulf %157, %156 : vector<8x8x32xf32>
    %cst_123 = arith.constant 7.500000e-01 : f32
    %159 = vector.broadcast %cst_123 : f32 to vector<8x8x32xf32>
    %160 = arith.mulf %159, %115 : vector<8x8x32xf32>
    %cst_124 = arith.constant 2.500000e-01 : f32
    %161 = vector.broadcast %cst_124 : f32 to vector<8x8x32xf32>
    %162 = arith.mulf %161, %120 : vector<8x8x32xf32>
    %163 = arith.addf %160, %162 : vector<8x8x32xf32>
    %cst_125 = arith.constant 2.500000e-01 : f32
    %164 = vector.broadcast %cst_125 : f32 to vector<8x8x32xf32>
    %165 = arith.mulf %164, %163 : vector<8x8x32xf32>
    %166 = arith.addf %158, %165 : vector<8x8x32xf32>
    %cst_126 = arith.constant 7.500000e-01 : f32
    %167 = vector.broadcast %cst_126 : f32 to vector<8x8x32xf32>
    %168 = arith.mulf %167, %113 : vector<8x8x32xf32>
    %cst_127 = arith.constant 2.500000e-01 : f32
    %169 = vector.broadcast %cst_127 : f32 to vector<8x8x32xf32>
    %170 = arith.mulf %169, %117 : vector<8x8x32xf32>
    %171 = arith.addf %168, %170 : vector<8x8x32xf32>
    %cst_128 = arith.constant 7.500000e-01 : f32
    %172 = vector.broadcast %cst_128 : f32 to vector<8x8x32xf32>
    %173 = arith.mulf %172, %171 : vector<8x8x32xf32>
    %cst_129 = arith.constant 7.500000e-01 : f32
    %174 = vector.broadcast %cst_129 : f32 to vector<8x8x32xf32>
    %175 = arith.mulf %174, %115 : vector<8x8x32xf32>
    %cst_130 = arith.constant 2.500000e-01 : f32
    %176 = vector.broadcast %cst_130 : f32 to vector<8x8x32xf32>
    %177 = arith.mulf %176, %121 : vector<8x8x32xf32>
    %178 = arith.addf %175, %177 : vector<8x8x32xf32>
    %cst_131 = arith.constant 2.500000e-01 : f32
    %179 = vector.broadcast %cst_131 : f32 to vector<8x8x32xf32>
    %180 = arith.mulf %179, %178 : vector<8x8x32xf32>
    %181 = arith.addf %173, %180 : vector<8x8x32xf32>
    %182 = vector.shape_cast %136 : vector<8x8x32xf32> to vector<1x8x8x32xf32>
    %c0_132 = arith.constant 0 : index
    %c0_133 = arith.constant 0 : index
    %c0_134 = arith.constant 0 : index
    %c0_135 = arith.constant 0 : index
    %183 = vector.load %arg7[%c0_132, %c0_133, %c0_134, %c0_135] : memref<1x8x8x32xf32, #tpu.memory_space<vmem>>, vector<1x8x8x32xf32>
    tpu.vector_store %arg7[%c0_132, %c0_133, %c0_134, %c0_135], %182 {strides = array<i32>} : memref<1x8x8x32xf32, #tpu.memory_space<vmem>>, vector<1x8x8x32xf32>,
    %184 = vector.shape_cast %151 : vector<8x8x32xf32> to vector<1x8x8x32xf32>
    %c0_136 = arith.constant 0 : index
    %c0_137 = arith.constant 0 : index
    %c0_138 = arith.constant 0 : index
    %c0_139 = arith.constant 0 : index
    %185 = vector.load %arg8[%c0_136, %c0_137, %c0_138, %c0_139] : memref<1x8x8x32xf32, #tpu.memory_space<vmem>>, vector<1x8x8x32xf32>
    tpu.vector_store %arg8[%c0_136, %c0_137, %c0_138, %c0_139], %184 {strides = array<i32>} : memref<1x8x8x32xf32, #tpu.memory_space<vmem>>, vector<1x8x8x32xf32>,
    %186 = vector.shape_cast %166 : vector<8x8x32xf32> to vector<1x8x8x32xf32>
    %c0_140 = arith.constant 0 : index
    %c0_141 = arith.constant 0 : index
    %c0_142 = arith.constant 0 : index
    %c0_143 = arith.constant 0 : index
    %187 = vector.load %arg9[%c0_140, %c0_141, %c0_142, %c0_143] : memref<1x8x8x32xf32, #tpu.memory_space<vmem>>, vector<1x8x8x32xf32>
    tpu.vector_store %arg9[%c0_140, %c0_141, %c0_142, %c0_143], %186 {strides = array<i32>} : memref<1x8x8x32xf32, #tpu.memory_space<vmem>>, vector<1x8x8x32xf32>,
    %188 = vector.shape_cast %181 : vector<8x8x32xf32> to vector<1x8x8x32xf32>
    %c0_144 = arith.constant 0 : index
    %c0_145 = arith.constant 0 : index
    %c0_146 = arith.constant 0 : index
    %c0_147 = arith.constant 0 : index
    %189 = vector.load %arg10[%c0_144, %c0_145, %c0_146, %c0_147] : memref<1x8x8x32xf32, #tpu.memory_space<vmem>>, vector<1x8x8x32xf32>
    tpu.vector_store %arg10[%c0_144, %c0_145, %c0_146, %c0_147], %188 {strides = array<i32>} : memref<1x8x8x32xf32, #tpu.memory_space<vmem>>, vector<1x8x8x32xf32>,
    return
  }
  func.func @transform_0(%arg0: i32) -> (i32, i32, i32, i32) {
    %c0_i32 = arith.constant 0 : i32
    %c0_i32_0 = arith.constant 0 : i32
    %c0_i32_1 = arith.constant 0 : i32
    %c0_i32_2 = arith.constant 0 : i32
    return %arg0, %c0_i32, %c0_i32_0, %c0_i32_1 : i32, i32, i32, i32
  }
  func.func @transform_1(%arg0: i32) -> (i32, i32, i32, i32) {
    %c0_i32 = arith.constant 0 : i32
    %c0_i32_0 = arith.constant 0 : i32
    %c0_i32_1 = arith.constant 0 : i32
    %c0_i32_2 = arith.constant 0 : i32
    return %arg0, %c0_i32, %c0_i32_0, %c0_i32_1 : i32, i32, i32, i32
  }
  func.func @transform_2(%arg0: i32) -> (i32, i32, i32) {
    %c0_i32 = arith.constant 0 : i32
    %c0_i32_0 = arith.constant 0 : i32
    %c0_i32_1 = arith.constant 0 : i32
    %c0_i32_2 = arith.constant 0 : i32
    return %c0_i32, %c0_i32_0, %c0_i32_1 : i32, i32, i32
  }
  func.func @transform_3(%arg0: i32) -> (i32, i32) {
    %c0_i32 = arith.constant 0 : i32
    %c0_i32_0 = arith.constant 0 : i32
    %c0_i32_1 = arith.constant 0 : i32
    return %c0_i32, %c0_i32_0 : i32, i32
  }
  func.func @transform_4(%arg0: i32) -> (i32, i32) {
    %c0_i32 = arith.constant 0 : i32
    %c0_i32_0 = arith.constant 0 : i32
    %c0_i32_1 = arith.constant 0 : i32
    return %c0_i32, %c0_i32_0 : i32, i32
  }
  func.func @transform_5(%arg0: i32) -> (i32, i32) {
    %c0_i32 = arith.constant 0 : i32
    %c0_i32_0 = arith.constant 0 : i32
    %c0_i32_1 = arith.constant 0 : i32
    return %c0_i32, %c0_i32_0 : i32, i32
  }
  func.func @transform_6(%arg0: i32) -> (i32, i32, i32, i32) {
    %c0_i32 = arith.constant 0 : i32
    %c0_i32_0 = arith.constant 0 : i32
    %c0_i32_1 = arith.constant 0 : i32
    %c0_i32_2 = arith.constant 0 : i32
    return %arg0, %c0_i32, %c0_i32_0, %c0_i32_1 : i32, i32, i32, i32
  }
  func.func @transform_7(%arg0: i32) -> (i32, i32, i32, i32) {
    %c0_i32 = arith.constant 0 : i32
    %c0_i32_0 = arith.constant 0 : i32
    %c0_i32_1 = arith.constant 0 : i32
    %c0_i32_2 = arith.constant 0 : i32
    return %arg0, %c0_i32, %c0_i32_0, %c0_i32_1 : i32, i32, i32, i32
  }
  func.func @transform_8(%arg0: i32) -> (i32, i32, i32, i32) {
    %c0_i32 = arith.constant 0 : i32
    %c0_i32_0 = arith.constant 0 : i32
    %c0_i32_1 = arith.constant 0 : i32
    %c0_i32_2 = arith.constant 0 : i32
    return %arg0, %c0_i32, %c0_i32_0, %c0_i32_1 : i32, i32, i32, i32
  }
  func.func @transform_9(%arg0: i32) -> (i32, i32, i32, i32) {
    %c0_i32 = arith.constant 0 : i32
    %c0_i32_0 = arith.constant 0 : i32
    %c0_i32_1 = arith.constant 0 : i32
    %c0_i32_2 = arith.constant 0 : i32
    return %arg0, %c0_i32, %c0_i32_0, %c0_i32_1 : i32, i32, i32, i32
  }
}

module attributes {stable_mosaic.version = 11 : i64} {
  func.func @_tail_kernel(%arg0: i32, %arg1: memref<1x16x16x32xf32, #tpu.memory_space<vmem>>, %arg2: memref<1x16x16x32xf32, #tpu.memory_space<vmem>>, %arg3: memref<9x32x32xf32, #tpu.memory_space<vmem>>, %arg4: memref<1x32xf32, #tpu.memory_space<vmem>>, %arg5: memref<32x32xf32, #tpu.memory_space<vmem>>, %arg6: memref<1x32xf32, #tpu.memory_space<vmem>>, %arg7: memref<32x32xf32, #tpu.memory_space<vmem>>, %arg8: memref<1x32xf32, #tpu.memory_space<vmem>>, %arg9: memref<1x16x16x32xf32, #tpu.memory_space<vmem>>, %arg10: memref<18x18x32xf32, #tpu.memory_space<vmem>>) attributes {dimension_semantics = [#tpu.dimension_semantics<parallel>], iteration_bounds = array<i64: 2>, scalar_prefetch = 0 : i64, scratch_operands = 1 : i64, tpu.core_type = #tpu.core_type<tc>, window_params = [{transform_indices = @transform_0, window_bounds = array<i64: 1, 16, 16, 32>}, {transform_indices = @transform_1, window_bounds = array<i64: 1, 16, 16, 32>}, {pipeline_mode = #tpu.pipeline_mode<synchronous>, transform_indices = @transform_2, window_bounds = array<i64: 9, 32, 32>}, {pipeline_mode = #tpu.pipeline_mode<synchronous>, transform_indices = @transform_3, window_bounds = array<i64: 1, 32>}, {pipeline_mode = #tpu.pipeline_mode<synchronous>, transform_indices = @transform_4, window_bounds = array<i64: 32, 32>}, {pipeline_mode = #tpu.pipeline_mode<synchronous>, transform_indices = @transform_5, window_bounds = array<i64: 1, 32>}, {pipeline_mode = #tpu.pipeline_mode<synchronous>, transform_indices = @transform_6, window_bounds = array<i64: 32, 32>}, {pipeline_mode = #tpu.pipeline_mode<synchronous>, transform_indices = @transform_7, window_bounds = array<i64: 1, 32>}, {transform_indices = @transform_8, window_bounds = array<i64: 1, 16, 16, 32>}]} {
    %c0 = arith.constant 0 : index
    %c0_0 = arith.constant 0 : index
    %c0_1 = arith.constant 0 : index
    %c0_2 = arith.constant 0 : index
    %0 = vector.load %arg2[%c0, %c0_0, %c0_1, %c0_2] : memref<1x16x16x32xf32, #tpu.memory_space<vmem>>, vector<1x16x16x32xf32>
    %1 = vector.shape_cast %0 : vector<1x16x16x32xf32> to vector<16x16x32xf32>
    %cst = arith.constant 0.000000e+00 : f32
    %2 = vector.broadcast %cst : f32 to vector<18x18x32xf32>
    %c0_3 = arith.constant 0 : index
    %c0_4 = arith.constant 0 : index
    %c0_5 = arith.constant 0 : index
    %3 = vector.load %arg10[%c0_3, %c0_4, %c0_5] : memref<18x18x32xf32, #tpu.memory_space<vmem>>, vector<18x18x32xf32>
    tpu.vector_store %arg10[%c0_3, %c0_4, %c0_5], %2 {strides = array<i32>} : memref<18x18x32xf32, #tpu.memory_space<vmem>>, vector<18x18x32xf32>,
    %c1 = arith.constant 1 : index
    %c1_6 = arith.constant 1 : index
    %c0_7 = arith.constant 0 : index
    %4 = vector.load %arg10[%c1, %c1_6, %c0_7] : memref<18x18x32xf32, #tpu.memory_space<vmem>>, vector<16x16x32xf32>
    tpu.vector_store %arg10[%c1, %c1_6, %c0_7], %1 {strides = array<i32>} : memref<18x18x32xf32, #tpu.memory_space<vmem>>, vector<16x16x32xf32>,
    %c0_8 = arith.constant 0 : index
    %c0_9 = arith.constant 0 : index
    %c0_10 = arith.constant 0 : index
    %5 = vector.load %arg3[%c0_8, %c0_9, %c0_10] : memref<9x32x32xf32, #tpu.memory_space<vmem>>, vector<9x32x32xf32>
    %cst_11 = arith.constant 0.000000e+00 : f32
    %6 = vector.broadcast %cst_11 : f32 to vector<256x32xf32>
    %c0_12 = arith.constant 0 : index
    %c0_13 = arith.constant 0 : index
    %c0_14 = arith.constant 0 : index
    %7 = vector.load %arg10[%c0_12, %c0_13, %c0_14] : memref<18x18x32xf32, #tpu.memory_space<vmem>>, vector<16x16x32xf32>
    %8 = vector.shape_cast %7 : vector<16x16x32xf32> to vector<256x32xf32>
    %9 = vector.extract_strided_slice %5 {offsets = [0, 0, 0], sizes = [1, 32, 32], strides = [1, 1, 1]} : vector<9x32x32xf32> to vector<1x32x32xf32>
    %10 = vector.shape_cast %9 : vector<1x32x32xf32> to vector<32x32xf32>
    %11 = arith.truncf %8 : vector<256x32xf32> to vector<256x32xbf16>
    %12 = arith.truncf %10 : vector<32x32xf32> to vector<32x32xbf16>
    %cst_15 = arith.constant dense<0.000000e+00> : vector<256x32xf32>
    %13 = tpu.matmul %11, %12, %cst_15 {dimension_numbers = #tpu.dot_dimension_numbers<[1], [0], [0], [1], [0, 0, 1, 1], [], []>} : vector<256x32xbf16>, vector<32x32xbf16>, vector<256x32xf32> -> vector<256x32xf32>
    %14 = arith.addf %6, %13 : vector<256x32xf32>
    %c0_16 = arith.constant 0 : index
    %c1_17 = arith.constant 1 : index
    %c0_18 = arith.constant 0 : index
    %15 = vector.load %arg10[%c0_16, %c1_17, %c0_18] : memref<18x18x32xf32, #tpu.memory_space<vmem>>, vector<16x16x32xf32>
    %16 = vector.shape_cast %15 : vector<16x16x32xf32> to vector<256x32xf32>
    %17 = vector.extract_strided_slice %5 {offsets = [1, 0, 0], sizes = [1, 32, 32], strides = [1, 1, 1]} : vector<9x32x32xf32> to vector<1x32x32xf32>
    %18 = vector.shape_cast %17 : vector<1x32x32xf32> to vector<32x32xf32>
    %19 = arith.truncf %16 : vector<256x32xf32> to vector<256x32xbf16>
    %20 = arith.truncf %18 : vector<32x32xf32> to vector<32x32xbf16>
    %cst_19 = arith.constant dense<0.000000e+00> : vector<256x32xf32>
    %21 = tpu.matmul %19, %20, %cst_19 {dimension_numbers = #tpu.dot_dimension_numbers<[1], [0], [0], [1], [0, 0, 1, 1], [], []>} : vector<256x32xbf16>, vector<32x32xbf16>, vector<256x32xf32> -> vector<256x32xf32>
    %22 = arith.addf %14, %21 : vector<256x32xf32>
    %c0_20 = arith.constant 0 : index
    %c2 = arith.constant 2 : index
    %c0_21 = arith.constant 0 : index
    %23 = vector.load %arg10[%c0_20, %c2, %c0_21] : memref<18x18x32xf32, #tpu.memory_space<vmem>>, vector<16x16x32xf32>
    %24 = vector.shape_cast %23 : vector<16x16x32xf32> to vector<256x32xf32>
    %25 = vector.extract_strided_slice %5 {offsets = [2, 0, 0], sizes = [1, 32, 32], strides = [1, 1, 1]} : vector<9x32x32xf32> to vector<1x32x32xf32>
    %26 = vector.shape_cast %25 : vector<1x32x32xf32> to vector<32x32xf32>
    %27 = arith.truncf %24 : vector<256x32xf32> to vector<256x32xbf16>
    %28 = arith.truncf %26 : vector<32x32xf32> to vector<32x32xbf16>
    %cst_22 = arith.constant dense<0.000000e+00> : vector<256x32xf32>
    %29 = tpu.matmul %27, %28, %cst_22 {dimension_numbers = #tpu.dot_dimension_numbers<[1], [0], [0], [1], [0, 0, 1, 1], [], []>} : vector<256x32xbf16>, vector<32x32xbf16>, vector<256x32xf32> -> vector<256x32xf32>
    %30 = arith.addf %22, %29 : vector<256x32xf32>
    %c1_23 = arith.constant 1 : index
    %c0_24 = arith.constant 0 : index
    %c0_25 = arith.constant 0 : index
    %31 = vector.load %arg10[%c1_23, %c0_24, %c0_25] : memref<18x18x32xf32, #tpu.memory_space<vmem>>, vector<16x16x32xf32>
    %32 = vector.shape_cast %31 : vector<16x16x32xf32> to vector<256x32xf32>
    %33 = vector.extract_strided_slice %5 {offsets = [3, 0, 0], sizes = [1, 32, 32], strides = [1, 1, 1]} : vector<9x32x32xf32> to vector<1x32x32xf32>
    %34 = vector.shape_cast %33 : vector<1x32x32xf32> to vector<32x32xf32>
    %35 = arith.truncf %32 : vector<256x32xf32> to vector<256x32xbf16>
    %36 = arith.truncf %34 : vector<32x32xf32> to vector<32x32xbf16>
    %cst_26 = arith.constant dense<0.000000e+00> : vector<256x32xf32>
    %37 = tpu.matmul %35, %36, %cst_26 {dimension_numbers = #tpu.dot_dimension_numbers<[1], [0], [0], [1], [0, 0, 1, 1], [], []>} : vector<256x32xbf16>, vector<32x32xbf16>, vector<256x32xf32> -> vector<256x32xf32>
    %38 = arith.addf %30, %37 : vector<256x32xf32>
    %c1_27 = arith.constant 1 : index
    %c1_28 = arith.constant 1 : index
    %c0_29 = arith.constant 0 : index
    %39 = vector.load %arg10[%c1_27, %c1_28, %c0_29] : memref<18x18x32xf32, #tpu.memory_space<vmem>>, vector<16x16x32xf32>
    %40 = vector.shape_cast %39 : vector<16x16x32xf32> to vector<256x32xf32>
    %41 = vector.extract_strided_slice %5 {offsets = [4, 0, 0], sizes = [1, 32, 32], strides = [1, 1, 1]} : vector<9x32x32xf32> to vector<1x32x32xf32>
    %42 = vector.shape_cast %41 : vector<1x32x32xf32> to vector<32x32xf32>
    %43 = arith.truncf %40 : vector<256x32xf32> to vector<256x32xbf16>
    %44 = arith.truncf %42 : vector<32x32xf32> to vector<32x32xbf16>
    %cst_30 = arith.constant dense<0.000000e+00> : vector<256x32xf32>
    %45 = tpu.matmul %43, %44, %cst_30 {dimension_numbers = #tpu.dot_dimension_numbers<[1], [0], [0], [1], [0, 0, 1, 1], [], []>} : vector<256x32xbf16>, vector<32x32xbf16>, vector<256x32xf32> -> vector<256x32xf32>
    %46 = arith.addf %38, %45 : vector<256x32xf32>
    %c1_31 = arith.constant 1 : index
    %c2_32 = arith.constant 2 : index
    %c0_33 = arith.constant 0 : index
    %47 = vector.load %arg10[%c1_31, %c2_32, %c0_33] : memref<18x18x32xf32, #tpu.memory_space<vmem>>, vector<16x16x32xf32>
    %48 = vector.shape_cast %47 : vector<16x16x32xf32> to vector<256x32xf32>
    %49 = vector.extract_strided_slice %5 {offsets = [5, 0, 0], sizes = [1, 32, 32], strides = [1, 1, 1]} : vector<9x32x32xf32> to vector<1x32x32xf32>
    %50 = vector.shape_cast %49 : vector<1x32x32xf32> to vector<32x32xf32>
    %51 = arith.truncf %48 : vector<256x32xf32> to vector<256x32xbf16>
    %52 = arith.truncf %50 : vector<32x32xf32> to vector<32x32xbf16>
    %cst_34 = arith.constant dense<0.000000e+00> : vector<256x32xf32>
    %53 = tpu.matmul %51, %52, %cst_34 {dimension_numbers = #tpu.dot_dimension_numbers<[1], [0], [0], [1], [0, 0, 1, 1], [], []>} : vector<256x32xbf16>, vector<32x32xbf16>, vector<256x32xf32> -> vector<256x32xf32>
    %54 = arith.addf %46, %53 : vector<256x32xf32>
    %c2_35 = arith.constant 2 : index
    %c0_36 = arith.constant 0 : index
    %c0_37 = arith.constant 0 : index
    %55 = vector.load %arg10[%c2_35, %c0_36, %c0_37] : memref<18x18x32xf32, #tpu.memory_space<vmem>>, vector<16x16x32xf32>
    %56 = vector.shape_cast %55 : vector<16x16x32xf32> to vector<256x32xf32>
    %57 = vector.extract_strided_slice %5 {offsets = [6, 0, 0], sizes = [1, 32, 32], strides = [1, 1, 1]} : vector<9x32x32xf32> to vector<1x32x32xf32>
    %58 = vector.shape_cast %57 : vector<1x32x32xf32> to vector<32x32xf32>
    %59 = arith.truncf %56 : vector<256x32xf32> to vector<256x32xbf16>
    %60 = arith.truncf %58 : vector<32x32xf32> to vector<32x32xbf16>
    %cst_38 = arith.constant dense<0.000000e+00> : vector<256x32xf32>
    %61 = tpu.matmul %59, %60, %cst_38 {dimension_numbers = #tpu.dot_dimension_numbers<[1], [0], [0], [1], [0, 0, 1, 1], [], []>} : vector<256x32xbf16>, vector<32x32xbf16>, vector<256x32xf32> -> vector<256x32xf32>
    %62 = arith.addf %54, %61 : vector<256x32xf32>
    %c2_39 = arith.constant 2 : index
    %c1_40 = arith.constant 1 : index
    %c0_41 = arith.constant 0 : index
    %63 = vector.load %arg10[%c2_39, %c1_40, %c0_41] : memref<18x18x32xf32, #tpu.memory_space<vmem>>, vector<16x16x32xf32>
    %64 = vector.shape_cast %63 : vector<16x16x32xf32> to vector<256x32xf32>
    %65 = vector.extract_strided_slice %5 {offsets = [7, 0, 0], sizes = [1, 32, 32], strides = [1, 1, 1]} : vector<9x32x32xf32> to vector<1x32x32xf32>
    %66 = vector.shape_cast %65 : vector<1x32x32xf32> to vector<32x32xf32>
    %67 = arith.truncf %64 : vector<256x32xf32> to vector<256x32xbf16>
    %68 = arith.truncf %66 : vector<32x32xf32> to vector<32x32xbf16>
    %cst_42 = arith.constant dense<0.000000e+00> : vector<256x32xf32>
    %69 = tpu.matmul %67, %68, %cst_42 {dimension_numbers = #tpu.dot_dimension_numbers<[1], [0], [0], [1], [0, 0, 1, 1], [], []>} : vector<256x32xbf16>, vector<32x32xbf16>, vector<256x32xf32> -> vector<256x32xf32>
    %70 = arith.addf %62, %69 : vector<256x32xf32>
    %c2_43 = arith.constant 2 : index
    %c2_44 = arith.constant 2 : index
    %c0_45 = arith.constant 0 : index
    %71 = vector.load %arg10[%c2_43, %c2_44, %c0_45] : memref<18x18x32xf32, #tpu.memory_space<vmem>>, vector<16x16x32xf32>
    %72 = vector.shape_cast %71 : vector<16x16x32xf32> to vector<256x32xf32>
    %73 = vector.extract_strided_slice %5 {offsets = [8, 0, 0], sizes = [1, 32, 32], strides = [1, 1, 1]} : vector<9x32x32xf32> to vector<1x32x32xf32>
    %74 = vector.shape_cast %73 : vector<1x32x32xf32> to vector<32x32xf32>
    %75 = arith.truncf %72 : vector<256x32xf32> to vector<256x32xbf16>
    %76 = arith.truncf %74 : vector<32x32xf32> to vector<32x32xbf16>
    %cst_46 = arith.constant dense<0.000000e+00> : vector<256x32xf32>
    %77 = tpu.matmul %75, %76, %cst_46 {dimension_numbers = #tpu.dot_dimension_numbers<[1], [0], [0], [1], [0, 0, 1, 1], [], []>} : vector<256x32xbf16>, vector<32x32xbf16>, vector<256x32xf32> -> vector<256x32xf32>
    %78 = arith.addf %70, %77 : vector<256x32xf32>
    %c0_47 = arith.constant 0 : index
    %c0_48 = arith.constant 0 : index
    %79 = vector.load %arg4[%c0_47, %c0_48] : memref<1x32xf32, #tpu.memory_space<vmem>>, vector<1x32xf32>
    %80 = vector.broadcast %79 : vector<1x32xf32> to vector<256x32xf32>
    %81 = arith.addf %78, %80 : vector<256x32xf32>
    %c0_49 = arith.constant 0 : index
    %c0_50 = arith.constant 0 : index
    %82 = vector.load %arg5[%c0_49, %c0_50] : memref<32x32xf32, #tpu.memory_space<vmem>>, vector<32x32xf32>
    %83 = arith.truncf %81 : vector<256x32xf32> to vector<256x32xbf16>
    %84 = arith.truncf %82 : vector<32x32xf32> to vector<32x32xbf16>
    %cst_51 = arith.constant dense<0.000000e+00> : vector<256x32xf32>
    %85 = tpu.matmul %83, %84, %cst_51 {dimension_numbers = #tpu.dot_dimension_numbers<[1], [0], [0], [1], [0, 0, 1, 1], [], []>} : vector<256x32xbf16>, vector<32x32xbf16>, vector<256x32xf32> -> vector<256x32xf32>
    %c0_52 = arith.constant 0 : index
    %c0_53 = arith.constant 0 : index
    %86 = vector.load %arg6[%c0_52, %c0_53] : memref<1x32xf32, #tpu.memory_space<vmem>>, vector<1x32xf32>
    %87 = vector.broadcast %86 : vector<1x32xf32> to vector<256x32xf32>
    %88 = arith.addf %85, %87 : vector<256x32xf32>
    %cst_54 = arith.constant 0.000000e+00 : f32
    %89 = vector.broadcast %cst_54 : f32 to vector<256x32xf32>
    %90 = arith.cmpf oge, %88, %89 : vector<256x32xf32>
    %cst_55 = arith.constant 1.000000e-01 : f32
    %91 = vector.broadcast %cst_55 : f32 to vector<256x32xf32>
    %92 = arith.mulf %91, %88 : vector<256x32xf32>
    %93 = arith.select %90, %88, %92 : vector<256x32xi1>, vector<256x32xf32>
    %c0_56 = arith.constant 0 : index
    %c0_57 = arith.constant 0 : index
    %94 = vector.load %arg7[%c0_56, %c0_57] : memref<32x32xf32, #tpu.memory_space<vmem>>, vector<32x32xf32>
    %95 = arith.truncf %93 : vector<256x32xf32> to vector<256x32xbf16>
    %96 = arith.truncf %94 : vector<32x32xf32> to vector<32x32xbf16>
    %cst_58 = arith.constant dense<0.000000e+00> : vector<256x32xf32>
    %97 = tpu.matmul %95, %96, %cst_58 {dimension_numbers = #tpu.dot_dimension_numbers<[1], [0], [0], [1], [0, 0, 1, 1], [], []>} : vector<256x32xbf16>, vector<32x32xbf16>, vector<256x32xf32> -> vector<256x32xf32>
    %c0_59 = arith.constant 0 : index
    %c0_60 = arith.constant 0 : index
    %98 = vector.load %arg8[%c0_59, %c0_60] : memref<1x32xf32, #tpu.memory_space<vmem>>, vector<1x32xf32>
    %99 = vector.broadcast %98 : vector<1x32xf32> to vector<256x32xf32>
    %100 = arith.addf %97, %99 : vector<256x32xf32>
    %c0_61 = arith.constant 0 : index
    %c0_62 = arith.constant 0 : index
    %c0_63 = arith.constant 0 : index
    %c0_64 = arith.constant 0 : index
    %101 = vector.load %arg1[%c0_61, %c0_62, %c0_63, %c0_64] : memref<1x16x16x32xf32, #tpu.memory_space<vmem>>, vector<1x16x16x32xf32>
    %102 = vector.shape_cast %101 : vector<1x16x16x32xf32> to vector<16x16x32xf32>
    %103 = vector.shape_cast %102 : vector<16x16x32xf32> to vector<256x32xf32>
    %104 = arith.negf %81 : vector<256x32xf32>
    %105 = math.exp %104 : vector<256x32xf32>
    %cst_65 = arith.constant 1.000000e+00 : f32
    %106 = vector.broadcast %cst_65 : f32 to vector<256x32xf32>
    %107 = arith.addf %106, %105 : vector<256x32xf32>
    %108 = arith.divf %106, %107 : vector<256x32xf32>
    %109 = arith.mulf %103, %108 : vector<256x32xf32>
    %cst_66 = arith.constant 2.000000e+00 : f32
    %110 = vector.broadcast %cst_66 : f32 to vector<256x32xf32>
    %111 = arith.mulf %109, %110 : vector<256x32xf32>
    %112 = arith.addf %111, %100 : vector<256x32xf32>
    %113 = vector.shape_cast %112 : vector<256x32xf32> to vector<1x16x16x32xf32>
    %c0_67 = arith.constant 0 : index
    %c0_68 = arith.constant 0 : index
    %c0_69 = arith.constant 0 : index
    %c0_70 = arith.constant 0 : index
    %114 = vector.load %arg9[%c0_67, %c0_68, %c0_69, %c0_70] : memref<1x16x16x32xf32, #tpu.memory_space<vmem>>, vector<1x16x16x32xf32>
    tpu.vector_store %arg9[%c0_67, %c0_68, %c0_69, %c0_70], %113 {strides = array<i32>} : memref<1x16x16x32xf32, #tpu.memory_space<vmem>>, vector<1x16x16x32xf32>,
    return
  }
  func.func @transform_0(%arg0: i32) -> (i32, i32, i32, i32) {
    %c0_i32 = arith.constant 0 : i32
    %c0_i32_0 = arith.constant 0 : i32
    %c0_i32_1 = arith.constant 0 : i32
    %c0_i32_2 = arith.constant 0 : i32
    return %arg0, %c0_i32, %c0_i32_0, %c0_i32_1 : i32, i32, i32, i32
  }
  func.func @transform_1(%arg0: i32) -> (i32, i32, i32, i32) {
    %c0_i32 = arith.constant 0 : i32
    %c0_i32_0 = arith.constant 0 : i32
    %c0_i32_1 = arith.constant 0 : i32
    %c0_i32_2 = arith.constant 0 : i32
    return %arg0, %c0_i32, %c0_i32_0, %c0_i32_1 : i32, i32, i32, i32
  }
  func.func @transform_2(%arg0: i32) -> (i32, i32, i32) {
    %c0_i32 = arith.constant 0 : i32
    %c0_i32_0 = arith.constant 0 : i32
    %c0_i32_1 = arith.constant 0 : i32
    %c0_i32_2 = arith.constant 0 : i32
    return %c0_i32, %c0_i32_0, %c0_i32_1 : i32, i32, i32
  }
  func.func @transform_3(%arg0: i32) -> (i32, i32) {
    %c0_i32 = arith.constant 0 : i32
    %c0_i32_0 = arith.constant 0 : i32
    %c0_i32_1 = arith.constant 0 : i32
    return %c0_i32, %c0_i32_0 : i32, i32
  }
  func.func @transform_4(%arg0: i32) -> (i32, i32) {
    %c0_i32 = arith.constant 0 : i32
    %c0_i32_0 = arith.constant 0 : i32
    %c0_i32_1 = arith.constant 0 : i32
    return %c0_i32, %c0_i32_0 : i32, i32
  }
  func.func @transform_5(%arg0: i32) -> (i32, i32) {
    %c0_i32 = arith.constant 0 : i32
    %c0_i32_0 = arith.constant 0 : i32
    %c0_i32_1 = arith.constant 0 : i32
    return %c0_i32, %c0_i32_0 : i32, i32
  }
  func.func @transform_6(%arg0: i32) -> (i32, i32) {
    %c0_i32 = arith.constant 0 : i32
    %c0_i32_0 = arith.constant 0 : i32
    %c0_i32_1 = arith.constant 0 : i32
    return %c0_i32, %c0_i32_0 : i32, i32
  }
  func.func @transform_7(%arg0: i32) -> (i32, i32) {
    %c0_i32 = arith.constant 0 : i32
    %c0_i32_0 = arith.constant 0 : i32
    %c0_i32_1 = arith.constant 0 : i32
    return %c0_i32, %c0_i32_0 : i32, i32
  }
  func.func @transform_8(%arg0: i32) -> (i32, i32, i32, i32) {
    %c0_i32 = arith.constant 0 : i32
    %c0_i32_0 = arith.constant 0 : i32
    %c0_i32_1 = arith.constant 0 : i32
    %c0_i32_2 = arith.constant 0 : i32
    return %arg0, %c0_i32, %c0_i32_0, %c0_i32_1 : i32, i32, i32, i32
  }
}

</mosaic_0001>

<bundles_post_ra>
// kernel: attention_forward.4
= control target key start
LH: loop header
LB: loop body
LE: loop exit
PB: predicated region body
PF: predicated region fallthrough
CT: control target
= control target key end

     0   :  { %15 = vsyncpa [#allocation5], 0  ;;  %s3004_s0 = inlined_call_operand.hbm [shape: f32[2,16,16,32], index: 0, kind: input, shape index: {}]   ;;  %s3005_s1 = inlined_call_operand.hbm [shape: f32[32,32], index: 1, kind: input, shape index: {}]   ;;  %s3006_s2 = inlined_call_operand.vmem [shape: f32[1,32], index: 2, kind: input, shape index: {}]   ;;  %s3007_s3 = inlined_call_operand.hbm [shape: f32[32,32], index: 3, kind: input, shape index: {}]   ;;  %s3008_s4 = inlined_call_operand.hbm [shape: f32[32,32], index: 4, kind: input, shape index: {}]   ;;  %s3009_s5 = inlined_call_operand.vmem [shape: f32[1,32], index: 5, kind: input, shape index: {}]   ;;  %s3010_s6 = inlined_call_operand.vmem [shape: f32[32,32], index: 6, kind: input, shape index: {}]   ;;  %s3011_s7 = inlined_call_operand.vmem [shape: f32[1,32], index: 7, kind: input, shape index: {}]   ;;  %s3012_s8 = inlined_call_operand.vmem [shape: f32[2,8,8,32], index: 8, kind: output, shape index: {0}]   ;;  %s3013_s9 = inlined_call_operand.vmem [shape: f32[2,8,8,32], index: 9, kind: output, shape index: {1}]  }
   0x1   :  { %17 = vsyncpa [#allocation5 + $0x1], 0 }
   0x2   :  { %18 = vsyncpa [#allocation7], 0 }
   0x3   :  { %19 = vsyncpa [#allocation10], 0  ;;  %s2399_s30 = smov 0   ;;  %s2401_s10 = smov 0  }
   0x4   :  { %s2403_s11 = smov 0   ;;  %s2405_s12 = smov 0  }
   0x5 LB: > { %s2418_s13 = sadd.s32 4294967295, %s2339_s12   ;;  %p45_p0 = scmp.ne.s32.totalorder %s2331_s10, %s2327_s30  ;;  %s2339_s12 = sphi %s2405_s12, %s3032_s12   ;;  %s2335_s11 = sphi %s2403_s11, %s3031_s11   ;;  %s2331_s10 = sphi %s2401_s10, %s3030_s10   ;;  %s2327_s30 = sphi %s2399_s30, %s3029_s30  }
   0x6   : > { %p3015_p1 = scmp.eq.s32.totalorder %s2418_s13, 0  ;;  %p1952_p2 = scmp.ge.s32.totalorder %s2339_s12, 1 }
   0x7   : > { %p255_p3 = scmp.lt.s32.totalorder %s2339_s12, 3  ;;  %s2341_s16 = smov [#allocation6]  }
   0x8   : > { %p2426_p4 = por %p3015_p1, %p45_p0  ;;  %s267_s17 = sshll.u32 %s2341_s16, 4  ;;  %s268_s17 = int_to_ptr.vmem [resolvable:$true] %s267_s17 }
   0x9   : > { %p2430_p5 = pnand %p1952_p2, %p255_p3  ;;  %s2342_s19 = smov [#allocation8]  }
   0xa   : > { %s3018_s14 = scalar_select %p2426_p4, 1, 0 }
   0xb   : > { %s3019_s15 = scalar_select %p2430_p5, 1, 0 }
   0xc   : > { %p2131_p6 = pneg %p2430_p5  ;;  %s283_s20 = sshll.u32 %s2342_s19, 4  ;;  %s284_s20 = int_to_ptr.vmem [resolvable:$true] %s283_s20 }
   0xd   : > { %s2343_s21 = smov [#allocation9]   ;;  %s2202_s23 = scalar_lea.vmem %s268_s17, 512 }
   0xe   : > { %p2438_p7 = pnand %p2131_p6, %p3015_p1  ;;  %s296_s22 = sshll.u32 %s2343_s21, 4  ;;  %s297_s22 = int_to_ptr.vmem [resolvable:$true] %s296_s22 }
   0xf   : > { %p2203_p9 = scmp.ne.s32.totalorder %s268_s17, %s2202_s23  ;;  %p2210_p12 = scmp.lt.s32.totalorder %s268_s17, %s268_s17 }
  0x10   : > { %p2193_p8 = pneg %p2438_p7  ;;  %p2211_p13 = scmp.lt.s32.totalorder %s2202_s23, %s2202_s23 }
  0x12   : > { %p2205_p10 = pnand %p2203_p9, %p2193_p8  ;;  %p2212_p0 = por %p2211_p13, %p2210_p12 }
  0x14   : > { %p2206_p11 = pneg %p2205_p10 }
  0x16   : > { %p2213_p2 = pnand %p2212_p0, %p2206_p11 }
  0x18   : > { %2216 = shalt.err (!%p2213_p2)
}
  0x19   : > { %s3014_s24 = smov 128   ;;  %s2345_s25 = smov 8  }
  0x1a   : > { %2134 = dma.hbm_to_vmem [thread:$0]  (!%p2438_p7), %s3005_s1, 512, %s268_s17, [#allocation7], %s3014_s24, %s3014_s24, %s2345_s25  }
  0x1b   : > { %s2228_s28 = scalar_lea.vmem %s284_s20, 512  ;;  %p2236_p10 = scmp.lt.s32.totalorder %s284_s20, %s284_s20 }
  0x1c   : > { %p2229_p3 = scmp.ne.s32.totalorder %s284_s20, %s2228_s28  ;;  %p2237_p11 = scmp.lt.s32.totalorder %s2228_s28, %s2228_s28 }
  0x1e   : > { %p2231_p6 = pnand %p2229_p3, %p2193_p8  ;;  %p2238_p12 = por %p2237_p11, %p2236_p10 }
  0x20   : > { %p2232_p9 = pneg %p2231_p6 }
  0x22   : > { %p2239_p13 = pnand %p2238_p12, %p2232_p9 }
  0x24   : > { %2242 = shalt.err (!%p2239_p13)
}
  0x25   : > { %2137 = dma.hbm_to_vmem [thread:$0]  (!%p2438_p7), %s3007_s3, 512, %s284_s20, [#allocation7], %s3014_s24, %s3014_s24, %s2345_s25  }
  0x26   : > { %s2254_s16 = scalar_lea.vmem %s297_s22, 512  ;;  %p2262_p6 = scmp.lt.s32.totalorder %s297_s22, %s297_s22 }
  0x27   : > { %p2255_p0 = scmp.ne.s32.totalorder %s297_s22, %s2254_s16  ;;  %p2263_p9 = scmp.lt.s32.totalorder %s2254_s16, %s2254_s16 }
  0x29   : > { %p2257_p2 = pnand %p2255_p0, %p2193_p8  ;;  %p2264_p10 = por %p2263_p9, %p2262_p6 }
  0x2b   : > { %p2258_p3 = pneg %p2257_p2 }
  0x2d   : > { %p2265_p11 = pnand %p2264_p10, %p2258_p3 }
  0x2f   : > { %2268 = shalt.err (!%p2265_p11)
}
  0x30   : > { %2140 = dma.hbm_to_vmem [thread:$0]  (!%p2438_p7), %s3008_s4, 512, %s297_s22, [#allocation10], %s3014_s24, %s3014_s24, %s2345_s25  }
  0x31   : > { %s2478_s20 = sadd.s32 1, %s2339_s12   ;;  %s32_s21 = sadd.s32 1, %s2335_s11 }
  0x32   : > { %s29_s18 = ssub.s32 %s2339_s12, %s2478_s20  ;;  %p39_p12 = scmp.ne.s32.totalorder %s2335_s11, %s2331_s10 }
  0x33   : > { %p30_p8 = scmp.eq.s32.totalorder %s29_s18, 0  ;;  %p40_p13 = scmp.eq.s32.totalorder %s2339_s12, 0 }
  0x34   : > { %p2148_p0 = scmp.lt.s32.totalorder %s2339_s12, 2  ;;  %s319_s26 = sand.u32 1, %s2335_s11  }
  0x35   : > { %s2488_s23 = scalar_select %p30_p8, %s2335_s11, %s32_s21  }
  0x36   : > { %p41_p2 = por %p40_p13, %p39_p12  ;;  %s1957_s27 = sshll.u32 %s319_s26, 8 }
  0x37   : > { %s2002_s28 = sshll.u32 %s2339_s12, 12  ;;  %s323_s22 = scalar_lea.vmem [#allocation4], %s1957_s27 }
  0x38   : > { %s2495_s16 = scalar_lea.hbm %s3004_s0, %s2002_s28  ;;  %s330_s17 = sshll.u32 %s323_s22, 4  ;;  %s2497_s17 = int_to_ptr.vmem [resolvable:$true] %s330_s17 }
  0x39   : > { %p2499_p7 = pnand %p2148_p0, %p41_p2  ;;  %s2503_s18 = scalar_lea.sflag [#allocation5], %s319_s26 }
  0x3a   : > { %s2269_s12 = scalar_lea.hbm %s2495_s16, 4096  ;;  %s2274_s27 = scalar_lea.hbm %s3004_s0, 8192 }
  0x3b   : > { %p2270_p3 = scmp.ne.s32.totalorder %s2495_s16, %s2269_s12  ;;  %p2271_p6 = pneg %p2499_p7 }
  0x3c   : > { %p2275_p11 = scmp.lt.s32.totalorder %s2495_s16, %s3004_s0  ;;  %p2276_p8 = scmp.lt.s32.totalorder %s2274_s27, %s2269_s12 }
  0x3d   : > { %p2272_p9 = pnand %p2271_p6, %p2270_p3 }
  0x3e   : > { %p2277_p12 = por %p2276_p8, %p2275_p11 }
  0x3f   : > { %p2273_p10 = pneg %p2272_p9 }
  0x41   : > { %p2278_p13 = pnand %p2277_p12, %p2273_p10 }
  0x43   : > { %2281 = shalt.err (!%p2278_p13)
}
  0x44   : > { %s2282_s26 = scalar_lea.vmem %s2497_s17, 4096  ;;  %s2346_s22 = smov [#allocation4]  }
  0x45   : > { %p2283_p0 = scmp.ne.s32.totalorder %s2497_s17, %s2282_s26  ;;  %s2287_s24 = sshll.u32 %s2346_s22, 4  ;;  %s2288_s24 = int_to_ptr.vmem [resolvable:$false] %s2287_s24 }
  0x46   : > { %s2289_s21 = scalar_lea.vmem %s2288_s24, 8192  ;;  %p2290_p9 = scmp.lt.s32.totalorder %s2497_s17, %s2288_s24 }
  0x47   : > { %p2285_p2 = pnand %p2283_p0, %p2271_p6  ;;  %p2291_p1 = scmp.lt.s32.totalorder %s2289_s21, %s2282_s26 }
  0x49   : > { %p2286_p3 = pneg %p2285_p2  ;;  %p2292_p4 = por %p2291_p1, %p2290_p9 }
  0x4b   : > { %p2293_p5 = pnand %p2292_p4, %p2286_p3 }
  0x4d   : > { %2296 = shalt.err (!%p2293_p5)
}
  0x4e   : > { %s3022_s12 = smov 128   ;;  %p3023_p6 = scmp.ne.s32.totalorder %s3019_s15, 0 }
  0x4f   : > { %2144 = dma.hbm_to_vmem [thread:$0]  (!%p2499_p7), %s2495_s16, 4096, %s2497_s17, %s2503_s18, %s3022_s12, %s3022_s12, %s2345_s25  }
  0x50   : > { %342 = sbr.rel (%p3023_p6) target bundleno = 815 (0x32f), region = 52  ;;  %s344_s28 = sand.u32 (!%p3023_p6), 1, %s2331_s10  }
  0x51   : > { %s1961_s24 = sshll.u32 (!%p3023_p6), %s344_s28, 8  ;;  %s345_s27 = scalar_lea.sflag (!%p3023_p6), [#allocation5], %s344_s28 }
  0x52   : > { %s2530_s29 = scalar_lea.vmem (!%p3023_p6), [#allocation4], %s1961_s24  ;;  %p3024_p1 = scmp.ne.s32.totalorder (!%p3023_p6), %s3018_s14, 0 }
  0x55   : > { %2314 = dma.done.wait (%p3024_p1), %s345_s27, 4096  }
  0x56   : > { %2316 = vsyncadd (%p3024_p1), %s345_s27, 4294963200  ;;  %p3025_p4 = scmp.eq.s32.totalorder %s2418_s13, 0 }
  0x58   : > { %2318 = dma.done.wait (%p3025_p4), [#allocation7], 1024   ;;  %p3026_p5 = pmov %p3025_p4 }
  0x59   : > { %p3027_p7 = pmov %p3025_p4 }
  0x5a   : > { %2320 = vsyncadd (%p3026_p5), [#allocation7], 4294966272 }
  0x5b   : > { %2322 = dma.done.wait (%p3027_p7), [#allocation10], 512   ;;  %p3028_p10 = pmov %p3025_p4 }
  0x5c   : > { %v445_v0 = vld [vmem:[#allocation6 + $0x10] sm:$0xff]  ;;  %v446_v1 = vld [vmem:[#allocation6 + $0x18] sm:$0xff]  ;;  %v443_v2 = vld [vmem:[#allocation6] sm:$0xff]  ;;  %vm472_vm0 = vcmask 261120   ;;  %v2347_v54 = vmov -3.4028235e+38  }
  0x5d   : > { %2324 = vsyncadd (%p3028_p10), [#allocation10], 4294966784  ;;  %v464_v3 = vpack.c.bf16 %v446_v1, %v445_v0  ;;  %v444_v4 = vld [vmem:[#allocation6 + $0x8] sm:$0xff]  ;;  %v411_v5 = vld [vmem:[%s2530_s29] sm:$0xff]  ;;  %785 = vst.msk [vmem:[#allocation2 + $0x30] sm:$0xff] %vm472_vm0, %v2347_v54  ;;  %v2348_v55 = vmov 0.0  }
  0x5e   : > { %v412_v6 = vld [vmem:[%s2530_s29 + $0x8] sm:$0xff]  ;;  %v463_v7 = vpack.c.bf16 %v444_v4, %v443_v2  ;;  %v413_v9 = vld [vmem:[%s2530_s29 + $0x10] sm:$0xff]  ;;  %v414_v10 = vld [vmem:[%s2530_s29 + $0x18] sm:$0xff]  ;;  %786 = vst.msk [vmem:[#allocation2 + $0x38] sm:$0xff] %vm472_vm0, %v2347_v54  ;;  %vm780_vm1 = vcmask 253952   ;;  %p400_p11 = scmp.lt.s32.totalorder %s2418_s13, 1 }
  0x5f   : > { %v447_v8 = vpack.c.bf16 %v412_v6, %v411_v5  ;;  %2041 = vmatprep.subr.bf16.mxu0 %v464_v3  ;;  %2113 = vmatprep.subr.bf16.mxu1 %v464_v3  ;;  %v415_v11 = vld [vmem:[%s2530_s29 + $0x20] sm:$0xff]  ;;  %v416_v12 = vld [vmem:[%s2530_s29 + $0x28] sm:$0xff]  ;;  %v448_v13 = vpack.c.bf16 %v414_v10, %v413_v9  ;;  %v441_v18 = vld [vmem:[%s2530_s29 + $0xf0] sm:$0xff]  ;;  %836 = vst.msk [vmem:[#allocation3 + $0x30] sm:$0xff] %vm472_vm0, %v2348_v55 }
  0x60   : > { %2042 = vmatpush3.bf16.msra.mxu0 %v464_v3  ;;  %2115 = vmatpush3.bf16.msra.mxu1 %v464_v3  ;;  %v449_v14 = vpack.c.bf16 %v416_v12, %v415_v11  ;;  %v439_v15 = vld [vmem:[%s2530_s29 + $0xe0] sm:$0xff]  ;;  %v440_v16 = vld [vmem:[%s2530_s29 + $0xe8] sm:$0xff]  ;;  %v442_v19 = vld [vmem:[%s2530_s29 + $0xf8] sm:$0xff]  ;;  %837 = vst.msk [vmem:[#allocation3 + $0x38] sm:$0xff] %vm472_vm0, %v2348_v55  ;;  %s3034_s13 = smov (!%p400_p11, %s2418_s13), 1 }
  0x61   : > { %2045 = vmatprep.mubr.msk.bf16.mxu0 %vm472_vm0, %v447_v8  ;;  %2043 = vmatprep.subr.bf16.mxu0 %v463_v7  ;;  %v461_v17 = vpack.c.bf16 %v440_v16, %v439_v15  ;;  %v462_v20 = vpack.c.bf16 %v442_v19, %v441_v18  ;;  %v417_v21 = vld [vmem:[%s2530_s29 + $0x30] sm:$0xff]  ;;  %v418_v22 = vld [vmem:[%s2530_s29 + $0x38] sm:$0xff]  ;;  %v419_v23 = vld [vmem:[%s2530_s29 + $0x40] sm:$0xff]  ;;  %778 = vst.msk [vmem:[#allocation2] sm:$0xff] %vm472_vm0, %v2347_v54  ;;  %s2003_s28 = sshll.u32 %s3034_s13, 6 }
  0x62   : > { %2114 = vmatprep.subr.bf16.mxu1 %v463_v7  ;;  %v420_v24 = vld [vmem:[%s2530_s29 + $0x48] sm:$0xff]  ;;  %v450_v25 = vpack.c.bf16 %v418_v22, %v417_v21  ;;  %v421_v27 = vld [vmem:[%s2530_s29 + $0x50] sm:$0xff]  ;;  %v422_v28 = vld [vmem:[%s2530_s29 + $0x58] sm:$0xff]  ;;  %779 = vst.msk [vmem:[#allocation2 + $0x8] sm:$0xff] %vm472_vm0, %v2347_v54  ;;  %s2973_s17 = scalar_lea.vmem %s3013_s9, %s2003_s28 }
  0x63   : > { %2073 = vmatprep.mubr.msk.bf16.mxu1 %vm472_vm0, %v461_v17  ;;  %v451_v26 = vpack.c.bf16 %v420_v24, %v419_v23  ;;  %v423_v29 = vld [vmem:[%s2530_s29 + $0x60] sm:$0xff]  ;;  %v424_v30 = vld [vmem:[%s2530_s29 + $0x68] sm:$0xff]  ;;  %v452_v31 = vpack.c.bf16 %v422_v28, %v421_v27  ;;  %v425_v33 = vld [vmem:[%s2530_s29 + $0x70] sm:$0xff]  ;;  %782 = vst.msk [vmem:[#allocation2 + $0x18] sm:$0xff] %vm472_vm0, %v2347_v54 }
  0x64   : > { %2044 = vmatpush3.bf16.msra.mxu0 %v463_v7  ;;  %2116 = vmatpush3.bf16.msra.mxu1 %v463_v7  ;;  %v453_v32 = vpack.c.bf16 %v424_v30, %v423_v29  ;;  %v426_v34 = vld [vmem:[%s2530_s29 + $0x78] sm:$0xff]  ;;  %v427_v35 = vld [vmem:[%s2530_s29 + $0x80] sm:$0xff]  ;;  %v428_v36 = vld [vmem:[%s2530_s29 + $0x88] sm:$0xff]  ;;  %783 = vst.msk [vmem:[#allocation2 + $0x20] sm:$0xff] %vm472_vm0, %v2347_v54 }
  0x65   : > { %v454_v37 = vpack.c.bf16 %v426_v34, %v425_v33  ;;  %v455_v38 = vpack.c.bf16 %v428_v36, %v427_v35  ;;  %v429_v39 = vld [vmem:[%s2530_s29 + $0x90] sm:$0xff]  ;;  %v430_v40 = vld [vmem:[%s2530_s29 + $0x98] sm:$0xff]  ;;  %v431_v41 = vld [vmem:[%s2530_s29 + $0xa0] sm:$0xff]  ;;  %788 = vst.msk [vmem:[#allocation2 + $0x48] sm:$0xff] %vm472_vm0, %v2347_v54 }
  0x66   : > { %v432_v42 = vld [vmem:[%s2530_s29 + $0xa8] sm:$0xff]  ;;  %v456_v43 = vpack.c.bf16 %v430_v40, %v429_v39  ;;  %v433_v45 = vld [vmem:[%s2530_s29 + $0xb0] sm:$0xff]  ;;  %v434_v46 = vld [vmem:[%s2530_s29 + $0xb8] sm:$0xff]  ;;  %789 = vst.msk [vmem:[#allocation2 + $0x50] sm:$0xff] %vm472_vm0, %v2347_v54 }
  0x67   : > { %2046 = vmatmul.mubr.msk.bf16.vlgmr.msra.gmra.mxu0 %vm472_vm0, %v448_v13  ;;  %2074 = vmatmul.mubr.msk.bf16.vlgmr.msra.gmra.mxu1 %vm472_vm0, %v462_v20  ;;  %v457_v44 = vpack.c.bf16 %v432_v42, %v431_v41  ;;  %v435_v47 = vld [vmem:[%s2530_s29 + $0xc0] sm:$0xff]  ;;  %v436_v48 = vld [vmem:[%s2530_s29 + $0xc8] sm:$0xff]  ;;  %v458_v49 = vpack.c.bf16 %v434_v46, %v433_v45  ;;  %v437_v51 = vld [vmem:[%s2530_s29 + $0xd0] sm:$0xff]  ;;  %791 = vst.msk [vmem:[#allocation2 + $0x60] sm:$0xff] %vm472_vm0, %v2347_v54 }
  0x68   : > { %2049 = vmatprep.mubr.msk.bf16.mxu0 %vm472_vm0, %v449_v14  ;;  %v459_v50 = vpack.c.bf16 %v436_v48, %v435_v47  ;;  %v438_v52 = vld [vmem:[%s2530_s29 + $0xd8] sm:$0xff]  ;;  %792 = vst.msk [vmem:[#allocation2 + $0x68] sm:$0xff] %vm472_vm0, %v2347_v54  ;;  %794 = vst.msk [vmem:[#allocation2 + $0x78] sm:$0xff] %vm472_vm0, %v2347_v54  ;;  %v1395_v56 = vld [vmem:[#allocation9 + $0x10] sm:$0xff]  ;;  %s2943_s29 = scalar_lea.vmem %s3012_s8, %s2003_s28 }
  0x69   : > { %v460_v53 = vpack.c.bf16 %v438_v52, %v437_v51  ;;  %795 = vst.msk [vmem:[#allocation2 + $0x80] sm:$0xff] %vm472_vm0, %v2347_v54  ;;  %797 = vst.msk [vmem:[#allocation2 + $0x90] sm:$0xff] %vm472_vm0, %v2347_v54  ;;  %v1396_v57 = vld [vmem:[#allocation9 + $0x18] sm:$0xff]  ;;  %v1393_v59 = vld [vmem:[#allocation9] sm:$0xff] }
  0x6a   : > { %798 = vst.msk [vmem:[#allocation2 + $0x98] sm:$0xff] %vm472_vm0, %v2347_v54  ;;  %800 = vst.msk [vmem:[#allocation2 + $0xa8] sm:$0xff] %vm472_vm0, %v2347_v54  ;;  %v1402_v58 = vpack.c.bf16 %v1396_v57, %v1395_v56  ;;  %v1394_v60 = vld [vmem:[#allocation9 + $0x8] sm:$0xff]  ;;  %v1385_v62 = vld [vmem:[#allocation8 + $0x10] sm:$0xff] }
  0x6b   : > { %801 = vst.msk [vmem:[#allocation2 + $0xb0] sm:$0xff] %vm472_vm0, %v2347_v54  ;;  %803 = vst.msk [vmem:[#allocation2 + $0xc0] sm:$0xff] %vm472_vm0, %v2347_v54  ;;  %v1401_v61 = vpack.c.bf16 %v1394_v60, %v1393_v59  ;;  %v1386_v63 = vld [vmem:[#allocation8 + $0x18] sm:$0xff]  ;;  %v2802_v1 = vld [vmem:[%s3006_s2] ss:$0 sm:$0xff] }
  0x6c   : > { %804 = vst.msk [vmem:[#allocation2 + $0xc8] sm:$0xff] %vm472_vm0, %v2347_v54  ;;  %806 = vst.msk [vmem:[#allocation2 + $0xd8] sm:$0xff] %vm472_vm0, %v2347_v54  ;;  %2077 = vmatprep.subr.bf16.mxu1 %v1402_v58  ;;  %v2796_v0 = vpack.c.bf16 %v1386_v63, %v1385_v62 }
  0x6d   : > { %807 = vst.msk [vmem:[#allocation2 + $0xe0] sm:$0xff] %vm472_vm0, %v2347_v54  ;;  %809 = vst.msk [vmem:[#allocation2 + $0xf0] sm:$0xff] %vm472_vm0, %v2347_v54  ;;  %2078 = vmatpush3.bf16.msra.mxu1 %v1402_v58 }
  0x6e   : > { %810 = vst.msk [vmem:[#allocation2 + $0xf8] sm:$0xff] %vm472_vm0, %v2347_v54  ;;  %812 = vst.msk [vmem:[#allocation2 + $0x108] sm:$0xff] %vm472_vm0, %v2347_v54  ;;  %2079 = vmatprep.subr.bf16.mxu1 %v1401_v61 }
  0x6f   : > { %2050 = vmatmul.mubr.msk.bf16.gmra.mxu0 %vm472_vm0, %v450_v25  ;;  %813 = vst.msk [vmem:[#allocation2 + $0x110] sm:$0xff] %vm472_vm0, %v2347_v54  ;;  %815 = vst.msk [vmem:[#allocation2 + $0x120] sm:$0xff] %vm472_vm0, %v2347_v54 }
  0x70   : > { %2053 = vmatprep.mubr.msk.bf16.mxu0 %vm472_vm0, %v451_v26  ;;  %816 = vst.msk [vmem:[#allocation2 + $0x128] sm:$0xff] %vm472_vm0, %v2347_v54  ;;  %818 = vst.msk [vmem:[#allocation2 + $0x138] sm:$0xff] %vm472_vm0, %v2347_v54 }
  0x71   : > { %819 = vst.msk [vmem:[#allocation2 + $0x140] sm:$0xff] %vm472_vm0, %v2347_v54  ;;  %821 = vst.msk [vmem:[#allocation2 + $0x150] sm:$0xff] %vm472_vm0, %v2347_v54  ;;  %2080 = vmatpush3.bf16.msra.mxu1 %v1401_v61 }
  0x72   : > { %822 = vst.msk [vmem:[#allocation2 + $0x158] sm:$0xff] %vm472_vm0, %v2347_v54  ;;  %824 = vst.msk [vmem:[#allocation2 + $0x168] sm:$0xff] %vm472_vm0, %v2347_v54  ;;  %2089 = vmatprep.subr.bf16.mxu1 %v2796_v0 }
  0x73   : > { %825 = vst.msk [vmem:[#allocation2 + $0x170] sm:$0xff] %vm472_vm0, %v2347_v54  ;;  %827 = vst.msk [vmem:[#allocation2 + $0x180] sm:$0xff] %vm472_vm0, %v2347_v54 }
  0x74   : > { %828 = vst.msk [vmem:[#allocation2 + $0x188] sm:$0xff] %vm472_vm0, %v2347_v54  ;;  %830 = vst.msk [vmem:[#allocation3] sm:$0xff] %vm472_vm0, %v2348_v55 }
  0x75   : > { %831 = vst.msk [vmem:[#allocation3 + $0x8] sm:$0xff] %vm472_vm0, %v2348_v55  ;;  %833 = vst.msk [vmem:[#allocation3 + $0x18] sm:$0xff] %vm472_vm0, %v2348_v55 }
  0x76   : > { %834 = vst.msk [vmem:[#allocation3 + $0x20] sm:$0xff] %vm472_vm0, %v2348_v55  ;;  %839 = vst.msk [vmem:[#allocation3 + $0x48] sm:$0xff] %vm472_vm0, %v2348_v55 }
  0x77   : > { %2054 = vmatmul.mubr.msk.bf16.gmra.mxu0 %vm472_vm0, %v452_v31  ;;  %840 = vst.msk [vmem:[#allocation3 + $0x50] sm:$0xff] %vm472_vm0, %v2348_v55  ;;  %842 = vst.msk [vmem:[#allocation3 + $0x60] sm:$0xff] %vm472_vm0, %v2348_v55 }
  0x78   : > { %2057 = vmatprep.mubr.msk.bf16.mxu0 %vm472_vm0, %v453_v32  ;;  %843 = vst.msk [vmem:[#allocation3 + $0x68] sm:$0xff] %vm472_vm0, %v2348_v55  ;;  %845 = vst.msk [vmem:[#allocation3 + $0x78] sm:$0xff] %vm472_vm0, %v2348_v55 }
  0x79   : > { %846 = vst.msk [vmem:[#allocation3 + $0x80] sm:$0xff] %vm472_vm0, %v2348_v55  ;;  %848 = vst.msk [vmem:[#allocation3 + $0x90] sm:$0xff] %vm472_vm0, %v2348_v55 }
  0x7a   : > { %849 = vst.msk [vmem:[#allocation3 + $0x98] sm:$0xff] %vm472_vm0, %v2348_v55  ;;  %851 = vst.msk [vmem:[#allocation3 + $0xa8] sm:$0xff] %vm472_vm0, %v2348_v55 }
  0x7b   : > { %852 = vst.msk [vmem:[#allocation3 + $0xb0] sm:$0xff] %vm472_vm0, %v2348_v55  ;;  %854 = vst.msk [vmem:[#allocation3 + $0xc0] sm:$0xff] %vm472_vm0, %v2348_v55 }
  0x7c   : > { %855 = vst.msk [vmem:[#allocation3 + $0xc8] sm:$0xff] %vm472_vm0, %v2348_v55  ;;  %857 = vst.msk [vmem:[#allocation3 + $0xd8] sm:$0xff] %vm472_vm0, %v2348_v55  ;;  %v970_v24 = vld [vmem:[#allocation3] ss:$2 sm:$0xff]  ;;  %v1018_v30 = vld [vmem:[#allocation3 + $0x1] ss:$2 sm:$0xff] }
  0x7d   : > { %858 = vst.msk [vmem:[#allocation3 + $0xe0] sm:$0xff] %vm472_vm0, %v2348_v55  ;;  %860 = vst.msk [vmem:[#allocation3 + $0xf0] sm:$0xff] %vm472_vm0, %v2348_v55  ;;  %v1033_v39 = vadd.f32 %v1018_v30, %v970_v24 }
  0x7e   : > { %861 = vst.msk [vmem:[#allocation3 + $0xf8] sm:$0xff] %vm472_vm0, %v2348_v55  ;;  %863 = vst.msk [vmem:[#allocation3 + $0x108] sm:$0xff] %vm472_vm0, %v2348_v55 }
  0x7f   : > { %2058 = vmatmul.mubr.msk.bf16.gmra.mxu0 %vm472_vm0, %v454_v37  ;;  %864 = vst.msk [vmem:[#allocation3 + $0x110] sm:$0xff] %vm472_vm0, %v2348_v55  ;;  %866 = vst.msk [vmem:[#allocation3 + $0x120] sm:$0xff] %vm472_vm0, %v2348_v55 }
  0x80   : > { %2061 = vmatprep.mubr.msk.bf16.mxu0 %vm472_vm0, %v455_v38  ;;  %867 = vst.msk [vmem:[#allocation3 + $0x128] sm:$0xff] %vm472_vm0, %v2348_v55  ;;  %869 = vst.msk [vmem:[#allocation3 + $0x138] sm:$0xff] %vm472_vm0, %v2348_v55 }
  0x81   : > { %870 = vst.msk [vmem:[#allocation3 + $0x140] sm:$0xff] %vm472_vm0, %v2348_v55  ;;  %872 = vst.msk [vmem:[#allocation3 + $0x150] sm:$0xff] %vm472_vm0, %v2348_v55 }
  0x82   : > { %873 = vst.msk [vmem:[#allocation3 + $0x158] sm:$0xff] %vm472_vm0, %v2348_v55  ;;  %875 = vst.msk [vmem:[#allocation3 + $0x168] sm:$0xff] %vm472_vm0, %v2348_v55 }
  0x83   : > { %876 = vst.msk [vmem:[#allocation3 + $0x170] sm:$0xff] %vm472_vm0, %v2348_v55  ;;  %878 = vst.msk [vmem:[#allocation3 + $0x180] sm:$0xff] %vm472_vm0, %v2348_v55 }
  0x84   : > { %879 = vst.msk [vmem:[#allocation3 + $0x188] sm:$0xff] %vm472_vm0, %v2348_v55 }
  0x85   : > { %787 = vst.msk [vmem:[#allocation2 + $0x40] sm:$0x1] %vm780_vm1, %v2347_v54  ;;  %838 = vst.msk [vmem:[#allocation3 + $0x40] sm:$0x1] %vm780_vm1, %v2348_v55 }
  0x86   : > { %781 = vst.msk [vmem:[#allocation2 + $0x10] sm:$0x1] %vm780_vm1, %v2347_v54  ;;  %784 = vst.msk [vmem:[#allocation2 + $0x28] sm:$0x1] %vm780_vm1, %v2347_v54 }
  0x87   : > { %2062 = vmatmul.mubr.msk.bf16.gmra.mxu0 %vm472_vm0, %v456_v43  ;;  %790 = vst.msk [vmem:[#allocation2 + $0x58] sm:$0x1] %vm780_vm1, %v2347_v54  ;;  %793 = vst.msk [vmem:[#allocation2 + $0x70] sm:$0x1] %vm780_vm1, %v2347_v54 }
  0x88   : > { %2065 = vmatprep.mubr.msk.bf16.mxu0 %vm472_vm0, %v457_v44  ;;  %796 = vst.msk [vmem:[#allocation2 + $0x88] sm:$0x1] %vm780_vm1, %v2347_v54  ;;  %799 = vst.msk [vmem:[#allocation2 + $0xa0] sm:$0x1] %vm780_vm1, %v2347_v54 }
  0x89   : > { %802 = vst.msk [vmem:[#allocation2 + $0xb8] sm:$0x1] %vm780_vm1, %v2347_v54  ;;  %805 = vst.msk [vmem:[#allocation2 + $0xd0] sm:$0x1] %vm780_vm1, %v2347_v54 }
  0x8a   : > { %808 = vst.msk [vmem:[#allocation2 + $0xe8] sm:$0x1] %vm780_vm1, %v2347_v54  ;;  %811 = vst.msk [vmem:[#allocation2 + $0x100] sm:$0x1] %vm780_vm1, %v2347_v54 }
  0x8b   : > { %814 = vst.msk [vmem:[#allocation2 + $0x118] sm:$0x1] %vm780_vm1, %v2347_v54  ;;  %817 = vst.msk [vmem:[#allocation2 + $0x130] sm:$0x1] %vm780_vm1, %v2347_v54 }
  0x8c   : > { %820 = vst.msk [vmem:[#allocation2 + $0x148] sm:$0x1] %vm780_vm1, %v2347_v54  ;;  %823 = vst.msk [vmem:[#allocation2 + $0x160] sm:$0x1] %vm780_vm1, %v2347_v54 }
  0x8d   : > { %826 = vst.msk [vmem:[#allocation2 + $0x178] sm:$0x1] %vm780_vm1, %v2347_v54  ;;  %829 = vst.msk [vmem:[#allocation2 + $0x190] sm:$0x1] %vm780_vm1, %v2347_v54 }
  0x8e   : > { %832 = vst.msk [vmem:[#allocation3 + $0x10] sm:$0x1] %vm780_vm1, %v2348_v55  ;;  %835 = vst.msk [vmem:[#allocation3 + $0x28] sm:$0x1] %vm780_vm1, %v2348_v55 }
  0x8f   : > { %2066 = vmatmul.mubr.msk.bf16.gmra.mxu0 %vm472_vm0, %v458_v49  ;;  %841 = vst.msk [vmem:[#allocation3 + $0x58] sm:$0x1] %vm780_vm1, %v2348_v55  ;;  %844 = vst.msk [vmem:[#allocation3 + $0x70] sm:$0x1] %vm780_vm1, %v2348_v55 }
  0x90   : > { %2069 = vmatprep.mubr.msk.bf16.mxu0 %vm472_vm0, %v459_v50  ;;  %847 = vst.msk [vmem:[#allocation3 + $0x88] sm:$0x1] %vm780_vm1, %v2348_v55  ;;  %850 = vst.msk [vmem:[#allocation3 + $0xa0] sm:$0x1] %vm780_vm1, %v2348_v55 }
  0x91   : > { %853 = vst.msk [vmem:[#allocation3 + $0xb8] sm:$0x1] %vm780_vm1, %v2348_v55  ;;  %856 = vst.msk [vmem:[#allocation3 + $0xd0] sm:$0x1] %vm780_vm1, %v2348_v55 }
  0x92   : > { %859 = vst.msk [vmem:[#allocation3 + $0xe8] sm:$0x1] %vm780_vm1, %v2348_v55  ;;  %862 = vst.msk [vmem:[#allocation3 + $0x100] sm:$0x1] %vm780_vm1, %v2348_v55 }
  0x93   : > { %865 = vst.msk [vmem:[#allocation3 + $0x118] sm:$0x1] %vm780_vm1, %v2348_v55  ;;  %868 = vst.msk [vmem:[#allocation3 + $0x130] sm:$0x1] %vm780_vm1, %v2348_v55 }
  0x94   : > { %871 = vst.msk [vmem:[#allocation3 + $0x148] sm:$0x1] %vm780_vm1, %v2348_v55  ;;  %874 = vst.msk [vmem:[#allocation3 + $0x160] sm:$0x1] %vm780_vm1, %v2348_v55 }
  0x95   : > { %877 = vst.msk [vmem:[#allocation3 + $0x178] sm:$0x1] %vm780_vm1, %v2348_v55  ;;  %880 = vst.msk [vmem:[#allocation3 + $0x190] sm:$0x1] %vm780_vm1, %v2348_v55  ;;  %v1066_v45 = vld [vmem:[#allocation3 + $0x2] ss:$2 sm:$0xff] }
  0x96   : > { %v1081_v52 = vadd.f32 %v1066_v45, %v1033_v39 }
  0x97   : > { %2070 = vmatmul.mubr.msk.bf16.gmra.mxu0 %vm472_vm0, %v460_v53 }
 0x127   : > { %v2047_v2 = vpop.f32.mrf.mxu0  ;;  %v2075_v5 = vpop.f32.mrf.mxu1 }
 0x128   : > { %v564_v3 = vadd.f32 %v2047_v2, %v2802_v1  ;;  %v676_v8 = vadd.f32 %v2075_v5, %v2802_v1 }
 0x129   : > { %v555_v4 = vpop.f32.mrf.mxu0  ;;  %v667_v10 = vpop.f32.mrf.mxu1 }
 0x12a   : > { %vm684_vm2 = vcmp.ge.f32.partialorder %v564_v3, 0.0  ;;  %v716_v6 = vmul.f32 0.1, %v564_v3  ;;  %v556_v7 = vadd.f32 %v2802_v1, %v555_v4  ;;  %vm712_vm4 = vcmp.ge.f32.partialorder %v676_v8, 0.0 }
 0x12b   : > { %v2048_v9 = vpop.f32.mrf.mxu0  ;;  %v744_v15 = vmul.f32 0.1, %v676_v8  ;;  %v668_v16 = vadd.f32 %v2802_v1, %v667_v10  ;;  %v2076_v17 = vpop.f32.mrf.mxu1 }
 0x12c   : > { %v748_v11 = vsel %vm684_vm2, %v564_v3, %v716_v6  ;;  %vm682_vm3 = vcmp.ge.f32.partialorder %v556_v7, 0.0  ;;  %v714_v12 = vmul.f32 0.1, %v556_v7  ;;  %v567_v13 = vadd.f32 %v2048_v9, %v2802_v1 }
 0x12d   : > { %884 = vst.msk [vmem:[#allocation2 + $0x31] sm:$0xff] %vm472_vm0, %v748_v11  ;;  %917 = vst.msk [vmem:[#allocation3 + $0x31] sm:$0xff] %vm472_vm0, %v748_v11  ;;  %v558_v14 = vpop.f32.mrf.mxu0  ;;  %v776_v22 = vsel %vm712_vm4, %v676_v8, %v744_v15  ;;  %vm710_vm6 = vcmp.ge.f32.partialorder %v668_v16, 0.0  ;;  %v742_v23 = vmul.f32 0.1, %v668_v16  ;;  %v679_v25 = vadd.f32 %v2076_v17, %v2802_v1  ;;  %v670_v26 = vpop.f32.mrf.mxu1 }
 0x12e   : > { %v746_v18 = vsel %vm682_vm3, %v556_v7, %v714_v12  ;;  %vm685_vm5 = vcmp.ge.f32.partialorder %v567_v13, 0.0  ;;  %v717_v19 = vmul.f32 0.1, %v567_v13  ;;  %v559_v20 = vadd.f32 %v2802_v1, %v558_v14  ;;  %912 = vst.msk [vmem:[#allocation2 + $0x181] sm:$0xff] %vm472_vm0, %v776_v22  ;;  %945 = vst.msk [vmem:[#allocation3 + $0x181] sm:$0xff] %vm472_vm0, %v776_v22 }
 0x12f   : > { %882 = vst.msk [vmem:[#allocation2 + $0x19] sm:$0xff] %vm472_vm0, %v746_v18  ;;  %915 = vst.msk [vmem:[#allocation3 + $0x19] sm:$0xff] %vm472_vm0, %v746_v18  ;;  %v2051_v21 = vpop.f32.mrf.mxu0  ;;  %v774_v32 = vsel %vm710_vm6, %v668_v16, %v742_v23  ;;  %vm713_vm8 = vcmp.ge.f32.partialorder %v679_v25, 0.0  ;;  %v745_v33 = vmul.f32 0.1, %v679_v25  ;;  %v671_v34 = vadd.f32 %v2802_v1, %v670_v26 }
 0x130   : > { %v749_v27 = vsel %vm685_vm5, %v567_v13, %v717_v19  ;;  %vm683_vm7 = vcmp.ge.f32.partialorder %v559_v20, 0.0  ;;  %v715_v28 = vmul.f32 0.1, %v559_v20  ;;  %v580_v29 = vadd.f32 %v2051_v21, %v2802_v1  ;;  %910 = vst.msk [vmem:[#allocation2 + $0x169] sm:$0xff] %vm472_vm0, %v774_v32  ;;  %943 = vst.msk [vmem:[#allocation3 + $0x169] sm:$0xff] %vm472_vm0, %v774_v32 }
 0x131   : > { %885 = vst.msk [vmem:[#allocation2 + $0x39] sm:$0xff] %vm472_vm0, %v749_v27  ;;  %918 = vst.msk [vmem:[#allocation3 + $0x39] sm:$0xff] %vm472_vm0, %v749_v27  ;;  %v571_v31 = vpop.f32.mrf.mxu0  ;;  %v777_v40 = vsel %vm713_vm8, %v679_v25, %v745_v33  ;;  %vm711_vm10 = vcmp.ge.f32.partialorder %v671_v34, 0.0  ;;  %v743_v41 = vmul.f32 0.1, %v671_v34 }
 0x132   : > { %v747_v35 = vsel %vm683_vm7, %v559_v20, %v715_v28  ;;  %vm688_vm9 = vcmp.ge.f32.partialorder %v580_v29, 0.0  ;;  %v720_v36 = vmul.f32 0.1, %v580_v29  ;;  %v572_v37 = vadd.f32 %v2802_v1, %v571_v31  ;;  %913 = vst.msk [vmem:[#allocation2 + $0x189] sm:$0xff] %vm472_vm0, %v777_v40  ;;  %946 = vst.msk [vmem:[#allocation3 + $0x189] sm:$0xff] %vm472_vm0, %v777_v40 }
 0x133   : > { %883 = vst.msk [vmem:[#allocation2 + $0x21] sm:$0xff] %vm472_vm0, %v747_v35  ;;  %916 = vst.msk [vmem:[#allocation3 + $0x21] sm:$0xff] %vm472_vm0, %v747_v35  ;;  %v2052_v38 = vpop.f32.mrf.mxu0  ;;  %v775_v47 = vsel %vm711_vm10, %v671_v34, %v743_v41 }
 0x134   : > { %v752_v42 = vsel %vm688_vm9, %v580_v29, %v720_v36  ;;  %vm686_vm11 = vcmp.ge.f32.partialorder %v572_v37, 0.0  ;;  %v718_v43 = vmul.f32 0.1, %v572_v37  ;;  %v583_v44 = vadd.f32 %v2052_v38, %v2802_v1  ;;  %911 = vst.msk [vmem:[#allocation2 + $0x171] sm:$0xff] %vm472_vm0, %v775_v47  ;;  %944 = vst.msk [vmem:[#allocation3 + $0x171] sm:$0xff] %vm472_vm0, %v775_v47 }
 0x135   : > { %888 = vst.msk [vmem:[#allocation2 + $0x61] sm:$0xff] %vm472_vm0, %v752_v42  ;;  %921 = vst.msk [vmem:[#allocation3 + $0x61] sm:$0xff] %vm472_vm0, %v752_v42  ;;  %v574_v46 = vpop.f32.mrf.mxu0 }
 0x136   : > { %v750_v48 = vsel %vm686_vm11, %v572_v37, %v718_v43  ;;  %vm689_vm12 = vcmp.ge.f32.partialorder %v583_v44, 0.0  ;;  %v721_v49 = vmul.f32 0.1, %v583_v44  ;;  %v575_v50 = vadd.f32 %v2802_v1, %v574_v46 }
 0x137   : > { %886 = vst.msk [vmem:[#allocation2 + $0x49] sm:$0xff] %vm472_vm0, %v750_v48  ;;  %919 = vst.msk [vmem:[#allocation3 + $0x49] sm:$0xff] %vm472_vm0, %v750_v48  ;;  %v2055_v51 = vpop.f32.mrf.mxu0 }
 0x138   : > { %v753_v53 = vsel %vm689_vm12, %v583_v44, %v721_v49  ;;  %vm687_vm13 = vcmp.ge.f32.partialorder %v575_v50, 0.0  ;;  %v719_v54 = vmul.f32 0.1, %v575_v50  ;;  %v596_v55 = vadd.f32 %v2055_v51, %v2802_v1  ;;  %v972_v57 = vld [vmem:[#allocation3 + $0x30] ss:$2 sm:$0xff] }
 0x139   : > { %889 = vst.msk [vmem:[#allocation2 + $0x69] sm:$0xff] %vm472_vm0, %v753_v53  ;;  %922 = vst.msk [vmem:[#allocation3 + $0x69] sm:$0xff] %vm472_vm0, %v753_v53  ;;  %v587_v56 = vpop.f32.mrf.mxu0  ;;  %v1020_v58 = vld [vmem:[#allocation3 + $0x31] ss:$2 sm:$0xff]  ;;  %v1068_v19 = vld [vmem:[#allocation3 + $0x32] ss:$2 sm:$0xff] }
 0x13a   : > { %v751_v59 = vsel %vm687_vm13, %v575_v50, %v719_v54  ;;  %vm692_vm14 = vcmp.ge.f32.partialorder %v596_v55, 0.0  ;;  %v724_v60 = vmul.f32 0.1, %v596_v55  ;;  %v588_v61 = vadd.f32 %v2802_v1, %v587_v56  ;;  %v1112_v62 = vld [vmem:[#allocation3 + $0x18] ss:$2 sm:$0xff] }
 0x13b   : > { %887 = vst.msk [vmem:[#allocation2 + $0x51] sm:$0xff] %vm472_vm0, %v751_v59  ;;  %920 = vst.msk [vmem:[#allocation3 + $0x51] sm:$0xff] %vm472_vm0, %v751_v59  ;;  %v2056_v63 = vpop.f32.mrf.mxu0  ;;  %v1127_v2 = vadd.f32 %v1112_v62, %v1081_v52  ;;  %v1160_v6 = vld [vmem:[#allocation3 + $0x19] ss:$2 sm:$0xff]  ;;  %v1034_v8 = vadd.f32 %v1020_v58, %v972_v57  ;;  %v1208_v13 = vld [vmem:[#allocation3 + $0x1a] ss:$2 sm:$0xff] }
 0x13c   : > { %v756_v3 = vsel %vm692_vm14, %v596_v55, %v724_v60  ;;  %vm690_vm15 = vcmp.ge.f32.partialorder %v588_v61, 0.0  ;;  %v722_v4 = vmul.f32 0.1, %v588_v61  ;;  %v599_v5 = vadd.f32 %v2056_v63, %v2802_v1  ;;  %v1256_v22 = vld [vmem:[#allocation3 + $0x30] ss:$2 sm:$0xff] }
 0x13d   : > { %892 = vst.msk [vmem:[#allocation2 + $0x91] sm:$0xff] %vm472_vm0, %v756_v3  ;;  %925 = vst.msk [vmem:[#allocation3 + $0x91] sm:$0xff] %vm472_vm0, %v756_v3  ;;  %v590_v7 = vpop.f32.mrf.mxu0  ;;  %v1175_v9 = vadd.f32 %v1160_v6, %v1127_v2  ;;  %v1082_v21 = vadd.f32 %v1068_v19, %v1034_v8  ;;  %v1304_v38 = vld [vmem:[#allocation3 + $0x31] ss:$2 sm:$0xff]  ;;  %v1352_v51 = vld [vmem:[#allocation3 + $0x32] ss:$2 sm:$0xff] }
 0x13e   : > { %v754_v10 = vsel %vm690_vm15, %v588_v61, %v722_v4  ;;  %vm693_vm1 = vcmp.ge.f32.partialorder %v599_v5, 0.0  ;;  %v725_v11 = vmul.f32 0.1, %v599_v5  ;;  %v591_v12 = vadd.f32 %v2802_v1, %v590_v7 }
 0x13f   : > { %890 = vst.msk [vmem:[#allocation2 + $0x79] sm:$0xff] %vm472_vm0, %v754_v10  ;;  %923 = vst.msk [vmem:[#allocation3 + $0x79] sm:$0xff] %vm472_vm0, %v754_v10  ;;  %v2059_v14 = vpop.f32.mrf.mxu0  ;;  %v1223_v15 = vadd.f32 %v1208_v13, %v1175_v9 }
 0x140   : > { %v757_v16 = vsel %vm693_vm1, %v599_v5, %v725_v11  ;;  %vm691_vm2 = vcmp.ge.f32.partialorder %v591_v12, 0.0  ;;  %v723_v17 = vmul.f32 0.1, %v591_v12  ;;  %v612_v18 = vadd.f32 %v2059_v14, %v2802_v1  ;;  %v974_v23 = vld [vmem:[#allocation3 + $0x60] ss:$2 sm:$0xff] }
 0x141   : > { %893 = vst.msk [vmem:[#allocation2 + $0x99] sm:$0xff] %vm472_vm0, %v757_v16  ;;  %926 = vst.msk [vmem:[#allocation3 + $0x99] sm:$0xff] %vm472_vm0, %v757_v16  ;;  %v603_v20 = vpop.f32.mrf.mxu0  ;;  %v1271_v30 = vadd.f32 %v1256_v22, %v1223_v15  ;;  %v1022_v31 = vld [vmem:[#allocation3 + $0x61] ss:$2 sm:$0xff]  ;;  %v1258_v46 = vld [vmem:[#allocation3 + $0x60] ss:$2 sm:$0xff] }
 0x142   : > { %v755_v24 = vsel %vm691_vm2, %v591_v12, %v723_v17  ;;  %vm696_vm3 = vcmp.ge.f32.partialorder %v612_v18, 0.0  ;;  %v728_v25 = vmul.f32 0.1, %v612_v18  ;;  %v604_v26 = vadd.f32 %v2802_v1, %v603_v20  ;;  %v1114_v27 = vld [vmem:[#allocation3 + $0x48] ss:$2 sm:$0xff] }
 0x143   : > { %891 = vst.msk [vmem:[#allocation2 + $0x81] sm:$0xff] %vm472_vm0, %v755_v24  ;;  %924 = vst.msk [vmem:[#allocation3 + $0x81] sm:$0xff] %vm472_vm0, %v755_v24  ;;  %v2060_v28 = vpop.f32.mrf.mxu0  ;;  %v1128_v29 = vadd.f32 %v1114_v27, %v1082_v21  ;;  %v1162_v35 = vld [vmem:[#allocation3 + $0x49] ss:$2 sm:$0xff]  ;;  %v1035_v39 = vadd.f32 %v1022_v31, %v974_v23  ;;  %v1210_v43 = vld [vmem:[#allocation3 + $0x4a] ss:$2 sm:$0xff]  ;;  %v1319_v47 = vadd.f32 %v1304_v38, %v1271_v30 }
 0x144   : > { %v760_v32 = vsel %vm696_vm3, %v612_v18, %v728_v25  ;;  %vm694_vm4 = vcmp.ge.f32.partialorder %v604_v26, 0.0  ;;  %v726_v33 = vmul.f32 0.1, %v604_v26  ;;  %v615_v34 = vadd.f32 %v2060_v28, %v2802_v1  ;;  %v1070_v52 = vld [vmem:[#allocation3 + $0x62] ss:$2 sm:$0xff] }
 0x145   : > { %896 = vst.msk [vmem:[#allocation2 + $0xc1] sm:$0xff] %vm472_vm0, %v760_v32  ;;  %929 = vst.msk [vmem:[#allocation3 + $0xc1] sm:$0xff] %vm472_vm0, %v760_v32  ;;  %v606_v36 = vpop.f32.mrf.mxu0  ;;  %v1176_v37 = vadd.f32 %v1162_v35, %v1128_v29  ;;  %v1306_v55 = vld [vmem:[#allocation3 + $0x61] ss:$2 sm:$0xff]  ;;  %v1083_v58 = vadd.f32 %v1070_v52, %v1035_v39  ;;  %v1354_v3 = vld [vmem:[#allocation3 + $0x62] ss:$2 sm:$0xff]  ;;  %v1367_v4 = vadd.f32 %v1352_v51, %v1319_v47 }
 0x146   : > { %v758_v40 = vsel %vm694_vm4, %v604_v26, %v726_v33  ;;  %vm697_vm5 = vcmp.ge.f32.partialorder %v615_v34, 0.0  ;;  %v729_v41 = vmul.f32 0.1, %v615_v34  ;;  %v607_v42 = vadd.f32 %v2802_v1, %v606_v36  ;;  %v2875_v32 = vld [vmem:[#allocation2] ss:$2 sm:$0xff] }
 0x147   : > { %894 = vst.msk [vmem:[#allocation2 + $0xa9] sm:$0xff] %vm472_vm0, %v758_v40  ;;  %927 = vst.msk [vmem:[#allocation3 + $0xa9] sm:$0xff] %vm472_vm0, %v758_v40  ;;  %v2063_v44 = vpop.f32.mrf.mxu0  ;;  %v1224_v45 = vadd.f32 %v1210_v43, %v1176_v37  ;;  %v1375_v19 = vmul.f32 0.11111111, %v1367_v4 }
 0x148   : > { %v761_v48 = vsel %vm697_vm5, %v615_v34, %v729_v41  ;;  %vm695_vm6 = vcmp.ge.f32.partialorder %v607_v42, 0.0  ;;  %v727_v49 = vmul.f32 0.1, %v607_v42  ;;  %v628_v50 = vadd.f32 %v2063_v44, %v2802_v1  ;;  %v976_v56 = vld [vmem:[#allocation3 + $0x90] ss:$2 sm:$0xff] }
 0x149   : > { %897 = vst.msk [vmem:[#allocation2 + $0xc9] sm:$0xff] %vm472_vm0, %v761_v48  ;;  %930 = vst.msk [vmem:[#allocation3 + $0xc9] sm:$0xff] %vm472_vm0, %v761_v48  ;;  %v619_v53 = vpop.f32.mrf.mxu0  ;;  %v1272_v54 = vadd.f32 %v1258_v46, %v1224_v45  ;;  %v1024_v57 = vld [vmem:[#allocation3 + $0x91] ss:$2 sm:$0xff]  ;;  %v1072_v21 = vld [vmem:[#allocation3 + $0x92] ss:$2 sm:$0xff] }
 0x14a   : > { %v759_v59 = vsel %vm695_vm6, %v607_v42, %v727_v49  ;;  %vm700_vm7 = vcmp.ge.f32.partialorder %v628_v50, 0.0  ;;  %v732_v60 = vmul.f32 0.1, %v628_v50  ;;  %v620_v61 = vadd.f32 %v2802_v1, %v619_v53  ;;  %v1116_v62 = vld [vmem:[#allocation3 + $0x78] ss:$2 sm:$0xff] }
 0x14b   : > { %895 = vst.msk [vmem:[#allocation2 + $0xb1] sm:$0xff] %vm472_vm0, %v759_v59  ;;  %928 = vst.msk [vmem:[#allocation3 + $0xb1] sm:$0xff] %vm472_vm0, %v759_v59  ;;  %v2064_v63 = vpop.f32.mrf.mxu0  ;;  %v1320_v2 = vadd.f32 %v1306_v55, %v1272_v54  ;;  %v1129_v5 = vadd.f32 %v1116_v62, %v1083_v58  ;;  %v1164_v9 = vld [vmem:[#allocation3 + $0x79] ss:$2 sm:$0xff]  ;;  %v1036_v12 = vadd.f32 %v1024_v57, %v976_v56  ;;  %v1212_v17 = vld [vmem:[#allocation3 + $0x7a] ss:$2 sm:$0xff] }
 0x14c   : > { %v764_v6 = vsel %vm700_vm7, %v628_v50, %v732_v60  ;;  %vm698_vm8 = vcmp.ge.f32.partialorder %v620_v61, 0.0  ;;  %v730_v7 = vmul.f32 0.1, %v620_v61  ;;  %v631_v8 = vadd.f32 %v2064_v63, %v2802_v1  ;;  %v1260_v26 = vld [vmem:[#allocation3 + $0x90] ss:$2 sm:$0xff] }
 0x14d   : > { %900 = vst.msk [vmem:[#allocation2 + $0xf1] sm:$0xff] %vm472_vm0, %v764_v6  ;;  %933 = vst.msk [vmem:[#allocation3 + $0xf1] sm:$0xff] %vm472_vm0, %v764_v6  ;;  %v622_v10 = vpop.f32.mrf.mxu0  ;;  %v1368_v11 = vadd.f32 %v1354_v3, %v1320_v2  ;;  %v1177_v13 = vadd.f32 %v1164_v9, %v1129_v5  ;;  %v1084_v29 = vadd.f32 %v1072_v21, %v1036_v12  ;;  %v1308_v39 = vld [vmem:[#allocation3 + $0x91] ss:$2 sm:$0xff]  ;;  %v949_v41 = vld [vmem:[#allocation2 + $0x30] ss:$2 sm:$0xff] }
 0x14e   : > { %v762_v14 = vsel %vm698_vm8, %v620_v61, %v730_v7  ;;  %vm701_vm9 = vcmp.ge.f32.partialorder %v631_v8, 0.0  ;;  %v733_v15 = vmul.f32 0.1, %v631_v8  ;;  %v623_v16 = vadd.f32 %v2802_v1, %v622_v10  ;;  %v994_v55 = vld [vmem:[#allocation2 + $0x1] ss:$2 sm:$0xff] }
 0x14f   : > { %898 = vst.msk [vmem:[#allocation2 + $0xd9] sm:$0xff] %vm472_vm0, %v762_v14  ;;  %931 = vst.msk [vmem:[#allocation3 + $0xd9] sm:$0xff] %vm472_vm0, %v762_v14  ;;  %v2067_v18 = vpop.f32.mrf.mxu0  ;;  %v1376_v20 = vmul.f32 0.11111111, %v1368_v11  ;;  %v1225_v22 = vadd.f32 %v1212_v17, %v1177_v13  ;;  %v962_v50 = vmax.f32 %v2875_v32, -3.4028235e+38 }
 0x150   : > { %v765_v23 = vsel %vm701_vm9, %v631_v8, %v733_v15  ;;  %vm699_vm10 = vcmp.ge.f32.partialorder %v623_v16, 0.0  ;;  %v731_v24 = vmul.f32 0.1, %v623_v16  ;;  %v644_v25 = vadd.f32 %v2067_v18, %v2802_v1  ;;  %v978_v31 = vld [vmem:[#allocation3 + $0xc0] ss:$2 sm:$0xff] }
 0x151   : > { %901 = vst.msk [vmem:[#allocation2 + $0xf9] sm:$0xff] %vm472_vm0, %v765_v23  ;;  %934 = vst.msk [vmem:[#allocation3 + $0xf9] sm:$0xff] %vm472_vm0, %v765_v23  ;;  %v635_v27 = vpop.f32.mrf.mxu0  ;;  %v1397_v28 = vpack.c.bf16 %v1376_v20, %v1375_v19  ;;  %v1273_v30 = vadd.f32 %v1260_v26, %v1225_v22  ;;  %v1026_v40 = vld [vmem:[#allocation3 + $0xc1] ss:$2 sm:$0xff]  ;;  %v1262_v58 = vld [vmem:[#allocation3 + $0xc0] ss:$2 sm:$0xff]  ;;  %v2894_v19 = vmax.f32 %v962_v50, %v994_v55 }
 0x152   : > { %v763_v33 = vsel %vm699_vm10, %v623_v16, %v731_v24  ;;  %vm704_vm11 = vcmp.ge.f32.partialorder %v644_v25, 0.0  ;;  %v736_v34 = vmul.f32 0.1, %v644_v25  ;;  %v636_v35 = vadd.f32 %v2802_v1, %v635_v27  ;;  %v1118_v36 = vld [vmem:[#allocation3 + $0xa8] ss:$2 sm:$0xff] }
 0x153   : > { %899 = vst.msk [vmem:[#allocation2 + $0xe1] sm:$0xff] %vm472_vm0, %v763_v33  ;;  %932 = vst.msk [vmem:[#allocation3 + $0xe1] sm:$0xff] %vm472_vm0, %v763_v33  ;;  %v2068_v37 = vpop.f32.mrf.mxu0  ;;  %2081 = vmatprep.mubr.msk.bf16.mxu1 %vm472_vm0, %v1397_v28  ;;  %v1130_v38 = vadd.f32 %v1118_v36, %v1084_v29  ;;  %v1166_v45 = vld [vmem:[#allocation3 + $0xa9] ss:$2 sm:$0xff]  ;;  %v1321_v48 = vadd.f32 %v1308_v39, %v1273_v30  ;;  %v1037_v49 = vadd.f32 %v1026_v40, %v978_v31  ;;  %v1214_v54 = vld [vmem:[#allocation3 + $0xaa] ss:$2 sm:$0xff] }
 0x154   : > { %v768_v42 = vsel %vm704_vm11, %v644_v25, %v736_v34  ;;  %vm702_vm12 = vcmp.ge.f32.partialorder %v636_v35, 0.0  ;;  %v734_v43 = vmul.f32 0.1, %v636_v35  ;;  %v647_v44 = vadd.f32 %v2068_v37, %v2802_v1  ;;  %v1356_v59 = vld [vmem:[#allocation3 + $0x92] ss:$2 sm:$0xff] }
 0x155   : > { %904 = vst.msk [vmem:[#allocation2 + $0x121] sm:$0xff] %vm472_vm0, %v768_v42  ;;  %937 = vst.msk [vmem:[#allocation3 + $0x121] sm:$0xff] %vm472_vm0, %v768_v42  ;;  %v638_v46 = vpop.f32.mrf.mxu0  ;;  %v1178_v47 = vadd.f32 %v1166_v45, %v1130_v38  ;;  %v963_v60 = vmax.f32 %v949_v41, -3.4028235e+38  ;;  %v1074_v2 = vld [vmem:[#allocation3 + $0xc2] ss:$2 sm:$0xff]  ;;  %v1369_v7 = vadd.f32 %v1356_v59, %v1321_v48 }
 0x156   : > { %v766_v51 = vsel %vm702_vm12, %v636_v35, %v734_v43  ;;  %vm705_vm13 = vcmp.ge.f32.partialorder %v647_v44, 0.0  ;;  %v737_v52 = vmul.f32 0.1, %v647_v44  ;;  %v639_v53 = vadd.f32 %v2802_v1, %v638_v46  ;;  %v996_v3 = vld [vmem:[#allocation2 + $0x31] ss:$2 sm:$0xff] }
 0x157   : > { %902 = vst.msk [vmem:[#allocation2 + $0x109] sm:$0xff] %vm472_vm0, %v766_v51  ;;  %935 = vst.msk [vmem:[#allocation3 + $0x109] sm:$0xff] %vm472_vm0, %v766_v51  ;;  %v2071_v56 = vpop.f32.mrf.mxu0  ;;  %v1226_v57 = vadd.f32 %v1214_v54, %v1178_v47  ;;  %v1310_v6 = vld [vmem:[#allocation3 + $0xc1] ss:$2 sm:$0xff]  ;;  %v1085_v10 = vadd.f32 %v1074_v2, %v1037_v49  ;;  %v1358_v17 = vld [vmem:[#allocation3 + $0xc2] ss:$2 sm:$0xff]  ;;  %v1010_v20 = vmax.f32 %v963_v60, %v996_v3 }
 0x158   : > { %v769_v61 = vsel %vm705_vm13, %v647_v44, %v737_v52  ;;  %vm703_vm14 = vcmp.ge.f32.partialorder %v639_v53, 0.0  ;;  %v735_v62 = vmul.f32 0.1, %v639_v53  ;;  %v660_v63 = vadd.f32 %v2071_v56, %v2802_v1  ;;  %v980_v8 = vld [vmem:[#allocation3 + $0xf0] ss:$2 sm:$0xff]  ;;  %v1384_v38 = vld [vmem:[#allocation8 + $0x8] sm:$0xff] }
 0x159   : > { %905 = vst.msk [vmem:[#allocation2 + $0x129] sm:$0xff] %vm472_vm0, %v769_v61  ;;  %938 = vst.msk [vmem:[#allocation3 + $0x129] sm:$0xff] %vm472_vm0, %v769_v61  ;;  %v651_v4 = vpop.f32.mrf.mxu0  ;;  %v1274_v5 = vadd.f32 %v1262_v58, %v1226_v57  ;;  %v1028_v9 = vld [vmem:[#allocation3 + $0xf1] ss:$2 sm:$0xff]  ;;  %v1377_v28 = vmul.f32 0.11111111, %v1369_v7 }
 0x15a   : > { %v767_v11 = vsel %vm703_vm14, %v639_v53, %v735_v62  ;;  %vm708_vm15 = vcmp.ge.f32.partialorder %v660_v63, 0.0  ;;  %v740_v12 = vmul.f32 0.1, %v660_v63  ;;  %v652_v13 = vadd.f32 %v2802_v1, %v651_v4  ;;  %v1120_v14 = vld [vmem:[#allocation3 + $0xd8] ss:$2 sm:$0xff] }
 0x15b   : > { %903 = vst.msk [vmem:[#allocation2 + $0x111] sm:$0xff] %vm472_vm0, %v767_v11  ;;  %936 = vst.msk [vmem:[#allocation3 + $0x111] sm:$0xff] %vm472_vm0, %v767_v11  ;;  %v2072_v15 = vpop.f32.mrf.mxu0  ;;  %v1322_v16 = vadd.f32 %v1310_v6, %v1274_v5  ;;  %v1131_v18 = vadd.f32 %v1120_v14, %v1085_v10  ;;  %v1168_v24 = vld [vmem:[#allocation3 + $0xd9] ss:$2 sm:$0xff]  ;;  %v1038_v29 = vadd.f32 %v1028_v9, %v980_v8  ;;  %v1042_v31 = vld [vmem:[#allocation2 + $0x2] ss:$2 sm:$0xff] }
 0x15c   : > { %v772_v21 = vsel %vm708_vm15, %v660_v63, %v740_v12  ;;  %vm706_vm1 = vcmp.ge.f32.partialorder %v652_v13, 0.0  ;;  %v738_v22 = vmul.f32 0.1, %v652_v13  ;;  %v663_v23 = vadd.f32 %v2072_v15, %v2802_v1  ;;  %v1383_v25 = vld [vmem:[#allocation8] sm:$0xff]  ;;  %v951_v32 = vld [vmem:[#allocation2 + $0x60] ss:$2 sm:$0xff] }
 0x15d   : > { %908 = vst.msk [vmem:[#allocation2 + $0x151] sm:$0xff] %vm472_vm0, %v772_v21  ;;  %941 = vst.msk [vmem:[#allocation3 + $0x151] sm:$0xff] %vm472_vm0, %v772_v21  ;;  %v654_v26 = vpop.f32.mrf.mxu0  ;;  %v1370_v27 = vadd.f32 %v1358_v17, %v1322_v16  ;;  %v1179_v30 = vadd.f32 %v1168_v24, %v1131_v18  ;;  %v953_v33 = vld [vmem:[#allocation2 + $0x90] ss:$2 sm:$0xff]  ;;  %v1391_v48 = vpack.c.bf16 %v1384_v38, %v1383_v25  ;;  %v964_v56 = vmax.f32 %v951_v32, -3.4028235e+38 }
 0x15e   : > { %v770_v34 = vsel %vm706_vm1, %v652_v13, %v738_v22  ;;  %vm709_vm2 = vcmp.ge.f32.partialorder %v663_v23, 0.0  ;;  %v741_v35 = vmul.f32 0.1, %v663_v23  ;;  %v655_v36 = vadd.f32 %v2802_v1, %v654_v26  ;;  %v1216_v37 = vld [vmem:[#allocation3 + $0xda] ss:$2 sm:$0xff] }
 0x15f   : > { %906 = vst.msk [vmem:[#allocation2 + $0x139] sm:$0xff] %vm472_vm0, %v770_v34  ;;  %939 = vst.msk [vmem:[#allocation3 + $0x139] sm:$0xff] %vm472_vm0, %v770_v34  ;;  %v1378_v39 = vmul.f32 0.11111111, %v1370_v27  ;;  %v1076_v40 = vld [vmem:[#allocation3 + $0xf2] ss:$2 sm:$0xff]  ;;  %v1227_v41 = vadd.f32 %v1216_v37, %v1179_v30  ;;  %v1057_v54 = vmax.f32 %v2894_v19, %v1042_v31 }
 0x160   : > { %v1264_v42 = vld [vmem:[#allocation3 + $0xf0] ss:$2 sm:$0xff]  ;;  %v773_v43 = vsel %vm709_vm2, %v663_v23, %v741_v35  ;;  %vm707_vm3 = vcmp.ge.f32.partialorder %v655_v36, 0.0  ;;  %v739_v44 = vmul.f32 0.1, %v655_v36  ;;  %v1086_v1 = vadd.f32 %v1076_v40, %v1038_v29 }
 0x161   : > { %v965_v45 = vmax.f32 %v953_v33, -3.4028235e+38  ;;  %909 = vst.msk [vmem:[#allocation2 + $0x159] sm:$0xff] %vm472_vm0, %v773_v43  ;;  %942 = vst.msk [vmem:[#allocation3 + $0x159] sm:$0xff] %vm472_vm0, %v773_v43  ;;  %v1398_v46 = vpack.c.bf16 %v1378_v39, %v1377_v28  ;;  %v1275_v47 = vadd.f32 %v1264_v42, %v1227_v41  ;;  %v1044_v49 = vld [vmem:[#allocation2 + $0x32] ss:$2 sm:$0xff] }
 0x162   : > { %v1091_v50 = vld [vmem:[#allocation2 + $0x48] ss:$2 sm:$0xff]  ;;  %v771_v51 = vsel %vm707_vm3, %v655_v36, %v739_v44  ;;  %v982_v53 = vld [vmem:[#allocation3 + $0x120] ss:$2 sm:$0xff]  ;;  %v1058_v55 = vmax.f32 %v1010_v20, %v1044_v49  ;;  %v1030_v58 = vld [vmem:[#allocation3 + $0x121] ss:$2 sm:$0xff] }
 0x163   : > { %v1122_v52 = vld [vmem:[#allocation3 + $0x108] ss:$2 sm:$0xff]  ;;  %907 = vst.msk [vmem:[#allocation2 + $0x141] sm:$0xff] %vm472_vm0, %v771_v51  ;;  %940 = vst.msk [vmem:[#allocation3 + $0x141] sm:$0xff] %vm472_vm0, %v771_v51  ;;  %2082 = vmatmul.mubr.msk.bf16.vlgmr.msra.gmra.mxu1 %vm472_vm0, %v1398_v46  ;;  %v1000_v60 = vld [vmem:[#allocation2 + $0x91] ss:$2 sm:$0xff]  ;;  %v1039_v5 = vadd.f32 %v1030_v58, %v982_v53 }
 0x164   : > { %v1132_v57 = vadd.f32 %v1122_v52, %v1086_v1  ;;  %v1089_v59 = vld [vmem:[#allocation2 + $0x18] ss:$2 sm:$0xff]  ;;  %v1170_v61 = vld [vmem:[#allocation3 + $0x109] ss:$2 sm:$0xff]  ;;  %2090 = vmatpush3.bf16.msra.mxu1 %v2796_v0  ;;  %v1105_v63 = vmax.f32 %v1058_v55, %v1091_v50  ;;  %v1012_v2 = vmax.f32 %v965_v45, %v1000_v60  ;;  %v1095_v20 = vld [vmem:[#allocation2 + $0xa8] ss:$2 sm:$0xff] }
 0x165   : > { %v1312_v62 = vld [vmem:[#allocation3 + $0xf1] ss:$2 sm:$0xff]  ;;  %2091 = vmatprep.subr.bf16.mxu1 %v1391_v48  ;;  %v1218_v7 = vld [vmem:[#allocation3 + $0x10a] ss:$2 sm:$0xff]  ;;  %v1104_v9 = vmax.f32 %v1057_v54, %v1089_v59  ;;  %v1136_v15 = vld [vmem:[#allocation2 + $0x19] ss:$2 sm:$0xff] }
 0x166   : > { %v1180_v3 = vadd.f32 %v1170_v61, %v1132_v57  ;;  %v1323_v4 = vadd.f32 %v1312_v62, %v1275_v47  ;;  %v998_v6 = vld [vmem:[#allocation2 + $0x61] ss:$2 sm:$0xff]  ;;  %v1360_v8 = vld [vmem:[#allocation3 + $0xf2] ss:$2 sm:$0xff]  ;;  %v1078_v14 = vld [vmem:[#allocation3 + $0x122] ss:$2 sm:$0xff] }
 0x167   : > { %v1138_v10 = vld [vmem:[#allocation2 + $0x49] ss:$2 sm:$0xff]  ;;  %v1011_v11 = vmax.f32 %v964_v56, %v998_v6  ;;  %v1266_v13 = vld [vmem:[#allocation3 + $0x120] ss:$2 sm:$0xff]  ;;  %v1087_v24 = vadd.f32 %v1078_v14, %v1039_v5  ;;  %v1314_v28 = vld [vmem:[#allocation3 + $0x121] ss:$2 sm:$0xff]  ;;  %v1151_v32 = vmax.f32 %v1104_v9, %v1136_v15 }
 0x168   : > { %v1228_v12 = vadd.f32 %v1218_v7, %v1180_v3  ;;  %v1048_v16 = vld [vmem:[#allocation2 + $0x92] ss:$2 sm:$0xff]  ;;  %v1032_v18 = vld [vmem:[#allocation3 + $0x151] ss:$2 sm:$0xff]  ;;  %2092 = vmatpush3.bf16.msra.mxu1 %v1391_v48  ;;  %v1152_v0 = vmax.f32 %v1105_v63, %v1138_v10  ;;  %v1371_v22 = vadd.f32 %v1360_v8, %v1323_v4  ;;  %v1046_v25 = vld [vmem:[#allocation2 + $0x62] ss:$2 sm:$0xff] }
 0x169   : > { %v984_v17 = vld [vmem:[#allocation3 + $0x150] ss:$2 sm:$0xff]  ;;  %v1060_v19 = vmax.f32 %v1012_v2, %v1048_v16  ;;  %v1093_v26 = vld [vmem:[#allocation2 + $0x78] ss:$2 sm:$0xff]  ;;  %v1059_v33 = vmax.f32 %v1011_v11, %v1046_v25  ;;  %v1174_v43 = vld [vmem:[#allocation3 + $0x169] ss:$2 sm:$0xff] }
 0x16a   : > { %v1276_v21 = vadd.f32 %v1266_v13, %v1228_v12  ;;  %v1040_v23 = vadd.f32 %v1032_v18, %v984_v17  ;;  %v955_v27 = vld [vmem:[#allocation2 + $0xc0] ss:$2 sm:$0xff]  ;;  %v1124_v30 = vld [vmem:[#allocation3 + $0x138] ss:$2 sm:$0xff]  ;;  %v1172_v42 = vld [vmem:[#allocation3 + $0x139] ss:$2 sm:$0xff] }
 0x16b   : > { %v1080_v29 = vld [vmem:[#allocation3 + $0x152] ss:$2 sm:$0xff]  ;;  %v1362_v35 = vld [vmem:[#allocation3 + $0x122] ss:$2 sm:$0xff]  ;;  %v1133_v37 = vadd.f32 %v1124_v30, %v1087_v24  ;;  %v1107_v40 = vmax.f32 %v1060_v19, %v1095_v20  ;;  %v2909_v45 = vmax.f32 %v1059_v33, %v1093_v26  ;;  %v1142_v46 = vld [vmem:[#allocation2 + $0xa9] ss:$2 sm:$0xff] }
 0x16c   : > { %v1126_v31 = vld [vmem:[#allocation3 + $0x168] ss:$2 sm:$0xff]  ;;  %v1324_v34 = vadd.f32 %v1314_v28, %v1276_v21  ;;  %v1088_v36 = vadd.f32 %v1080_v29, %v1040_v23  ;;  %v957_v41 = vld [vmem:[#allocation2 + $0xf0] ss:$2 sm:$0xff]  ;;  %v966_v1 = vmax.f32 %v955_v27, -3.4028235e+38 }
 0x16d   : > { %v1184_v38 = vld [vmem:[#allocation2 + $0x1a] ss:$2 sm:$0xff]  ;;  %v1186_v39 = vld [vmem:[#allocation2 + $0x4a] ss:$2 sm:$0xff]  ;;  %v967_v47 = vmax.f32 %v957_v41, -3.4028235e+38  ;;  %v1181_v51 = vadd.f32 %v1172_v42, %v1133_v37  ;;  %v1154_v3 = vmax.f32 %v1107_v40, %v1142_v46 }
 0x16e   : > { %v1200_v44 = vmax.f32 %v1152_v0, %v1186_v39  ;;  %v1372_v48 = vadd.f32 %v1362_v35, %v1324_v34  ;;  %v1379_v49 = vmul.f32 0.11111111, %v1371_v22  ;;  %v1134_v50 = vadd.f32 %v1126_v31, %v1088_v36  ;;  %v1234_v52 = vld [vmem:[#allocation2 + $0x60] ss:$2 sm:$0xff]  ;;  %v1002_v53 = vld [vmem:[#allocation2 + $0xc1] ss:$2 sm:$0xff] }
 0x16f   : > { %v1004_v54 = vld [vmem:[#allocation2 + $0xf1] ss:$2 sm:$0xff]  ;;  %v1220_v55 = vld [vmem:[#allocation3 + $0x13a] ss:$2 sm:$0xff]  ;;  %v1222_v56 = vld [vmem:[#allocation3 + $0x16a] ss:$2 sm:$0xff]  ;;  %v1199_v57 = vmax.f32 %v1151_v32, %v1184_v38  ;;  %v1013_v58 = vmax.f32 %v966_v1, %v1002_v53 }
 0x170   : > { %v1014_v59 = vmax.f32 %v967_v47, %v1004_v54  ;;  %v1050_v60 = vld [vmem:[#allocation2 + $0xc2] ss:$2 sm:$0xff]  ;;  %v1052_v61 = vld [vmem:[#allocation2 + $0xf2] ss:$2 sm:$0xff]  ;;  %v1380_v62 = vmul.f32 0.11111111, %v1372_v48  ;;  %v1182_v63 = vadd.f32 %v1174_v43, %v1134_v50  ;;  %v1229_v2 = vadd.f32 %v1220_v55, %v1181_v51 }
 0x171   : > { %v1097_v4 = vld [vmem:[#allocation2 + $0xd8] ss:$2 sm:$0xff]  ;;  %v1099_v5 = vld [vmem:[#allocation2 + $0x108] ss:$2 sm:$0xff]  ;;  %v1248_v9 = vmax.f32 %v1200_v44, %v1234_v52  ;;  %v1140_v10 = vld [vmem:[#allocation2 + $0x79] ss:$2 sm:$0xff]  ;;  %v1061_v11 = vmax.f32 %v1013_v58, %v1050_v60 }
 0x172   : > { %v1268_v6 = vld [vmem:[#allocation3 + $0x150] ss:$2 sm:$0xff]  ;;  %v1270_v7 = vld [vmem:[#allocation3 + $0x180] ss:$2 sm:$0xff]  ;;  %v1062_v12 = vmax.f32 %v1014_v59, %v1052_v61  ;;  %v1399_v13 = vpack.c.bf16 %v1380_v62, %v1379_v49  ;;  %v1230_v14 = vadd.f32 %v1222_v56, %v1182_v63  ;;  %v1316_v16 = vld [vmem:[#allocation3 + $0x151] ss:$2 sm:$0xff]  ;;  %v1153_v18 = vmax.f32 %v2909_v45, %v1140_v10 }
 0x173   : > { %v1232_v8 = vld [vmem:[#allocation2 + $0x30] ss:$2 sm:$0xff]  ;;  %v1277_v15 = vadd.f32 %v1268_v6, %v1229_v2  ;;  %v1282_v17 = vld [vmem:[#allocation2 + $0x61] ss:$2 sm:$0xff]  ;;  %v959_v19 = vld [vmem:[#allocation2 + $0x120] ss:$2 sm:$0xff]  ;;  %v1108_v23 = vmax.f32 %v1061_v11, %v1097_v4 }
 0x174   : > { %v1190_v0 = vld [vmem:[#allocation2 + $0xaa] ss:$2 sm:$0xff]  ;;  %v1318_v20 = vld [vmem:[#allocation3 + $0x181] ss:$2 sm:$0xff]  ;;  %v1247_v21 = vmax.f32 %v1199_v57, %v1232_v8  ;;  %v1188_v22 = vld [vmem:[#allocation2 + $0x7a] ss:$2 sm:$0xff]  ;;  %v1109_v24 = vmax.f32 %v1062_v12, %v1099_v5  ;;  %2085 = vmatprep.mubr.msk.bf16.mxu1 %vm472_vm0, %v1399_v13  ;;  %v1278_v28 = vadd.f32 %v1270_v7, %v1230_v14  ;;  %v1296_v36 = vmax.f32 %v1248_v9, %v1282_v17 }
 0x175   : > { %v1144_v25 = vld [vmem:[#allocation2 + $0xd9] ss:$2 sm:$0xff]  ;;  %v961_v26 = vld [vmem:[#allocation2 + $0x150] ss:$2 sm:$0xff]  ;;  %v968_v27 = vmax.f32 %v959_v19, -3.4028235e+38  ;;  %v1325_v29 = vadd.f32 %v1316_v16, %v1277_v15  ;;  %v1202_v31 = vmax.f32 %v1154_v3, %v1190_v0  ;;  %v1201_v44 = vmax.f32 %v1153_v18, %v1188_v22 }
 0x176   : > { %v1280_v30 = vld [vmem:[#allocation2 + $0x31] ss:$2 sm:$0xff]  ;;  %v969_v33 = vmax.f32 %v961_v26, -3.4028235e+38  ;;  %v1006_v34 = vld [vmem:[#allocation2 + $0x121] ss:$2 sm:$0xff]  ;;  %v1155_v37 = vmax.f32 %v1108_v23, %v1144_v25  ;;  %v1326_v42 = vadd.f32 %v1318_v20, %v1278_v28 }
 0x177   : > { %v1146_v32 = vld [vmem:[#allocation2 + $0x109] ss:$2 sm:$0xff]  ;;  %v1364_v35 = vld [vmem:[#allocation3 + $0x152] ss:$2 sm:$0xff]  ;;  %v1192_v39 = vld [vmem:[#allocation2 + $0xda] ss:$2 sm:$0xff]  ;;  %v1015_v41 = vmax.f32 %v968_v27, %v1006_v34  ;;  %v1295_v49 = vmax.f32 %v1247_v21, %v1280_v30 }
 0x178   : > { %v1156_v38 = vmax.f32 %v1109_v24, %v1146_v32  ;;  %v1008_v40 = vld [vmem:[#allocation2 + $0x151] ss:$2 sm:$0xff]  ;;  %v1373_v43 = vadd.f32 %v1364_v35, %v1325_v29  ;;  %v1194_v45 = vld [vmem:[#allocation2 + $0x10a] ss:$2 sm:$0xff]  ;;  %v1366_v48 = vld [vmem:[#allocation3 + $0x182] ss:$2 sm:$0xff]  ;;  %v1203_v51 = vmax.f32 %v1155_v37, %v1192_v39 }
 0x179   : > { %v1016_v46 = vmax.f32 %v969_v33, %v1008_v40  ;;  %v1054_v1 = vld [vmem:[#allocation2 + $0x122] ss:$2 sm:$0xff]  ;;  %v1056_v53 = vld [vmem:[#allocation2 + $0x152] ss:$2 sm:$0xff]  ;;  %v1374_v55 = vadd.f32 %v1366_v48, %v1326_v42  ;;  %v1148_v9 = vld [vmem:[#allocation2 + $0x139] ss:$2 sm:$0xff] }
 0x17a   : > { %v1101_v47 = vld [vmem:[#allocation2 + $0x138] ss:$2 sm:$0xff]  ;;  %v1204_v52 = vmax.f32 %v1156_v38, %v1194_v45  ;;  %v1063_v54 = vmax.f32 %v1015_v41, %v1054_v1  ;;  %v1103_v3 = vld [vmem:[#allocation2 + $0x168] ss:$2 sm:$0xff]  ;;  %v1381_v5 = vmul.f32 0.11111111, %v1373_v43 }
 0x17b   : > { %v1238_v50 = vld [vmem:[#allocation2 + $0xc0] ss:$2 sm:$0xff]  ;;  %v1064_v60 = vmax.f32 %v1016_v46, %v1056_v53  ;;  %v1236_v62 = vld [vmem:[#allocation2 + $0x90] ss:$2 sm:$0xff]  ;;  %v1382_v6 = vmul.f32 0.11111111, %v1374_v55 }
 0x17c   : > { %v1328_v56 = vld [vmem:[#allocation2 + $0x32] ss:$2 sm:$0xff]  ;;  %v1330_v57 = vld [vmem:[#allocation2 + $0x62] ss:$2 sm:$0xff]  ;;  %v1250_v58 = vmax.f32 %v1202_v31, %v1238_v50  ;;  %v1110_v4 = vmax.f32 %v1063_v54, %v1101_v47  ;;  %v1249_v7 = vmax.f32 %v1201_v44, %v1236_v62  ;;  %v1286_v11 = vld [vmem:[#allocation2 + $0xc1] ss:$2 sm:$0xff] }
 0x17d   : > { %v1242_v59 = vld [vmem:[#allocation2 + $0x120] ss:$2 sm:$0xff]  ;;  %v1344_v61 = vmax.f32 %v1296_v36, %v1330_v57  ;;  %v1240_v63 = vld [vmem:[#allocation2 + $0xf0] ss:$2 sm:$0xff]  ;;  %v1111_v8 = vmax.f32 %v1064_v60, %v1103_v3  ;;  %v1343_v10 = vmax.f32 %v1295_v49, %v1328_v56  ;;  %v1150_v13 = vld [vmem:[#allocation2 + $0x169] ss:$2 sm:$0xff]  ;;  %v1400_v15 = vpack.c.bf16 %v1382_v6, %v1381_v5 }
 0x17e   : > { %v1252_v2 = vmax.f32 %v1204_v52, %v1242_v59  ;;  %v1251_v12 = vmax.f32 %v1203_v51, %v1240_v63  ;;  %v1157_v14 = vmax.f32 %v1110_v4, %v1148_v9  ;;  %v1298_v16 = vmax.f32 %v1250_v58, %v1286_v11  ;;  %v1290_v17 = vld [vmem:[#allocation2 + $0x121] ss:$2 sm:$0xff]  ;;  %v1284_v19 = vld [vmem:[#allocation2 + $0x91] ss:$2 sm:$0xff]  ;;  %v1196_v21 = vld [vmem:[#allocation2 + $0x13a] ss:$2 sm:$0xff] }
 0x17f   : > { %v1158_v18 = vmax.f32 %v1111_v8, %v1150_v13  ;;  %v1387_v0 = vpack.c.bf16 %v1344_v61, %v1343_v10  ;;  %v1198_v22 = vld [vmem:[#allocation2 + $0x16a] ss:$2 sm:$0xff]  ;;  %2086 = vmatmul.mubr.msk.bf16.gmra.mxu1 %vm472_vm0, %v1400_v15  ;;  %v1297_v23 = vmax.f32 %v1249_v7, %v1284_v19  ;;  %v1288_v24 = vld [vmem:[#allocation2 + $0xf1] ss:$2 sm:$0xff]  ;;  %v1294_v40 = vld [vmem:[#allocation2 + $0x181] ss:$2 sm:$0xff] }
 0x180   : > { %v1300_v20 = vmax.f32 %v1252_v2, %v1290_v17  ;;  %v1205_v25 = vmax.f32 %v1157_v14, %v1196_v21  ;;  %v1334_v27 = vld [vmem:[#allocation2 + $0xc2] ss:$2 sm:$0xff]  ;;  %v1299_v28 = vmax.f32 %v1251_v12, %v1288_v24  ;;  %v1332_v33 = vld [vmem:[#allocation2 + $0x92] ss:$2 sm:$0xff]  ;;  %v1292_v44 = vld [vmem:[#allocation2 + $0x151] ss:$2 sm:$0xff] }
 0x181   : > { %v1206_v26 = vmax.f32 %v1158_v18, %v1198_v22  ;;  %2093 = vmatprep.mubr.msk.bf16.mxu1 %vm472_vm0, %v1387_v0  ;;  %v1246_v29 = vld [vmem:[#allocation2 + $0x180] ss:$2 sm:$0xff]  ;;  %v1346_v30 = vmax.f32 %v1298_v16, %v1334_v27  ;;  %v1244_v35 = vld [vmem:[#allocation2 + $0x150] ss:$2 sm:$0xff]  ;;  %v1345_v36 = vmax.f32 %v1297_v23, %v1332_v33 }
 0x182   : > { %v1338_v31 = vld [vmem:[#allocation2 + $0x122] ss:$2 sm:$0xff]  ;;  %v1336_v37 = vld [vmem:[#allocation2 + $0xf2] ss:$2 sm:$0xff]  ;;  %v1253_v38 = vmax.f32 %v1205_v25, %v1244_v35 }
 0x183   : > { %v1254_v32 = vmax.f32 %v1206_v26, %v1246_v29  ;;  %v1348_v34 = vmax.f32 %v1300_v20, %v1338_v31  ;;  %v1347_v39 = vmax.f32 %v1299_v28, %v1336_v37  ;;  %v1388_v41 = vpack.c.bf16 %v1346_v30, %v1345_v36  ;;  %v1342_v46 = vld [vmem:[#allocation2 + $0x182] ss:$2 sm:$0xff]  ;;  %v1340_v47 = vld [vmem:[#allocation2 + $0x152] ss:$2 sm:$0xff] }
 0x184   : > { %v1301_v45 = vmax.f32 %v1253_v38, %v1292_v44  ;;  %v1598_v50 = vld [vmem:[%s3010_s6 + $0x10] sm:$0xff]  ;;  %v1599_v51 = vld [vmem:[%s3010_s6 + $0x18] sm:$0xff]  ;;  %v1596_v53 = vld [vmem:[%s3010_s6] sm:$0xff] }
 0x185   : > { %v1302_v42 = vmax.f32 %v1254_v32, %v1294_v40  ;;  %v1389_v43 = vpack.c.bf16 %v1348_v34, %v1347_v39  ;;  %v1605_v52 = vpack.c.bf16 %v1599_v51, %v1598_v50  ;;  %v1597_v54 = vld [vmem:[%s3010_s6 + $0x8] sm:$0xff]  ;;  %v1994_v3 = vld [vmem:[%s3009_s5] ss:$0 sm:$0xff] }
 0x186   : > { %v1349_v48 = vmax.f32 %v1301_v45, %v1340_v47  ;;  %v1604_v55 = vpack.c.bf16 %v1597_v54, %v1596_v53 }
 0x187   : > { %2094 = vmatmul.mubr.msk.bf16.vlgmr.msra.gmra.mxu1 %vm472_vm0, %v1388_v41  ;;  %v1350_v1 = vmax.f32 %v1302_v42, %v1342_v46  ;;  %2101 = vmatprep.subr.bf16.mxu1 %v1605_v52  ;;  %v1995_v46 = vld [vmem:[%s3011_s7] ss:$0 sm:$0xff] }
 0x188   : > { %2097 = vmatprep.mubr.msk.bf16.mxu1 %vm472_vm0, %v1389_v43  ;;  %2102 = vmatpush3.bf16.msra.mxu1 %v1605_v52 }
 0x189   : > { %v1390_v49 = vpack.c.bf16 %v1350_v1, %v1349_v48  ;;  %2103 = vmatprep.subr.bf16.mxu1 %v1604_v55 }
 0x18c   : > { %2104 = vmatpush3.bf16.msra.mxu1 %v1604_v55 }
 0x18f   : > { %2098 = vmatmul.mubr.msk.bf16.gmra.mxu1 %vm472_vm0, %v1390_v49 }
 0x223   : > { %v2083_v56 = vpop.f32.mrf.mxu1 }
 0x225   : > { %v1449_v57 = vpop.f32.mrf.mxu1 }
 0x227   : > { %v2084_v58 = vpop.f32.mrf.mxu1 }
 0x229   : > { %v1452_v59 = vpop.f32.mrf.mxu1 }
 0x23f   : > { %v2087_v60 = vpop.f32.mrf.mxu1 }
 0x241   : > { %v1465_v61 = vpop.f32.mrf.mxu1 }
 0x243   : > { %v2088_v62 = vpop.f32.mrf.mxu1 }
 0x245   : > { %v1468_v63 = vpop.f32.mrf.mxu1 }
 0x247   : > { %v2095_v2 = vpop.f32.mrf.mxu1 }
 0x248   : > { %v1535_v4 = vadd.f32 %v2095_v2, %v2083_v56 }
 0x249   : > { %v1526_v5 = vpop.f32.mrf.mxu1 }
 0x24a   : > { %v1566_v6 = vadd.f32 %v1994_v3, %v1535_v4  ;;  %v1527_v7 = vadd.f32 %v1526_v5, %v1449_v57 }
 0x24b   : > { %v2096_v8 = vpop.f32.mrf.mxu1 }
 0x24c   : > { %vm1574_vm4 = vcmp.ge.f32.partialorder %v1566_v6, 0.0  ;;  %v1582_v9 = vmul.f32 0.1, %v1566_v6  ;;  %v1564_v10 = vadd.f32 %v1994_v3, %v1527_v7  ;;  %v1538_v11 = vadd.f32 %v2096_v8, %v2084_v58 }
 0x24d   : > { %v1529_v12 = vpop.f32.mrf.mxu1 }
 0x24e   : > { %v1590_v13 = vsel %vm1574_vm4, %v1566_v6, %v1582_v9  ;;  %vm1572_vm5 = vcmp.ge.f32.partialorder %v1564_v10, 0.0  ;;  %v1580_v14 = vmul.f32 0.1, %v1564_v10  ;;  %v1567_v15 = vadd.f32 %v1994_v3, %v1538_v11 }
 0x24f   : > { %1716 = vst.msk [vmem:[%s2943_s29 + $0x10] sm:$0xff] %vm472_vm0, %v1590_v13  ;;  %v1530_v16 = vadd.f32 %v1529_v12, %v1452_v59  ;;  %v2099_v17 = vpop.f32.mrf.mxu1 }
 0x250   : > { %v1588_v18 = vsel %vm1572_vm5, %v1564_v10, %v1580_v14  ;;  %vm1575_vm6 = vcmp.ge.f32.partialorder %v1567_v15, 0.0  ;;  %v1583_v0 = vmul.f32 0.1, %v1567_v15  ;;  %v1551_v19 = vadd.f32 %v2099_v17, %v2087_v60 }
 0x251   : > { %1714 = vst.msk [vmem:[%s2943_s29] sm:$0xff] %vm472_vm0, %v1588_v18  ;;  %v1565_v20 = vadd.f32 %v1994_v3, %v1530_v16  ;;  %v1542_v21 = vpop.f32.mrf.mxu1 }
 0x252   : > { %v1591_v22 = vsel %vm1575_vm6, %v1567_v15, %v1583_v0  ;;  %v1570_v23 = vadd.f32 %v1994_v3, %v1551_v19  ;;  %v1543_v24 = vadd.f32 %v1542_v21, %v1465_v61 }
 0x253   : > { %1717 = vst.msk [vmem:[%s2943_s29 + $0x18] sm:$0xff] %vm472_vm0, %v1591_v22  ;;  %vm1573_vm7 = vcmp.ge.f32.partialorder %v1565_v20, 0.0  ;;  %v1581_v25 = vmul.f32 0.1, %v1565_v20  ;;  %v2100_v26 = vpop.f32.mrf.mxu1  ;;  %v1601_v37 = vpack.c.bf16 %v1591_v22, %v1590_v13 }
 0x254   : > { %vm1578_vm8 = vcmp.ge.f32.partialorder %v1570_v23, 0.0  ;;  %v1586_v27 = vmul.f32 0.1, %v1570_v23  ;;  %v1568_v28 = vadd.f32 %v1994_v3, %v1543_v24  ;;  %v1554_v29 = vadd.f32 %v2100_v26, %v2088_v62 }
 0x255   : > { %v1589_v30 = vsel %vm1573_vm7, %v1565_v20, %v1581_v25  ;;  %v1545_v31 = vpop.f32.mrf.mxu1 }
 0x256   : > { %1715 = vst.msk [vmem:[%s2943_s29 + $0x8] sm:$0xff] %vm472_vm0, %v1589_v30  ;;  %v1594_v32 = vsel %vm1578_vm8, %v1570_v23, %v1586_v27  ;;  %vm1576_vm9 = vcmp.ge.f32.partialorder %v1568_v28, 0.0  ;;  %v1584_v33 = vmul.f32 0.1, %v1568_v28  ;;  %v1571_v34 = vadd.f32 %v1994_v3, %v1554_v29 }
 0x257   : > { %1720 = vst.msk [vmem:[%s2943_s29 + $0x30] sm:$0xff] %vm472_vm0, %v1594_v32  ;;  %v1546_v35 = vadd.f32 %v1545_v31, %v1468_v63  ;;  %v1600_v36 = vpack.c.bf16 %v1589_v30, %v1588_v18 }
 0x258   : > { %v1592_v38 = vsel %vm1576_vm9, %v1568_v28, %v1584_v33  ;;  %vm1579_vm10 = vcmp.ge.f32.partialorder %v1571_v34, 0.0  ;;  %v1587_v39 = vmul.f32 0.1, %v1571_v34 }
 0x259   : > { %1718 = vst.msk [vmem:[%s2943_s29 + $0x20] sm:$0xff] %vm472_vm0, %v1592_v38  ;;  %v1569_v40 = vadd.f32 %v1994_v3, %v1546_v35  ;;  %2105 = vmatprep.mubr.msk.bf16.mxu1 %vm472_vm0, %v1600_v36 }
 0x25a   : > { %v1595_v41 = vsel %vm1579_vm10, %v1571_v34, %v1587_v39  ;;  %2106 = vmatmul.mubr.msk.bf16.vlgmr.msra.gmra.mxu1 %vm472_vm0, %v1601_v37 }
 0x25b   : > { %1721 = vst.msk [vmem:[%s2943_s29 + $0x38] sm:$0xff] %vm472_vm0, %v1595_v41  ;;  %vm1577_vm11 = vcmp.ge.f32.partialorder %v1569_v40, 0.0  ;;  %v1585_v42 = vmul.f32 0.1, %v1569_v40  ;;  %v1603_v45 = vpack.c.bf16 %v1595_v41, %v1594_v32 }
 0x25d   : > { %v1593_v43 = vsel %vm1577_vm11, %v1569_v40, %v1585_v42 }
 0x25e   : > { %1719 = vst.msk [vmem:[%s2943_s29 + $0x28] sm:$0xff] %vm472_vm0, %v1593_v43  ;;  %v1602_v44 = vpack.c.bf16 %v1593_v43, %v1592_v38 }
 0x260   : > { %2109 = vmatprep.mubr.msk.bf16.mxu1 %vm472_vm0, %v1602_v44 }
 0x262   : > { %2110 = vmatmul.mubr.msk.bf16.gmra.mxu1 %vm472_vm0, %v1603_v45 }
 0x31a   : > { %v2107_v1 = vpop.f32.mrf.mxu1 }
 0x31b   : > { %v1668_v47 = vadd.f32 %v2107_v1, %v1995_v46 }
 0x31c   : > { %v1659_v48 = vpop.f32.mrf.mxu1 }
 0x31d   : > { %vm1692_vm12 = vcmp.ge.f32.partialorder %v1668_v47, 0.0  ;;  %v1700_v49 = vmul.f32 0.1, %v1668_v47  ;;  %v1660_v50 = vadd.f32 %v1995_v46, %v1659_v48 }
 0x31e   : > { %v2108_v51 = vpop.f32.mrf.mxu1 }
 0x31f   : > { %v1708_v52 = vsel %vm1692_vm12, %v1668_v47, %v1700_v49  ;;  %vm1690_vm13 = vcmp.ge.f32.partialorder %v1660_v50, 0.0  ;;  %v1698_v53 = vmul.f32 0.1, %v1660_v50  ;;  %v1671_v54 = vadd.f32 %v2108_v51, %v1995_v46 }
 0x320   : > { %1724 = vst.msk [vmem:[%s2973_s17 + $0x10] sm:$0xff] %vm472_vm0, %v1708_v52  ;;  %v1662_v55 = vpop.f32.mrf.mxu1 }
 0x321   : > { %v1706_v56 = vsel %vm1690_vm13, %v1660_v50, %v1698_v53  ;;  %vm1693_vm14 = vcmp.ge.f32.partialorder %v1671_v54, 0.0  ;;  %v1701_v57 = vmul.f32 0.1, %v1671_v54  ;;  %v1663_v58 = vadd.f32 %v1995_v46, %v1662_v55 }
 0x322   : > { %1722 = vst.msk [vmem:[%s2973_s17] sm:$0xff] %vm472_vm0, %v1706_v56  ;;  %v2111_v59 = vpop.f32.mrf.mxu1 }
 0x323   : > { %v1709_v60 = vsel %vm1693_vm14, %v1671_v54, %v1701_v57  ;;  %vm1691_vm15 = vcmp.ge.f32.partialorder %v1663_v58, 0.0  ;;  %v1699_v61 = vmul.f32 0.1, %v1663_v58  ;;  %v1684_v62 = vadd.f32 %v2111_v59, %v1995_v46 }
 0x324   : > { %1725 = vst.msk [vmem:[%s2973_s17 + $0x18] sm:$0xff] %vm472_vm0, %v1709_v60  ;;  %v1675_v63 = vpop.f32.mrf.mxu1 }
 0x325   : > { %v1707_v2 = vsel %vm1691_vm15, %v1663_v58, %v1699_v61  ;;  %vm1696_vm1 = vcmp.ge.f32.partialorder %v1684_v62, 0.0  ;;  %v1704_v3 = vmul.f32 0.1, %v1684_v62  ;;  %v1676_v4 = vadd.f32 %v1995_v46, %v1675_v63 }
 0x326   : > { %1723 = vst.msk [vmem:[%s2973_s17 + $0x8] sm:$0xff] %vm472_vm0, %v1707_v2  ;;  %v2112_v5 = vpop.f32.mrf.mxu1 }
 0x327   : > { %v1712_v6 = vsel %vm1696_vm1, %v1684_v62, %v1704_v3  ;;  %vm1694_vm2 = vcmp.ge.f32.partialorder %v1676_v4, 0.0  ;;  %v1702_v7 = vmul.f32 0.1, %v1676_v4  ;;  %v1687_v8 = vadd.f32 %v2112_v5, %v1995_v46 }
 0x328   : > { %1728 = vst.msk [vmem:[%s2973_s17 + $0x30] sm:$0xff] %vm472_vm0, %v1712_v6  ;;  %v1678_v9 = vpop.f32.mrf.mxu1 }
 0x329   : > { %v1710_v10 = vsel %vm1694_vm2, %v1676_v4, %v1702_v7  ;;  %vm1697_vm3 = vcmp.ge.f32.partialorder %v1687_v8, 0.0  ;;  %v1705_v11 = vmul.f32 0.1, %v1687_v8  ;;  %v1679_v12 = vadd.f32 %v1995_v46, %v1678_v9 }
 0x32a   : > { %1726 = vst.msk [vmem:[%s2973_s17 + $0x20] sm:$0xff] %vm472_vm0, %v1710_v10 }
 0x32b   : > { %v1713_v13 = vsel %vm1697_vm3, %v1687_v8, %v1705_v11  ;;  %vm1695_vm4 = vcmp.ge.f32.partialorder %v1679_v12, 0.0  ;;  %v1703_v14 = vmul.f32 0.1, %v1679_v12 }
 0x32c   : > { %1729 = vst.msk [vmem:[%s2973_s17 + $0x38] sm:$0xff] %vm472_vm0, %v1713_v13 }
 0x32d   : > { %v1711_v15 = vsel %vm1695_vm4, %v1679_v12, %v1703_v14 }
 0x32e   : > { %1727 = vst.msk [vmem:[%s2973_s17 + $0x28] sm:$0xff] %vm472_vm0, %v1711_v15 }
 0x32f PF: > { %p22_p8 = scmp.ge.s32.totalorder %s2478_s20, 4   ;;  %s3029_s30 = smov %s2331_s10 }
 0x330   : > { %s3030_s10 = smov %s2335_s11  ;;  %s3031_s11 = smov %s2488_s23 }
 0x331   : > { %s3032_s12 = smov %s2478_s20  ;;  %24 = sbr.rel (!%p22_p8) target bundleno = 5 (0x5), region = 258 }
 0x336   :  { %1767 = vsyncpa [#allocation5], 1 }
 0x337   :  { %1769 = vsyncpa [#allocation5 + $0x1], 1 }
 0x338   :  { %1770 = vsyncpa [#allocation7], 1 }
 0x339   :  { %1771 = vsyncpa [#allocation10], 1 }

// kernel: attention_forward.6
= control target key start
LH: loop header
LB: loop body
LE: loop exit
PB: predicated region body
PF: predicated region fallthrough
CT: control target
= control target key end

     0   :  { %s2354_s30 = smov 0   ;;  %s2834_s0 = inlined_call_operand.vmem [shape: f32[2,8,8,32], index: 0, kind: input, shape index: {}]   ;;  %s2835_s1 = inlined_call_operand.vmem [shape: f32[2,8,8,32], index: 1, kind: input, shape index: {}]   ;;  %s2836_s2 = inlined_call_operand.vmem [shape: f32[9,32,32], index: 2, kind: input, shape index: {}]   ;;  %s2837_s3 = inlined_call_operand.vmem [shape: f32[1,32], index: 3, kind: input, shape index: {}]   ;;  %s2838_s4 = inlined_call_operand.vmem [shape: f32[32,32], index: 4, kind: input, shape index: {}]   ;;  %s2839_s5 = inlined_call_operand.vmem [shape: f32[1,32], index: 5, kind: input, shape index: {}]   ;;  %s2840_s6 = inlined_call_operand.vmem [shape: f32[2,8,8,32], index: 6, kind: output, shape index: {0}]   ;;  %s2841_s7 = inlined_call_operand.vmem [shape: f32[2,8,8,32], index: 7, kind: output, shape index: {1}]   ;;  %s2842_s8 = inlined_call_operand.vmem [shape: f32[2,8,8,32], index: 8, kind: output, shape index: {2}]   ;;  %s2843_s9 = inlined_call_operand.vmem [shape: f32[2,8,8,32], index: 9, kind: output, shape index: {3}]  }
   0x1 LB: > { %s2039_s10 = sadd.s32 4294967295, %s2301_s30   ;;  %p2043_p0 = scmp.ge.s32.totalorder %s2301_s30, 1  ;;  %s2301_s30 = sphi %s2354_s30, %s20_s30  }
   0x2   : > { %p304_p1 = scmp.lt.s32.totalorder %s2301_s30, 3 }
   0x4   : > { %p305_p2 = pnand %p2043_p0, %p304_p1 }
   0x6   : > { %308 = sbr.rel (%p305_p2) target bundleno = 564 (0x234), region = 44 }
   0xb   : > { %v436_v0 = vld [vmem:[%s2836_s2 + $0x30] sm:$0xff]  ;;  %v437_v1 = vld [vmem:[%s2836_s2 + $0x38] sm:$0xff]  ;;  %p2373_p3 = scmp.lt.s32.totalorder %s2039_s10, 1  ;;  %vm399_vm0 = vcmask 261120   ;;  %v434_v5 = vld [vmem:[%s2836_s2 + $0x20] sm:$0xff]  ;;  %v2303_v7 = vmov 0.0  }
   0xc   : > { %v432_v2 = vld [vmem:[%s2836_s2 + $0x10] sm:$0xff]  ;;  %v493_v3 = vpack.c.bf16 %v437_v1, %v436_v0  ;;  %v433_v4 = vld [vmem:[%s2836_s2 + $0x18] sm:$0xff]  ;;  %v435_v6 = vld [vmem:[%s2836_s2 + $0x28] sm:$0xff]  ;;  %400 = vst.msk [vmem:[#allocation2] sm:$0xff] %vm399_vm0, %v2303_v7  ;;  %vm401_vm1 = vcmask 254976   ;;  %vm1537_vm14 = vcmask 253952  }
   0xd   : > { %403 = vst.msk [vmem:[#allocation2 + $0x10] sm:$0xff] %vm399_vm0, %v2303_v7  ;;  %405 = vst.msk [vmem:[#allocation2 + $0x20] sm:$0xff] %vm399_vm0, %v2303_v7  ;;  %v479_v8 = vpack.c.bf16 %v433_v4, %v432_v2  ;;  %v492_v9 = vpack.c.bf16 %v435_v6, %v434_v5  ;;  %v430_v10 = vld [vmem:[%s2836_s2] sm:$0xff]  ;;  %v431_v11 = vld [vmem:[%s2836_s2 + $0x8] sm:$0xff]  ;;  %s2852_s10 = smov (!%p2373_p3, %s2039_s10), 1 }
   0xe   : > { %407 = vst.msk [vmem:[#allocation2 + $0x30] sm:$0xff] %vm399_vm0, %v2303_v7  ;;  %409 = vst.msk [vmem:[#allocation2 + $0x40] sm:$0xff] %vm399_vm0, %v2303_v7  ;;  %v440_v12 = vld [vmem:[%s2836_s2 + $0x50] sm:$0xff]  ;;  %2166 = vmatprep.subr.bf16.mxu0 %v493_v3  ;;  %v478_v13 = vpack.c.bf16 %v431_v11, %v430_v10  ;;  %v441_v14 = vld [vmem:[%s2836_s2 + $0x58] sm:$0xff]  ;;  %s2422_s13 = sshll.u32 %s2852_s10, 6 }
   0xf   : > { %411 = vst.msk [vmem:[#allocation2 + $0x50] sm:$0xff] %vm399_vm0, %v2303_v7  ;;  %413 = vst.msk [vmem:[#allocation2 + $0x60] sm:$0xff] %vm399_vm0, %v2303_v7  ;;  %2167 = vmatpush3.bf16.msra.mxu0 %v493_v3  ;;  %2178 = vmatprep.subr.bf16.mxu1 %v479_v8  ;;  %v444_v15 = vld [vmem:[%s2836_s2 + $0x70] sm:$0xff]  ;;  %v445_v16 = vld [vmem:[%s2836_s2 + $0x78] sm:$0xff]  ;;  %s364_s20 = scalar_lea.vmem %s2834_s0, %s2422_s13  ;;  %v661_v17 = vpack.c.bf16 %v441_v14, %v440_v12  ;;  %s2658_s23 = scalar_lea.vmem %s2835_s1, %s2422_s13 }
  0x10   : > { %415 = vst.msk [vmem:[#allocation2 + $0x70] sm:$0xff] %vm399_vm0, %v2303_v7  ;;  %417 = vst.msk [vmem:[#allocation2 + $0x80] sm:$0xff] %vm399_vm0, %v2303_v7  ;;  %2179 = vmatpush3.bf16.msra.mxu1 %v479_v8  ;;  %2168 = vmatprep.subr.bf16.mxu0 %v492_v9  ;;  %v391_v18 = vld [vmem:[%s364_s20] sm:$0xff]  ;;  %v392_v19 = vld [vmem:[%s364_s20 + $0x8] sm:$0xff]  ;;  %v760_v21 = vpack.c.bf16 %v445_v16, %v444_v15  ;;  %s2719_s28 = scalar_lea.vmem %s2840_s6, %s2422_s13  ;;  %s2725_s12 = scalar_lea.vmem %s2841_s7, %s2422_s13 }
  0x11   : > { %419 = vst.msk [vmem:[#allocation2 + $0x90] sm:$0xff] %vm399_vm0, %v2303_v7  ;;  %2180 = vmatprep.subr.bf16.mxu1 %v478_v13  ;;  %v393_v20 = vld [vmem:[%s364_s20 + $0x10] sm:$0xff]  ;;  %v394_v22 = vld [vmem:[%s364_s20 + $0x18] sm:$0xff]  ;;  %v395_v23 = vld [vmem:[%s364_s20 + $0x20] sm:$0xff]  ;;  %s2740_s16 = scalar_lea.vmem %s2842_s8, %s2422_s13  ;;  %s2753_s19 = scalar_lea.vmem %s2843_s9, %s2422_s13 }
  0x12   : > { %402 = vst.msk [vmem:[#allocation2 + $0x8] sm:$0x3] %vm401_vm1, %v2303_v7  ;;  %404 = vst.msk [vmem:[#allocation2 + $0x18] sm:$0x3] %vm401_vm1, %v2303_v7  ;;  %v396_v24 = vld [vmem:[%s364_s20 + $0x28] sm:$0xff]  ;;  %v397_v25 = vld [vmem:[%s364_s20 + $0x30] sm:$0xff] }
  0x13   : > { %406 = vst.msk [vmem:[#allocation2 + $0x28] sm:$0x3] %vm401_vm1, %v2303_v7  ;;  %408 = vst.msk [vmem:[#allocation2 + $0x38] sm:$0x3] %vm401_vm1, %v2303_v7  ;;  %2169 = vmatpush3.bf16.msra.mxu0 %v492_v9  ;;  %v398_v26 = vld [vmem:[%s364_s20 + $0x38] sm:$0xff]  ;;  %v466_v28 = vld [vmem:[#allocation2] sm:$0xff] }
  0x14   : > { %410 = vst.msk [vmem:[#allocation2 + $0x48] sm:$0x3] %vm401_vm1, %v2303_v7  ;;  %412 = vst.msk [vmem:[#allocation2 + $0x58] sm:$0x3] %vm401_vm1, %v2303_v7  ;;  %2181 = vmatpush3.bf16.msra.mxu1 %v478_v13  ;;  %2190 = vmatprep.subr.bf16.mxu0 %v661_v17  ;;  %v438_v29 = vld [vmem:[%s2836_s2 + $0x40] sm:$0xff]  ;;  %v439_v30 = vld [vmem:[%s2836_s2 + $0x48] sm:$0xff] }
  0x15   : > { %414 = vst.msk [vmem:[#allocation2 + $0x68] sm:$0x3] %vm401_vm1, %v2303_v7  ;;  %416 = vst.msk [vmem:[#allocation2 + $0x78] sm:$0x3] %vm401_vm1, %v2303_v7  ;;  %2202 = vmatprep.subr.bf16.mxu1 %v760_v21  ;;  %v442_v31 = vld [vmem:[%s2836_s2 + $0x60] sm:$0xff]  ;;  %v443_v32 = vld [vmem:[%s2836_s2 + $0x68] sm:$0xff]  ;;  %v660_v46 = vpack.c.bf16 %v439_v30, %v438_v29 }
  0x16   : > { %418 = vst.msk [vmem:[#allocation2 + $0x88] sm:$0x3] %vm401_vm1, %v2303_v7  ;;  %420 = vst.msk [vmem:[#allocation2 + $0x98] sm:$0x3] %vm401_vm1, %v2303_v7  ;;  %v448_v49 = vld [vmem:[%s2836_s2 + $0x90] sm:$0xff]  ;;  %v449_v50 = vld [vmem:[%s2836_s2 + $0x98] sm:$0xff]  ;;  %v759_v53 = vpack.c.bf16 %v443_v32, %v442_v31 }
  0x17   : > { %422 = vst.msk [vmem:[#allocation2 + $0x11] sm:$0xff] %vm399_vm0, %v391_v18  ;;  %423 = vst.msk [vmem:[#allocation2 + $0x21] sm:$0xff] %vm399_vm0, %v392_v19  ;;  %v859_v59 = vpack.c.bf16 %v449_v50, %v448_v49  ;;  %v452_v60 = vld [vmem:[%s2836_s2 + $0xb0] sm:$0xff]  ;;  %v453_v61 = vld [vmem:[%s2836_s2 + $0xb8] sm:$0xff] }
  0x18   : > { %424 = vst.msk [vmem:[#allocation2 + $0x31] sm:$0xff] %vm399_vm0, %v393_v20  ;;  %425 = vst.msk [vmem:[#allocation2 + $0x41] sm:$0xff] %vm399_vm0, %v394_v22  ;;  %v958_v2 = vpack.c.bf16 %v453_v61, %v452_v60  ;;  %v446_v7 = vld [vmem:[%s2836_s2 + $0x80] sm:$0xff]  ;;  %v447_v8 = vld [vmem:[%s2836_s2 + $0x88] sm:$0xff] }
  0x19   : > { %426 = vst.msk [vmem:[#allocation2 + $0x51] sm:$0xff] %vm399_vm0, %v395_v23  ;;  %427 = vst.msk [vmem:[#allocation2 + $0x61] sm:$0xff] %vm399_vm0, %v396_v24  ;;  %v480_v27 = vld [vmem:[#allocation2 + $0x1] sm:$0xff]  ;;  %v858_v14 = vpack.c.bf16 %v447_v8, %v446_v7  ;;  %v456_v16 = vld [vmem:[%s2836_s2 + $0xd0] sm:$0xff] }
  0x1a   : > { %428 = vst.msk [vmem:[#allocation2 + $0x71] sm:$0xff] %vm399_vm0, %v397_v25  ;;  %429 = vst.msk [vmem:[#allocation2 + $0x81] sm:$0xff] %vm399_vm0, %v398_v26  ;;  %v648_v57 = vld [vmem:[#allocation2 + $0x2] sm:$0xff]  ;;  %v460_v23 = vld [vmem:[%s2836_s2 + $0xf0] sm:$0xff] }
  0x1b   : > { %v450_v12 = vld [vmem:[%s2836_s2 + $0xa0] sm:$0xff]  ;;  %v451_v13 = vld [vmem:[%s2836_s2 + $0xa8] sm:$0xff]  ;;  %v461_v24 = vld [vmem:[%s2836_s2 + $0xf8] sm:$0xff] }
  0x1c   : > { %v957_v18 = vpack.c.bf16 %v451_v13, %v450_v12  ;;  %v1157_v29 = vpack.c.bf16 %v461_v24, %v460_v23  ;;  %v454_v30 = vld [vmem:[%s2836_s2 + $0xc0] sm:$0xff]  ;;  %v455_v31 = vld [vmem:[%s2836_s2 + $0xc8] sm:$0xff] }
  0x1d   : > { %v462_v50 = vld [vmem:[%s2836_s2 + $0x100] sm:$0xff]  ;;  %v1398_v60 = vld [vmem:[%s2838_s4 + $0x8] sm:$0xff] }
  0x1e   : > { %v2454_v33 = vld [vmem:[#allocation2 + $0x11] sm:$0xff]  ;;  %v2456_v35 = vld [vmem:[#allocation2 + $0x21] sm:$0xff] }
  0x1f   : > { %v467_v34 = vld [vmem:[#allocation2 + $0x10] sm:$0xff]  ;;  %v488_v36 = vpack.c.bf16 %v2454_v33, %v480_v27  ;;  %v468_v39 = vld [vmem:[#allocation2 + $0x20] sm:$0xff]  ;;  %v854_v27 = vpack.c.bf16 %v2456_v35, %v2454_v33 }
  0x20   : > { %v474_v37 = vpack.c.bf16 %v467_v34, %v466_v28  ;;  %v2459_v38 = vld [vmem:[#allocation2 + $0x31] sm:$0xff]  ;;  %v2467_v43 = vld [vmem:[#allocation2 + $0x41] sm:$0xff]  ;;  %v755_v1 = vpack.c.bf16 %v468_v39, %v467_v34 }
  0x21   : > { %v469_v40 = vld [vmem:[#allocation2 + $0x30] sm:$0xff]  ;;  %v2463_v41 = vpack.c.bf16 %v2459_v38, %v2456_v35  ;;  %v470_v45 = vld [vmem:[#allocation2 + $0x40] sm:$0xff]  ;;  %2170 = vmatprep.mubr.msk.bf16.mxu0 %vm399_vm0, %v488_v36  ;;  %v855_v32 = vpack.c.bf16 %v2467_v43, %v2459_v38  ;;  %v459_v36 = vld [vmem:[%s2836_s2 + $0xe8] sm:$0xff] }
  0x22   : > { %v2465_v42 = vpack.c.bf16 %v469_v40, %v468_v39  ;;  %v2469_v44 = vld [vmem:[#allocation2 + $0x51] sm:$0xff]  ;;  %2182 = vmatprep.mubr.msk.bf16.mxu1 %vm399_vm0, %v474_v37  ;;  %v2489_v52 = vld [vmem:[#allocation2 + $0x61] sm:$0xff]  ;;  %v756_v10 = vpack.c.bf16 %v470_v45, %v469_v40  ;;  %v1057_v37 = vpack.c.bf16 %v455_v31, %v454_v30 }
  0x23   : > { %v2475_v47 = vpack.c.bf16 %v2469_v44, %v2467_v43  ;;  %v471_v48 = vld [vmem:[#allocation2 + $0x50] sm:$0xff]  ;;  %2171 = vmatmul.mubr.msk.bf16.vlgmr.msra.gmra.mxu0 %vm399_vm0, %v2463_v41  ;;  %v472_v55 = vld [vmem:[#allocation2 + $0x60] sm:$0xff]  ;;  %v856_v34 = vpack.c.bf16 %v2489_v52, %v2469_v44  ;;  %v465_v38 = vld [vmem:[%s2836_s2 + $0x118] sm:$0xff] }
  0x24   : > { %2183 = vmatmul.mubr.msk.bf16.vlgmr.msra.gmra.mxu1 %vm399_vm0, %v2465_v42  ;;  %v2487_v51 = vpack.c.bf16 %v471_v48, %v470_v45  ;;  %2191 = vmatpush3.bf16.msra.mxu0 %v661_v17  ;;  %v2493_v54 = vld [vmem:[#allocation2 + $0x71] sm:$0xff]  ;;  %v650_v3 = vld [vmem:[#allocation2 + $0x22] sm:$0xff]  ;;  %v757_v15 = vpack.c.bf16 %v472_v55, %v471_v48 }
  0x25   : > { %2174 = vmatprep.mubr.msk.bf16.mxu0 %vm399_vm0, %v2475_v47  ;;  %v2495_v56 = vld [vmem:[#allocation2 + $0x70] sm:$0xff]  ;;  %2192 = vmatprep.subr.bf16.mxu0 %v660_v46  ;;  %v2507_v62 = vpack.c.bf16 %v2493_v54, %v2489_v52  ;;  %v652_v5 = vld [vmem:[#allocation2 + $0x42] sm:$0xff]  ;;  %v457_v17 = vld [vmem:[%s2836_s2 + $0xd8] sm:$0xff] }
  0x26   : > { %2186 = vmatprep.mubr.msk.bf16.mxu1 %vm399_vm0, %v2487_v51  ;;  %v649_v58 = vld [vmem:[#allocation2 + $0x12] sm:$0xff]  ;;  %2203 = vmatpush3.bf16.msra.mxu1 %v760_v21  ;;  %v2510_v63 = vpack.c.bf16 %v2495_v56, %v472_v55  ;;  %v654_v19 = vld [vmem:[#allocation2 + $0x62] sm:$0xff]  ;;  %v1058_v22 = vpack.c.bf16 %v457_v17, %v456_v16 }
  0x27   : > { %2204 = vmatprep.subr.bf16.mxu1 %v759_v53  ;;  %v656_v0 = vpack.c.bf16 %v649_v58, %v648_v57  ;;  %v651_v4 = vld [vmem:[#allocation2 + $0x32] sm:$0xff]  ;;  %v2545_v21 = vld [vmem:[#allocation2 + $0x80] sm:$0xff]  ;;  %v953_v28 = vpack.c.bf16 %v650_v3, %v649_v58  ;;  %v463_v52 = vld [vmem:[%s2836_s2 + $0x108] sm:$0xff] }
  0x28   : > { %2193 = vmatpush3.bf16.msra.mxu0 %v660_v46  ;;  %v653_v6 = vld [vmem:[#allocation2 + $0x52] sm:$0xff]  ;;  %v2524_v9 = vpack.c.bf16 %v651_v4, %v650_v3  ;;  %v758_v26 = vpack.c.bf16 %v2545_v21, %v2495_v56  ;;  %v954_v33 = vpack.c.bf16 %v652_v5, %v651_v4  ;;  %v458_v35 = vld [vmem:[%s2836_s2 + $0xe0] sm:$0xff] }
  0x29   : > { %2214 = vmatprep.subr.bf16.mxu0 %v859_v59  ;;  %v2526_v11 = vpack.c.bf16 %v653_v6, %v652_v5  ;;  %v655_v20 = vld [vmem:[#allocation2 + $0x72] sm:$0xff]  ;;  %v955_v39 = vpack.c.bf16 %v654_v19, %v653_v6  ;;  %v1156_v43 = vpack.c.bf16 %v459_v36, %v458_v35  ;;  %v853_v44 = vld [vmem:[#allocation2 + $0x81] sm:$0xff] }
  0x2a   : > { %2205 = vmatpush3.bf16.msra.mxu1 %v759_v53  ;;  %v2554_v25 = vpack.c.bf16 %v655_v20, %v654_v19  ;;  %v464_v40 = vld [vmem:[%s2836_s2 + $0x110] sm:$0xff]  ;;  %v952_v45 = vld [vmem:[#allocation2 + $0x82] sm:$0xff]  ;;  %v857_v48 = vpack.c.bf16 %v853_v44, %v2493_v54  ;;  %v1255_v53 = vpack.c.bf16 %v463_v52, %v462_v50  ;;  %v1400_v57 = vld [vmem:[%s2838_s4 + $0x18] sm:$0xff] }
  0x2b   : > { %2175 = vmatmul.mubr.msk.bf16.gmra.mxu0 %vm399_vm0, %v2507_v62  ;;  %2226 = vmatprep.subr.bf16.mxu1 %v958_v2  ;;  %v1256_v46 = vpack.c.bf16 %v465_v38, %v464_v40  ;;  %v956_v49 = vpack.c.bf16 %v952_v45, %v655_v20  ;;  %v1399_v56 = vld [vmem:[%s2838_s4 + $0x10] sm:$0xff] }
  0x2c   : > { %2187 = vmatmul.mubr.msk.bf16.gmra.mxu1 %vm399_vm0, %v2510_v63  ;;  %2194 = vmatprep.mubr.msk.bf16.mxu0 %vm399_vm0, %v656_v0  ;;  %v1406_v58 = vpack.c.bf16 %v1400_v57, %v1399_v56 }
  0x2d   : > { %2206 = vmatprep.mubr.msk.bf16.mxu1 %vm399_vm0, %v755_v1 }
  0x33   : > { %2195 = vmatmul.mubr.msk.bf16.vlgmr.msra.gmra.mxu0 %vm399_vm0, %v2524_v9 }
  0x34   : > { %2207 = vmatmul.mubr.msk.bf16.vlgmr.msra.gmra.mxu1 %vm399_vm0, %v756_v10  ;;  %2215 = vmatpush3.bf16.msra.mxu0 %v859_v59  ;;  %v1397_v59 = vld [vmem:[%s2838_s4] sm:$0xff] }
  0x35   : > { %2198 = vmatprep.mubr.msk.bf16.mxu0 %vm399_vm0, %v2526_v11  ;;  %2216 = vmatprep.subr.bf16.mxu0 %v858_v14  ;;  %v1405_v61 = vpack.c.bf16 %v1398_v60, %v1397_v59 }
  0x36   : > { %2210 = vmatprep.mubr.msk.bf16.mxu1 %vm399_vm0, %v757_v15  ;;  %2227 = vmatpush3.bf16.msra.mxu1 %v958_v2 }
  0x37   : > { %2228 = vmatprep.subr.bf16.mxu1 %v957_v18 }
  0x38   : > { %2217 = vmatpush3.bf16.msra.mxu0 %v858_v14 }
  0x39   : > { %2238 = vmatprep.subr.bf16.mxu0 %v1058_v22 }
  0x3a   : > { %2229 = vmatpush3.bf16.msra.mxu1 %v957_v18 }
  0x3b   : > { %2199 = vmatmul.mubr.msk.bf16.gmra.mxu0 %vm399_vm0, %v2554_v25  ;;  %2250 = vmatprep.subr.bf16.mxu1 %v1157_v29 }
  0x3c   : > { %2211 = vmatmul.mubr.msk.bf16.gmra.mxu1 %vm399_vm0, %v758_v26  ;;  %2218 = vmatprep.mubr.msk.bf16.mxu0 %vm399_vm0, %v854_v27 }
  0x3d   : > { %2230 = vmatprep.mubr.msk.bf16.mxu1 %vm399_vm0, %v953_v28 }
  0x43   : > { %2219 = vmatmul.mubr.msk.bf16.vlgmr.msra.gmra.mxu0 %vm399_vm0, %v855_v32 }
  0x44   : > { %2231 = vmatmul.mubr.msk.bf16.vlgmr.msra.gmra.mxu1 %vm399_vm0, %v954_v33  ;;  %2239 = vmatpush3.bf16.msra.mxu0 %v1058_v22 }
  0x45   : > { %2222 = vmatprep.mubr.msk.bf16.mxu0 %vm399_vm0, %v856_v34  ;;  %2240 = vmatprep.subr.bf16.mxu0 %v1057_v37 }
  0x46   : > { %2234 = vmatprep.mubr.msk.bf16.mxu1 %vm399_vm0, %v955_v39  ;;  %2251 = vmatpush3.bf16.msra.mxu1 %v1157_v29 }
  0x47   : > { %2252 = vmatprep.subr.bf16.mxu1 %v1156_v43 }
  0x48   : > { %2241 = vmatpush3.bf16.msra.mxu0 %v1057_v37 }
  0x49   : > { %2262 = vmatprep.subr.bf16.mxu0 %v1256_v46 }
  0x4a   : > { %2253 = vmatpush3.bf16.msra.mxu1 %v1156_v43 }
  0x4b   : > { %2223 = vmatmul.mubr.msk.bf16.gmra.mxu0 %vm399_vm0, %v857_v48  ;;  %2274 = vmatprep.subr.bf16.mxu1 %v1406_v58 }
  0x4c   : > { %2235 = vmatmul.mubr.msk.bf16.gmra.mxu1 %vm399_vm0, %v956_v49  ;;  %2242 = vmatprep.mubr.msk.bf16.mxu0 %vm399_vm0, %v2465_v42  ;;  %v1151_v42 = vld [vmem:[#allocation2 + $0x91] sm:$0xff] }
  0x4d   : > { %2254 = vmatprep.mubr.msk.bf16.mxu1 %vm399_vm0, %v2463_v41  ;;  %v1052_v41 = vld [vmem:[#allocation2 + $0x90] sm:$0xff]  ;;  %v1155_v55 = vpack.c.bf16 %v1151_v42, %v853_v44 }
  0x4e   : > { %v1056_v54 = vpack.c.bf16 %v1052_v41, %v2545_v21 }
  0x53   : > { %2243 = vmatmul.mubr.msk.bf16.vlgmr.msra.gmra.mxu0 %vm399_vm0, %v2487_v51 }
  0x54   : > { %2255 = vmatmul.mubr.msk.bf16.vlgmr.msra.gmra.mxu1 %vm399_vm0, %v2475_v47  ;;  %2263 = vmatpush3.bf16.msra.mxu0 %v1256_v46  ;;  %v1250_v47 = vld [vmem:[#allocation2 + $0x92] sm:$0xff] }
  0x55   : > { %2246 = vmatprep.mubr.msk.bf16.mxu0 %vm399_vm0, %v2510_v63  ;;  %2264 = vmatprep.subr.bf16.mxu0 %v1255_v53  ;;  %v1254_v51 = vpack.c.bf16 %v1250_v47, %v952_v45 }
  0x56   : > { %2258 = vmatprep.mubr.msk.bf16.mxu1 %vm399_vm0, %v2507_v62  ;;  %2275 = vmatpush3.bf16.msra.mxu1 %v1406_v58 }
  0x57   : > { %2276 = vmatprep.subr.bf16.mxu1 %v1405_v61 }
  0x58   : > { %2265 = vmatpush3.bf16.msra.mxu0 %v1255_v53 }
  0x5a   : > { %2277 = vmatpush3.bf16.msra.mxu1 %v1405_v61 }
  0x5b   : > { %2247 = vmatmul.mubr.msk.bf16.gmra.mxu0 %vm399_vm0, %v1056_v54 }
  0x5c   : > { %2259 = vmatmul.mubr.msk.bf16.gmra.mxu1 %vm399_vm0, %v1155_v55  ;;  %2266 = vmatprep.mubr.msk.bf16.mxu0 %vm399_vm0, %v2524_v9 }
  0x63   : > { %2267 = vmatmul.mubr.msk.bf16.vlgmr.msra.gmra.mxu0 %vm399_vm0, %v2526_v11 }
  0x64   : > { %2270 = vmatprep.mubr.msk.bf16.mxu0 %vm399_vm0, %v2554_v25 }
  0x6b   : > { %2271 = vmatmul.mubr.msk.bf16.gmra.mxu0 %vm399_vm0, %v1254_v51 }
  0xe3   : > { %v2172_v62 = vpop.f32.mrf.mxu0 }
  0xe4   : > { %v2184_v63 = vpop.f32.mrf.mxu1 }
  0xe5   : > { %v540_v0 = vpop.f32.mrf.mxu0  ;;  %v626_v46 = vadd.f32 %v2184_v63, %v2172_v62 }
  0xe6   : > { %v617_v1 = vpop.f32.mrf.mxu1 }
  0xe7   : > { %v2173_v2 = vpop.f32.mrf.mxu0  ;;  %v618_v50 = vadd.f32 %v617_v1, %v540_v0 }
  0xe8   : > { %v2185_v3 = vpop.f32.mrf.mxu1 }
  0xe9   : > { %v543_v4 = vpop.f32.mrf.mxu0  ;;  %v629_v42 = vadd.f32 %v2185_v3, %v2173_v2 }
  0xea   : > { %v620_v5 = vpop.f32.mrf.mxu1 }
  0xeb   : > { %v2176_v6 = vpop.f32.mrf.mxu0  ;;  %v621_v57 = vadd.f32 %v620_v5, %v543_v4 }
  0xec   : > { %v2188_v7 = vpop.f32.mrf.mxu1 }
  0xed   : > { %v556_v8 = vpop.f32.mrf.mxu0  ;;  %v642_v59 = vadd.f32 %v2188_v7, %v2176_v6 }
  0xee   : > { %v633_v9 = vpop.f32.mrf.mxu1 }
  0xef   : > { %v2177_v10 = vpop.f32.mrf.mxu0 }
  0xf0   : > { %v2189_v11 = vpop.f32.mrf.mxu1 }
  0xf1   : > { %v559_v12 = vpop.f32.mrf.mxu0  ;;  %v645_v2 = vadd.f32 %v2189_v11, %v2177_v10 }
  0xf2   : > { %v636_v13 = vpop.f32.mrf.mxu1 }
  0xf3   : > { %v2196_v14 = vpop.f32.mrf.mxu0 }
  0xf4   : > { %v2208_v15 = vpop.f32.mrf.mxu1  ;;  %v741_v52 = vadd.f32 %v2196_v14, %v626_v46 }
  0xf5   : > { %v708_v16 = vpop.f32.mrf.mxu0 }
  0xf6   : > { %v807_v17 = vpop.f32.mrf.mxu1  ;;  %v739_v54 = vadd.f32 %v708_v16, %v618_v50  ;;  %v840_v47 = vadd.f32 %v2208_v15, %v741_v52  ;;  %v637_v15 = vadd.f32 %v636_v13, %v559_v12 }
  0xf7   : > { %v2197_v18 = vpop.f32.mrf.mxu0 }
  0xf8   : > { %v2209_v19 = vpop.f32.mrf.mxu1  ;;  %v742_v51 = vadd.f32 %v2197_v18, %v629_v42  ;;  %v838_v60 = vadd.f32 %v807_v17, %v739_v54 }
  0xf9   : > { %v711_v20 = vpop.f32.mrf.mxu0 }
  0xfa   : > { %v810_v21 = vpop.f32.mrf.mxu1  ;;  %v740_v62 = vadd.f32 %v711_v20, %v621_v57 }
  0xfb   : > { %v2200_v22 = vpop.f32.mrf.mxu0 }
  0xfc   : > { %v2212_v23 = vpop.f32.mrf.mxu1  ;;  %v839_v18 = vadd.f32 %v810_v21, %v740_v62 }
  0xfd   : > { %v724_v24 = vpop.f32.mrf.mxu0 }
  0xfe   : > { %v823_v25 = vpop.f32.mrf.mxu1 }
  0xff   : > { %v2201_v26 = vpop.f32.mrf.mxu0 }
 0x100   : > { %v2634_v27 = vpop.f32.mrf.mxu1  ;;  %v746_v5 = vadd.f32 %v2201_v26, %v645_v2 }
 0x101   : > { %v727_v28 = vpop.f32.mrf.mxu0 }
 0x102   : > { %v2636_v29 = vpop.f32.mrf.mxu1  ;;  %v845_v10 = vadd.f32 %v2634_v27, %v746_v5 }
 0x103   : > { %2845 = vst [vmem:[#allocation4_spill] sm:$0xff] %v2636_v29  ;;  %v2220_v30 = vpop.f32.mrf.mxu0  ;;  %v841_v29 = vadd.f32 %v2209_v19, %v742_v51 }
 0x104   : > { %v2232_v31 = vpop.f32.mrf.mxu1  ;;  %v939_v61 = vadd.f32 %v2220_v30, %v840_v47 }
 0x105   : > { %v906_v32 = vpop.f32.mrf.mxu0 }
 0x106   : > { %v1005_v33 = vpop.f32.mrf.mxu1  ;;  %v937_v0 = vadd.f32 %v906_v32, %v838_v60  ;;  %v1038_v3 = vadd.f32 %v2232_v31, %v939_v61 }
 0x107   : > { %v2221_v34 = vpop.f32.mrf.mxu0 }
 0x108   : > { %v2233_v35 = vpop.f32.mrf.mxu1  ;;  %v940_v16 = vadd.f32 %v2221_v34, %v841_v29  ;;  %v1036_v6 = vadd.f32 %v1005_v33, %v937_v0  ;;  %v2647_v34 = vld [vmem:[%s2837_s3] ss:$0 sm:$0xff] }
 0x109   : > { %v909_v36 = vpop.f32.mrf.mxu0 }
 0x10a   : > { %v1008_v37 = vpop.f32.mrf.mxu1  ;;  %v938_v20 = vadd.f32 %v909_v36, %v839_v18  ;;  %v2848_v21 = vld [vmem:[#allocation4_spill] sm:$0xff] }
 0x10b   : > { %v2224_v39 = vpop.f32.mrf.mxu0 }
 0x10c   : > { %v2236_v40 = vpop.f32.mrf.mxu1  ;;  %v1037_v26 = vadd.f32 %v1008_v37, %v938_v20  ;;  %v1383_v20 = vld [vmem:[%s2658_s23 + $0x10] sm:$0xff] }
 0x10d   : > { %v922_v38 = vpop.f32.mrf.mxu0 }
 0x10e   : > { %v1021_v43 = vpop.f32.mrf.mxu1 }
 0x10f   : > { %v2225_v44 = vpop.f32.mrf.mxu0 }
 0x110   : > { %v2638_v45 = vpop.f32.mrf.mxu1  ;;  %v944_v33 = vadd.f32 %v2225_v44, %v845_v10 }
 0x111   : > { %2846 = vst [vmem:[#allocation5_spill] sm:$0xff] %v2638_v45  ;;  %v925_v48 = vpop.f32.mrf.mxu0  ;;  %v634_v45 = vadd.f32 %v633_v9, %v556_v8  ;;  %v744_v9 = vadd.f32 %v727_v28, %v637_v15 }
 0x112   : > { %v2640_v49 = vpop.f32.mrf.mxu1 }
 0x113   : > { %2847 = vst [vmem:[#allocation6_spill] sm:$0xff] %v2640_v49  ;;  %v2244_v53 = vpop.f32.mrf.mxu0  ;;  %v745_v49 = vadd.f32 %v2200_v22, %v642_v59  ;;  %v743_v14 = vadd.f32 %v724_v24, %v634_v45  ;;  %v1039_v22 = vadd.f32 %v2233_v35, %v940_v16 }
 0x114   : > { %v2256_v41 = vpop.f32.mrf.mxu1  ;;  %v1138_v7 = vadd.f32 %v2244_v53, %v1038_v3 }
 0x115   : > { %v1105_v55 = vpop.f32.mrf.mxu0  ;;  %v844_v4 = vadd.f32 %v2212_v23, %v745_v49  ;;  %v842_v8 = vadd.f32 %v823_v25, %v743_v14  ;;  %v843_v23 = vadd.f32 %v2848_v21, %v744_v9 }
 0x116   : > { %v1204_v56 = vpop.f32.mrf.mxu1  ;;  %v1136_v32 = vadd.f32 %v1105_v55, %v1036_v6  ;;  %v1237_v11 = vadd.f32 %v2256_v41, %v1138_v7  ;;  %v1381_v6 = vld [vmem:[%s2658_s23] sm:$0xff] }
 0x117   : > { %v2245_v58 = vpop.f32.mrf.mxu0  ;;  %v943_v30 = vadd.f32 %v2224_v39, %v844_v4  ;;  %v941_v24 = vadd.f32 %v922_v38, %v842_v8  ;;  %v942_v27 = vadd.f32 %v925_v48, %v843_v23 }
 0x118   : > { %v2257_v1 = vpop.f32.mrf.mxu1  ;;  %v1139_v12 = vadd.f32 %v2245_v58, %v1039_v22  ;;  %v1235_v25 = vadd.f32 %v1204_v56, %v1136_v32  ;;  %v2849_v44 = vld [vmem:[#allocation5_spill] sm:$0xff] }
 0x119   : > { %v1108_v63 = vpop.f32.mrf.mxu0  ;;  %v1042_v31 = vadd.f32 %v2236_v40, %v943_v30  ;;  %v1040_v35 = vadd.f32 %v1021_v43, %v941_v24  ;;  %v1043_v42 = vadd.f32 %v2849_v44, %v944_v33 }
 0x11a   : > { %v1207_v17 = vpop.f32.mrf.mxu1  ;;  %v1137_v36 = vadd.f32 %v1108_v63, %v1037_v26  ;;  %v1238_v38 = vadd.f32 %v2257_v1, %v1139_v12  ;;  %v2850_v56 = vld [vmem:[#allocation6_spill] sm:$0xff] }
 0x11b   : > { %v2248_v46 = vpop.f32.mrf.mxu0  ;;  %v1041_v43 = vadd.f32 %v2850_v56, %v942_v27 }
 0x11c   : > { %v2260_v13 = vpop.f32.mrf.mxu1  ;;  %v1142_v49 = vadd.f32 %v2248_v46, %v1042_v31  ;;  %v1236_v47 = vadd.f32 %v1207_v17, %v1137_v36  ;;  %v1382_v17 = vld [vmem:[%s2658_s23 + $0x8] sm:$0xff] }
 0x11d   : > { %v1121_v50 = vpop.f32.mrf.mxu0 }
 0x11e   : > { %v1220_v52 = vpop.f32.mrf.mxu1  ;;  %v1140_v41 = vadd.f32 %v1121_v50, %v1040_v35  ;;  %v1241_v57 = vadd.f32 %v2260_v13, %v1142_v49  ;;  %v1384_v50 = vld [vmem:[%s2658_s23 + $0x18] sm:$0xff]  ;;  %v1386_v49 = vld [vmem:[%s2658_s23 + $0x28] sm:$0xff] }
 0x11f   : > { %v2249_v19 = vpop.f32.mrf.mxu0  ;;  %v1388_v35 = vld [vmem:[%s2658_s23 + $0x38] sm:$0xff] }
 0x120   : > { %v1143_v48 = vadd.f32 %v2249_v19, %v1043_v42  ;;  %v2261_v58 = vpop.f32.mrf.mxu1  ;;  %v1239_v60 = vadd.f32 %v1220_v52, %v1140_v41 }
 0x121   : > { %v1124_v45 = vpop.f32.mrf.mxu0 }
 0x122   : > { %v1141_v46 = vadd.f32 %v1124_v45, %v1041_v43  ;;  %v1242_v16 = vadd.f32 %v2261_v58, %v1143_v48  ;;  %v1223_v15 = vpop.f32.mrf.mxu1 }
 0x123   : > { %v2268_v29 = vpop.f32.mrf.mxu0 }
 0x124   : > { %v1336_v28 = vadd.f32 %v2268_v29, %v1237_v11  ;;  %v1240_v32 = vadd.f32 %v1223_v15, %v1141_v46 }
 0x125   : > { %v1303_v39 = vpop.f32.mrf.mxu0 }
 0x126   : > { %v1334_v53 = vadd.f32 %v1303_v39, %v1235_v25  ;;  %v1351_v37 = vadd.f32 %v2647_v34, %v1336_v28  ;;  %v1385_v39 = vld [vmem:[%s2658_s23 + $0x20] sm:$0xff] }
 0x127   : > { %v2269_v40 = vpop.f32.mrf.mxu0 }
 0x128   : > { %v1349_v54 = vadd.f32 %v2647_v34, %v1334_v53  ;;  %v1337_v55 = vadd.f32 %v2269_v40, %v1238_v38  ;;  %v1367_v61 = vmul.f32 0.1, %v1351_v37  ;;  %vm1359_vm4 = vcmp.ge.f32.partialorder %v1351_v37, 0.0  ;;  %v1387_v53 = vld [vmem:[%s2658_s23 + $0x30] sm:$0xff] }
 0x129   : > { %v1306_v51 = vpop.f32.mrf.mxu0 }
 0x12a   : > { %v1352_v59 = vadd.f32 %v2647_v34, %v1337_v55  ;;  %v1365_v62 = vmul.f32 0.1, %v1349_v54  ;;  %v1335_v63 = vadd.f32 %v1306_v51, %v1236_v47  ;;  %vm1357_vm2 = vcmp.ge.f32.partialorder %v1349_v54, 0.0  ;;  %v2093_v55 = vld [vmem:[%s2839_s5] ss:$0 sm:$0xff] }
 0x12b   : > { %v2272_v0 = vpop.f32.mrf.mxu0  ;;  %v1375_v9 = vsel %vm1359_vm4, %v1351_v37, %v1367_v61 }
 0x12c   : > { %vm1360_vm3 = vcmp.ge.f32.partialorder %v1352_v59, 0.0  ;;  %v1368_v1 = vmul.f32 0.1, %v1352_v59  ;;  %v1340_v14 = vadd.f32 %v2272_v0, %v1241_v57  ;;  %v1350_v2 = vadd.f32 %v2647_v34, %v1335_v63 }
 0x12d   : > { %v1319_v3 = vpop.f32.mrf.mxu0  ;;  %v1373_v5 = vsel %vm1357_vm2, %v1349_v54, %v1365_v62  ;;  %v1391_v13 = vadd.f32 %v1383_v20, %v1375_v9 }
 0x12e   : > { %v1376_v18 = vsel %vm1360_vm3, %v1352_v59, %v1368_v1  ;;  %v1338_v4 = vadd.f32 %v1319_v3, %v1239_v60  ;;  %vm1358_vm5 = vcmp.ge.f32.partialorder %v1350_v2, 0.0  ;;  %v1366_v7 = vmul.f32 0.1, %v1350_v2 }
 0x12f   : > { %v2273_v8 = vpop.f32.mrf.mxu0  ;;  %v1355_v19 = vadd.f32 %v2647_v34, %v1340_v14  ;;  %v1392_v24 = vadd.f32 %v1384_v50, %v1376_v18  ;;  %v1389_v11 = vadd.f32 %v1381_v6, %v1373_v5 }
 0x130   : > { %v1353_v22 = vadd.f32 %v2647_v34, %v1338_v4  ;;  %v1341_v30 = vadd.f32 %v2273_v8, %v1242_v16  ;;  %v1374_v45 = vsel %vm1358_vm5, %v1350_v2, %v1366_v7 }
 0x131   : > { %v1322_v10 = vpop.f32.mrf.mxu0  ;;  %v1390_v12 = vadd.f32 %v1382_v17, %v1374_v45  ;;  %vm1363_vm6 = vcmp.ge.f32.partialorder %v1355_v19, 0.0  ;;  %v1371_v29 = vmul.f32 0.1, %v1355_v19  ;;  %v1402_v33 = vpack.c.bf16 %v1392_v24, %v1391_v13 }
 0x132   : > { %v1369_v21 = vmul.f32 0.1, %v1353_v22  ;;  %v1356_v23 = vadd.f32 %v2647_v34, %v1341_v30  ;;  %v1339_v26 = vadd.f32 %v1322_v10, %v1240_v32  ;;  %vm1361_vm7 = vcmp.ge.f32.partialorder %v1353_v22, 0.0 }
 0x133   : > { %v1401_v31 = vpack.c.bf16 %v1390_v12, %v1389_v11  ;;  %v1379_v52 = vsel %vm1363_vm6, %v1355_v19, %v1371_v29 }
 0x134   : > { %vm1364_vm8 = vcmp.ge.f32.partialorder %v1356_v23, 0.0  ;;  %v1372_v25 = vmul.f32 0.1, %v1356_v23  ;;  %v1354_v28 = vadd.f32 %v2647_v34, %v1339_v26  ;;  %v1377_v36 = vsel %vm1361_vm7, %v1353_v22, %v1369_v21 }
 0x135   : > { %2278 = vmatprep.mubr.msk.bf16.mxu1 %vm399_vm0, %v1401_v31  ;;  %v1393_v40 = vadd.f32 %v1385_v39, %v1377_v36  ;;  %v1395_v42 = vadd.f32 %v1387_v53, %v1379_v52 }
 0x136   : > { %v1380_v27 = vsel %vm1364_vm8, %v1356_v23, %v1372_v25  ;;  %vm1362_vm9 = vcmp.ge.f32.partialorder %v1354_v28, 0.0  ;;  %v1370_v38 = vmul.f32 0.1, %v1354_v28  ;;  %2279 = vmatmul.mubr.msk.bf16.vlgmr.msra.gmra.mxu1 %vm399_vm0, %v1402_v33 }
 0x137   : > { %v1396_v41 = vadd.f32 %v1388_v35, %v1380_v27 }
 0x138   : > { %v1378_v37 = vsel %vm1362_vm9, %v1354_v28, %v1370_v38 }
 0x139   : > { %v1394_v44 = vadd.f32 %v1386_v49, %v1378_v37  ;;  %v1404_v54 = vpack.c.bf16 %v1396_v41, %v1395_v42 }
 0x13b   : > { %v1403_v34 = vpack.c.bf16 %v1394_v44, %v1393_v40 }
 0x13d   : > { %2282 = vmatprep.mubr.msk.bf16.mxu1 %vm399_vm0, %v1403_v34 }
 0x13e   : > { %2283 = vmatmul.mubr.msk.bf16.gmra.mxu1 %vm399_vm0, %v1404_v54 }
 0x1f6   : > { %v2280_v47 = vpop.f32.mrf.mxu1 }
 0x1f7   : > { %v1469_v51 = vadd.f32 %v2280_v47, %v2093_v55 }
 0x1f8   : > { %v1460_v56 = vpop.f32.mrf.mxu1 }
 0x1f9   : > { %vm1493_vm10 = vcmp.ge.f32.partialorder %v1469_v51, 0.0  ;;  %v1501_v43 = vmul.f32 0.1, %v1469_v51  ;;  %v1461_v57 = vadd.f32 %v2093_v55, %v1460_v56 }
 0x1fa   : > { %v2281_v48 = vpop.f32.mrf.mxu1 }
 0x1fb   : > { %v1509_v58 = vsel %vm1493_vm10, %v1469_v51, %v1501_v43  ;;  %vm1491_vm11 = vcmp.ge.f32.partialorder %v1461_v57, 0.0  ;;  %v1499_v59 = vmul.f32 0.1, %v1461_v57  ;;  %v1472_v60 = vadd.f32 %v2281_v48, %v2093_v55 }
 0x1fc   : > { %1518 = vst.msk [vmem:[#allocation3 + $0x31] sm:$0xff] %vm399_vm0, %v1509_v58  ;;  %v1463_v61 = vpop.f32.mrf.mxu1 }
 0x1fd   : > { %v1507_v62 = vsel %vm1491_vm11, %v1461_v57, %v1499_v59  ;;  %vm1494_vm12 = vcmp.ge.f32.partialorder %v1472_v60, 0.0  ;;  %v1502_v63 = vmul.f32 0.1, %v1472_v60  ;;  %v1464_v0 = vadd.f32 %v2093_v55, %v1463_v61 }
 0x1fe   : > { %1516 = vst.msk [vmem:[#allocation3 + $0x11] sm:$0xff] %vm399_vm0, %v1507_v62  ;;  %1524 = vst.msk [vmem:[#allocation3 + $0x1] sm:$0xff] %vm399_vm0, %v1507_v62  ;;  %v2284_v1 = vpop.f32.mrf.mxu1 }
 0x1ff   : > { %v1510_v14 = vsel %vm1494_vm12, %v1472_v60, %v1502_v63  ;;  %vm1492_vm13 = vcmp.ge.f32.partialorder %v1464_v0, 0.0  ;;  %v1500_v46 = vmul.f32 0.1, %v1464_v0  ;;  %v1485_v2 = vadd.f32 %v2284_v1, %v2093_v55 }
 0x200   : > { %1519 = vst.msk [vmem:[#allocation3 + $0x41] sm:$0xff] %vm399_vm0, %v1510_v14  ;;  %v1476_v3 = vpop.f32.mrf.mxu1 }
 0x201   : > { %v1508_v16 = vsel %vm1492_vm13, %v1464_v0, %v1500_v46  ;;  %vm1497_vm15 = vcmp.ge.f32.partialorder %v1485_v2, 0.0  ;;  %v1505_v15 = vmul.f32 0.1, %v1485_v2  ;;  %v1477_v18 = vadd.f32 %v2093_v55, %v1476_v3 }
 0x202   : > { %1517 = vst.msk [vmem:[#allocation3 + $0x21] sm:$0xff] %vm399_vm0, %v1508_v16  ;;  %v2285_v50 = vpop.f32.mrf.mxu1 }
 0x203   : > { %v1530_v4 = vld [vmem:[#allocation3 + $0x31] sm:$0x1]  ;;  %v1551_v5 = vld [vmem:[#allocation3 + $0x38] sm:$0x1]  ;;  %v1513_v6 = vsel %vm1497_vm15, %v1485_v2, %v1505_v15  ;;  %vm1495_vm1 = vcmp.ge.f32.partialorder %v1477_v18, 0.0  ;;  %v1488_v7 = vadd.f32 %v2285_v50, %v2093_v55 }
 0x204   : > { %1541 = vst.msk [vmem:[#allocation3 + $0x30] sm:$0x1] %vm1537_vm14, %v1530_v4  ;;  %1561 = vst.msk [vmem:[#allocation3 + $0x39] sm:$0x1] %vm1537_vm14, %v1551_v5  ;;  %v1503_v17 = vmul.f32 0.1, %v1477_v18  ;;  %v1479_v8 = vpop.f32.mrf.mxu1 }
 0x205   : > { %1522 = vst.msk [vmem:[#allocation3 + $0x71] sm:$0xff] %vm399_vm0, %v1513_v6  ;;  %v1527_v9 = vld [vmem:[#allocation3 + $0x1] sm:$0x1]  ;;  %v1528_v20 = vld [vmem:[#allocation3 + $0x11] sm:$0x1]  ;;  %v1480_v22 = vadd.f32 %v2093_v55, %v1479_v8  ;;  %vm1498_vm2 = vcmp.ge.f32.partialorder %v1488_v7, 0.0 }
 0x206   : > { %v1548_v19 = vld [vmem:[#allocation3 + $0x8] sm:$0x1]  ;;  %1538 = vst.msk [vmem:[#allocation3] sm:$0x1] %vm1537_vm14, %v1527_v9  ;;  %1539 = vst.msk [vmem:[#allocation3 + $0x10] sm:$0x1] %vm1537_vm14, %v1528_v20  ;;  %v1511_v32 = vsel %vm1495_vm1, %v1477_v18, %v1503_v17 }
 0x207   : > { %v1549_v30 = vld [vmem:[#allocation3 + $0x18] sm:$0x1]  ;;  %1558 = vst.msk [vmem:[#allocation3 + $0x9] sm:$0x1] %vm1537_vm14, %v1548_v19  ;;  %v1531_v24 = vld [vmem:[#allocation3 + $0x41] sm:$0x1] }
 0x208   : > { %1559 = vst.msk [vmem:[#allocation3 + $0x19] sm:$0x1] %vm1537_vm14, %v1549_v30  ;;  %v1552_v45 = vld [vmem:[#allocation3 + $0x48] sm:$0x1]  ;;  %v1570_v10 = vld [vmem:[#allocation3 + $0x31] sm:$0xff]  ;;  %vm1496_vm3 = vcmp.ge.f32.partialorder %v1480_v22, 0.0 }
 0x209   : > { %1520 = vst.msk [vmem:[#allocation3 + $0x51] sm:$0xff] %vm399_vm0, %v1511_v32  ;;  %v1506_v11 = vmul.f32 0.1, %v1488_v7  ;;  %v1504_v12 = vmul.f32 0.1, %v1480_v22  ;;  %v1568_v23 = vld [vmem:[#allocation3 + $0x11] sm:$0xff] }
 0x20a   : > { %1542 = vst.msk [vmem:[#allocation3 + $0x40] sm:$0x1] %vm1537_vm14, %v1531_v24  ;;  %1562 = vst.msk [vmem:[#allocation3 + $0x49] sm:$0x1] %vm1537_vm14, %v1552_v45  ;;  %v1529_v13 = vld [vmem:[#allocation3 + $0x21] sm:$0x1] }
 0x20b   : > { %v1550_v21 = vld [vmem:[#allocation3 + $0x28] sm:$0x1]  ;;  %1540 = vst.msk [vmem:[#allocation3 + $0x20] sm:$0x1] %vm1537_vm14, %v1529_v13  ;;  %v1514_v31 = vsel %vm1498_vm2, %v1488_v7, %v1506_v11  ;;  %v1512_v33 = vsel %vm1496_vm3, %v1480_v22, %v1504_v12  ;;  %v1595_v25 = vld [vmem:[#allocation3 + $0x30] sm:$0xff]  ;;  %v1643_v35 = vmul.f32 0.75, %v1570_v10 }
 0x20c   : > { %v1576_v26 = vld [vmem:[#allocation3 + $0x1] sm:$0xff]  ;;  %1560 = vst.msk [vmem:[#allocation3 + $0x29] sm:$0x1] %vm1537_vm14, %v1550_v21  ;;  %v1603_v28 = vld [vmem:[#allocation3 + $0x32] sm:$0xff]  ;;  %v1534_v36 = vld [vmem:[#allocation3 + $0x71] sm:$0x1] }
 0x20d   : > { %v1571_v29 = vld [vmem:[#allocation3 + $0x41] sm:$0xff]  ;;  %1523 = vst.msk [vmem:[#allocation3 + $0x81] sm:$0xff] %vm399_vm0, %v1514_v31  ;;  %1526 = vst.msk [vmem:[#allocation3 + $0x91] sm:$0xff] %vm399_vm0, %v1514_v31  ;;  %v1651_v39 = vmul.f32 0.25, %v1595_v25  ;;  %v1715_v27 = vmul.f32 0.25, %v1603_v28  ;;  %v1574_v52 = vld [vmem:[#allocation3 + $0x71] sm:$0xff] }
 0x20e   : > { %1521 = vst.msk [vmem:[#allocation3 + $0x61] sm:$0xff] %vm399_vm0, %v1512_v33  ;;  %v1569_v38 = vld [vmem:[#allocation3 + $0x21] sm:$0xff]  ;;  %v1555_v49 = vld [vmem:[#allocation3 + $0x78] sm:$0x1]  ;;  %v1593_v53 = vld [vmem:[#allocation3 + $0x10] sm:$0xff]  ;;  %v1641_v40 = vmul.f32 0.75, %v1568_v23 }
 0x20f   : > { %1545 = vst.msk [vmem:[#allocation3 + $0x70] sm:$0x1] %vm1537_vm14, %v1534_v36  ;;  %v1609_v41 = vld [vmem:[#allocation3] sm:$0xff]  ;;  %v1673_v44 = vmul.f32 0.75, %v1576_v26  ;;  %v1644_v42 = vmul.f32 0.75, %v1571_v29  ;;  %v1659_v34 = vadd.f32 %v1651_v39, %v1643_v35  ;;  %v1723_v54 = vadd.f32 %v1715_v27, %v1643_v35  ;;  %v1601_v55 = vld [vmem:[#allocation3 + $0x12] sm:$0xff] }
 0x210   : > { %v1617_v37 = vld [vmem:[#allocation3 + $0x2] sm:$0xff]  ;;  %1565 = vst.msk [vmem:[#allocation3 + $0x79] sm:$0x1] %vm1537_vm14, %v1555_v49  ;;  %v1649_v47 = vmul.f32 0.25, %v1593_v53  ;;  %v1681_v51 = vmul.f32 0.25, %v1609_v41  ;;  %v1713_v43 = vmul.f32 0.25, %v1601_v55 }
 0x211   : > { %v1532_v56 = vld [vmem:[#allocation3 + $0x51] sm:$0x1]  ;;  %v1737_v57 = vmul.f32 0.25, %v1617_v37  ;;  %v1596_v48 = vld [vmem:[#allocation3 + $0x40] sm:$0xff]  ;;  %v1553_v59 = vld [vmem:[#allocation3 + $0x58] sm:$0x1] }
 0x212   : > { %v1604_v58 = vld [vmem:[#allocation3 + $0x42] sm:$0xff]  ;;  %1543 = vst.msk [vmem:[#allocation3 + $0x50] sm:$0x1] %vm1537_vm14, %v1532_v56  ;;  %v1667_v60 = vmul.f32 0.75, %v1659_v34  ;;  %v2704_v61 = vmul.f32 0.25, %v1659_v34  ;;  %v1642_v62 = vmul.f32 0.75, %v1569_v38  ;;  %v1657_v14 = vadd.f32 %v1649_v47, %v1641_v40 }
 0x213   : > { %v2706_v63 = vmul.f32 0.75, %v1574_v52  ;;  %1563 = vst.msk [vmem:[#allocation3 + $0x59] sm:$0x1] %vm1537_vm14, %v1553_v59  ;;  %v2709_v0 = vmul.f32 0.75, %v1723_v54  ;;  %v2711_v1 = vmul.f32 0.25, %v1723_v54  ;;  %v1689_v46 = vadd.f32 %v1681_v51, %v1673_v44  ;;  %v1594_v2 = vld [vmem:[#allocation3 + $0x20] sm:$0xff] }
 0x214   : > { %v1602_v3 = vld [vmem:[#allocation3 + $0x22] sm:$0xff]  ;;  %v1721_v16 = vadd.f32 %v1713_v43, %v1641_v40  ;;  %v1745_v15 = vadd.f32 %v1737_v57, %v1673_v44  ;;  %v1652_v18 = vmul.f32 0.25, %v1596_v48  ;;  %v1716_v50 = vmul.f32 0.25, %v1604_v58  ;;  %v1535_v4 = vld [vmem:[#allocation3 + $0x81] sm:$0x1]  ;;  %v1572_v55 = vld [vmem:[#allocation3 + $0x51] sm:$0xff] }
 0x215   : > { %v1536_v5 = vld [vmem:[#allocation3 + $0x91] sm:$0x1]  ;;  %v1665_v6 = vmul.f32 0.75, %v1657_v14  ;;  %v1697_v7 = vmul.f32 0.25, %v1689_v46  ;;  %v1650_v17 = vmul.f32 0.25, %v1594_v2  ;;  %v1714_v24 = vmul.f32 0.25, %v1602_v3 }
 0x216   : > { %1546 = vst.msk [vmem:[#allocation3 + $0x80] sm:$0x1] %vm1537_vm14, %v1535_v4  ;;  %1547 = vst.msk [vmem:[#allocation3 + $0x90] sm:$0x1] %vm1537_vm14, %v1536_v5  ;;  %v1729_v8 = vmul.f32 0.75, %v1721_v16  ;;  %v1753_v9 = vmul.f32 0.25, %v1745_v15  ;;  %v1660_v20 = vadd.f32 %v1652_v18, %v1644_v42  ;;  %v1724_v30 = vadd.f32 %v1716_v50, %v1644_v42 }
 0x217   : > { %v1556_v19 = vld [vmem:[#allocation3 + $0x88] sm:$0x1]  ;;  %v1705_v22 = vadd.f32 %v1697_v7, %v1665_v6  ;;  %v1658_v32 = vadd.f32 %v1650_v17, %v1642_v62  ;;  %v1557_v45 = vld [vmem:[#allocation3 + $0x98] sm:$0x1]  ;;  %v1533_v10 = vld [vmem:[#allocation3 + $0x61] sm:$0x1]  ;;  %v1722_v36 = vadd.f32 %v1714_v24, %v1642_v62 }
 0x218   : > { %1566 = vst.msk [vmem:[#allocation3 + $0x89] sm:$0x1] %vm1537_vm14, %v1556_v19  ;;  %v1698_v11 = vmul.f32 0.25, %v1657_v14  ;;  %v1761_v12 = vadd.f32 %v1753_v9, %v1729_v8  ;;  %v2728_v13 = vmul.f32 0.75, %v1660_v20  ;;  %v2730_v21 = vmul.f32 0.25, %v1660_v20  ;;  %v1599_v39 = vld [vmem:[#allocation3 + $0x70] sm:$0xff] }
 0x219   : > { %1567 = vst.msk [vmem:[#allocation3 + $0x99] sm:$0x1] %vm1537_vm14, %v1557_v45  ;;  %1544 = vst.msk [vmem:[#allocation3 + $0x60] sm:$0x1] %vm1537_vm14, %v1533_v10  ;;  %v1554_v23 = vld [vmem:[#allocation3 + $0x68] sm:$0x1] }
 0x21a   : > { %v1754_v26 = vmul.f32 0.25, %v1721_v16  ;;  %1841 = vst.msk [vmem:[%s2719_s28] sm:$0xff] %vm399_vm0, %v1705_v22  ;;  %v2742_v29 = vmul.f32 0.75, %v1724_v30  ;;  %v2744_v31 = vmul.f32 0.25, %v1724_v30  ;;  %v1666_v33 = vmul.f32 0.75, %v1658_v32  ;;  %1849 = vst.msk [vmem:[%s2725_s12] sm:$0xff] %vm399_vm0, %v1761_v12 }
 0x21b   : > { %1564 = vst.msk [vmem:[#allocation3 + $0x69] sm:$0x1] %vm1537_vm14, %v1554_v23  ;;  %v1708_v25 = vadd.f32 %v2704_v61, %v2728_v13  ;;  %v1803_v28 = vadd.f32 %v2730_v21, %v1667_v60  ;;  %v1699_v35 = vmul.f32 0.25, %v1658_v32  ;;  %v1607_v27 = vld [vmem:[#allocation3 + $0x72] sm:$0xff]  ;;  %v1730_v41 = vmul.f32 0.75, %v1722_v36  ;;  %v1575_v48 = vld [vmem:[#allocation3 + $0x81] sm:$0xff] }
 0x21c   : > { %v1764_v38 = vadd.f32 %v2711_v1, %v2742_v29  ;;  %v1835_v49 = vadd.f32 %v2744_v31, %v2709_v0  ;;  %v1706_v52 = vadd.f32 %v1698_v11, %v1666_v33  ;;  %v1755_v37 = vmul.f32 0.25, %v1722_v36  ;;  %v1597_v44 = vld [vmem:[#allocation3 + $0x50] sm:$0xff]  ;;  %v1573_v23 = vld [vmem:[#allocation3 + $0x61] sm:$0xff] }
 0x21d   : > { %1844 = vst.msk [vmem:[%s2719_s28 + $0x18] sm:$0xff] %vm399_vm0, %v1708_v25  ;;  %1859 = vst.msk [vmem:[%s2740_s16 + $0x10] sm:$0xff] %vm399_vm0, %v1803_v28  ;;  %v1707_v53 = vadd.f32 %v1699_v35, %v1667_v60  ;;  %v1802_v40 = vadd.f32 %v2704_v61, %v1666_v33  ;;  %v1801_v42 = vadd.f32 %v1699_v35, %v1665_v6  ;;  %v1655_v34 = vmul.f32 0.25, %v1599_v39  ;;  %v1605_v47 = vld [vmem:[#allocation3 + $0x52] sm:$0xff]  ;;  %v1600_v51 = vld [vmem:[#allocation3 + $0x80] sm:$0xff] }
 0x21e   : > { %1852 = vst.msk [vmem:[%s2725_s12 + $0x18] sm:$0xff] %vm399_vm0, %v1764_v38  ;;  %1867 = vst.msk [vmem:[%s2753_s19 + $0x10] sm:$0xff] %vm399_vm0, %v1835_v49  ;;  %v1719_v54 = vmul.f32 0.25, %v1607_v27  ;;  %v1762_v56 = vadd.f32 %v1754_v26, %v1730_v41  ;;  %v1763_v43 = vadd.f32 %v1755_v37, %v2709_v0  ;;  %v1834_v57 = vadd.f32 %v2711_v1, %v1730_v41  ;;  %v1632_v14 = vld [vmem:[#allocation3 + $0x90] sm:$0xff] }
 0x21f   : > { %1842 = vst.msk [vmem:[%s2719_s28 + $0x8] sm:$0xff] %vm399_vm0, %v1706_v52  ;;  %1843 = vst.msk [vmem:[%s2719_s28 + $0x10] sm:$0xff] %vm399_vm0, %v1707_v53  ;;  %v1608_v58 = vld [vmem:[#allocation3 + $0x82] sm:$0xff]  ;;  %v1833_v59 = vadd.f32 %v1755_v37, %v1729_v8  ;;  %v1663_v60 = vadd.f32 %v1655_v34, %v2706_v63  ;;  %v1653_v62 = vmul.f32 0.25, %v1597_v44  ;;  %v1645_v0 = vmul.f32 0.75, %v1572_v55  ;;  %v1592_v3 = vld [vmem:[#allocation3 + $0x91] sm:$0xff] }
 0x220   : > { %1858 = vst.msk [vmem:[%s2740_s16 + $0x8] sm:$0xff] %vm399_vm0, %v1802_v40  ;;  %1857 = vst.msk [vmem:[%s2740_s16] sm:$0xff] %vm399_vm0, %v1801_v42  ;;  %v1727_v61 = vadd.f32 %v1719_v54, %v2706_v63  ;;  %v1717_v1 = vmul.f32 0.25, %v1605_v47  ;;  %v1656_v46 = vmul.f32 0.25, %v1600_v51  ;;  %v1720_v2 = vmul.f32 0.25, %v1608_v58  ;;  %v1640_v30 = vld [vmem:[#allocation3 + $0x92] sm:$0xff] }
 0x221   : > { %1850 = vst.msk [vmem:[%s2725_s12 + $0x8] sm:$0xff] %vm399_vm0, %v1762_v56  ;;  %1851 = vst.msk [vmem:[%s2725_s12 + $0x10] sm:$0xff] %vm399_vm0, %v1763_v43  ;;  %v1648_v16 = vmul.f32 0.75, %v1575_v48  ;;  %v1671_v15 = vmul.f32 0.75, %v1663_v60  ;;  %v1704_v18 = vmul.f32 0.25, %v1663_v60  ;;  %v1661_v50 = vadd.f32 %v1653_v62, %v1645_v0  ;;  %v1598_v26 = vld [vmem:[#allocation3 + $0x60] sm:$0xff] }
 0x222   : > { %1866 = vst.msk [vmem:[%s2753_s19 + $0x8] sm:$0xff] %vm399_vm0, %v1834_v57  ;;  %1865 = vst.msk [vmem:[%s2753_s19] sm:$0xff] %vm399_vm0, %v1833_v59  ;;  %v1725_v63 = vadd.f32 %v1717_v1, %v1645_v0  ;;  %v1735_v4 = vmul.f32 0.75, %v1727_v61  ;;  %v1784_v7 = vmul.f32 0.25, %v1632_v14  ;;  %v1760_v17 = vmul.f32 0.25, %v1727_v61  ;;  %v1606_v33 = vld [vmem:[#allocation3 + $0x62] sm:$0xff] }
 0x223   : > { %v1664_v5 = vadd.f32 %v1656_v46, %v1648_v16  ;;  %v1728_v6 = vadd.f32 %v1720_v2, %v1648_v16  ;;  %v1669_v8 = vmul.f32 0.75, %v1661_v50  ;;  %v1776_v20 = vmul.f32 0.75, %v1592_v3 }
 0x224   : > { %v1733_v9 = vmul.f32 0.75, %v1725_v63  ;;  %v1796_v19 = vmul.f32 0.25, %v1661_v50  ;;  %v1828_v22 = vmul.f32 0.25, %v1725_v63  ;;  %v1816_v39 = vmul.f32 0.25, %v1640_v30 }
 0x225   : > { %v1672_v32 = vmul.f32 0.75, %v1664_v5  ;;  %v1736_v24 = vmul.f32 0.75, %v1728_v6  ;;  %v1709_v45 = vadd.f32 %v2730_v21, %v1669_v8  ;;  %v1792_v11 = vadd.f32 %v1784_v7, %v1776_v20 }
 0x226   : > { %v1765_v10 = vadd.f32 %v2744_v31, %v1733_v9  ;;  %v1799_v12 = vmul.f32 0.25, %v1664_v5  ;;  %v1804_v25 = vadd.f32 %v1796_v19, %v2728_v13  ;;  %v1836_v28 = vadd.f32 %v1828_v22, %v2742_v29 }
 0x227   : > { %v1712_v35 = vadd.f32 %v1704_v18, %v1672_v32  ;;  %v1768_v36 = vadd.f32 %v1760_v17, %v1736_v24  ;;  %1845 = vst.msk [vmem:[%s2719_s28 + $0x20] sm:$0xff] %vm399_vm0, %v1709_v45  ;;  %v1800_v21 = vmul.f32 0.25, %v1792_v11  ;;  %v1831_v27 = vmul.f32 0.25, %v1728_v6 }
 0x228   : > { %1853 = vst.msk [vmem:[%s2725_s12 + $0x20] sm:$0xff] %vm399_vm0, %v1765_v10  ;;  %v1807_v31 = vadd.f32 %v1799_v12, %v1671_v15  ;;  %1860 = vst.msk [vmem:[%s2740_s16 + $0x18] sm:$0xff] %vm399_vm0, %v1804_v25  ;;  %v1646_v13 = vmul.f32 0.75, %v1573_v23  ;;  %v1654_v29 = vmul.f32 0.25, %v1598_v26  ;;  %v1718_v38 = vmul.f32 0.25, %v1606_v33 }
 0x229   : > { %1868 = vst.msk [vmem:[%s2753_s19 + $0x18] sm:$0xff] %vm399_vm0, %v1836_v28  ;;  %1848 = vst.msk [vmem:[%s2719_s28 + $0x38] sm:$0xff] %vm399_vm0, %v1712_v35  ;;  %v1808_v49 = vadd.f32 %v1800_v21, %v1672_v32  ;;  %v1824_v52 = vadd.f32 %v1816_v39, %v1776_v20  ;;  %v1839_v53 = vadd.f32 %v1831_v27, %v1735_v4 }
 0x22a   : > { %1856 = vst.msk [vmem:[%s2725_s12 + $0x38] sm:$0xff] %vm399_vm0, %v1768_v36  ;;  %1863 = vst.msk [vmem:[%s2740_s16 + $0x30] sm:$0xff] %vm399_vm0, %v1807_v31  ;;  %v1662_v41 = vadd.f32 %v1654_v29, %v1646_v13  ;;  %v1726_v37 = vadd.f32 %v1718_v38, %v1646_v13 }
 0x22b   : > { %v1832_v40 = vmul.f32 0.25, %v1824_v52  ;;  %1864 = vst.msk [vmem:[%s2740_s16 + $0x38] sm:$0xff] %vm399_vm0, %v1808_v49  ;;  %1871 = vst.msk [vmem:[%s2753_s19 + $0x30] sm:$0xff] %vm399_vm0, %v1839_v53 }
 0x22c   : > { %v1670_v44 = vmul.f32 0.75, %v1662_v41  ;;  %v1703_v42 = vmul.f32 0.25, %v1662_v41  ;;  %v1734_v34 = vmul.f32 0.75, %v1726_v37  ;;  %v1759_v54 = vmul.f32 0.25, %v1726_v37 }
 0x22d   : > { %v1840_v55 = vadd.f32 %v1832_v40, %v1736_v24 }
 0x22e   : > { %v1710_v47 = vadd.f32 %v1796_v19, %v1670_v44  ;;  %v1711_v51 = vadd.f32 %v1703_v42, %v1671_v15  ;;  %v1766_v56 = vadd.f32 %v1828_v22, %v1734_v34  ;;  %v1767_v43 = vadd.f32 %v1759_v54, %v1735_v4 }
 0x22f   : > { %1872 = vst.msk [vmem:[%s2753_s19 + $0x38] sm:$0xff] %vm399_vm0, %v1840_v55  ;;  %v1805_v57 = vadd.f32 %v1703_v42, %v1669_v8  ;;  %v1806_v48 = vadd.f32 %v1704_v18, %v1670_v44  ;;  %v1837_v58 = vadd.f32 %v1759_v54, %v1733_v9  ;;  %v1838_v59 = vadd.f32 %v1760_v17, %v1734_v34 }
 0x230   : > { %1846 = vst.msk [vmem:[%s2719_s28 + $0x28] sm:$0xff] %vm399_vm0, %v1710_v47  ;;  %1847 = vst.msk [vmem:[%s2719_s28 + $0x30] sm:$0xff] %vm399_vm0, %v1711_v51 }
 0x231   : > { %1854 = vst.msk [vmem:[%s2725_s12 + $0x28] sm:$0xff] %vm399_vm0, %v1766_v56  ;;  %1855 = vst.msk [vmem:[%s2725_s12 + $0x30] sm:$0xff] %vm399_vm0, %v1767_v43 }
 0x232   : > { %1861 = vst.msk [vmem:[%s2740_s16 + $0x20] sm:$0xff] %vm399_vm0, %v1805_v57  ;;  %1862 = vst.msk [vmem:[%s2740_s16 + $0x28] sm:$0xff] %vm399_vm0, %v1806_v48 }
 0x233   : > { %1869 = vst.msk [vmem:[%s2753_s19 + $0x20] sm:$0xff] %vm399_vm0, %v1837_v58  ;;  %1870 = vst.msk [vmem:[%s2753_s19 + $0x28] sm:$0xff] %vm399_vm0, %v1838_v59 }
 0x234 PF: > { %s20_s30 = sadd.s32 1, %s2301_s30  }
 0x235   : > { %p17_p4 = scmp.ge.s32.totalorder %s20_s30, 4  }
 0x237   :  { %19 = sbr.rel (!%p17_p4) target bundleno = 1 (0x1), region = 118 }

// kernel: attention_forward.5
= control target key start
LH: loop header
LB: loop body
LE: loop exit
PB: predicated region body
PF: predicated region fallthrough
CT: control target
= control target key end

     0   :  { %15 = vsyncpa [#allocation7], 0  ;;  %s3404_s30 = smov 0   ;;  %s4048_s0 = inlined_call_operand.vmem [shape: f32[2,8,8,32], index: 0, kind: input, shape index: {}]   ;;  %s4049_s1 = inlined_call_operand.vmem [shape: f32[9,32,32], index: 1, kind: input, shape index: {}]   ;;  %s4050_s2 = inlined_call_operand.vmem [shape: f32[9,32,32], index: 2, kind: input, shape index: {}]   ;;  %s4051_s3 = inlined_call_operand.vmem [shape: f32[1,32], index: 3, kind: input, shape index: {}]   ;;  %s4052_s4 = inlined_call_operand.hbm [shape: f32[9,32,32], index: 4, kind: input, shape index: {}]   ;;  %s4053_s5 = inlined_call_operand.vmem [shape: f32[1,32], index: 5, kind: input, shape index: {}]   ;;  %s4054_s6 = inlined_call_operand.vmem [shape: f32[2,4,4,32], index: 6, kind: output, shape index: {0}]   ;;  %s4055_s7 = inlined_call_operand.vmem [shape: f32[2,4,4,32], index: 7, kind: output, shape index: {1}]   ;;  %s4056_s8 = inlined_call_operand.vmem [shape: f32[2,4,4,32], index: 8, kind: output, shape index: {2}]   ;;  %s4057_s9 = inlined_call_operand.vmem [shape: f32[2,4,4,32], index: 9, kind: output, shape index: {3}]  }
   0x1 LB: > { %s3410_s10 = sadd.s32 4294967295, %s3346_s30   ;;  %p2884_p0 = scmp.ge.s32.totalorder %s3346_s30, 1  ;;  %s3346_s30 = sphi %s3404_s30, %s21_s30  }
   0x2   : > { %p261_p1 = scmp.lt.s32.totalorder %s3346_s30, 3  ;;  %s3348_s11 = smov [#allocation6]  }
   0x3   : > { %s282_s12 = sshll.u32 %s3348_s11, 4  ;;  %p3240_p3 = scmp.eq.s32.totalorder %s3410_s10, 0  ;;  %s283_s12 = int_to_ptr.vmem [resolvable:$true] %s282_s12 }
   0x4   : > { %p3414_p2 = pnand %p2884_p0, %p261_p1  ;;  %s3321_s14 = scalar_lea.vmem %s283_s12, 4608 }
   0x5   : > { %p3322_p7 = scmp.ne.s32.totalorder %s283_s12, %s3321_s14  ;;  %p3329_p10 = scmp.lt.s32.totalorder %s283_s12, %s283_s12 }
   0x6   : > { %p3236_p4 = pneg %p3414_p2  ;;  %p3330_p11 = scmp.lt.s32.totalorder %s3321_s14, %s3321_s14 }
   0x8   : > { %p3237_p5 = pnand %p3240_p3, %p3236_p4  ;;  %p3331_p12 = por %p3330_p11, %p3329_p10 }
   0xa   : > { %p3312_p6 = pneg %p3237_p5 }
   0xc   : > { %p3324_p8 = pnand %p3322_p7, %p3312_p6 }
   0xe   : > { %p3325_p9 = pneg %p3324_p8 }
  0x10   : > { %p3332_p13 = pnand %p3331_p12, %p3325_p9 }
  0x12   : > { %3335 = shalt.err (!%p3332_p13)
}
  0x13   : > { %s3349_s15 = smov 128   ;;  %s3350_s16 = smov 8  }
  0x14   : > { %3239 = dma.hbm_to_vmem [thread:$0]  (!%p3237_p5), %s4052_s4, 4608, %s283_s12, [#allocation7], %s3349_s15, %s3349_s15, %s3350_s16  }
  0x15   : > { %309 = sbr.rel (%p3414_p2) target bundleno = 655 (0x28f), region = 44 }
  0x1a   : > { %3341 = dma.done.wait (%p3240_p3), [#allocation7], 4608  }
  0x1b   : > { %3343 = vsyncadd (%p3240_p3), [#allocation7], 4294962688  ;;  %p360_p0 = scmp.lt.s32.totalorder %s3410_s10, 1  ;;  %vm394_vm0 = vcmask 261120   ;;  %v3351_v0 = vmov 0.0   ;;  %vm396_vm1 = vcmask 253952  }
  0x1c   : > { %3016 = vmatprep.subr.bf16.mxu0 %v3351_v0  ;;  %3024 = vmatprep.subr.bf16.mxu1 %v3351_v0  ;;  %416 = vst.msk [vmem:[#allocation3 + $0x10] sm:$0xff] %vm394_vm0, %v3351_v0  ;;  %418 = vst.msk [vmem:[#allocation3 + $0x20] sm:$0xff] %vm394_vm0, %v3351_v0  ;;  %vm666_vm2 = vcmask 259072   ;;  %vm3352_vm3 = vmmov 0   ;;  %v3353_v1 = vmov -3.4028235e+38  }
  0x1d   : > { %420 = vst.msk [vmem:[#allocation3 + $0x30] sm:$0xff] %vm394_vm0, %v3351_v0  ;;  %422 = vst.msk [vmem:[#allocation3 + $0x40] sm:$0xff] %vm394_vm0, %v3351_v0  ;;  %3020 = vmatprep.mubr.msk.bf16.mxu0 %vm3352_vm3, %v3351_v0  ;;  %3028 = vmatprep.mubr.msk.bf16.mxu1 %vm3352_vm3, %v3351_v0  ;;  %s4060_s10 = smov (!%p360_p0, %s3410_s10), 1  ;;  %v685_v2 = vld [vmem:[%s4049_s1 + $0x30] sm:$0xff]  ;;  %v686_v3 = vld [vmem:[%s4049_s1 + $0x38] sm:$0xff]  ;;  %vm674_vm4 = vcmask 257024  }
  0x1e   : > { %424 = vst.msk [vmem:[#allocation3 + $0x50] sm:$0xff] %vm394_vm0, %v3351_v0  ;;  %426 = vst.msk [vmem:[#allocation3 + $0x60] sm:$0xff] %vm394_vm0, %v3351_v0  ;;  %s2930_s19 = sshll.u32 %s4060_s10, 6  ;;  %v681_v4 = vld [vmem:[%s4049_s1 + $0x10] sm:$0xff]  ;;  %v744_v5 = vpack.c.bf16 %v686_v3, %v685_v2  ;;  %v682_v6 = vld [vmem:[%s4049_s1 + $0x18] sm:$0xff] }
  0x1f   : > { %414 = vst.msk [vmem:[#allocation3] sm:$0xff] %vm394_vm0, %v3351_v0  ;;  %428 = vst.msk [vmem:[#allocation3 + $0x70] sm:$0xff] %vm394_vm0, %v3351_v0  ;;  %s3523_s28 = scalar_lea.vmem %s4048_s0, %s2930_s19  ;;  %v683_v7 = vld [vmem:[%s4049_s1 + $0x20] sm:$0xff]  ;;  %v684_v8 = vld [vmem:[%s4049_s1 + $0x28] sm:$0xff]  ;;  %v729_v9 = vpack.c.bf16 %v682_v6, %v681_v4  ;;  %s3979_s19 = sshll.u32 %s4060_s10, 4 }
  0x20   : > { %430 = vst.msk [vmem:[#allocation3 + $0x80] sm:$0xff] %vm394_vm0, %v3351_v0  ;;  %395 = vst.msk [vmem:[#allocation2] sm:$0xff] %vm394_vm0, %v3353_v1  ;;  %v679_v10 = vld [vmem:[%s4049_s1] sm:$0xff]  ;;  %v680_v11 = vld [vmem:[%s4049_s1 + $0x8] sm:$0xff]  ;;  %3017 = vmatpush3.bf16.msra.mxu0 %v744_v5  ;;  %v743_v13 = vpack.c.bf16 %v684_v8, %v683_v7  ;;  %s3987_s21 = scalar_lea.vmem %s4054_s6, %s3979_s19  ;;  %s3996_s24 = scalar_lea.vmem %s4055_s7, %s3979_s19 }
  0x21   : > { %397 = vst.msk [vmem:[#allocation2 + $0x8] sm:$0x1] %vm396_vm1, %v3353_v1  ;;  %399 = vst.msk [vmem:[#allocation2 + $0x18] sm:$0x1] %vm396_vm1, %v3353_v1  ;;  %v386_v12 = vld [vmem:[%s3523_s28] sm:$0xff]  ;;  %v387_v14 = vld [vmem:[%s3523_s28 + $0x8] sm:$0xff]  ;;  %3025 = vmatpush3.bf16.msra.mxu1 %v729_v9  ;;  %3018 = vmatprep.subr.bf16.mxu0 %v3351_v0  ;;  %v728_v17 = vpack.c.bf16 %v680_v11, %v679_v10  ;;  %s4007_s27 = scalar_lea.vmem %s4056_s8, %s3979_s19  ;;  %s4015_s11 = scalar_lea.vmem %s4057_s9, %s3979_s19 }
  0x22   : > { %398 = vst.msk [vmem:[#allocation2 + $0x10] sm:$0xff] %vm394_vm0, %v3353_v1  ;;  %400 = vst.msk [vmem:[#allocation2 + $0x20] sm:$0xff] %vm394_vm0, %v3353_v1  ;;  %v388_v15 = vld [vmem:[%s3523_s28 + $0x10] sm:$0xff]  ;;  %v389_v16 = vld [vmem:[%s3523_s28 + $0x18] sm:$0xff]  ;;  %3026 = vmatprep.subr.bf16.mxu1 %v3351_v0 }
  0x23   : > { %401 = vst.msk [vmem:[#allocation2 + $0x28] sm:$0x1] %vm396_vm1, %v3353_v1  ;;  %403 = vst.msk [vmem:[#allocation2 + $0x38] sm:$0x1] %vm396_vm1, %v3353_v1  ;;  %v390_v18 = vld [vmem:[%s3523_s28 + $0x20] sm:$0xff]  ;;  %v391_v19 = vld [vmem:[%s3523_s28 + $0x28] sm:$0xff] }
  0x24   : > { %402 = vst.msk [vmem:[#allocation2 + $0x30] sm:$0xff] %vm394_vm0, %v3353_v1  ;;  %404 = vst.msk [vmem:[#allocation2 + $0x40] sm:$0xff] %vm394_vm0, %v3353_v1  ;;  %3019 = vmatpush3.bf16.msra.mxu0 %v743_v13  ;;  %v392_v25 = vld [vmem:[%s3523_s28 + $0x30] sm:$0xff]  ;;  %v393_v32 = vld [vmem:[%s3523_s28 + $0x38] sm:$0xff] }
  0x25   : > { %405 = vst.msk [vmem:[#allocation2 + $0x48] sm:$0x1] %vm396_vm1, %v3353_v1  ;;  %407 = vst.msk [vmem:[#allocation2 + $0x58] sm:$0x1] %vm396_vm1, %v3353_v1  ;;  %3027 = vmatpush3.bf16.msra.mxu1 %v728_v17  ;;  %3032 = vmatprep.subr.bf16.mxu0 %v3351_v0 }
  0x26   : > { %406 = vst.msk [vmem:[#allocation2 + $0x50] sm:$0xff] %vm394_vm0, %v3353_v1  ;;  %408 = vst.msk [vmem:[#allocation2 + $0x60] sm:$0xff] %vm394_vm0, %v3353_v1  ;;  %3040 = vmatprep.subr.bf16.mxu1 %v3351_v0 }
  0x27   : > { %409 = vst.msk [vmem:[#allocation2 + $0x68] sm:$0x1] %vm396_vm1, %v3353_v1  ;;  %417 = vst.msk [vmem:[#allocation3 + $0x18] sm:$0x1] %vm396_vm1, %v3351_v0 }
  0x28   : > { %419 = vst.msk [vmem:[#allocation3 + $0x28] sm:$0x1] %vm396_vm1, %v3351_v0  ;;  %421 = vst.msk [vmem:[#allocation3 + $0x38] sm:$0x1] %vm396_vm1, %v3351_v0 }
  0x29   : > { %423 = vst.msk [vmem:[#allocation3 + $0x48] sm:$0x1] %vm396_vm1, %v3351_v0  ;;  %425 = vst.msk [vmem:[#allocation3 + $0x58] sm:$0x1] %vm396_vm1, %v3351_v0 }
  0x2a   : > { %427 = vst.msk [vmem:[#allocation3 + $0x68] sm:$0x1] %vm396_vm1, %v3351_v0  ;;  %411 = vst.msk [vmem:[#allocation2 + $0x78] sm:$0x1] %vm396_vm1, %v3353_v1 }
  0x2b   : > { %667 = vst.msk [vmem:[#allocation4] sm:$0x3f] %vm666_vm2, %v3351_v0  ;;  %668 = vst.msk [vmem:[#allocation4 + $0x8] sm:$0x3f] %vm666_vm2, %v3351_v0 }
  0x2c   : > { %669 = vst.msk [vmem:[#allocation4 + $0x10] sm:$0x3f] %vm666_vm2, %v3351_v0  ;;  %670 = vst.msk [vmem:[#allocation4 + $0x18] sm:$0x3f] %vm666_vm2, %v3351_v0 }
  0x2d   : > { %410 = vst.msk [vmem:[#allocation2 + $0x70] sm:$0xff] %vm394_vm0, %v3353_v1  ;;  %412 = vst.msk [vmem:[#allocation2 + $0x80] sm:$0xff] %vm394_vm0, %v3353_v1  ;;  %v450_v20 = vld [vmem:[#allocation2] ss:$2 sm:$0xf] }
  0x2e   : > { %413 = vst.msk [vmem:[#allocation2 + $0x88] sm:$0x1] %vm396_vm1, %v3353_v1  ;;  %415 = vst.msk [vmem:[#allocation3 + $0x8] sm:$0x1] %vm396_vm1, %v3351_v0  ;;  %v457_v21 = vmax.f32 %v450_v20, -3.4028235e+38 }
  0x2f   : > { %429 = vst.msk [vmem:[#allocation3 + $0x78] sm:$0x1] %vm396_vm1, %v3351_v0  ;;  %431 = vst.msk [vmem:[#allocation3 + $0x88] sm:$0x1] %vm396_vm1, %v3351_v0 }
  0x30   : > { %671 = vst.msk [vmem:[#allocation4 + $0x20] sm:$0x3f] %vm666_vm2, %v3351_v0  ;;  %672 = vst.msk [vmem:[#allocation4 + $0x28] sm:$0x3f] %vm666_vm2, %v3351_v0 }
  0x31   : > { %433 = vst.msk [vmem:[#allocation2 + $0x11] sm:$0xff] %vm394_vm0, %v386_v12  ;;  %442 = vst.msk [vmem:[#allocation3 + $0x11] sm:$0xff] %vm394_vm0, %v386_v12  ;;  %v473_v22 = vld [vmem:[#allocation2 + $0x1] ss:$2 sm:$0xf] }
  0x32   : > { %434 = vst.msk [vmem:[#allocation2 + $0x21] sm:$0xff] %vm394_vm0, %v387_v14  ;;  %435 = vst.msk [vmem:[#allocation2 + $0x31] sm:$0xff] %vm394_vm0, %v388_v15  ;;  %v480_v23 = vmax.f32 %v457_v21, %v473_v22  ;;  %v497_v24 = vld [vmem:[#allocation2 + $0x2] ss:$2 sm:$0xf] }
  0x33   : > { %436 = vst.msk [vmem:[#allocation2 + $0x41] sm:$0xff] %vm394_vm0, %v389_v16  ;;  %443 = vst.msk [vmem:[#allocation3 + $0x21] sm:$0xff] %vm394_vm0, %v387_v14 }
  0x34   : > { %444 = vst.msk [vmem:[#allocation3 + $0x31] sm:$0xff] %vm394_vm0, %v388_v15  ;;  %445 = vst.msk [vmem:[#allocation3 + $0x41] sm:$0xff] %vm394_vm0, %v389_v16  ;;  %v504_v29 = vmax.f32 %v480_v23, %v497_v24 }
  0x35   : > { %437 = vst.msk [vmem:[#allocation2 + $0x51] sm:$0xff] %vm394_vm0, %v390_v18  ;;  %438 = vst.msk [vmem:[#allocation2 + $0x61] sm:$0xff] %vm394_vm0, %v391_v19 }
  0x36   : > { %446 = vst.msk [vmem:[#allocation3 + $0x51] sm:$0xff] %vm394_vm0, %v390_v18  ;;  %447 = vst.msk [vmem:[#allocation3 + $0x61] sm:$0xff] %vm394_vm0, %v391_v19 }
  0x37   : > { %439 = vst.msk [vmem:[#allocation2 + $0x71] sm:$0xff] %vm394_vm0, %v392_v25  ;;  %448 = vst.msk [vmem:[#allocation3 + $0x71] sm:$0xff] %vm394_vm0, %v392_v25 }
  0x38   : > { %v520_v26 = vld [vmem:[#allocation2 + $0x10] ss:$2 sm:$0xf]  ;;  %440 = vst.msk [vmem:[#allocation2 + $0x81] sm:$0xff] %vm394_vm0, %v393_v32  ;;  %449 = vst.msk [vmem:[#allocation3 + $0x81] sm:$0xff] %vm394_vm0, %v393_v32 }
  0x39   : > { %v452_v27 = vld [vmem:[#allocation2 + $0x20] ss:$2 sm:$0xf]  ;;  %v475_v33 = vld [vmem:[#allocation2 + $0x21] ss:$2 sm:$0xf]  ;;  %v527_v37 = vmax.f32 %v504_v29, %v520_v26 }
  0x3a   : > { %v454_v28 = vld [vmem:[#allocation2 + $0x40] ss:$2 sm:$0xf]  ;;  %v458_v30 = vmax.f32 %v452_v27, -3.4028235e+38  ;;  %v690_v29 = vld [vmem:[%s4049_s1 + $0x58] sm:$0xff] }
  0x3b   : > { %v459_v31 = vmax.f32 %v454_v28, -3.4028235e+38  ;;  %v477_v34 = vld [vmem:[#allocation2 + $0x41] ss:$2 sm:$0xf]  ;;  %v689_v28 = vld [vmem:[%s4049_s1 + $0x50] sm:$0xff] }
  0x3c   : > { %v481_v35 = vmax.f32 %v458_v30, %v475_v33  ;;  %v543_v38 = vld [vmem:[#allocation2 + $0x11] ss:$2 sm:$0xf]  ;;  %v499_v39 = vld [vmem:[#allocation2 + $0x22] ss:$2 sm:$0xf] }
  0x3d   : > { %v482_v36 = vmax.f32 %v459_v31, %v477_v34  ;;  %v501_v40 = vld [vmem:[#allocation2 + $0x42] ss:$2 sm:$0xf]  ;;  %v522_v43 = vld [vmem:[#allocation2 + $0x30] ss:$2 sm:$0xf]  ;;  %v550_v47 = vmax.f32 %v527_v37, %v543_v38 }
  0x3e   : > { %v505_v41 = vmax.f32 %v481_v35, %v499_v39  ;;  %v524_v44 = vld [vmem:[#allocation2 + $0x50] ss:$2 sm:$0xf]  ;;  %v545_v48 = vld [vmem:[#allocation2 + $0x31] ss:$2 sm:$0xf] }
  0x3f   : > { %v506_v42 = vmax.f32 %v482_v36, %v501_v40  ;;  %v547_v49 = vld [vmem:[#allocation2 + $0x51] ss:$2 sm:$0xf]  ;;  %v567_v52 = vld [vmem:[#allocation2 + $0x12] ss:$2 sm:$0xf] }
  0x40   : > { %v528_v45 = vmax.f32 %v505_v41, %v522_v43  ;;  %v569_v53 = vld [vmem:[#allocation2 + $0x32] ss:$2 sm:$0xf]  ;;  %v574_v55 = vmax.f32 %v550_v47, %v567_v52  ;;  %v591_v58 = vld [vmem:[#allocation2 + $0x20] ss:$2 sm:$0xf] }
  0x41   : > { %v529_v46 = vmax.f32 %v506_v42, %v524_v44  ;;  %v571_v54 = vld [vmem:[#allocation2 + $0x52] ss:$2 sm:$0xf]  ;;  %v593_v59 = vld [vmem:[#allocation2 + $0x40] ss:$2 sm:$0xf] }
  0x42   : > { %v551_v50 = vmax.f32 %v528_v45, %v545_v48  ;;  %v595_v60 = vld [vmem:[#allocation2 + $0x60] ss:$2 sm:$0xf]  ;;  %v598_v61 = vmax.f32 %v574_v55, %v591_v58  ;;  %v463_v62 = vld [vmem:[#allocation3 + $0x20] ss:$2 sm:$0xf] }
  0x43   : > { %v552_v51 = vmax.f32 %v529_v46, %v547_v49  ;;  %v487_v63 = vld [vmem:[#allocation3 + $0x21] ss:$2 sm:$0xf]  ;;  %v615_v3 = vld [vmem:[#allocation2 + $0x21] ss:$2 sm:$0xf] }
  0x44   : > { %v575_v56 = vmax.f32 %v551_v50, %v569_v53  ;;  %v617_v4 = vld [vmem:[#allocation2 + $0x41] ss:$2 sm:$0xf]  ;;  %v465_v5 = vld [vmem:[#allocation3 + $0x40] ss:$2 sm:$0xf]  ;;  %v622_v8 = vmax.f32 %v598_v61, %v615_v3  ;;  %v493_v10 = vadd.f32 %v487_v63, %v463_v62 }
  0x45   : > { %v576_v57 = vmax.f32 %v552_v51, %v571_v54  ;;  %v489_v6 = vld [vmem:[#allocation3 + $0x41] ss:$2 sm:$0xf]  ;;  %v619_v7 = vld [vmem:[#allocation2 + $0x61] ss:$2 sm:$0xf]  ;;  %v847_v51 = vpack.c.bf16 %v690_v29, %v689_v28 }
  0x46   : > { %v599_v1 = vmax.f32 %v575_v56, %v593_v59  ;;  %v511_v11 = vld [vmem:[#allocation3 + $0x22] ss:$2 sm:$0xf]  ;;  %v639_v13 = vld [vmem:[#allocation2 + $0x22] ss:$2 sm:$0xf]  ;;  %v494_v21 = vadd.f32 %v489_v6, %v465_v5 }
  0x47   : > { %v600_v2 = vmax.f32 %v576_v57, %v595_v60  ;;  %v641_v14 = vld [vmem:[#allocation2 + $0x42] ss:$2 sm:$0xf]  ;;  %v646_v16 = vmax.f32 %v622_v8, %v639_v13  ;;  %v479_v20 = vld [vmem:[#allocation2 + $0x61] ss:$2 sm:$0xf]  ;;  %v517_v23 = vadd.f32 %v511_v11, %v493_v10 }
  0x48   : > { %v623_v9 = vmax.f32 %v599_v1, %v617_v4  ;;  %v643_v15 = vld [vmem:[#allocation2 + $0x62] ss:$2 sm:$0xf]  ;;  %v513_v22 = vld [vmem:[#allocation3 + $0x42] ss:$2 sm:$0xf] }
  0x49   : > { %v624_v12 = vmax.f32 %v600_v2, %v619_v7  ;;  %675 = vst.msk [vmem:[#allocation4 + $0x9] sm:$0xf] %vm674_vm4, %v646_v16  ;;  %v456_v19 = vld [vmem:[#allocation2 + $0x60] ss:$2 sm:$0xf]  ;;  %v518_v31 = vadd.f32 %v513_v22, %v494_v21  ;;  %v693_v36 = vld [vmem:[%s4049_s1 + $0x70] sm:$0xff] }
  0x4a   : > { %v647_v17 = vmax.f32 %v623_v9, %v641_v14  ;;  %v460_v24 = vmax.f32 %v456_v19, -3.4028235e+38  ;;  %v533_v25 = vld [vmem:[#allocation3 + $0x30] ss:$2 sm:$0xf]  ;;  %v694_v37 = vld [vmem:[%s4049_s1 + $0x78] sm:$0xff] }
  0x4b   : > { %v648_v18 = vmax.f32 %v624_v12, %v643_v15  ;;  %v503_v26 = vld [vmem:[#allocation2 + $0x62] ss:$2 sm:$0xf]  ;;  %v526_v30 = vld [vmem:[#allocation2 + $0x70] ss:$2 sm:$0xf]  ;;  %v539_v33 = vadd.f32 %v533_v25, %v517_v23  ;;  %v908_v58 = vpack.c.bf16 %v694_v37, %v693_v36 }
  0x4c   : > { %676 = vst.msk [vmem:[#allocation4 + $0x11] sm:$0xf] %vm674_vm4, %v647_v17  ;;  %v483_v27 = vmax.f32 %v460_v24, %v479_v20  ;;  %v535_v32 = vld [vmem:[#allocation3 + $0x50] ss:$2 sm:$0xf]  ;;  %v688_v42 = vld [vmem:[%s4049_s1 + $0x48] sm:$0xff] }
  0x4d   : > { %677 = vst.msk [vmem:[#allocation4 + $0x19] sm:$0xf] %vm674_vm4, %v648_v18  ;;  %v557_v34 = vld [vmem:[#allocation3 + $0x31] ss:$2 sm:$0xf]  ;;  %v540_v48 = vadd.f32 %v535_v32, %v518_v31  ;;  %v692_v56 = vld [vmem:[%s4049_s1 + $0x68] sm:$0xff] }
  0x4e   : > { %v507_v35 = vmax.f32 %v483_v27, %v503_v26  ;;  %v549_v38 = vld [vmem:[#allocation2 + $0x71] ss:$2 sm:$0xf]  ;;  %v573_v39 = vld [vmem:[#allocation2 + $0x72] ss:$2 sm:$0xf]  ;;  %v563_v49 = vadd.f32 %v557_v34, %v539_v33 }
  0x4f   : > { %v687_v41 = vld [vmem:[%s4049_s1 + $0x40] sm:$0xff]  ;;  %v605_v63 = vld [vmem:[#allocation3 + $0x40] ss:$2 sm:$0xf]  ;;  %v698_v8 = vld [vmem:[%s4049_s1 + $0x98] sm:$0xff] }
  0x50   : > { %v3256_v40 = vld [vmem:[#allocation4 + $0x1] ss:$8 sps:$4 sm:$0xff]   ;;  %v530_v43 = vmax.f32 %v507_v35, %v526_v30  ;;  %v846_v2 = vpack.c.bf16 %v688_v42, %v687_v41  ;;  %v697_v7 = vld [vmem:[%s4049_s1 + $0x90] sm:$0xff]  ;;  %v702_v42 = vld [vmem:[%s4049_s1 + $0xb8] sm:$0xff] }
  0x51   : > { %v559_v44 = vld [vmem:[#allocation3 + $0x51] ss:$2 sm:$0xf]  ;;  %v581_v45 = vld [vmem:[#allocation3 + $0x32] ss:$2 sm:$0xf]  ;;  %v969_v21 = vpack.c.bf16 %v698_v8, %v697_v7 }
  0x52   : > { %v597_v47 = vld [vmem:[#allocation2 + $0x80] ss:$2 sm:$0xf]  ;;  %v553_v52 = vmax.f32 %v530_v43, %v549_v38  ;;  %v621_v57 = vld [vmem:[#allocation2 + $0x81] ss:$2 sm:$0xf]  ;;  %v564_v4 = vadd.f32 %v559_v44, %v540_v48  ;;  %v587_v5 = vadd.f32 %v581_v45, %v563_v49 }
  0x53   : > { %v3258_v50 = vld [vmem:[#allocation4] ss:$8 sps:$4 sm:$0xff]   ;;  %v461_v11 = vld [vmem:[#allocation3] ss:$2 sm:$0xf]  ;;  %v710_v8 = vld [vmem:[%s4049_s1 + $0xf8] sm:$0xff] }
  0x54   : > { %v3257_v46 = vld [vmem:[#allocation4 + $0x11] ss:$8 sps:$4 sm:$0xff]   ;;  %v691_v55 = vld [vmem:[%s4049_s1 + $0x60] sm:$0xff]  ;;  %v577_v61 = vmax.f32 %v553_v52, %v573_v39  ;;  %v611_v18 = vadd.f32 %v605_v63, %v587_v5  ;;  %v696_v25 = vld [vmem:[%s4049_s1 + $0x88] sm:$0xff] }
  0x55   : > { %v742_v53 = vpack.c.bf16 %v3257_v46, %v3256_v40  ;;  %v3259_v54 = vld [vmem:[#allocation4 + $0x10] ss:$8 sps:$4 sm:$0xff]   ;;  %v3260_v59 = vld [vmem:[#allocation4 + $0x2] ss:$8 sps:$4 sm:$0xff]   ;;  %v907_v9 = vpack.c.bf16 %v692_v56, %v691_v55 }
  0x56   : > { %v3261_v60 = vld [vmem:[#allocation4 + $0x12] ss:$8 sps:$4 sm:$0xff]   ;;  %v583_v62 = vld [vmem:[#allocation3 + $0x52] ss:$2 sm:$0xf]  ;;  %v727_v1 = vpack.c.bf16 %v3259_v54, %v3258_v50  ;;  %v601_v6 = vmax.f32 %v577_v61, %v597_v47 }
  0x57   : > { %3021 = vmatmul.mubr.msk.bf16.vlgmr.msra.gmra.mxu0 %vm394_vm0, %v742_v53  ;;  %1261 = vst.msk [vmem:[#allocation4] sm:$0x3f] %vm666_vm2, %v3351_v0  ;;  %v645_v3 = vld [vmem:[#allocation2 + $0x82] ss:$2 sm:$0xf]  ;;  %v845_v14 = vpack.c.bf16 %v3261_v60, %v3260_v59  ;;  %v588_v17 = vadd.f32 %v583_v62, %v564_v4  ;;  %v701_v37 = vld [vmem:[%s4049_s1 + $0xb0] sm:$0xff] }
  0x58   : > { %3033 = vmatpush3.bf16.msra.mxu0 %v847_v51  ;;  %3036 = vmatprep.mubr.msk.bf16.mxu0 %vm3352_vm3, %v3351_v0  ;;  %v625_v10 = vmax.f32 %v601_v6, %v621_v57  ;;  %v485_v12 = vld [vmem:[#allocation3 + $0x1] ss:$2 sm:$0xf]  ;;  %v607_v13 = vld [vmem:[#allocation3 + $0x60] ss:$2 sm:$0xf]  ;;  %v1030_v51 = vpack.c.bf16 %v702_v42, %v701_v37 }
  0x59   : > { %3029 = vmatmul.mubr.msk.bf16.vlgmr.msra.gmra.mxu1 %vm394_vm0, %v727_v1  ;;  %3034 = vmatprep.subr.bf16.mxu0 %v3351_v0  ;;  %v492_v15 = vadd.f32 %v485_v12, %v461_v11  ;;  %v509_v16 = vld [vmem:[#allocation3 + $0x2] ss:$2 sm:$0xf]  ;;  %v629_v19 = vld [vmem:[#allocation3 + $0x41] ss:$2 sm:$0xf]  ;;  %v612_v32 = vadd.f32 %v607_v13, %v588_v17 }
  0x5a   : > { %3041 = vmatpush3.bf16.msra.mxu1 %v908_v58  ;;  %3044 = vmatprep.mubr.msk.bf16.mxu1 %vm3352_vm3, %v3351_v0  ;;  %v649_v20 = vmax.f32 %v625_v10, %v645_v3  ;;  %v531_v22 = vld [vmem:[#allocation3 + $0x10] ss:$2 sm:$0xf]  ;;  %v3262_v23 = vld [vmem:[#allocation4 + $0x8] ss:$8 sps:$4 sm:$0xff]   ;;  %v635_v33 = vadd.f32 %v629_v19, %v611_v18  ;;  %v706_v47 = vld [vmem:[%s4049_s1 + $0xd8] sm:$0xff] }
  0x5b   : > { %3042 = vmatprep.subr.bf16.mxu1 %v3351_v0  ;;  %v695_v24 = vld [vmem:[%s4049_s1 + $0x80] sm:$0xff]  ;;  %v516_v26 = vadd.f32 %v509_v16, %v492_v15  ;;  %v631_v28 = vld [vmem:[#allocation3 + $0x61] ss:$2 sm:$0xf]  ;;  %v700_v55 = vld [vmem:[%s4049_s1 + $0xa8] sm:$0xff] }
  0x5c   : > { %3035 = vmatpush3.bf16.msra.mxu0 %v846_v2  ;;  %678 = vst.msk [vmem:[#allocation4 + $0x21] sm:$0xf] %vm674_vm4, %v649_v20  ;;  %v555_v27 = vld [vmem:[#allocation3 + $0x11] ss:$2 sm:$0xf]  ;;  %v968_v35 = vpack.c.bf16 %v696_v25, %v695_v24  ;;  %v636_v44 = vadd.f32 %v631_v28, %v612_v32  ;;  %v705_v46 = vld [vmem:[%s4049_s1 + $0xd0] sm:$0xff] }
  0x5d   : > { %3048 = vmatprep.subr.bf16.mxu0 %v3351_v0  ;;  %v3264_v29 = vld [vmem:[#allocation4 + $0x9] ss:$8 sps:$4 sm:$0xff]   ;;  %v538_v30 = vadd.f32 %v531_v22, %v516_v26  ;;  %v579_v36 = vld [vmem:[#allocation3 + $0x12] ss:$2 sm:$0xf]  ;;  %v1092_v58 = vpack.c.bf16 %v706_v47, %v705_v46  ;;  %v714_v17 = vld [vmem:[%s4049_s1 + $0x118] sm:$0xff] }
  0x5e   : > { %3043 = vmatpush3.bf16.msra.mxu1 %v907_v9  ;;  %v3621_v31 = vld [vmem:[#allocation4 + $0xa] ss:$8 sps:$4 sm:$0xff]   ;;  %v699_v52 = vld [vmem:[%s4049_s1 + $0xa0] sm:$0xff]  ;;  %v1274_v42 = vld [vmem:[%s4050_s2 + $0x18] sm:$0xff] }
  0x5f   : > { %3037 = vmatmul.mubr.msk.bf16.vlgmr.msra.gmra.mxu0 %vm394_vm0, %v845_v14  ;;  %3056 = vmatprep.subr.bf16.mxu1 %v3351_v0  ;;  %v653_v34 = vld [vmem:[#allocation3 + $0x42] ss:$2 sm:$0xf]  ;;  %1262 = vst.msk [vmem:[#allocation4 + $0x8] sm:$0x3f] %vm666_vm2, %v3351_v0  ;;  %v562_v38 = vadd.f32 %v555_v27, %v538_v30  ;;  %v703_v59 = vld [vmem:[%s4049_s1 + $0xc0] sm:$0xff]  ;;  %v1029_v3 = vpack.c.bf16 %v700_v55, %v699_v52 }
  0x60   : > { %3049 = vmatpush3.bf16.msra.mxu0 %v969_v21  ;;  %3052 = vmatprep.mubr.msk.bf16.mxu0 %vm3352_vm3, %v3351_v0  ;;  %v603_v39 = vld [vmem:[#allocation3 + $0x20] ss:$2 sm:$0xf]  ;;  %v627_v40 = vld [vmem:[#allocation3 + $0x21] ss:$2 sm:$0xf]  ;;  %v659_v48 = vadd.f32 %v653_v34, %v635_v33 }
  0x61   : > { %3050 = vmatprep.subr.bf16.mxu0 %v3351_v0  ;;  %v655_v41 = vld [vmem:[#allocation3 + $0x62] ss:$2 sm:$0xf]  ;;  %v586_v43 = vadd.f32 %v579_v36, %v562_v38  ;;  %v704_v1 = vld [vmem:[%s4049_s1 + $0xc8] sm:$0xff]  ;;  %v707_v15 = vld [vmem:[%s4049_s1 + $0xe0] sm:$0xff] }
  0x62   : > { %v651_v45 = vld [vmem:[#allocation3 + $0x22] ss:$2 sm:$0xf]  ;;  %v660_v60 = vadd.f32 %v655_v41, %v636_v44  ;;  %v3650_v61 = vmul.f32 0.11111111, %v659_v48  ;;  %v1091_v10 = vpack.c.bf16 %v704_v1, %v703_v59  ;;  %v708_v20 = vld [vmem:[%s4049_s1 + $0xe8] sm:$0xff] }
  0x63   : > { %v3263_v49 = vld [vmem:[#allocation4 + $0x18] ss:$8 sps:$4 sm:$0xff]   ;;  %v610_v50 = vadd.f32 %v603_v39, %v586_v43  ;;  %v709_v4 = vld [vmem:[%s4049_s1 + $0xf0] sm:$0xff]  ;;  %v712_v27 = vld [vmem:[%s4049_s1 + $0x108] sm:$0xff]  ;;  %v1152_v33 = vpack.c.bf16 %v708_v20, %v707_v15 }
  0x64   : > { %3051 = vmatpush3.bf16.msra.mxu0 %v968_v35  ;;  %v3265_v53 = vld [vmem:[#allocation4 + $0x19] ss:$8 sps:$4 sm:$0xff]   ;;  %v906_v54 = vpack.c.bf16 %v3263_v49, %v3262_v23  ;;  %v467_v6 = vld [vmem:[#allocation3 + $0x60] ss:$2 sm:$0xf]  ;;  %v1153_v19 = vpack.c.bf16 %v710_v8, %v709_v4 }
  0x65   : > { %3064 = vmatprep.subr.bf16.mxu0 %v3351_v0  ;;  %v634_v56 = vadd.f32 %v627_v40, %v610_v50  ;;  %v967_v57 = vpack.c.bf16 %v3265_v53, %v3264_v29  ;;  %v3267_v63 = vld [vmem:[#allocation4 + $0x1a] ss:$8 sps:$4 sm:$0xff]   ;;  %v491_v9 = vld [vmem:[#allocation3 + $0x61] ss:$2 sm:$0xf]  ;;  %v1276_v50 = vld [vmem:[%s4050_s2 + $0x28] sm:$0xff] }
  0x66   : > { %3045 = vmatmul.mubr.msk.bf16.vlgmr.msra.gmra.mxu1 %vm394_vm0, %v906_v54  ;;  %v3268_v2 = vld [vmem:[#allocation4 + $0x10] ss:$8 sps:$4 sm:$0xff]   ;;  %v3269_v5 = vld [vmem:[#allocation4 + $0x20] ss:$8 sps:$4 sm:$0xff]   ;;  %v495_v11 = vadd.f32 %v491_v9, %v467_v6  ;;  %v664_v13 = vmul.f32 0.11111111, %v660_v60  ;;  %v1028_v14 = vpack.c.bf16 %v3267_v63, %v3621_v31 }
  0x67   : > { %v658_v62 = vadd.f32 %v651_v45, %v634_v56  ;;  %3057 = vmatpush3.bf16.msra.mxu1 %v1030_v51  ;;  %3060 = vmatprep.mubr.msk.bf16.mxu1 %vm3352_vm3, %v3351_v0  ;;  %v515_v12 = vld [vmem:[#allocation3 + $0x62] ss:$2 sm:$0xf]  ;;  %v537_v18 = vld [vmem:[#allocation3 + $0x70] ss:$2 sm:$0xf]  ;;  %v1090_v24 = vpack.c.bf16 %v3269_v5, %v3268_v2 }
  0x68   : > { %3058 = vmatprep.subr.bf16.mxu1 %v3351_v0  ;;  %3053 = vmatmul.mubr.msk.bf16.vlgmr.msra.gmra.mxu0 %vm394_vm0, %v967_v57  ;;  %v713_v16 = vld [vmem:[%s4049_s1 + $0x110] sm:$0xff]  ;;  %v519_v22 = vadd.f32 %v515_v12, %v495_v11  ;;  %v561_v23 = vld [vmem:[#allocation3 + $0x71] ss:$2 sm:$0xf]  ;;  %v1278_v35 = vld [vmem:[%s4050_s2 + $0x38] sm:$0xff] }
  0x69   : > { %v662_v7 = vmul.f32 0.11111111, %v658_v62  ;;  %3065 = vmatpush3.bf16.msra.mxu0 %v1092_v58  ;;  %3068 = vmatprep.mubr.msk.bf16.mxu0 %vm3352_vm3, %v3351_v0  ;;  %v3270_v21 = vld [vmem:[#allocation4 + $0x11] ss:$8 sps:$4 sm:$0xff]   ;;  %v3271_v25 = vld [vmem:[#allocation4 + $0x21] ss:$8 sps:$4 sm:$0xff]   ;;  %v1214_v29 = vpack.c.bf16 %v714_v17, %v713_v16 }
  0x6a   : > { %3066 = vmatprep.subr.bf16.mxu0 %v3351_v0  ;;  %v711_v26 = vld [vmem:[%s4049_s1 + $0x100] sm:$0xff]  ;;  %v541_v30 = vadd.f32 %v537_v18, %v519_v22  ;;  %v3272_v31 = vld [vmem:[#allocation4 + $0x12] ss:$8 sps:$4 sm:$0xff]   ;;  %v1151_v43 = vpack.c.bf16 %v3271_v25, %v3270_v21  ;;  %v1272_v58 = vld [vmem:[%s4050_s2 + $0x8] sm:$0xff] }
  0x6b   : > { %1267 = vst.msk [vmem:[#allocation4 + $0x9] sm:$0xf] %vm674_vm4, %v662_v7  ;;  %3059 = vmatpush3.bf16.msra.mxu1 %v1029_v3  ;;  %v585_v28 = vld [vmem:[#allocation3 + $0x72] ss:$2 sm:$0xf]  ;;  %v1277_v34 = vld [vmem:[%s4050_s2 + $0x30] sm:$0xff]  ;;  %v1213_v40 = vpack.c.bf16 %v712_v27, %v711_v26 }
  0x6c   : > { %3072 = vmatprep.subr.bf16.mxu1 %v3351_v0  ;;  %v3273_v32 = vld [vmem:[#allocation4 + $0x22] ss:$8 sps:$4 sm:$0xff]   ;;  %v565_v36 = vadd.f32 %v561_v23, %v541_v30  ;;  %1263 = vst.msk [vmem:[#allocation4 + $0x10] sm:$0x3f] %vm666_vm2, %v3351_v0  ;;  %1264 = vst.msk [vmem:[#allocation4 + $0x18] sm:$0x3f] %vm666_vm2, %v3351_v0  ;;  %v1336_v45 = vpack.c.bf16 %v1278_v35, %v1277_v34 }
  0x6d   : > { %3067 = vmatpush3.bf16.msra.mxu0 %v1091_v10  ;;  %1265 = vst.msk [vmem:[#allocation4 + $0x20] sm:$0x3f] %vm666_vm2, %v3351_v0  ;;  %1266 = vst.msk [vmem:[#allocation4 + $0x28] sm:$0x3f] %vm666_vm2, %v3351_v0  ;;  %v1273_v39 = vld [vmem:[%s4050_s2 + $0x10] sm:$0xff]  ;;  %v1275_v49 = vld [vmem:[%s4050_s2 + $0x20] sm:$0xff]  ;;  %v1212_v52 = vpack.c.bf16 %v3273_v32, %v3272_v31 }
  0x6e   : > { %3061 = vmatmul.mubr.msk.bf16.vlgmr.msra.gmra.mxu1 %vm394_vm0, %v1028_v14  ;;  %3080 = vmatprep.subr.bf16.mxu0 %v3351_v0  ;;  %v609_v37 = vld [vmem:[#allocation3 + $0x80] ss:$2 sm:$0xf]  ;;  %v633_v38 = vld [vmem:[#allocation3 + $0x81] ss:$2 sm:$0xf]  ;;  %v589_v41 = vadd.f32 %v585_v28, %v565_v36  ;;  %v1321_v54 = vpack.c.bf16 %v1274_v42, %v1273_v39  ;;  %v1335_v59 = vpack.c.bf16 %v1276_v50, %v1275_v49 }
  0x6f   : > { %3073 = vmatpush3.bf16.msra.mxu1 %v1153_v19  ;;  %3076 = vmatprep.mubr.msk.bf16.mxu1 %vm3352_vm3, %v3351_v0  ;;  %1268 = vst.msk [vmem:[#allocation4 + $0x11] sm:$0xf] %vm674_vm4, %v3650_v61  ;;  %1269 = vst.msk [vmem:[#allocation4 + $0x19] sm:$0xf] %vm674_vm4, %v664_v13  ;;  %v1271_v55 = vld [vmem:[%s4050_s2] sm:$0xff]  ;;  %v1281_v56 = vld [vmem:[%s4050_s2 + $0x50] sm:$0xff] }
  0x70   : > { %3074 = vmatprep.subr.bf16.mxu1 %v3351_v0  ;;  %3069 = vmatmul.mubr.msk.bf16.vlgmr.msra.gmra.mxu0 %vm394_vm0, %v1090_v24  ;;  %v613_v46 = vadd.f32 %v609_v37, %v589_v41  ;;  %v657_v51 = vld [vmem:[#allocation3 + $0x82] ss:$2 sm:$0xf]  ;;  %v1320_v2 = vpack.c.bf16 %v1272_v58, %v1271_v55  ;;  %v1279_v6 = vld [vmem:[%s4050_s2 + $0x40] sm:$0xff]  ;;  %v1280_v7 = vld [vmem:[%s4050_s2 + $0x48] sm:$0xff] }
  0x71   : > { %3081 = vmatpush3.bf16.msra.mxu0 %v1214_v29  ;;  %3084 = vmatprep.mubr.msk.bf16.mxu0 %vm3352_vm3, %v3351_v0  ;;  %v1282_v57 = vld [vmem:[%s4050_s2 + $0x58] sm:$0xff]  ;;  %v1285_v63 = vld [vmem:[%s4050_s2 + $0x70] sm:$0xff]  ;;  %v1283_v10 = vld [vmem:[%s4050_s2 + $0x60] sm:$0xff]  ;;  %v1438_v17 = vpack.c.bf16 %v1280_v7, %v1279_v6 }
  0x72   : > { %3082 = vmatprep.subr.bf16.mxu0 %v3351_v0  ;;  %v3274_v44 = vld [vmem:[#allocation4 + $0x1] ss:$8 sps:$4 sm:$0xff]   ;;  %v637_v53 = vadd.f32 %v633_v38, %v613_v46  ;;  %v1286_v4 = vld [vmem:[%s4050_s2 + $0x78] sm:$0xff]  ;;  %v1439_v5 = vpack.c.bf16 %v1282_v57, %v1281_v56  ;;  %v1289_v13 = vld [vmem:[%s4050_s2 + $0x90] sm:$0xff] }
  0x73   : > { %3075 = vmatpush3.bf16.msra.mxu1 %v1152_v33  ;;  %v3276_v47 = vld [vmem:[#allocation4] ss:$8 sps:$4 sm:$0xff]   ;;  %v1500_v9 = vpack.c.bf16 %v1286_v4, %v1285_v63  ;;  %v1290_v14 = vld [vmem:[%s4050_s2 + $0x98] sm:$0xff]  ;;  %v1293_v20 = vld [vmem:[%s4050_s2 + $0xb0] sm:$0xff] }
  0x74   : > { %v3722_v48 = vld [vmem:[#allocation4 + $0x2] ss:$8 sps:$4 sm:$0xff]   ;;  %3088 = vmatprep.subr.bf16.mxu1 %v3351_v0  ;;  %v661_v60 = vadd.f32 %v657_v51, %v637_v53  ;;  %v1294_v21 = vld [vmem:[%s4050_s2 + $0xb8] sm:$0xff]  ;;  %v1561_v24 = vpack.c.bf16 %v1290_v14, %v1289_v13  ;;  %v1297_v31 = vld [vmem:[%s4050_s2 + $0xd0] sm:$0xff] }
  0x75   : > { %1875 = vst.msk [vmem:[#allocation4] sm:$0x3f] %vm666_vm2, %v3351_v0  ;;  %3083 = vmatpush3.bf16.msra.mxu0 %v1213_v40  ;;  %v1284_v11 = vld [vmem:[%s4050_s2 + $0x68] sm:$0xff]  ;;  %v1287_v25 = vld [vmem:[%s4050_s2 + $0x80] sm:$0xff]  ;;  %v1622_v28 = vpack.c.bf16 %v1294_v21, %v1293_v20  ;;  %v1298_v32 = vld [vmem:[%s4050_s2 + $0xd8] sm:$0xff] }
  0x76   : > { %3077 = vmatmul.mubr.msk.bf16.vlgmr.msra.gmra.mxu1 %vm394_vm0, %v1151_v43  ;;  %3096 = vmatprep.subr.bf16.mxu0 %v3351_v0  ;;  %v3275_v61 = vld [vmem:[#allocation4 + $0x11] ss:$8 sps:$4 sm:$0xff]   ;;  %v665_v1 = vmul.f32 0.11111111, %v661_v60  ;;  %v1499_v19 = vpack.c.bf16 %v1284_v11, %v1283_v10  ;;  %v1288_v26 = vld [vmem:[%s4050_s2 + $0x88] sm:$0xff]  ;;  %v1291_v29 = vld [vmem:[%s4050_s2 + $0xa0] sm:$0xff]  ;;  %v1683_v46 = vpack.c.bf16 %v1298_v32, %v1297_v31 }
  0x77   : > { %3089 = vmatpush3.bf16.msra.mxu1 %v1336_v45  ;;  %3092 = vmatprep.mubr.msk.bf16.mxu1 %vm3352_vm3, %v3351_v0  ;;  %v3277_v62 = vld [vmem:[#allocation4 + $0x10] ss:$8 sps:$4 sm:$0xff]   ;;  %v1334_v3 = vpack.c.bf16 %v3275_v61, %v3274_v44  ;;  %v1292_v33 = vld [vmem:[%s4050_s2 + $0xa8] sm:$0xff]  ;;  %v1560_v35 = vpack.c.bf16 %v1288_v26, %v1287_v25  ;;  %v1299_v51 = vld [vmem:[%s4050_s2 + $0xe0] sm:$0xff] }
  0x78   : > { %3090 = vmatprep.subr.bf16.mxu1 %v3351_v0  ;;  %3085 = vmatmul.mubr.msk.bf16.vlgmr.msra.gmra.mxu0 %vm394_vm0, %v1212_v52  ;;  %1270 = vst.msk [vmem:[#allocation4 + $0x21] sm:$0xf] %vm674_vm4, %v665_v1  ;;  %v1319_v8 = vpack.c.bf16 %v3277_v62, %v3276_v47  ;;  %v3279_v12 = vld [vmem:[#allocation4 + $0x12] ss:$8 sps:$4 sm:$0xff]   ;;  %v1621_v42 = vpack.c.bf16 %v1292_v33, %v1291_v29  ;;  %v1295_v47 = vld [vmem:[%s4050_s2 + $0xc0] sm:$0xff]  ;;  %v1300_v52 = vld [vmem:[%s4050_s2 + $0xe8] sm:$0xff] }
  0x79   : > { %3097 = vmatpush3.bf16.msra.mxu0 %v1321_v54  ;;  %3100 = vmatprep.mubr.msk.bf16.mxu0 %vm3352_vm3, %v3351_v0  ;;  %v3280_v15 = vld [vmem:[#allocation4 + $0x8] ss:$8 sps:$4 sm:$0xff]   ;;  %v1437_v22 = vpack.c.bf16 %v3279_v12, %v3722_v48  ;;  %v1302_v39 = vld [vmem:[%s4050_s2 + $0xf8] sm:$0xff]  ;;  %v1743_v56 = vpack.c.bf16 %v1300_v52, %v1299_v51  ;;  %v1889_v6 = vld [vmem:[#allocation6 + $0x20] sm:$0xff] }
  0x7a   : > { %3098 = vmatprep.subr.bf16.mxu0 %v3351_v0  ;;  %v3782_v16 = vld [vmem:[#allocation4 + $0x9] ss:$8 sps:$4 sm:$0xff]   ;;  %v1306_v55 = vld [vmem:[%s4050_s2 + $0x118] sm:$0xff] }
  0x7b   : > { %3091 = vmatpush3.bf16.msra.mxu1 %v1335_v59  ;;  %v3788_v18 = vld [vmem:[#allocation4 + $0xa] ss:$8 sps:$4 sm:$0xff]   ;;  %v1303_v59 = vld [vmem:[%s4050_s2 + $0x100] sm:$0xff] }
  0x7c   : > { %3104 = vmatprep.subr.bf16.mxu1 %v3351_v0  ;;  %1876 = vst.msk [vmem:[#allocation4 + $0x8] sm:$0x3f] %vm666_vm2, %v3351_v0  ;;  %v3286_v36 = vld [vmem:[#allocation4 + $0x10] ss:$8 sps:$4 sm:$0xff]   ;;  %v1296_v48 = vld [vmem:[%s4050_s2 + $0xc8] sm:$0xff] }
  0x7d   : > { %3099 = vmatpush3.bf16.msra.mxu0 %v1320_v2  ;;  %v1301_v38 = vld [vmem:[%s4050_s2 + $0xf0] sm:$0xff]  ;;  %v1682_v53 = vpack.c.bf16 %v1296_v48, %v1295_v47  ;;  %v1304_v60 = vld [vmem:[%s4050_s2 + $0x108] sm:$0xff]  ;;  %v1892_v2 = vld [vmem:[#allocation6 + $0x38] sm:$0xff] }
  0x7e   : > { %3093 = vmatmul.mubr.msk.bf16.vlgmr.msra.gmra.mxu1 %vm394_vm0, %v1334_v3  ;;  %3112 = vmatprep.subr.bf16.mxu0 %v3351_v0  ;;  %v3288_v40 = vld [vmem:[#allocation4 + $0x11] ss:$8 sps:$4 sm:$0xff]   ;;  %v1744_v50 = vpack.c.bf16 %v1302_v39, %v1301_v38  ;;  %v1804_v62 = vpack.c.bf16 %v1304_v60, %v1303_v59  ;;  %v1890_v7 = vld [vmem:[#allocation6 + $0x28] sm:$0xff] }
  0x7f   : > { %3105 = vmatpush3.bf16.msra.mxu1 %v1439_v5  ;;  %3108 = vmatprep.mubr.msk.bf16.mxu1 %vm3352_vm3, %v3351_v0  ;;  %v3281_v23 = vld [vmem:[#allocation4 + $0x18] ss:$8 sps:$4 sm:$0xff]   ;;  %v1305_v54 = vld [vmem:[%s4050_s2 + $0x110] sm:$0xff]  ;;  %v1886_v10 = vld [vmem:[#allocation6 + $0x8] sm:$0xff]  ;;  %v1949_v11 = vpack.c.bf16 %v1890_v7, %v1889_v6 }
  0x80   : > { %3106 = vmatprep.subr.bf16.mxu1 %v3351_v0  ;;  %3101 = vmatmul.mubr.msk.bf16.vlgmr.msra.gmra.mxu0 %vm394_vm0, %v1319_v8  ;;  %v1498_v27 = vpack.c.bf16 %v3281_v23, %v3280_v15  ;;  %v3283_v30 = vld [vmem:[#allocation4 + $0x19] ss:$8 sps:$4 sm:$0xff]   ;;  %v1805_v58 = vpack.c.bf16 %v1306_v55, %v1305_v54  ;;  %v1891_v1 = vld [vmem:[#allocation6 + $0x30] sm:$0xff] }
  0x81   : > { %3113 = vmatpush3.bf16.msra.mxu0 %v1500_v9  ;;  %3116 = vmatprep.mubr.msk.bf16.mxu0 %vm3352_vm3, %v3351_v0  ;;  %v3285_v34 = vld [vmem:[#allocation4 + $0x1a] ss:$8 sps:$4 sm:$0xff]   ;;  %v1559_v43 = vpack.c.bf16 %v3283_v30, %v3782_v16  ;;  %v1887_v3 = vld [vmem:[#allocation6 + $0x10] sm:$0xff]  ;;  %v1950_v4 = vpack.c.bf16 %v1892_v2, %v1891_v1 }
  0x82   : > { %3114 = vmatprep.subr.bf16.mxu0 %v3351_v0  ;;  %v3287_v37 = vld [vmem:[#allocation4 + $0x20] ss:$8 sps:$4 sm:$0xff]   ;;  %v3290_v44 = vld [vmem:[#allocation4 + $0x12] ss:$8 sps:$4 sm:$0xff]   ;;  %v1620_v49 = vpack.c.bf16 %v3285_v34, %v3788_v18 }
  0x83   : > { %3107 = vmatpush3.bf16.msra.mxu1 %v1438_v17  ;;  %v3289_v41 = vld [vmem:[#allocation4 + $0x21] ss:$8 sps:$4 sm:$0xff]   ;;  %1877 = vst.msk [vmem:[#allocation4 + $0x10] sm:$0x3f] %vm666_vm2, %v3351_v0  ;;  %1878 = vst.msk [vmem:[#allocation4 + $0x18] sm:$0x3f] %vm666_vm2, %v3351_v0  ;;  %v1681_v57 = vpack.c.bf16 %v3287_v37, %v3286_v36 }
  0x84   : > { %3120 = vmatprep.subr.bf16.mxu1 %v3351_v0  ;;  %v3291_v45 = vld [vmem:[#allocation4 + $0x22] ss:$8 sps:$4 sm:$0xff]   ;;  %v1742_v61 = vpack.c.bf16 %v3289_v41, %v3288_v40  ;;  %v1888_v5 = vld [vmem:[#allocation6 + $0x18] sm:$0xff] }
  0x85   : > { %3115 = vmatpush3.bf16.msra.mxu0 %v1499_v19  ;;  %1880 = vst.msk [vmem:[#allocation4 + $0x28] sm:$0x3f] %vm666_vm2, %v3351_v0  ;;  %1879 = vst.msk [vmem:[#allocation4 + $0x20] sm:$0x3f] %vm666_vm2, %v3351_v0  ;;  %v1803_v63 = vpack.c.bf16 %v3291_v45, %v3290_v44  ;;  %v1935_v8 = vpack.c.bf16 %v1888_v5, %v1887_v3  ;;  %v1885_v9 = vld [vmem:[#allocation6] sm:$0xff] }
  0x86   : > { %3109 = vmatmul.mubr.msk.bf16.vlgmr.msra.gmra.mxu1 %vm394_vm0, %v1437_v22  ;;  %3128 = vmatprep.subr.bf16.mxu0 %v3351_v0  ;;  %v1934_v12 = vpack.c.bf16 %v1886_v10, %v1885_v9 }
  0x87   : > { %3121 = vmatpush3.bf16.msra.mxu1 %v1561_v24  ;;  %3124 = vmatprep.mubr.msk.bf16.mxu1 %vm3352_vm3, %v3351_v0 }
  0x88   : > { %3122 = vmatprep.subr.bf16.mxu1 %v3351_v0  ;;  %3117 = vmatmul.mubr.msk.bf16.vlgmr.msra.gmra.mxu0 %vm394_vm0, %v1498_v27 }
  0x89   : > { %3129 = vmatpush3.bf16.msra.mxu0 %v1622_v28  ;;  %3132 = vmatprep.mubr.msk.bf16.mxu0 %vm3352_vm3, %v3351_v0 }
  0x8a   : > { %3130 = vmatprep.subr.bf16.mxu0 %v3351_v0 }
  0x8b   : > { %3123 = vmatpush3.bf16.msra.mxu1 %v1560_v35 }
  0x8c   : > { %3136 = vmatprep.subr.bf16.mxu1 %v3351_v0 }
  0x8d   : > { %3131 = vmatpush3.bf16.msra.mxu0 %v1621_v42 }
  0x8e   : > { %3125 = vmatmul.mubr.msk.bf16.vlgmr.msra.gmra.mxu1 %vm394_vm0, %v1559_v43  ;;  %3144 = vmatprep.subr.bf16.mxu0 %v3351_v0 }
  0x8f   : > { %3137 = vmatpush3.bf16.msra.mxu1 %v1683_v46  ;;  %3140 = vmatprep.mubr.msk.bf16.mxu1 %vm3352_vm3, %v3351_v0 }
  0x90   : > { %3138 = vmatprep.subr.bf16.mxu1 %v3351_v0  ;;  %3133 = vmatmul.mubr.msk.bf16.vlgmr.msra.gmra.mxu0 %vm394_vm0, %v1620_v49 }
  0x91   : > { %3145 = vmatpush3.bf16.msra.mxu0 %v1744_v50  ;;  %3148 = vmatprep.mubr.msk.bf16.mxu0 %vm3352_vm3, %v3351_v0 }
  0x92   : > { %3146 = vmatprep.subr.bf16.mxu0 %v3351_v0 }
  0x93   : > { %3139 = vmatpush3.bf16.msra.mxu1 %v1682_v53 }
  0x94   : > { %3152 = vmatprep.subr.bf16.mxu1 %v3351_v0 }
  0x95   : > { %3147 = vmatpush3.bf16.msra.mxu0 %v1743_v56 }
  0x96   : > { %3141 = vmatmul.mubr.msk.bf16.vlgmr.msra.gmra.mxu1 %vm394_vm0, %v1681_v57  ;;  %3160 = vmatprep.subr.bf16.mxu0 %v3351_v0 }
  0x97   : > { %3153 = vmatpush3.bf16.msra.mxu1 %v1805_v58  ;;  %3156 = vmatprep.mubr.msk.bf16.mxu1 %vm3352_vm3, %v3351_v0 }
  0x98   : > { %3154 = vmatprep.subr.bf16.mxu1 %v3351_v0  ;;  %3149 = vmatmul.mubr.msk.bf16.vlgmr.msra.gmra.mxu0 %vm394_vm0, %v1742_v61 }
  0x99   : > { %3164 = vmatprep.mubr.msk.bf16.mxu0 %vm3352_vm3, %v3351_v0  ;;  %3161 = vmatpush3.bf16.msra.mxu0 %v1950_v4 }
  0x9a   : > { %3162 = vmatprep.subr.bf16.mxu0 %v3351_v0 }
  0x9b   : > { %3155 = vmatpush3.bf16.msra.mxu1 %v1804_v62 }
  0x9c   : > { %3168 = vmatprep.subr.bf16.mxu1 %v3351_v0 }
  0x9d   : > { %3163 = vmatpush3.bf16.msra.mxu0 %v1949_v11 }
  0x9e   : > { %3157 = vmatmul.mubr.msk.bf16.vlgmr.msra.gmra.mxu1 %vm394_vm0, %v1803_v63  ;;  %3176 = vmatprep.subr.bf16.mxu0 %v3351_v0 }
  0x9f   : > { %3172 = vmatprep.mubr.msk.bf16.mxu1 %vm3352_vm3, %v3351_v0  ;;  %3169 = vmatpush3.bf16.msra.mxu1 %v1935_v8 }
  0xa0   : > { %3170 = vmatprep.subr.bf16.mxu1 %v3351_v0 }
  0xa3   : > { %3171 = vmatpush3.bf16.msra.mxu1 %v1934_v12 }
  0xa4   : > { %3184 = vmatprep.subr.bf16.mxu1 %v3351_v0 }
 0x117   : > { %v782_v13 = vpop.f32.mrf.mxu0 }
 0x119   : > { %v826_v14 = vpop.f32.mrf.mxu1  ;;  %v3022_v15 = vpop.f32.mrf.mxu0 }
 0x11a   : > { %v827_v63 = vadd.f32 %v826_v14, %v782_v13 }
 0x11b   : > { %v3030_v16 = vpop.f32.mrf.mxu1  ;;  %v785_v17 = vpop.f32.mrf.mxu0 }
 0x11d   : > { %v829_v18 = vpop.f32.mrf.mxu1  ;;  %v3023_v19 = vpop.f32.mrf.mxu0 }
 0x11e   : > { %v830_v8 = vadd.f32 %v829_v18, %v785_v17 }
 0x11f   : > { %v3031_v20 = vpop.f32.mrf.mxu1  ;;  %v885_v21 = vpop.f32.mrf.mxu0 }
 0x120   : > { %v892_v3 = vadd.f32 %v885_v21, %v827_v63 }
 0x121   : > { %v3038_v22 = vpop.f32.mrf.mxu0 }
 0x123   : > { %v888_v23 = vpop.f32.mrf.mxu0 }
 0x124   : > { %v893_v15 = vadd.f32 %v888_v23, %v830_v8  ;;  %v1893_v8 = vld [vmem:[#allocation6 + $0x40] sm:$0xff] }
 0x125   : > { %v3039_v24 = vpop.f32.mrf.mxu0 }
 0x126   : > { %v946_v25 = vpop.f32.mrf.mxu1 }
 0x127   : > { %v953_v12 = vadd.f32 %v946_v25, %v892_v3  ;;  %v1896_v3 = vld [vmem:[#allocation6 + $0x58] sm:$0xff] }
 0x128   : > { %v3046_v26 = vpop.f32.mrf.mxu1  ;;  %v1007_v27 = vpop.f32.mrf.mxu0 }
 0x129   : > { %v1014_v22 = vadd.f32 %v1007_v27, %v953_v12 }
 0x12a   : > { %v949_v28 = vpop.f32.mrf.mxu1  ;;  %v3054_v29 = vpop.f32.mrf.mxu0 }
 0x12b   : > { %v954_v29 = vadd.f32 %v949_v28, %v893_v15  ;;  %v1897_v15 = vld [vmem:[#allocation6 + $0x60] sm:$0xff] }
 0x12c   : > { %v3047_v30 = vpop.f32.mrf.mxu1  ;;  %v1010_v31 = vpop.f32.mrf.mxu0 }
 0x12e   : > { %v1068_v32 = vpop.f32.mrf.mxu1  ;;  %v3055_v33 = vpop.f32.mrf.mxu0 }
 0x130   : > { %v3062_v34 = vpop.f32.mrf.mxu1  ;;  %v1130_v35 = vpop.f32.mrf.mxu0 }
 0x131   : > { %v1075_v34 = vadd.f32 %v1068_v32, %v1014_v22 }
 0x132   : > { %v3897_v36 = vpop.f32.mrf.mxu1  ;;  %v3070_v37 = vpop.f32.mrf.mxu0 }
 0x133   : > { %v1015_v37 = vadd.f32 %v1010_v31, %v954_v29  ;;  %v1908_v29 = vld [vmem:[#allocation6 + $0xb8] sm:$0xff] }
 0x134   : > { %v3063_v38 = vpop.f32.mrf.mxu1  ;;  %v3899_v39 = vpop.f32.mrf.mxu0 }
 0x135   : > { %v1076_v27 = vadd.f32 %v3897_v36, %v1015_v37  ;;  %v1901_v37 = vld [vmem:[#allocation6 + $0x80] sm:$0xff] }
 0x136   : > { %v3901_v40 = vpop.f32.mrf.mxu1  ;;  %v3071_v41 = vpop.f32.mrf.mxu0 }
 0x137   : > { %v1137_v41 = vadd.f32 %v1130_v35, %v1075_v34 }
 0x138   : > { %v3078_v42 = vpop.f32.mrf.mxu1  ;;  %v3903_v43 = vpop.f32.mrf.mxu0 }
 0x139   : > { %v1198_v28 = vadd.f32 %v3901_v40, %v1137_v41 }
 0x13a   : > { %v3905_v44 = vpop.f32.mrf.mxu1  ;;  %v3086_v45 = vpop.f32.mrf.mxu0 }
 0x13c   : > { %v3079_v46 = vpop.f32.mrf.mxu1  ;;  %v3907_v47 = vpop.f32.mrf.mxu0 }
 0x13e   : > { %v1374_v48 = vpop.f32.mrf.mxu1  ;;  %v3087_v49 = vpop.f32.mrf.mxu0 }
 0x140   : > { %v3094_v50 = vpop.f32.mrf.mxu1  ;;  %v1418_v51 = vpop.f32.mrf.mxu0 }
 0x141   : > { %v1419_v60 = vadd.f32 %v1418_v51, %v1374_v48  ;;  %v1138_v50 = vadd.f32 %v3899_v39, %v1076_v27 }
 0x142   : > { %v1377_v52 = vpop.f32.mrf.mxu1  ;;  %v3102_v53 = vpop.f32.mrf.mxu0 }
 0x143   : > { %v1199_v36 = vadd.f32 %v3905_v44, %v1138_v50 }
 0x144   : > { %v3095_v54 = vpop.f32.mrf.mxu1  ;;  %v1421_v55 = vpop.f32.mrf.mxu0 }
 0x145   : > { %v1422_v5 = vadd.f32 %v1421_v55, %v1377_v52  ;;  %v1259_v52 = vadd.f32 %v3903_v43, %v1198_v28  ;;  %v2917_v54 = vld [vmem:[%s4051_s3] ss:$0 sm:$0xff]  ;;  %v1260_v40 = vadd.f32 %v3907_v47, %v1199_v36  ;;  %v1895_v47 = vld [vmem:[#allocation6 + $0x50] sm:$0xff]  ;;  %v1912_v28 = vld [vmem:[#allocation6 + $0xd8] sm:$0xff] }
 0x146   : > { %v1477_v56 = vpop.f32.mrf.mxu1  ;;  %v3103_v57 = vpop.f32.mrf.mxu0  ;;  %v2053_v12 = vpack.c.bf16 %v1896_v3, %v1895_v47  ;;  %v1910_v36 = vld [vmem:[#allocation6 + $0xc8] sm:$0xff] }
 0x147   : > { %v1484_v4 = vadd.f32 %v1477_v56, %v1419_v60  ;;  %v1918_v47 = vld [vmem:[#allocation6 + $0x108] sm:$0xff] }
 0x148   : > { %v3110_v58 = vpop.f32.mrf.mxu1  ;;  %v1538_v59 = vpop.f32.mrf.mxu0 }
 0x149   : > { %v1545_v9 = vadd.f32 %v1538_v59, %v1484_v4  ;;  %v1899_v4 = vld [vmem:[#allocation6 + $0x70] sm:$0xff] }
 0x14a   : > { %v1480_v61 = vpop.f32.mrf.mxu1  ;;  %v3118_v62 = vpop.f32.mrf.mxu0 }
 0x14b   : > { %v1485_v16 = vadd.f32 %v1480_v61, %v1422_v5  ;;  %v1900_v5 = vld [vmem:[#allocation6 + $0x78] sm:$0xff] }
 0x14c   : > { %v3111_v1 = vpop.f32.mrf.mxu1  ;;  %v1541_v2 = vpop.f32.mrf.mxu0 }
 0x14d   : > { %v1546_v26 = vadd.f32 %v1541_v2, %v1485_v16 }
 0x14e   : > { %v1599_v6 = vpop.f32.mrf.mxu1  ;;  %v3119_v7 = vpop.f32.mrf.mxu0 }
 0x14f   : > { %v1606_v24 = vadd.f32 %v1599_v6, %v1545_v9  ;;  %v1894_v9 = vld [vmem:[#allocation6 + $0x48] sm:$0xff] }
 0x150   : > { %v3126_v10 = vpop.f32.mrf.mxu1  ;;  %v1660_v11 = vpop.f32.mrf.mxu0 }
 0x151   : > { %v1667_v21 = vadd.f32 %v1660_v11, %v1606_v24  ;;  %v1903_v24 = vld [vmem:[#allocation6 + $0x90] sm:$0xff] }
 0x152   : > { %v1602_v19 = vpop.f32.mrf.mxu1  ;;  %v3134_v20 = vpop.f32.mrf.mxu0 }
 0x153   : > { %v1607_v17 = vadd.f32 %v1602_v19, %v1546_v26  ;;  %v2114_v19 = vpack.c.bf16 %v1900_v5, %v1899_v4  ;;  %v1898_v20 = vld [vmem:[#allocation6 + $0x68] sm:$0xff]  ;;  %v1904_v26 = vld [vmem:[#allocation6 + $0x98] sm:$0xff] }
 0x154   : > { %v3127_v13 = vpop.f32.mrf.mxu1  ;;  %v1663_v14 = vpop.f32.mrf.mxu0 }
 0x155   : > { %v1668_v23 = vadd.f32 %v1663_v14, %v1607_v17  ;;  %v2052_v13 = vpack.c.bf16 %v1894_v9, %v1893_v8  ;;  %v1907_v14 = vld [vmem:[#allocation6 + $0xb0] sm:$0xff] }
 0x156   : > { %v1721_v30 = vpop.f32.mrf.mxu1  ;;  %v3135_v33 = vpop.f32.mrf.mxu0  ;;  %v2236_v41 = vpack.c.bf16 %v1908_v29, %v1907_v14 }
 0x157   : > { %v1728_v25 = vadd.f32 %v1721_v30, %v1667_v21  ;;  %v2113_v21 = vpack.c.bf16 %v1898_v20, %v1897_v15 }
 0x158   : > { %v3142_v18 = vpop.f32.mrf.mxu1  ;;  %v1782_v38 = vpop.f32.mrf.mxu0 }
 0x159   : > { %v1789_v46 = vadd.f32 %v1782_v38, %v1728_v25  ;;  %v2175_v18 = vpack.c.bf16 %v1904_v26, %v1903_v24  ;;  %v1902_v25 = vld [vmem:[#allocation6 + $0x88] sm:$0xff] }
 0x15a   : > { %v1724_v42 = vpop.f32.mrf.mxu1  ;;  %v3150_v45 = vpop.f32.mrf.mxu0  ;;  %v2174_v27 = vpack.c.bf16 %v1902_v25, %v1901_v37 }
 0x15b   : > { %v1729_v51 = vadd.f32 %v1724_v42, %v1668_v23  ;;  %v1905_v42 = vld [vmem:[#allocation6 + $0xa0] sm:$0xff]  ;;  %v1906_v45 = vld [vmem:[#allocation6 + $0xa8] sm:$0xff] }
 0x15c   : > { %v3143_v48 = vpop.f32.mrf.mxu1  ;;  %v1785_v49 = vpop.f32.mrf.mxu0 }
 0x15d   : > { %v1790_v35 = vadd.f32 %v1785_v49, %v1729_v51  ;;  %v1911_v49 = vld [vmem:[#allocation6 + $0xd0] sm:$0xff] }
 0x15e   : > { %v1843_v32 = vpop.f32.mrf.mxu1  ;;  %v3151_v31 = vpop.f32.mrf.mxu0  ;;  %v1915_v51 = vld [vmem:[#allocation6 + $0xf0] sm:$0xff] }
 0x15f   : > { %v1850_v53 = vadd.f32 %v1843_v32, %v1789_v46  ;;  %v2235_v46 = vpack.c.bf16 %v1906_v45, %v1905_v42  ;;  %v1916_v32 = vld [vmem:[#allocation6 + $0xf8] sm:$0xff] }
 0x160   : > { %v3158_v55 = vpop.f32.mrf.mxu1 }
 0x161   : > { %v1852_v56 = vadd.f32 %v1850_v53, %v1259_v52  ;;  %v2297_v53 = vpack.c.bf16 %v1912_v28, %v1911_v49  ;;  %v1909_v55 = vld [vmem:[#allocation6 + $0xc0] sm:$0xff] }
 0x162   : > { %v1846_v57 = vpop.f32.mrf.mxu1 }
 0x163   : > { %v1861_v58 = vadd.f32 %v2917_v54, %v1852_v56  ;;  %v1851_v39 = vadd.f32 %v1846_v57, %v1790_v35  ;;  %v1913_v57 = vld [vmem:[#allocation6 + $0xe0] sm:$0xff] }
 0x164   : > { %v3159_v59 = vpop.f32.mrf.mxu1 }
 0x165   : > { %vm1863_vm5 = vcmp.ge.f32.partialorder %v1861_v58, 0.0  ;;  %v1865_v60 = vmul.f32 0.1, %v1861_v58  ;;  %v1853_v61 = vadd.f32 %v1851_v39, %v1260_v40  ;;  %v1914_v40 = vld [vmem:[#allocation6 + $0xe8] sm:$0xff] }
 0x166   : > { %v2357_v39 = vpack.c.bf16 %v1914_v40, %v1913_v57  ;;  %v2927_v40 = vld [vmem:[%s4053_s5] ss:$0 sm:$0xff] }
 0x167   : > { %v1867_v43 = vsel %vm1863_vm5, %v1861_v58, %v1865_v60  ;;  %v1862_v62 = vadd.f32 %v2917_v54, %v1853_v61  ;;  %v2358_v54 = vpack.c.bf16 %v1916_v32, %v1915_v51  ;;  %v2296_v58 = vpack.c.bf16 %v1910_v36, %v1909_v55  ;;  %v1919_v60 = vld [vmem:[#allocation6 + $0x110] sm:$0xff]  ;;  %v1920_v61 = vld [vmem:[#allocation6 + $0x118] sm:$0xff] }
 0x168   : > { %v1871_v63 = vcombine.high %v1867_v43, %v1867_v43  ;;  %1881 = vst.msk [vmem:[#allocation4 + $0x9] sm:$0xf] %vm674_vm4, %v1867_v43 }
 0x169   : > { %vm1864_vm6 = vcmp.ge.f32.partialorder %v1862_v62, 0.0  ;;  %v1866_v1 = vmul.f32 0.1, %v1862_v62 }
 0x16a   : > { %1882 = vst.msk [vmem:[#allocation4 + $0x11] sm:$0xf] %vm674_vm4, %v1871_v63 }
 0x16b   : > { %v1868_v44 = vsel %vm1864_vm6, %v1862_v62, %v1866_v1  ;;  %v2419_v1 = vpack.c.bf16 %v1920_v61, %v1919_v60 }
 0x16c   : > { %v1872_v2 = vcombine.high %v1868_v44, %v1868_v44  ;;  %1883 = vst.msk [vmem:[#allocation4 + $0x19] sm:$0xf] %vm674_vm4, %v1868_v44 }
 0x16e   : > { %1884 = vst.msk [vmem:[#allocation4 + $0x21] sm:$0xf] %vm674_vm4, %v1872_v2  ;;  %v1917_v2 = vld [vmem:[#allocation6 + $0x100] sm:$0xff] }
 0x16f   : > { %v3292_v6 = vld [vmem:[#allocation4 + $0x1] ss:$8 sps:$4 sm:$0xff]   ;;  %v2418_v4 = vpack.c.bf16 %v1918_v47, %v1917_v2 }
 0x170   : > { %v3294_v10 = vld [vmem:[#allocation4] ss:$8 sps:$4 sm:$0xff]  }
 0x171   : > { %v3296_v34 = vld [vmem:[#allocation4 + $0x2] ss:$8 sps:$4 sm:$0xff]  }
 0x172   : > { %v3298_v17 = vld [vmem:[#allocation4 + $0x8] ss:$8 sps:$4 sm:$0xff]  }
 0x173   : > { %v3293_v7 = vld [vmem:[#allocation4 + $0x11] ss:$8 sps:$4 sm:$0xff]  }
 0x174   : > { %v3295_v11 = vld [vmem:[#allocation4 + $0x10] ss:$8 sps:$4 sm:$0xff]   ;;  %v1948_v16 = vpack.c.bf16 %v3293_v7, %v3292_v6 }
 0x175   : > { %v1933_v22 = vpack.c.bf16 %v3295_v11, %v3294_v10  ;;  %v3297_v30 = vld [vmem:[#allocation4 + $0x12] ss:$8 sps:$4 sm:$0xff]   ;;  %v3305_v59 = vld [vmem:[#allocation4 + $0x20] ss:$8 sps:$4 sm:$0xff]  }
 0x176   : > { %3165 = vmatmul.mubr.msk.bf16.vlgmr.msra.gmra.mxu0 %vm394_vm0, %v1948_v16  ;;  %v3299_v33 = vld [vmem:[#allocation4 + $0x18] ss:$8 sps:$4 sm:$0xff]   ;;  %v2051_v38 = vpack.c.bf16 %v3297_v30, %v3296_v34  ;;  %v3300_v31 = vld [vmem:[#allocation4 + $0x9] ss:$8 sps:$4 sm:$0xff]  }
 0x177   : > { %3173 = vmatmul.mubr.msk.bf16.vlgmr.msra.gmra.mxu1 %vm394_vm0, %v1933_v22  ;;  %3177 = vmatpush3.bf16.msra.mxu0 %v2053_v12  ;;  %v2112_v23 = vpack.c.bf16 %v3299_v33, %v3298_v17  ;;  %v3301_v48 = vld [vmem:[#allocation4 + $0x19] ss:$8 sps:$4 sm:$0xff]   ;;  %v3302_v52 = vld [vmem:[#allocation4 + $0xa] ss:$8 sps:$4 sm:$0xff]  }
 0x178   : > { %3185 = vmatpush3.bf16.msra.mxu1 %v2114_v19  ;;  %3178 = vmatprep.subr.bf16.mxu0 %v3351_v0  ;;  %v3303_v50 = vld [vmem:[#allocation4 + $0x1a] ss:$8 sps:$4 sm:$0xff]   ;;  %v2173_v35 = vpack.c.bf16 %v3301_v48, %v3300_v31 }
 0x179   : > { %3186 = vmatprep.subr.bf16.mxu1 %v3351_v0  ;;  %3180 = vmatprep.mubr.msk.bf16.mxu0 %vm3352_vm3, %v3351_v0  ;;  %v2234_v56 = vpack.c.bf16 %v3303_v50, %v3302_v52  ;;  %v3307_v43 = vld [vmem:[#allocation4 + $0x21] ss:$8 sps:$4 sm:$0xff]   ;;  %v3304_v62 = vld [vmem:[#allocation4 + $0x10] ss:$8 sps:$4 sm:$0xff]  }
 0x17a   : > { %3188 = vmatprep.mubr.msk.bf16.mxu1 %vm3352_vm3, %v3351_v0  ;;  %v3306_v63 = vld [vmem:[#allocation4 + $0x11] ss:$8 sps:$4 sm:$0xff]   ;;  %v2295_v44 = vpack.c.bf16 %v3305_v59, %v3304_v62  ;;  %v3309_v5 = vld [vmem:[#allocation4 + $0x22] ss:$8 sps:$4 sm:$0xff]  }
 0x17b   : > { %3179 = vmatpush3.bf16.msra.mxu0 %v2052_v13  ;;  %v2356_v3 = vpack.c.bf16 %v3307_v43, %v3306_v63  ;;  %v3308_v6 = vld [vmem:[#allocation4 + $0x12] ss:$8 sps:$4 sm:$0xff]  }
 0x17c   : > { %3187 = vmatpush3.bf16.msra.mxu1 %v2113_v21  ;;  %3192 = vmatprep.subr.bf16.mxu0 %v3351_v0  ;;  %v2417_v7 = vpack.c.bf16 %v3309_v5, %v3308_v6 }
 0x17d   : > { %3200 = vmatprep.subr.bf16.mxu1 %v3351_v0 }
 0x17e   : > { %3181 = vmatmul.mubr.msk.bf16.vlgmr.msra.gmra.mxu0 %vm394_vm0, %v2051_v38 }
 0x17f   : > { %3189 = vmatmul.mubr.msk.bf16.vlgmr.msra.gmra.mxu1 %vm394_vm0, %v2112_v23  ;;  %3193 = vmatpush3.bf16.msra.mxu0 %v2175_v18 }
 0x180   : > { %3201 = vmatpush3.bf16.msra.mxu1 %v2236_v41  ;;  %3194 = vmatprep.subr.bf16.mxu0 %v3351_v0 }
 0x181   : > { %3202 = vmatprep.subr.bf16.mxu1 %v3351_v0  ;;  %3196 = vmatprep.mubr.msk.bf16.mxu0 %vm3352_vm3, %v3351_v0 }
 0x182   : > { %3204 = vmatprep.mubr.msk.bf16.mxu1 %vm3352_vm3, %v3351_v0 }
 0x183   : > { %3195 = vmatpush3.bf16.msra.mxu0 %v2174_v27 }
 0x184   : > { %3203 = vmatpush3.bf16.msra.mxu1 %v2235_v46  ;;  %3208 = vmatprep.subr.bf16.mxu0 %v3351_v0 }
 0x185   : > { %3216 = vmatprep.subr.bf16.mxu1 %v3351_v0 }
 0x186   : > { %3197 = vmatmul.mubr.msk.bf16.vlgmr.msra.gmra.mxu0 %vm394_vm0, %v2173_v35 }
 0x187   : > { %3205 = vmatmul.mubr.msk.bf16.vlgmr.msra.gmra.mxu1 %vm394_vm0, %v2234_v56  ;;  %3209 = vmatpush3.bf16.msra.mxu0 %v2297_v53 }
 0x188   : > { %3217 = vmatpush3.bf16.msra.mxu1 %v2358_v54  ;;  %3210 = vmatprep.subr.bf16.mxu0 %v3351_v0 }
 0x189   : > { %3218 = vmatprep.subr.bf16.mxu1 %v3351_v0  ;;  %3212 = vmatprep.mubr.msk.bf16.mxu0 %vm3352_vm3, %v3351_v0 }
 0x18a   : > { %3220 = vmatprep.mubr.msk.bf16.mxu1 %vm3352_vm3, %v3351_v0 }
 0x18b   : > { %3211 = vmatpush3.bf16.msra.mxu0 %v2296_v58 }
 0x18c   : > { %3219 = vmatpush3.bf16.msra.mxu1 %v2357_v39  ;;  %3224 = vmatprep.subr.bf16.mxu0 %v3351_v0 }
 0x18e   : > { %3213 = vmatmul.mubr.msk.bf16.vlgmr.msra.gmra.mxu0 %vm394_vm0, %v2295_v44 }
 0x18f   : > { %3221 = vmatmul.mubr.msk.bf16.vlgmr.msra.gmra.mxu1 %vm394_vm0, %v2356_v3  ;;  %3225 = vmatpush3.bf16.msra.mxu0 %v2419_v1 }
 0x190   : > { %3226 = vmatprep.subr.bf16.mxu0 %v3351_v0  ;;  %3228 = vmatprep.mubr.msk.bf16.mxu0 %vm3352_vm3, %v3351_v0 }
 0x193   : > { %3227 = vmatpush3.bf16.msra.mxu0 %v2418_v4 }
 0x196   : > { %3229 = vmatmul.mubr.msk.bf16.vlgmr.msra.gmra.mxu0 %vm394_vm0, %v2417_v7 }
 0x236   : > { %v1988_v8 = vpop.f32.mrf.mxu0 }
 0x237   : > { %v2032_v9 = vpop.f32.mrf.mxu1 }
 0x238   : > { %v3166_v10 = vpop.f32.mrf.mxu0  ;;  %v2033_v0 = vadd.f32 %v2032_v9, %v1988_v8 }
 0x239   : > { %v3174_v11 = vpop.f32.mrf.mxu1 }
 0x23a   : > { %v1991_v12 = vpop.f32.mrf.mxu0 }
 0x23b   : > { %v2035_v15 = vpop.f32.mrf.mxu1 }
 0x23c   : > { %v3167_v16 = vpop.f32.mrf.mxu0  ;;  %v2036_v34 = vadd.f32 %v2035_v15, %v1991_v12 }
 0x23d   : > { %v3175_v19 = vpop.f32.mrf.mxu1 }
 0x23e   : > { %v2091_v20 = vpop.f32.mrf.mxu0 }
 0x23f   : > { %v2152_v22 = vpop.f32.mrf.mxu1  ;;  %v2098_v21 = vadd.f32 %v2091_v20, %v2033_v0 }
 0x240   : > { %v3182_v24 = vpop.f32.mrf.mxu0 }
 0x241   : > { %v3190_v26 = vpop.f32.mrf.mxu1  ;;  %v2159_v18 = vadd.f32 %v2152_v22, %v2098_v21 }
 0x242   : > { %v2094_v13 = vpop.f32.mrf.mxu0 }
 0x243   : > { %v2155_v14 = vpop.f32.mrf.mxu1  ;;  %v2099_v38 = vadd.f32 %v2094_v13, %v2036_v34 }
 0x244   : > { %v3183_v29 = vpop.f32.mrf.mxu0 }
 0x245   : > { %v3191_v30 = vpop.f32.mrf.mxu1  ;;  %v2160_v27 = vadd.f32 %v2155_v14, %v2099_v38 }
 0x246   : > { %v2213_v33 = vpop.f32.mrf.mxu0 }
 0x247   : > { %v2274_v37 = vpop.f32.mrf.mxu1  ;;  %v2220_v23 = vadd.f32 %v2213_v33, %v2159_v18 }
 0x248   : > { %v3198_v17 = vpop.f32.mrf.mxu0 }
 0x249   : > { %v3206_v41 = vpop.f32.mrf.mxu1  ;;  %v2281_v49 = vadd.f32 %v2274_v37, %v2220_v23 }
 0x24a   : > { %v2216_v25 = vpop.f32.mrf.mxu0 }
 0x24b   : > { %v2277_v42 = vpop.f32.mrf.mxu1  ;;  %v2221_v28 = vadd.f32 %v2216_v25, %v2160_v27 }
 0x24c   : > { %v3199_v45 = vpop.f32.mrf.mxu0 }
 0x24d   : > { %v3207_v46 = vpop.f32.mrf.mxu1  ;;  %v2282_v53 = vadd.f32 %v2277_v42, %v2221_v28 }
 0x24e   : > { %v2335_v48 = vpop.f32.mrf.mxu0 }
 0x24f   : > { %v2396_v50 = vpop.f32.mrf.mxu1  ;;  %v2342_v32 = vadd.f32 %v2335_v48, %v2281_v49 }
 0x250   : > { %v3214_v51 = vpop.f32.mrf.mxu0 }
 0x251   : > { %v3222_v31 = vpop.f32.mrf.mxu1  ;;  %v2403_v55 = vadd.f32 %v2396_v50, %v2342_v32 }
 0x252   : > { %v2338_v52 = vpop.f32.mrf.mxu0 }
 0x253   : > { %v2399_v35 = vpop.f32.mrf.mxu1  ;;  %v2343_v36 = vadd.f32 %v2338_v52, %v2282_v53 }
 0x254   : > { %v3215_v54 = vpop.f32.mrf.mxu0 }
 0x255   : > { %v3223_v56 = vpop.f32.mrf.mxu1  ;;  %v2404_v59 = vadd.f32 %v2399_v35, %v2343_v36 }
 0x256   : > { %v2457_v57 = vpop.f32.mrf.mxu0 }
 0x257   : > { %v2464_v58 = vadd.f32 %v2457_v57, %v2403_v55 }
 0x258   : > { %v3230_v39 = vpop.f32.mrf.mxu0 }
 0x259   : > { %v2473_v60 = vadd.f32 %v2927_v40, %v2464_v58 }
 0x25a   : > { %v2460_v61 = vpop.f32.mrf.mxu0 }
 0x25b   : > { %vm2475_vm7 = vcmp.ge.f32.partialorder %v2473_v60, 0.0  ;;  %v2477_v43 = vmul.f32 0.1, %v2473_v60  ;;  %v2465_v62 = vadd.f32 %v2460_v61, %v2404_v59 }
 0x25c   : > { %v3231_v63 = vpop.f32.mrf.mxu0 }
 0x25d   : > { %v2479_v1 = vsel %vm2475_vm7, %v2473_v60, %v2477_v43  ;;  %v2474_v44 = vadd.f32 %v2927_v40, %v2465_v62 }
 0x25e   : > { %v2483_v2 = vcombine.high %v2479_v1, %v2479_v1  ;;  %2488 = vst.msk [vmem:[#allocation5 + $0x9] sm:$0xf] %vm674_vm4, %v2479_v1  ;;  %2492 = vst.msk [vmem:[#allocation5 + $0x1] sm:$0xf] %vm674_vm4, %v2479_v1 }
 0x25f   : > { %vm2476_vm8 = vcmp.ge.f32.partialorder %v2474_v44, 0.0  ;;  %v2478_v47 = vmul.f32 0.1, %v2474_v44 }
 0x260   : > { %2489 = vst.msk [vmem:[#allocation5 + $0x11] sm:$0xf] %vm674_vm4, %v2483_v2 }
 0x261   : > { %v2480_v3 = vsel %vm2476_vm8, %v2474_v44, %v2478_v47 }
 0x262   : > { %v2484_v4 = vcombine.high %v2480_v3, %v2480_v3  ;;  %2490 = vst.msk [vmem:[#allocation5 + $0x19] sm:$0xf] %vm674_vm4, %v2480_v3 }
 0x264   : > { %2491 = vst.msk [vmem:[#allocation5 + $0x21] sm:$0xf] %vm674_vm4, %v2484_v4  ;;  %2494 = vst.msk [vmem:[#allocation5 + $0x29] sm:$0xf] %vm674_vm4, %v2484_v4 }
 0x265   : > { %v2495_v5 = vld [vmem:[#allocation5 + $0x1] sm:$0x1]  ;;  %v2496_v6 = vld [vmem:[#allocation5 + $0x9] sm:$0x1]  ;;  %v2507_v7 = vld [vmem:[#allocation5 + $0x4] sm:$0x1] }
 0x266   : > { %2501 = vst.msk [vmem:[#allocation5] sm:$0x1] %vm396_vm1, %v2495_v5  ;;  %2502 = vst.msk [vmem:[#allocation5 + $0x8] sm:$0x1] %vm396_vm1, %v2496_v6  ;;  %v2508_v8 = vld [vmem:[#allocation5 + $0xc] sm:$0x1] }
 0x267   : > { %2513 = vst.msk [vmem:[#allocation5 + $0x5] sm:$0x1] %vm396_vm1, %v2507_v7  ;;  %v2497_v9 = vld [vmem:[#allocation5 + $0x11] sm:$0x1]  ;;  %v2509_v10 = vld [vmem:[#allocation5 + $0x14] sm:$0x1] }
 0x268   : > { %2514 = vst.msk [vmem:[#allocation5 + $0xd] sm:$0x1] %vm396_vm1, %v2508_v8  ;;  %2503 = vst.msk [vmem:[#allocation5 + $0x10] sm:$0x1] %vm396_vm1, %v2497_v9  ;;  %v2519_v12 = vld [vmem:[#allocation5 + $0x9] sm:$0xf] }
 0x269   : > { %2515 = vst.msk [vmem:[#allocation5 + $0x15] sm:$0x1] %vm396_vm1, %v2509_v10  ;;  %v2498_v11 = vld [vmem:[#allocation5 + $0x19] sm:$0x1]  ;;  %v2510_v15 = vld [vmem:[#allocation5 + $0x1c] sm:$0x1] }
 0x26a   : > { %2504 = vst.msk [vmem:[#allocation5 + $0x18] sm:$0x1] %vm396_vm1, %v2498_v11  ;;  %v2520_v16 = vld [vmem:[#allocation5 + $0x11] sm:$0xf]  ;;  %v2523_v19 = vld [vmem:[#allocation5 + $0x1] sm:$0xf] }
 0x26b   : > { %v2499_v20 = vld [vmem:[#allocation5 + $0x21] sm:$0x1]  ;;  %v2500_v22 = vld [vmem:[#allocation5 + $0x29] sm:$0x1]  ;;  %v2511_v24 = vld [vmem:[#allocation5 + $0x24] sm:$0x1] }
 0x26c   : > { %2516 = vst.msk [vmem:[#allocation5 + $0x1d] sm:$0x1] %vm396_vm1, %v2510_v15  ;;  %v2524_v26 = vld [vmem:[#allocation5 + $0x9] sm:$0xf]  ;;  %v2525_v13 = vld [vmem:[#allocation5 + $0x11] sm:$0xf] }
 0x26d   : > { %2505 = vst.msk [vmem:[#allocation5 + $0x20] sm:$0x1] %vm396_vm1, %v2499_v20  ;;  %2506 = vst.msk [vmem:[#allocation5 + $0x28] sm:$0x1] %vm396_vm1, %v2500_v22  ;;  %v2512_v0 = vld [vmem:[#allocation5 + $0x2c] sm:$0x1] }
 0x26e   : > { %2517 = vst.msk [vmem:[#allocation5 + $0x25] sm:$0x1] %vm396_vm1, %v2511_v24  ;;  %v2528_v14 = vld [vmem:[#allocation5 + $0x11] sm:$0xf]  ;;  %v2532_v29 = vld [vmem:[#allocation5 + $0x8] sm:$0xf] }
 0x26f   : > { %v2556_v21 = vmul.f32 0.75, %v2519_v12  ;;  %2518 = vst.msk [vmem:[#allocation5 + $0x2d] sm:$0x1] %vm396_vm1, %v2512_v0  ;;  %v2536_v30 = vld [vmem:[#allocation5 + $0xa] sm:$0xf]  ;;  %v2557_v41 = vmul.f32 0.75, %v2520_v16 }
 0x270   : > { %v2540_v33 = vld [vmem:[#allocation5] sm:$0xf]  ;;  %v2541_v34 = vld [vmem:[#allocation5 + $0x8] sm:$0xf]  ;;  %v2533_v37 = vld [vmem:[#allocation5 + $0x10] sm:$0xf] }
 0x271   : > { %v2537_v17 = vld [vmem:[#allocation5 + $0x12] sm:$0xf]  ;;  %v2544_v18 = vld [vmem:[#allocation5 + $0x2] sm:$0xf]  ;;  %v2545_v38 = vld [vmem:[#allocation5 + $0xa] sm:$0xf] }
 0x272   : > { %v2572_v25 = vmul.f32 0.75, %v2523_v19  ;;  %v2573_v23 = vmul.f32 0.75, %v2524_v26  ;;  %v2574_v42 = vmul.f32 0.75, %v2525_v13  ;;  %v2542_v45 = vld [vmem:[#allocation5 + $0x10] sm:$0xf]  ;;  %v2560_v27 = vmul.f32 0.25, %v2532_v29 }
 0x273   : > { %v2561_v46 = vmul.f32 0.25, %v2533_v37  ;;  %v2576_v48 = vmul.f32 0.25, %v2540_v33  ;;  %v2577_v49 = vmul.f32 0.25, %v2541_v34  ;;  %v2592_v28 = vmul.f32 0.25, %v2536_v30  ;;  %v2546_v31 = vld [vmem:[#allocation5 + $0x12] sm:$0xf] }
 0x274   : > { %v2593_v50 = vmul.f32 0.25, %v2537_v17  ;;  %v2604_v51 = vmul.f32 0.25, %v2544_v18  ;;  %v2620_v32 = vmul.f32 0.75, %v2528_v14  ;;  %v2564_v52 = vadd.f32 %v2560_v27, %v2556_v21  ;;  %v2548_v55 = vld [vmem:[#allocation5 + $0x10] sm:$0xf] }
 0x275   : > { %v2565_v53 = vadd.f32 %v2561_v46, %v2557_v41  ;;  %v2580_v35 = vadd.f32 %v2576_v48, %v2572_v25  ;;  %v2581_v54 = vadd.f32 %v2577_v49, %v2573_v23  ;;  %v2578_v36 = vmul.f32 0.25, %v2542_v45  ;;  %v2552_v58 = vld [vmem:[#allocation5 + $0x12] sm:$0xf]  ;;  %v2521_v44 = vld [vmem:[#allocation5 + $0x19] sm:$0xf] }
 0x276   : > { %v2596_v56 = vadd.f32 %v2592_v28, %v2556_v21  ;;  %v2597_v57 = vadd.f32 %v2593_v50, %v2557_v41  ;;  %v2605_v40 = vmul.f32 0.25, %v2545_v38  ;;  %v2568_v39 = vmul.f32 0.75, %v2564_v52  ;;  %v2522_v5 = vld [vmem:[#allocation5 + $0x21] sm:$0xf]  ;;  %v2534_v6 = vld [vmem:[#allocation5 + $0x18] sm:$0xf] }
 0x277   : > { %v3981_v59 = vmul.f32 0.75, %v2565_v53  ;;  %v2584_v60 = vmul.f32 0.25, %v2580_v35  ;;  %v2585_v61 = vmul.f32 0.25, %v2581_v54  ;;  %v2606_v63 = vmul.f32 0.25, %v2546_v31  ;;  %v2526_v10 = vld [vmem:[#allocation5 + $0x19] sm:$0xf] }
 0x278   : > { %v2600_v43 = vmul.f32 0.75, %v2596_v56  ;;  %v3989_v62 = vmul.f32 0.75, %v2597_v57  ;;  %v2608_v1 = vadd.f32 %v2604_v51, %v2572_v25  ;;  %v2609_v3 = vadd.f32 %v2605_v40, %v2573_v23  ;;  %v2535_v11 = vld [vmem:[#allocation5 + $0x20] sm:$0xf]  ;;  %v2543_v19 = vld [vmem:[#allocation5 + $0x18] sm:$0xf] }
 0x279   : > { %v2588_v2 = vadd.f32 %v2584_v60, %v2568_v39  ;;  %v2589_v47 = vadd.f32 %v2585_v61, %v3981_v59  ;;  %v2624_v4 = vmul.f32 0.25, %v2548_v55  ;;  %v2582_v7 = vadd.f32 %v2578_v36, %v2574_v42  ;;  %v2538_v26 = vld [vmem:[#allocation5 + $0x1a] sm:$0xf]  ;;  %v2539_v13 = vld [vmem:[#allocation5 + $0x22] sm:$0xf] }
 0x27a   : > { %v2612_v8 = vmul.f32 0.25, %v2608_v1  ;;  %v2640_v9 = vmul.f32 0.25, %v2552_v58  ;;  %v2610_v12 = vadd.f32 %v2606_v63, %v2574_v42  ;;  %v2613_v15 = vmul.f32 0.25, %v2609_v3  ;;  %v2547_v30 = vld [vmem:[#allocation5 + $0x1a] sm:$0xf] }
 0x27b   : > { %v2628_v16 = vadd.f32 %v2624_v4, %v2620_v32  ;;  %2656 = vst.msk [vmem:[%s3987_s21] sm:$0xf] %vm674_vm4, %v2588_v2  ;;  %2657 = vst.msk [vmem:[%s3987_s21 + $0x4] sm:$0xf] %vm674_vm4, %v2589_v47  ;;  %v2558_v20 = vmul.f32 0.75, %v2521_v44  ;;  %v2559_v0 = vmul.f32 0.75, %v2522_v5 }
 0x27c   : > { %v2616_v22 = vadd.f32 %v2612_v8, %v2600_v43  ;;  %v2644_v24 = vadd.f32 %v2640_v9, %v2620_v32  ;;  %v2562_v14 = vmul.f32 0.25, %v2534_v6  ;;  %v2617_v29 = vadd.f32 %v2613_v15, %v3989_v62  ;;  %v2529_v25 = vld [vmem:[#allocation5 + $0x19] sm:$0xf]  ;;  %v2530_v23 = vld [vmem:[#allocation5 + $0x21] sm:$0xf] }
 0x27d   : > { %v2632_v21 = vmul.f32 0.25, %v2628_v16  ;;  %v2563_v33 = vmul.f32 0.25, %v2535_v11  ;;  %v2575_v34 = vmul.f32 0.75, %v2526_v10  ;;  %v2579_v18 = vmul.f32 0.25, %v2543_v19  ;;  %v2531_v48 = vld [vmem:[#allocation5 + $0x29] sm:$0xf] }
 0x27e   : > { %v2648_v37 = vmul.f32 0.25, %v2644_v24  ;;  %2660 = vst.msk [vmem:[%s3996_s24] sm:$0xf] %vm674_vm4, %v2616_v22  ;;  %v2566_v17 = vadd.f32 %v2562_v14, %v2558_v20  ;;  %v2586_v38 = vmul.f32 0.25, %v2582_v7  ;;  %2661 = vst.msk [vmem:[%s3996_s24 + $0x4] sm:$0xf] %vm674_vm4, %v2617_v29 }
 0x27f   : > { %v2636_v41 = vadd.f32 %v2632_v21, %v2568_v39  ;;  %v2567_v42 = vadd.f32 %v2563_v33, %v2559_v0  ;;  %v2594_v45 = vmul.f32 0.25, %v2538_v26  ;;  %v2595_v27 = vmul.f32 0.25, %v2539_v13  ;;  %v2549_v49 = vld [vmem:[#allocation5 + $0x18] sm:$0xf]  ;;  %v2550_v32 = vld [vmem:[#allocation5 + $0x20] sm:$0xf] }
 0x280   : > { %v2652_v46 = vadd.f32 %v2648_v37, %v2600_v43  ;;  %v2570_v28 = vmul.f32 0.75, %v2566_v17  ;;  %v2583_v50 = vadd.f32 %v2579_v18, %v2575_v34  ;;  %v2607_v51 = vmul.f32 0.25, %v2547_v30  ;;  %v2551_v31 = vld [vmem:[#allocation5 + $0x28] sm:$0xf]  ;;  %v2553_v55 = vld [vmem:[#allocation5 + $0x1a] sm:$0xf] }
 0x281   : > { %2664 = vst.msk [vmem:[%s4007_s27] sm:$0xf] %vm674_vm4, %v2636_v41  ;;  %v2571_v52 = vmul.f32 0.75, %v2567_v42  ;;  %v2598_v53 = vadd.f32 %v2594_v45, %v2558_v20  ;;  %v2599_v35 = vadd.f32 %v2595_v27, %v2559_v0  ;;  %v2614_v54 = vmul.f32 0.25, %v2610_v12  ;;  %v2554_v36 = vld [vmem:[#allocation5 + $0x22] sm:$0xf] }
 0x282   : > { %2668 = vst.msk [vmem:[%s4015_s11] sm:$0xf] %vm674_vm4, %v2652_v46  ;;  %v2587_v56 = vmul.f32 0.25, %v2583_v50  ;;  %v2590_v57 = vadd.f32 %v2586_v38, %v2570_v28  ;;  %v2611_v40 = vadd.f32 %v2607_v51, %v2575_v34  ;;  %v2621_v58 = vmul.f32 0.75, %v2529_v25  ;;  %v2555_v39 = vld [vmem:[#allocation5 + $0x2a] sm:$0xf] }
 0x283   : > { %v2602_v60 = vmul.f32 0.75, %v2598_v53  ;;  %v2603_v61 = vmul.f32 0.75, %v2599_v35  ;;  %v2622_v43 = vmul.f32 0.75, %v2530_v23  ;;  %v2623_v63 = vmul.f32 0.75, %v2531_v48 }
 0x284   : > { %v2591_v1 = vadd.f32 %v2587_v56, %v2571_v52  ;;  %v2615_v44 = vmul.f32 0.25, %v2611_v40  ;;  %v2625_v2 = vmul.f32 0.25, %v2549_v49  ;;  %v2626_v47 = vmul.f32 0.25, %v2550_v32  ;;  %2658 = vst.msk [vmem:[%s3987_s21 + $0x8] sm:$0xf] %vm674_vm4, %v2590_v57 }
 0x285   : > { %v2618_v3 = vadd.f32 %v2614_v54, %v2602_v60  ;;  %v2627_v4 = vmul.f32 0.25, %v2551_v31  ;;  %v2641_v5 = vmul.f32 0.25, %v2553_v55  ;;  %v2642_v6 = vmul.f32 0.25, %v2554_v36 }
 0x286   : > { %v2619_v7 = vadd.f32 %v2615_v44, %v2603_v61  ;;  %v2629_v8 = vadd.f32 %v2625_v2, %v2621_v58  ;;  %v2630_v9 = vadd.f32 %v2626_v47, %v2622_v43  ;;  %v2643_v10 = vmul.f32 0.25, %v2555_v39  ;;  %2659 = vst.msk [vmem:[%s3987_s21 + $0xc] sm:$0xf] %vm674_vm4, %v2591_v1 }
 0x287   : > { %v2631_v11 = vadd.f32 %v2627_v4, %v2623_v63  ;;  %v2645_v12 = vadd.f32 %v2641_v5, %v2621_v58  ;;  %v2646_v15 = vadd.f32 %v2642_v6, %v2622_v43  ;;  %2662 = vst.msk [vmem:[%s3996_s24 + $0x8] sm:$0xf] %vm674_vm4, %v2618_v3 }
 0x288   : > { %v2633_v16 = vmul.f32 0.25, %v2629_v8  ;;  %v2634_v19 = vmul.f32 0.25, %v2630_v9  ;;  %v2647_v20 = vadd.f32 %v2643_v10, %v2623_v63  ;;  %2663 = vst.msk [vmem:[%s3996_s24 + $0xc] sm:$0xf] %vm674_vm4, %v2619_v7 }
 0x289   : > { %v2635_v22 = vmul.f32 0.25, %v2631_v11  ;;  %v2649_v24 = vmul.f32 0.25, %v2645_v12  ;;  %v2650_v26 = vmul.f32 0.25, %v2646_v15 }
 0x28a   : > { %v2637_v13 = vadd.f32 %v2633_v16, %v3981_v59  ;;  %v2638_v0 = vadd.f32 %v2634_v19, %v2570_v28  ;;  %v2651_v14 = vmul.f32 0.25, %v2647_v20 }
 0x28b   : > { %v2639_v29 = vadd.f32 %v2635_v22, %v2571_v52  ;;  %v2653_v21 = vadd.f32 %v2649_v24, %v3989_v62  ;;  %v2654_v30 = vadd.f32 %v2650_v26, %v2602_v60 }
 0x28c   : > { %v2655_v33 = vadd.f32 %v2651_v14, %v2603_v61  ;;  %2665 = vst.msk [vmem:[%s4007_s27 + $0x4] sm:$0xf] %vm674_vm4, %v2637_v13  ;;  %2666 = vst.msk [vmem:[%s4007_s27 + $0x8] sm:$0xf] %vm674_vm4, %v2638_v0 }
 0x28d   : > { %2667 = vst.msk [vmem:[%s4007_s27 + $0xc] sm:$0xf] %vm674_vm4, %v2639_v29  ;;  %2669 = vst.msk [vmem:[%s4015_s11 + $0x4] sm:$0xf] %vm674_vm4, %v2653_v21 }
 0x28e   : > { %2670 = vst.msk [vmem:[%s4015_s11 + $0x8] sm:$0xf] %vm674_vm4, %v2654_v30  ;;  %2671 = vst.msk [vmem:[%s4015_s11 + $0xc] sm:$0xf] %vm674_vm4, %v2655_v33 }
 0x28f PF: > { %s21_s30 = sadd.s32 1, %s3346_s30  }
 0x290   : > { %p18_p1 = scmp.ge.s32.totalorder %s21_s30, 4  }
 0x292   :  { %20 = sbr.rel (!%p18_p1) target bundleno = 1 (0x1), region = 190 }
 0x297   :  { %2741 = vsyncpa [#allocation7], 1 }
 0x298   :  { %2743 = vsyncpa [#allocation7 + $0x1], 1 }

// kernel: attention_forward.7
= control target key start
LH: loop header
LB: loop body
LE: loop exit
PB: predicated region body
PF: predicated region fallthrough
CT: control target
= control target key end

     0   :  { %13 = vsyncpa [#allocation4], 0  ;;  %s6767_s0 = inlined_call_operand.vmem [shape: f32[2,16,16,32], index: 0, kind: input, shape index: {}]   ;;  %s6768_s1 = inlined_call_operand.vmem [shape: f32[2,16,16,32], index: 1, kind: input, shape index: {}]   ;;  %s6769_s2 = inlined_call_operand.vmem [shape: f32[9,32,32], index: 2, kind: input, shape index: {}]   ;;  %s6770_s3 = inlined_call_operand.vmem [shape: f32[1,32], index: 3, kind: input, shape index: {}]   ;;  %s6771_s4 = inlined_call_operand.vmem [shape: f32[32,32], index: 4, kind: input, shape index: {}]   ;;  %s6772_s5 = inlined_call_operand.vmem [shape: f32[1,32], index: 5, kind: input, shape index: {}]   ;;  %s6773_s6 = inlined_call_operand.vmem [shape: f32[32,32], index: 6, kind: input, shape index: {}]   ;;  %s6774_s7 = inlined_call_operand.vmem [shape: f32[1,32], index: 7, kind: input, shape index: {}]   ;;  %s6775_s8 = inlined_call_operand.hbm [shape: f32[2,16,16,32], index: 8, kind: output, shape index: {}]  }
   0x1   :  { %15 = vsyncpa [#allocation4 + $0x1], 0  ;;  %s5196_s27 = smov 0   ;;  %s5198_s28 = smov 0  }
   0x2   :  { %s5200_s29 = smov 0   ;;  %s5202_s30 = smov 0  }
   0x3 LB: > { %s5217_s9 = sadd.s32 4294967295, %s5145_s30   ;;  %s4089_s10 = sadd.s32 4294967294, %s5145_s30   ;;  %s5145_s30 = sphi %s5202_s30, %s6803_s30   ;;  %s5141_s29 = sphi %s5200_s29, %s6802_s29   ;;  %s5137_s28 = sphi %s5198_s28, %s6801_s28   ;;  %s5133_s27 = sphi %s5196_s27, %s6800_s27  }
   0x4   : > { %s5221_s11 = sadd.s32 1, %s5145_s30   ;;  %s206_s12 = sadd.s32 1, %s5141_s29 }
   0x5   : > { %s203_s13 = ssub.s32 %s5145_s30, %s5221_s11  ;;  %p216_p0 = scmp.ne.s32.totalorder %s5141_s29, %s5137_s28 }
   0x6   : > { %p204_p1 = scmp.eq.s32.totalorder %s203_s13, 0  ;;  %p217_p2 = scmp.eq.s32.totalorder %s5217_s9, 1 }
   0x7   : > { %p222_p3 = scmp.ne.s32.totalorder %s5137_s28, %s5133_s27  ;;  %p223_p4 = scmp.eq.s32.totalorder %s4089_s10, 1 }
   0x8   : > { %s5232_s14 = scalar_select %p204_p1, %s5141_s29, %s206_s12  }
   0x9   : > { %p5234_p5 = por %p217_p2, %p216_p0  ;;  %p5238_p6 = por %p223_p4, %p222_p3 }
   0xa   : > { %p4092_p7 = scmp.ge.s32.totalorder %s5145_s30, 1  ;;  %p275_p8 = scmp.lt.s32.totalorder %s5145_s30, 3 }
   0xc   : > { %p276_p9 = pnand %p4092_p7, %p275_p8 }
   0xe   : > { %279 = sbr.rel (%p276_p9) target bundleno = 971 (0x3cb), region = 52 }
  0x13   : > { %v452_v0 = vld [vmem:[%s6769_s2 + $0x30] sm:$0xff]  ;;  %v453_v1 = vld [vmem:[%s6769_s2 + $0x38] sm:$0xff]  ;;  %v450_v2 = vld [vmem:[%s6769_s2 + $0x20] sm:$0xff]  ;;  %vm357_vm0 = vcmask 261120   ;;  %vm360_vm1 = vcmask 254976   ;;  %v5147_v5 = vmov 0.0  }
  0x14   : > { %v5253_v3 = vpack.c.bf16 %v453_v1, %v452_v0  ;;  %v451_v4 = vld [vmem:[%s6769_s2 + $0x28] sm:$0xff]  ;;  %358 = vst.msk [vmem:[#allocation2] sm:$0xff] %vm357_vm0, %v5147_v5  ;;  %359 = vst.msk [vmem:[#allocation2 + $0x8] sm:$0xff] %vm357_vm0, %v5147_v5  ;;  %p314_p10 = scmp.lt.s32.totalorder %s5217_s9, 1  ;;  %v448_v6 = vld [vmem:[%s6769_s2 + $0x10] sm:$0xff]  ;;  %s4316_s19 = sshll.u32 %s5217_s9, 12 }
  0x15   : > { %361 = vst.msk [vmem:[#allocation2 + $0x10] sm:$0x3] %vm360_vm1, %v5147_v5  ;;  %364 = vst.msk [vmem:[#allocation2 + $0x28] sm:$0x3] %vm360_vm1, %v5147_v5  ;;  %v580_v7 = vpack.c.bf16 %v451_v4, %v450_v2  ;;  %v449_v8 = vld [vmem:[%s6769_s2 + $0x18] sm:$0xff]  ;;  %v456_v9 = vld [vmem:[%s6769_s2 + $0x50] sm:$0xff]  ;;  %s6717_s26 = scalar_lea.hbm %s6775_s8, %s4316_s19 }
  0x16   : > { %362 = vst.msk [vmem:[#allocation2 + $0x18] sm:$0xff] %vm357_vm0, %v5147_v5  ;;  %363 = vst.msk [vmem:[#allocation2 + $0x20] sm:$0xff] %vm357_vm0, %v5147_v5  ;;  %v457_v10 = vld [vmem:[%s6769_s2 + $0x58] sm:$0xff]  ;;  %4515 = vmatprep.subr.bf16.mxu0 %v5253_v3  ;;  %4911 = vmatprep.subr.bf16.mxu1 %v5253_v3  ;;  %s5328_s20 = scalar_select %p314_p10, %s5217_s9, 1  ;;  %v5333_v11 = vpack.c.bf16 %v449_v8, %v448_v6  ;;  %v454_v29 = vld [vmem:[%s6769_s2 + $0x40] sm:$0xff] }
  0x17   : > { %365 = vst.msk [vmem:[#allocation2 + $0x30] sm:$0xff] %vm357_vm0, %v5147_v5  ;;  %366 = vst.msk [vmem:[#allocation2 + $0x38] sm:$0xff] %vm357_vm0, %v5147_v5  ;;  %4516 = vmatpush3.bf16.msra.mxu0 %v5253_v3  ;;  %4913 = vmatpush3.bf16.msra.mxu1 %v5253_v3  ;;  %v5335_v12 = vpack.c.bf16 %v457_v10, %v456_v9  ;;  %v455_v30 = vld [vmem:[%s6769_s2 + $0x48] sm:$0xff]  ;;  %v446_v37 = vld [vmem:[%s6769_s2] sm:$0xff]  ;;  %s5148_s10 = smov [#allocation3]  }
  0x18   : > { %367 = vst.msk [vmem:[#allocation2 + $0x40] sm:$0x3] %vm360_vm1, %v5147_v5  ;;  %370 = vst.msk [vmem:[#allocation2 + $0x58] sm:$0x3] %vm360_vm1, %v5147_v5  ;;  %4517 = vmatprep.subr.bf16.mxu0 %v580_v7  ;;  %4912 = vmatprep.subr.bf16.mxu1 %v580_v7  ;;  %s4314_s21 = sshll.u32 %s5328_s20, 8  ;;  %v447_v38 = vld [vmem:[%s6769_s2 + $0x8] sm:$0xff]  ;;  %v1048_v49 = vpack.c.bf16 %v455_v30, %v454_v29 }
  0x19   : > { %368 = vst.msk [vmem:[#allocation2 + $0x48] sm:$0xff] %vm357_vm0, %v5147_v5  ;;  %369 = vst.msk [vmem:[#allocation2 + $0x50] sm:$0xff] %vm357_vm0, %v5147_v5  ;;  %s5342_s24 = scalar_lea.vmem %s6768_s1, %s4314_s21  ;;  %v464_v45 = vld [vmem:[%s6769_s2 + $0x90] sm:$0xff]  ;;  %v465_v46 = vld [vmem:[%s6769_s2 + $0x98] sm:$0xff]  ;;  %v530_v60 = vpack.c.bf16 %v447_v38, %v446_v37  ;;  %s311_s20 = sand.u32 1, %s5137_s28  }
  0x1a   : > { %371 = vst.msk [vmem:[#allocation2 + $0x60] sm:$0xff] %vm357_vm0, %v5147_v5  ;;  %372 = vst.msk [vmem:[#allocation2 + $0x68] sm:$0xff] %vm357_vm0, %v5147_v5  ;;  %v325_v13 = vld [vmem:[%s5342_s24] sm:$0xff]  ;;  %v326_v14 = vld [vmem:[%s5342_s24 + $0x8] sm:$0xff]  ;;  %s6578_s17 = sshll.u32 %s311_s20, 8  ;;  %s6727_s9 = scalar_lea.sflag [#allocation4], %s311_s20 }
  0x1b   : > { %373 = vst.msk [vmem:[#allocation2 + $0x70] sm:$0x3] %vm360_vm1, %v5147_v5  ;;  %376 = vst.msk [vmem:[#allocation2 + $0x88] sm:$0x3] %vm360_vm1, %v5147_v5  ;;  %v339_v15 = vld [vmem:[%s5342_s24 + $0x70] sm:$0xff]  ;;  %4518 = vmatpush3.bf16.msra.mxu0 %v580_v7  ;;  %4914 = vmatpush3.bf16.msra.mxu1 %v580_v7  ;;  %v532_v16 = vld [vmem:[#allocation2 + $0x1] sm:$0xff] }
  0x1c   : > { %374 = vst.msk [vmem:[#allocation2 + $0x78] sm:$0xff] %vm357_vm0, %v5147_v5  ;;  %375 = vst.msk [vmem:[#allocation2 + $0x80] sm:$0xff] %vm357_vm0, %v5147_v5  ;;  %v533_v17 = vld [vmem:[#allocation2 + $0x9] sm:$0xff]  ;;  %v340_v18 = vld [vmem:[%s5342_s24 + $0x78] sm:$0xff]  ;;  %4551 = vmatprep.subr.bf16.mxu1 %v5333_v11  ;;  %4587 = vmatprep.subr.bf16.mxu0 %v5335_v12  ;;  %s6588_s18 = scalar_lea.vmem [#allocation3], %s6578_s17  ;;  %s5089_s12 = sshll.u32 %s5148_s10, 4  ;;  %s5090_s12 = int_to_ptr.vmem [resolvable:$false] %s5089_s12 }
  0x1d   : > { %377 = vst.msk [vmem:[#allocation2 + $0x90] sm:$0xff] %vm357_vm0, %v5147_v5  ;;  %378 = vst.msk [vmem:[#allocation2 + $0x98] sm:$0xff] %vm357_vm0, %v5147_v5  ;;  %v564_v19 = vpack.c.bf16 %v533_v17, %v532_v16  ;;  %v341_v20 = vld [vmem:[%s5342_s24 + $0x80] sm:$0xff]  ;;  %v342_v21 = vld [vmem:[%s5342_s24 + $0x88] sm:$0xff]  ;;  %s4015_s22 = sshll.u32 %s6588_s18, 4  ;;  %s6719_s22 = int_to_ptr.vmem [resolvable:$true] %s4015_s22 }
  0x1e   : > { %379 = vst.msk [vmem:[#allocation2 + $0xa0] sm:$0x3] %vm360_vm1, %v5147_v5  ;;  %382 = vst.msk [vmem:[#allocation2 + $0xb8] sm:$0x3] %vm360_vm1, %v5147_v5  ;;  %v327_v22 = vld [vmem:[%s5342_s24 + $0x10] sm:$0xff]  ;;  %v328_v23 = vld [vmem:[%s5342_s24 + $0x18] sm:$0xff]  ;;  %p5092_p0 = scmp.lt.s32.totalorder %s6719_s22, %s5090_s12 }
  0x1f   : > { %380 = vst.msk [vmem:[#allocation2 + $0xa8] sm:$0xff] %vm357_vm0, %v5147_v5  ;;  %381 = vst.msk [vmem:[#allocation2 + $0xb0] sm:$0xff] %vm357_vm0, %v5147_v5  ;;  %v329_v24 = vld [vmem:[%s5342_s24 + $0x20] sm:$0xff]  ;;  %v330_v25 = vld [vmem:[%s5342_s24 + $0x28] sm:$0xff]  ;;  %4519 = vmatprep.mubr.msk.bf16.mxu0 %vm357_vm0, %v564_v19 }
  0x20   : > { %383 = vst.msk [vmem:[#allocation2 + $0xc0] sm:$0xff] %vm357_vm0, %v5147_v5  ;;  %384 = vst.msk [vmem:[#allocation2 + $0xc8] sm:$0xff] %vm357_vm0, %v5147_v5  ;;  %v343_v26 = vld [vmem:[%s5342_s24 + $0x90] sm:$0xff]  ;;  %v344_v27 = vld [vmem:[%s5342_s24 + $0x98] sm:$0xff] }
  0x21   : > { %385 = vst.msk [vmem:[#allocation2 + $0xd0] sm:$0x3] %vm360_vm1, %v5147_v5  ;;  %388 = vst.msk [vmem:[#allocation2 + $0xe8] sm:$0x3] %vm360_vm1, %v5147_v5  ;;  %v345_v28 = vld [vmem:[%s5342_s24 + $0xa0] sm:$0xff]  ;;  %v346_v31 = vld [vmem:[%s5342_s24 + $0xa8] sm:$0xff] }
  0x22   : > { %386 = vst.msk [vmem:[#allocation2 + $0xd8] sm:$0xff] %vm357_vm0, %v5147_v5  ;;  %387 = vst.msk [vmem:[#allocation2 + $0xe0] sm:$0xff] %vm357_vm0, %v5147_v5  ;;  %v331_v32 = vld [vmem:[%s5342_s24 + $0x30] sm:$0xff]  ;;  %v332_v33 = vld [vmem:[%s5342_s24 + $0x38] sm:$0xff] }
  0x23   : > { %389 = vst.msk [vmem:[#allocation2 + $0xf0] sm:$0xff] %vm357_vm0, %v5147_v5  ;;  %390 = vst.msk [vmem:[#allocation2 + $0xf8] sm:$0xff] %vm357_vm0, %v5147_v5  ;;  %v333_v34 = vld [vmem:[%s5342_s24 + $0x40] sm:$0xff]  ;;  %v334_v35 = vld [vmem:[%s5342_s24 + $0x48] sm:$0xff] }
  0x24   : > { %391 = vst.msk [vmem:[#allocation2 + $0x100] sm:$0x3] %vm360_vm1, %v5147_v5  ;;  %394 = vst.msk [vmem:[#allocation2 + $0x118] sm:$0x3] %vm360_vm1, %v5147_v5  ;;  %v347_v36 = vld [vmem:[%s5342_s24 + $0xb0] sm:$0xff]  ;;  %v348_v39 = vld [vmem:[%s5342_s24 + $0xb8] sm:$0xff] }
  0x25   : > { %392 = vst.msk [vmem:[#allocation2 + $0x108] sm:$0xff] %vm357_vm0, %v5147_v5  ;;  %393 = vst.msk [vmem:[#allocation2 + $0x110] sm:$0xff] %vm357_vm0, %v5147_v5  ;;  %v349_v40 = vld [vmem:[%s5342_s24 + $0xc0] sm:$0xff]  ;;  %v350_v41 = vld [vmem:[%s5342_s24 + $0xc8] sm:$0xff] }
  0x26   : > { %395 = vst.msk [vmem:[#allocation2 + $0x120] sm:$0xff] %vm357_vm0, %v5147_v5  ;;  %396 = vst.msk [vmem:[#allocation2 + $0x128] sm:$0xff] %vm357_vm0, %v5147_v5  ;;  %v335_v50 = vld [vmem:[%s5342_s24 + $0x50] sm:$0xff]  ;;  %v336_v51 = vld [vmem:[%s5342_s24 + $0x58] sm:$0xff] }
  0x27   : > { %397 = vst.msk [vmem:[#allocation2 + $0x130] sm:$0x3] %vm360_vm1, %v5147_v5  ;;  %400 = vst.msk [vmem:[#allocation2 + $0x148] sm:$0x3] %vm360_vm1, %v5147_v5  ;;  %v460_v56 = vld [vmem:[%s6769_s2 + $0x70] sm:$0xff]  ;;  %v461_v61 = vld [vmem:[%s6769_s2 + $0x78] sm:$0xff] }
  0x28   : > { %398 = vst.msk [vmem:[#allocation2 + $0x138] sm:$0xff] %vm357_vm0, %v5147_v5  ;;  %399 = vst.msk [vmem:[#allocation2 + $0x140] sm:$0xff] %vm357_vm0, %v5147_v5  ;;  %v352_v17 = vld [vmem:[%s5342_s24 + $0xd8] sm:$0xff]  ;;  %v353_v19 = vld [vmem:[%s5342_s24 + $0xe0] sm:$0xff] }
  0x29   : > { %401 = vst.msk [vmem:[#allocation2 + $0x150] sm:$0xff] %vm357_vm0, %v5147_v5  ;;  %402 = vst.msk [vmem:[#allocation2 + $0x158] sm:$0xff] %vm357_vm0, %v5147_v5 }
  0x2a   : > { %403 = vst.msk [vmem:[#allocation2 + $0x160] sm:$0x3] %vm360_vm1, %v5147_v5  ;;  %406 = vst.msk [vmem:[#allocation2 + $0x178] sm:$0x3] %vm360_vm1, %v5147_v5 }
  0x2b   : > { %404 = vst.msk [vmem:[#allocation2 + $0x168] sm:$0xff] %vm357_vm0, %v5147_v5  ;;  %405 = vst.msk [vmem:[#allocation2 + $0x170] sm:$0xff] %vm357_vm0, %v5147_v5 }
  0x2c   : > { %407 = vst.msk [vmem:[#allocation2 + $0x180] sm:$0xff] %vm357_vm0, %v5147_v5  ;;  %408 = vst.msk [vmem:[#allocation2 + $0x188] sm:$0xff] %vm357_vm0, %v5147_v5 }
  0x2d   : > { %409 = vst.msk [vmem:[#allocation2 + $0x190] sm:$0x3] %vm360_vm1, %v5147_v5  ;;  %412 = vst.msk [vmem:[#allocation2 + $0x1a8] sm:$0x3] %vm360_vm1, %v5147_v5 }
  0x2e   : > { %410 = vst.msk [vmem:[#allocation2 + $0x198] sm:$0xff] %vm357_vm0, %v5147_v5  ;;  %411 = vst.msk [vmem:[#allocation2 + $0x1a0] sm:$0xff] %vm357_vm0, %v5147_v5  ;;  %v5436_v5 = vpack.c.bf16 %v465_v46, %v464_v45 }
  0x2f   : > { %414 = vst.msk [vmem:[#allocation2 + $0x19] sm:$0xff] %vm357_vm0, %v325_v13  ;;  %415 = vst.msk [vmem:[#allocation2 + $0x21] sm:$0xff] %vm357_vm0, %v326_v14  ;;  %v338_v14 = vld [vmem:[%s5342_s24 + $0x68] sm:$0xff] }
  0x30   : > { %428 = vst.msk [vmem:[#allocation2 + $0xc1] sm:$0xff] %vm357_vm0, %v339_v15  ;;  %429 = vst.msk [vmem:[#allocation2 + $0xc9] sm:$0xff] %vm357_vm0, %v340_v18  ;;  %v351_v15 = vld [vmem:[%s5342_s24 + $0xd0] sm:$0xff] }
  0x31   : > { %430 = vst.msk [vmem:[#allocation2 + $0xd9] sm:$0xff] %vm357_vm0, %v341_v20  ;;  %431 = vst.msk [vmem:[#allocation2 + $0xe1] sm:$0xff] %vm357_vm0, %v342_v21  ;;  %v354_v20 = vld [vmem:[%s5342_s24 + $0xe8] sm:$0xff] }
  0x32   : > { %416 = vst.msk [vmem:[#allocation2 + $0x31] sm:$0xff] %vm357_vm0, %v327_v22  ;;  %417 = vst.msk [vmem:[#allocation2 + $0x39] sm:$0xff] %vm357_vm0, %v328_v23 }
  0x33   : > { %418 = vst.msk [vmem:[#allocation2 + $0x49] sm:$0xff] %vm357_vm0, %v329_v24  ;;  %419 = vst.msk [vmem:[#allocation2 + $0x51] sm:$0xff] %vm357_vm0, %v330_v25 }
  0x34   : > { %432 = vst.msk [vmem:[#allocation2 + $0xf1] sm:$0xff] %vm357_vm0, %v343_v26  ;;  %433 = vst.msk [vmem:[#allocation2 + $0xf9] sm:$0xff] %vm357_vm0, %v344_v27 }
  0x35   : > { %434 = vst.msk [vmem:[#allocation2 + $0x109] sm:$0xff] %vm357_vm0, %v345_v28  ;;  %435 = vst.msk [vmem:[#allocation2 + $0x111] sm:$0xff] %vm357_vm0, %v346_v31 }
  0x36   : > { %420 = vst.msk [vmem:[#allocation2 + $0x61] sm:$0xff] %vm357_vm0, %v331_v32  ;;  %421 = vst.msk [vmem:[#allocation2 + $0x69] sm:$0xff] %vm357_vm0, %v332_v33  ;;  %v534_v42 = vld [vmem:[#allocation2 + $0x19] sm:$0xff]  ;;  %v535_v43 = vld [vmem:[#allocation2 + $0x21] sm:$0xff] }
  0x37   : > { %422 = vst.msk [vmem:[#allocation2 + $0x79] sm:$0xff] %vm357_vm0, %v333_v34  ;;  %423 = vst.msk [vmem:[#allocation2 + $0x81] sm:$0xff] %vm357_vm0, %v334_v35  ;;  %v548_v44 = vld [vmem:[#allocation2 + $0xc1] sm:$0xff]  ;;  %v5409_v47 = vpack.c.bf16 %v535_v43, %v534_v42  ;;  %v549_v48 = vld [vmem:[#allocation2 + $0xc9] sm:$0xff] }
  0x38   : > { %436 = vst.msk [vmem:[#allocation2 + $0x121] sm:$0xff] %vm357_vm0, %v347_v36  ;;  %437 = vst.msk [vmem:[#allocation2 + $0x129] sm:$0xff] %vm357_vm0, %v348_v39  ;;  %v5413_v52 = vpack.c.bf16 %v549_v48, %v548_v44  ;;  %v550_v53 = vld [vmem:[#allocation2 + $0xd9] sm:$0xff]  ;;  %v551_v54 = vld [vmem:[#allocation2 + $0xe1] sm:$0xff] }
  0x39   : > { %438 = vst.msk [vmem:[#allocation2 + $0x139] sm:$0xff] %vm357_vm0, %v349_v40  ;;  %439 = vst.msk [vmem:[#allocation2 + $0x141] sm:$0xff] %vm357_vm0, %v350_v41  ;;  %v536_v55 = vld [vmem:[#allocation2 + $0x31] sm:$0xff]  ;;  %4520 = vmatmul.mubr.msk.bf16.vlgmr.msra.gmra.mxu0 %vm357_vm0, %v5409_v47  ;;  %v5422_v57 = vpack.c.bf16 %v551_v54, %v550_v53  ;;  %v537_v58 = vld [vmem:[#allocation2 + $0x39] sm:$0xff] }
  0x3a   : > { %424 = vst.msk [vmem:[#allocation2 + $0x91] sm:$0xff] %vm357_vm0, %v335_v50  ;;  %425 = vst.msk [vmem:[#allocation2 + $0x99] sm:$0xff] %vm357_vm0, %v336_v51  ;;  %v538_v59 = vld [vmem:[#allocation2 + $0x49] sm:$0xff]  ;;  %4535 = vmatprep.mubr.msk.bf16.mxu1 %vm357_vm0, %v5413_v52  ;;  %4588 = vmatpush3.bf16.msra.mxu0 %v5335_v12  ;;  %v5430_v62 = vpack.c.bf16 %v537_v58, %v536_v55  ;;  %v539_v63 = vld [vmem:[#allocation2 + $0x51] sm:$0xff]  ;;  %v5445_v12 = vpack.c.bf16 %v461_v61, %v460_v56 }
  0x3b   : > { %v552_v0 = vld [vmem:[#allocation2 + $0xf1] sm:$0xff]  ;;  %v553_v1 = vld [vmem:[#allocation2 + $0xf9] sm:$0xff]  ;;  %4536 = vmatmul.mubr.msk.bf16.vlgmr.msra.gmra.mxu1 %vm357_vm0, %v5422_v57  ;;  %4589 = vmatprep.subr.bf16.mxu0 %v1048_v49  ;;  %v5441_v8 = vpack.c.bf16 %v539_v63, %v538_v59  ;;  %427 = vst.msk [vmem:[#allocation2 + $0xb1] sm:$0xff] %vm357_vm0, %v338_v14  ;;  %440 = vst.msk [vmem:[#allocation2 + $0x151] sm:$0xff] %vm357_vm0, %v351_v15 }
  0x3c   : > { %v5434_v2 = vpack.c.bf16 %v553_v1, %v552_v0  ;;  %4552 = vmatpush3.bf16.msra.mxu1 %v5333_v11  ;;  %4523 = vmatprep.mubr.msk.bf16.mxu0 %vm357_vm0, %v5430_v62  ;;  %v554_v6 = vld [vmem:[#allocation2 + $0x109] sm:$0xff]  ;;  %v555_v7 = vld [vmem:[#allocation2 + $0x111] sm:$0xff]  ;;  %v337_v11 = vld [vmem:[%s5342_s24 + $0x60] sm:$0xff]  ;;  %441 = vst.msk [vmem:[#allocation2 + $0x159] sm:$0xff] %vm357_vm0, %v352_v17 }
  0x3d   : > { %v540_v3 = vld [vmem:[#allocation2 + $0x61] sm:$0xff]  ;;  %v541_v4 = vld [vmem:[#allocation2 + $0x69] sm:$0xff]  ;;  %4553 = vmatprep.subr.bf16.mxu1 %v530_v60  ;;  %v5452_v16 = vpack.c.bf16 %v555_v7, %v554_v6  ;;  %426 = vst.msk [vmem:[#allocation2 + $0xa9] sm:$0xff] %vm357_vm0, %v337_v11  ;;  %442 = vst.msk [vmem:[#allocation2 + $0x169] sm:$0xff] %vm357_vm0, %v353_v19 }
  0x3e   : > { %4539 = vmatprep.mubr.msk.bf16.mxu1 %vm357_vm0, %v5434_v2  ;;  %v5447_v13 = vpack.c.bf16 %v541_v4, %v540_v3  ;;  %4590 = vmatpush3.bf16.msra.mxu0 %v1048_v49  ;;  %443 = vst.msk [vmem:[#allocation2 + $0x171] sm:$0xff] %vm357_vm0, %v354_v20  ;;  %v542_v21 = vld [vmem:[#allocation2 + $0x79] sm:$0xff]  ;;  %v543_v22 = vld [vmem:[#allocation2 + $0x81] sm:$0xff]  ;;  %v1001_v36 = vld [vmem:[#allocation2 + $0xa] sm:$0xff] }
  0x3f   : > { %v556_v9 = vld [vmem:[#allocation2 + $0x121] sm:$0xff]  ;;  %v557_v10 = vld [vmem:[#allocation2 + $0x129] sm:$0xff]  ;;  %4659 = vmatprep.subr.bf16.mxu0 %v5436_v5  ;;  %v5475_v27 = vpack.c.bf16 %v543_v22, %v542_v21  ;;  %v1004_v48 = vld [vmem:[#allocation2 + $0x32] sm:$0xff] }
  0x40   : > { %v5459_v18 = vpack.c.bf16 %v557_v10, %v556_v9  ;;  %4554 = vmatpush3.bf16.msra.mxu1 %v530_v60  ;;  %v558_v25 = vld [vmem:[#allocation2 + $0x139] sm:$0xff]  ;;  %v559_v26 = vld [vmem:[#allocation2 + $0x141] sm:$0xff]  ;;  %v486_v56 = vld [vmem:[#allocation2 + $0x30] sm:$0xff] }
  0x41   : > { %4524 = vmatmul.mubr.msk.bf16.gmra.mxu0 %vm357_vm0, %v5441_v8  ;;  %4623 = vmatprep.subr.bf16.mxu1 %v5445_v12  ;;  %v544_v23 = vld [vmem:[#allocation2 + $0x91] sm:$0xff]  ;;  %v545_v24 = vld [vmem:[#allocation2 + $0x99] sm:$0xff]  ;;  %v5479_v30 = vpack.c.bf16 %v559_v26, %v558_v25  ;;  %v1000_v35 = vld [vmem:[#allocation2 + $0x2] sm:$0xff] }
  0x42   : > { %4527 = vmatprep.mubr.msk.bf16.mxu0 %vm357_vm0, %v5447_v13  ;;  %v5477_v28 = vpack.c.bf16 %v545_v24, %v544_v23  ;;  %v560_v29 = vld [vmem:[#allocation2 + $0x151] sm:$0xff]  ;;  %v482_v40 = vld [vmem:[#allocation2] sm:$0xff]  ;;  %v483_v41 = vld [vmem:[#allocation2 + $0x8] sm:$0xff]  ;;  %v1032_v42 = vpack.c.bf16 %v1001_v36, %v1000_v35 }
  0x43   : > { %4540 = vmatmul.mubr.msk.bf16.gmra.mxu1 %vm357_vm0, %v5452_v16  ;;  %v561_v31 = vld [vmem:[#allocation2 + $0x159] sm:$0xff]  ;;  %v547_v34 = vld [vmem:[#allocation2 + $0xb1] sm:$0xff]  ;;  %v514_v44 = vpack.c.bf16 %v483_v41, %v482_v40  ;;  %v1003_v46 = vld [vmem:[#allocation2 + $0x22] sm:$0xff] }
  0x44   : > { %4543 = vmatprep.mubr.msk.bf16.mxu1 %vm357_vm0, %v5459_v18  ;;  %v5481_v32 = vpack.c.bf16 %v561_v31, %v560_v29  ;;  %v546_v33 = vld [vmem:[#allocation2 + $0xa9] sm:$0xff]  ;;  %v1002_v45 = vld [vmem:[#allocation2 + $0x1a] sm:$0xff]  ;;  %v1007_v7 = vld [vmem:[#allocation2 + $0x52] sm:$0xff] }
  0x45   : > { %v562_v37 = vld [vmem:[#allocation2 + $0x169] sm:$0xff]  ;;  %v563_v38 = vld [vmem:[#allocation2 + $0x171] sm:$0xff]  ;;  %v5491_v39 = vpack.c.bf16 %v547_v34, %v546_v33  ;;  %v1005_v49 = vld [vmem:[#allocation2 + $0x3a] sm:$0xff]  ;;  %v5507_v55 = vpack.c.bf16 %v1003_v46, %v1002_v45 }
  0x46   : > { %v5493_v43 = vpack.c.bf16 %v563_v38, %v562_v37  ;;  %v462_v50 = vld [vmem:[%s6769_s2 + $0x80] sm:$0xff]  ;;  %v484_v51 = vld [vmem:[#allocation2 + $0x18] sm:$0xff]  ;;  %v463_v54 = vld [vmem:[%s6769_s2 + $0x88] sm:$0xff]  ;;  %v5509_v59 = vpack.c.bf16 %v1005_v49, %v1004_v48 }
  0x47   : > { %v485_v53 = vld [vmem:[#allocation2 + $0x20] sm:$0xff]  ;;  %v487_v58 = vld [vmem:[#allocation2 + $0x38] sm:$0xff]  ;;  %v459_v61 = vld [vmem:[%s6769_s2 + $0x68] sm:$0xff]  ;;  %v1630_v0 = vpack.c.bf16 %v463_v54, %v462_v50 }
  0x48   : > { %v458_v60 = vld [vmem:[%s6769_s2 + $0x60] sm:$0xff]  ;;  %v5517_v63 = vpack.c.bf16 %v485_v53, %v484_v51  ;;  %v5519_v1 = vpack.c.bf16 %v487_v58, %v486_v56  ;;  %v472_v3 = vld [vmem:[%s6769_s2 + $0xd0] sm:$0xff]  ;;  %v473_v4 = vld [vmem:[%s6769_s2 + $0xd8] sm:$0xff] }
  0x49   : > { %4528 = vmatmul.mubr.msk.bf16.gmra.mxu0 %vm357_vm0, %v5475_v27  ;;  %v1006_v6 = vld [vmem:[#allocation2 + $0x4a] sm:$0xff]  ;;  %v1339_v9 = vpack.c.bf16 %v459_v61, %v458_v60  ;;  %v469_v11 = vld [vmem:[%s6769_s2 + $0xb8] sm:$0xff]  ;;  %v1008_v17 = vld [vmem:[#allocation2 + $0x62] sm:$0xff]  ;;  %v5542_v20 = vpack.c.bf16 %v473_v4, %v472_v3 }
  0x4a   : > { %4531 = vmatprep.mubr.msk.bf16.mxu0 %vm357_vm0, %v5477_v28  ;;  %v468_v10 = vld [vmem:[%s6769_s2 + $0xb0] sm:$0xff]  ;;  %v356_v15 = vld [vmem:[%s5342_s24 + $0xf8] sm:$0xff]  ;;  %v5549_v22 = vpack.c.bf16 %v1007_v7, %v1006_v6  ;;  %v490_v23 = vld [vmem:[#allocation2 + $0x60] sm:$0xff] }
  0x4b   : > { %4544 = vmatmul.mubr.msk.bf16.gmra.mxu1 %vm357_vm0, %v5479_v30  ;;  %v355_v14 = vld [vmem:[%s5342_s24 + $0xf0] sm:$0xff]  ;;  %445 = vst.msk [vmem:[#allocation2 + $0x189] sm:$0xff] %vm357_vm0, %v356_v15  ;;  %v491_v24 = vld [vmem:[#allocation2 + $0x68] sm:$0xff]  ;;  %v5551_v25 = vpack.c.bf16 %v469_v11, %v468_v10  ;;  %v1010_v31 = vld [vmem:[#allocation2 + $0x7a] sm:$0xff]  ;;  %s6486_s24 = scalar_lea.vmem %s6767_s0, %s4314_s21  ;;  %s5091_s21 = scalar_lea.vmem %s5090_s12, 8192 }
  0x4c   : > { %4547 = vmatprep.mubr.msk.bf16.mxu1 %vm357_vm0, %v5481_v32  ;;  %v1009_v19 = vld [vmem:[#allocation2 + $0x6a] sm:$0xff]  ;;  %444 = vst.msk [vmem:[#allocation2 + $0x181] sm:$0xff] %vm357_vm0, %v355_v14  ;;  %v1011_v33 = vld [vmem:[#allocation2 + $0x82] sm:$0xff]  ;;  %v1012_v34 = vld [vmem:[#allocation2 + $0x92] sm:$0xff] }
  0x4d   : > { %v489_v21 = vld [vmem:[#allocation2 + $0x50] sm:$0xff]  ;;  %v5553_v26 = vpack.c.bf16 %v1009_v19, %v1008_v17  ;;  %v1013_v35 = vld [vmem:[#allocation2 + $0x9a] sm:$0xff]  ;;  %v5569_v38 = vpack.c.bf16 %v1011_v33, %v1010_v31  ;;  %v1016_v49 = vld [vmem:[#allocation2 + $0xc2] sm:$0xff] }
  0x4e   : > { %v492_v36 = vld [vmem:[#allocation2 + $0x78] sm:$0xff]  ;;  %v493_v37 = vld [vmem:[#allocation2 + $0x80] sm:$0xff]  ;;  %v494_v40 = vld [vmem:[#allocation2 + $0x90] sm:$0xff] }
  0x4f   : > { %v495_v41 = vld [vmem:[#allocation2 + $0x98] sm:$0xff]  ;;  %v1014_v46 = vld [vmem:[#allocation2 + $0xaa] sm:$0xff]  ;;  %v498_v56 = vld [vmem:[#allocation2 + $0xc0] sm:$0xff] }
  0x50   : > { %v5575_v45 = vpack.c.bf16 %v495_v41, %v494_v40  ;;  %v1015_v48 = vld [vmem:[#allocation2 + $0xb2] sm:$0xff]  ;;  %v1017_v50 = vld [vmem:[#allocation2 + $0xca] sm:$0xff]  ;;  %v1018_v3 = vld [vmem:[#allocation2 + $0xda] sm:$0xff] }
  0x51   : > { %4532 = vmatmul.mubr.msk.bf16.gmra.mxu0 %vm357_vm0, %v5491_v39  ;;  %v496_v51 = vld [vmem:[#allocation2 + $0xa8] sm:$0xff]  ;;  %v497_v53 = vld [vmem:[#allocation2 + $0xb0] sm:$0xff]  ;;  %v5585_v54 = vpack.c.bf16 %v1015_v48, %v1014_v46  ;;  %v5587_v60 = vpack.c.bf16 %v1017_v50, %v1016_v49  ;;  %v1021_v7 = vld [vmem:[#allocation2 + $0xfa] sm:$0xff] }
  0x52   : > { %4591 = vmatprep.mubr.msk.bf16.mxu0 %vm357_vm0, %v1032_v42  ;;  %v5571_v42 = vpack.c.bf16 %v1013_v35, %v1012_v34  ;;  %v499_v58 = vld [vmem:[#allocation2 + $0xc8] sm:$0xff]  ;;  %v5589_v61 = vpack.c.bf16 %v497_v53, %v496_v51  ;;  %v1020_v6 = vld [vmem:[#allocation2 + $0xf2] sm:$0xff]  ;;  %v501_v10 = vld [vmem:[#allocation2 + $0xe0] sm:$0xff] }
  0x53   : > { %4548 = vmatmul.mubr.msk.bf16.gmra.mxu1 %vm357_vm0, %v5493_v43  ;;  %v1019_v4 = vld [vmem:[#allocation2 + $0xe2] sm:$0xff]  ;;  %v502_v14 = vld [vmem:[#allocation2 + $0xf0] sm:$0xff]  ;;  %v503_v15 = vld [vmem:[#allocation2 + $0xf8] sm:$0xff]  ;;  %v5603_v17 = vpack.c.bf16 %v1021_v7, %v1020_v6 }
  0x54   : > { %4555 = vmatprep.mubr.msk.bf16.mxu1 %vm357_vm0, %v514_v44  ;;  %v5573_v44 = vpack.c.bf16 %v493_v37, %v492_v36  ;;  %v5601_v11 = vpack.c.bf16 %v1019_v4, %v1018_v3  ;;  %v1025_v31 = vld [vmem:[#allocation2 + $0x12a] sm:$0xff]  ;;  %v506_v36 = vld [vmem:[#allocation2 + $0x120] sm:$0xff]  ;;  %v1028_v50 = vld [vmem:[#allocation2 + $0x152] sm:$0xff] }
  0x55   : > { %v504_v33 = vld [vmem:[#allocation2 + $0x108] sm:$0xff]  ;;  %v505_v34 = vld [vmem:[#allocation2 + $0x110] sm:$0xff]  ;;  %v1026_v48 = vld [vmem:[#allocation2 + $0x13a] sm:$0xff] }
  0x56   : > { %v507_v37 = vld [vmem:[#allocation2 + $0x128] sm:$0xff]  ;;  %v5621_v41 = vpack.c.bf16 %v505_v34, %v504_v33  ;;  %v1029_v51 = vld [vmem:[#allocation2 + $0x15a] sm:$0xff]  ;;  %v510_v3 = vld [vmem:[#allocation2 + $0x150] sm:$0xff] }
  0x57   : > { %v5623_v46 = vpack.c.bf16 %v507_v37, %v506_v36  ;;  %v1027_v49 = vld [vmem:[#allocation2 + $0x142] sm:$0xff]  ;;  %v508_v53 = vld [vmem:[#allocation2 + $0x138] sm:$0xff]  ;;  %v5635_v6 = vpack.c.bf16 %v1029_v51, %v1028_v50 }
  0x58   : > { %v511_v4 = vld [vmem:[#allocation2 + $0x158] sm:$0xff]  ;;  %v471_v33 = vld [vmem:[%s6769_s2 + $0xc8] sm:$0xff]  ;;  %v466_v34 = vld [vmem:[%s6769_s2 + $0xa0] sm:$0xff] }
  0x59   : > { %4592 = vmatmul.mubr.msk.bf16.vlgmr.msra.gmra.mxu0 %vm357_vm0, %v5507_v55  ;;  %v481_v37 = vld [vmem:[%s6769_s2 + $0x118] sm:$0xff] }
  0x5a   : > { %4660 = vmatpush3.bf16.msra.mxu0 %v5436_v5  ;;  %4595 = vmatprep.mubr.msk.bf16.mxu0 %vm357_vm0, %v5509_v59  ;;  %v488_v5 = vld [vmem:[#allocation2 + $0x48] sm:$0xff]  ;;  %v477_v50 = vld [vmem:[%s6769_s2 + $0xf8] sm:$0xff] }
  0x5b   : > { %4556 = vmatmul.mubr.msk.bf16.vlgmr.msra.gmra.mxu1 %vm357_vm0, %v5517_v63  ;;  %4661 = vmatprep.subr.bf16.mxu0 %v1630_v0  ;;  %v5555_v29 = vpack.c.bf16 %v489_v21, %v488_v5  ;;  %v5607_v5 = vpack.c.bf16 %v503_v15, %v502_v14  ;;  %v1022_v21 = vld [vmem:[#allocation2 + $0x10a] sm:$0xff]  ;;  %v1031_v14 = vld [vmem:[#allocation2 + $0x172] sm:$0xff] }
  0x5c   : > { %4624 = vmatpush3.bf16.msra.mxu1 %v5445_v12  ;;  %4559 = vmatprep.mubr.msk.bf16.mxu1 %vm357_vm0, %v5519_v1  ;;  %v5558_v12 = vpack.c.bf16 %v491_v24, %v490_v23  ;;  %v1023_v23 = vld [vmem:[#allocation2 + $0x112] sm:$0xff]  ;;  %v1024_v24 = vld [vmem:[#allocation2 + $0x122] sm:$0xff] }
  0x5d   : > { %4625 = vmatprep.subr.bf16.mxu1 %v1339_v9  ;;  %v5617_v35 = vpack.c.bf16 %v1023_v23, %v1022_v21  ;;  %v5619_v40 = vpack.c.bf16 %v1025_v31, %v1024_v24  ;;  %v512_v15 = vld [vmem:[#allocation2 + $0x168] sm:$0xff]  ;;  %v513_v21 = vld [vmem:[#allocation2 + $0x170] sm:$0xff]  ;;  %v470_v31 = vld [vmem:[%s6769_s2 + $0xc0] sm:$0xff] }
  0x5e   : > { %4662 = vmatpush3.bf16.msra.mxu0 %v1630_v0  ;;  %v5591_v0 = vpack.c.bf16 %v499_v58, %v498_v56  ;;  %v509_v56 = vld [vmem:[#allocation2 + $0x140] sm:$0xff]  ;;  %v5633_v58 = vpack.c.bf16 %v1027_v49, %v1026_v48  ;;  %v5651_v24 = vpack.c.bf16 %v513_v21, %v512_v15  ;;  %v2213_v36 = vpack.c.bf16 %v471_v33, %v470_v31  ;;  %v476_v49 = vld [vmem:[%s6769_s2 + $0xf0] sm:$0xff] }
  0x5f   : > { %4731 = vmatprep.subr.bf16.mxu0 %v5542_v20  ;;  %v5637_v7 = vpack.c.bf16 %v509_v56, %v508_v53  ;;  %v2456_v31 = vld [vmem:[#allocation2 + $0x31] sm:$0xff]  ;;  %v2457_v33 = vld [vmem:[#allocation2 + $0x39] sm:$0xff] }
  0x60   : > { %4626 = vmatpush3.bf16.msra.mxu1 %v1339_v9  ;;  %v500_v9 = vld [vmem:[#allocation2 + $0xd8] sm:$0xff] }
  0x61   : > { %4596 = vmatmul.mubr.msk.bf16.gmra.mxu0 %vm357_vm0, %v5549_v22  ;;  %4695 = vmatprep.subr.bf16.mxu1 %v5551_v25  ;;  %v5605_v19 = vpack.c.bf16 %v501_v10, %v500_v9  ;;  %v5639_v9 = vpack.c.bf16 %v511_v4, %v510_v3  ;;  %v1030_v10 = vld [vmem:[#allocation2 + $0x16a] sm:$0xff]  ;;  %v2195_v3 = vld [vmem:[#allocation2 + $0x198] sm:$0xff]  ;;  %v2196_v4 = vld [vmem:[#allocation2 + $0x1a0] sm:$0xff] }
  0x62   : > { %4599 = vmatprep.mubr.msk.bf16.mxu0 %vm357_vm0, %v5553_v26  ;;  %v5649_v23 = vpack.c.bf16 %v1031_v14, %v1030_v10  ;;  %v1903_v10 = vld [vmem:[#allocation2 + $0x182] sm:$0xff]  ;;  %v1904_v14 = vld [vmem:[#allocation2 + $0x18a] sm:$0xff] }
  0x63   : > { %4560 = vmatmul.mubr.msk.bf16.gmra.mxu1 %vm357_vm0, %v5555_v29 }
  0x64   : > { %4563 = vmatprep.mubr.msk.bf16.mxu1 %vm357_vm0, %v5558_v12 }
  0x69   : > { %4600 = vmatmul.mubr.msk.bf16.gmra.mxu0 %vm357_vm0, %v5569_v38 }
  0x6a   : > { %4603 = vmatprep.mubr.msk.bf16.mxu0 %vm357_vm0, %v5571_v42 }
  0x6b   : > { %4564 = vmatmul.mubr.msk.bf16.gmra.mxu1 %vm357_vm0, %v5573_v44 }
  0x6c   : > { %4567 = vmatprep.mubr.msk.bf16.mxu1 %vm357_vm0, %v5575_v45 }
  0x71   : > { %4604 = vmatmul.mubr.msk.bf16.gmra.mxu0 %vm357_vm0, %v5585_v54 }
  0x72   : > { %4607 = vmatprep.mubr.msk.bf16.mxu0 %vm357_vm0, %v5587_v60 }
  0x73   : > { %4568 = vmatmul.mubr.msk.bf16.gmra.mxu1 %vm357_vm0, %v5589_v61 }
  0x74   : > { %4571 = vmatprep.mubr.msk.bf16.mxu1 %vm357_vm0, %v5591_v0 }
  0x79   : > { %4608 = vmatmul.mubr.msk.bf16.gmra.mxu0 %vm357_vm0, %v5601_v11 }
  0x7a   : > { %4611 = vmatprep.mubr.msk.bf16.mxu0 %vm357_vm0, %v5603_v17 }
  0x7b   : > { %4572 = vmatmul.mubr.msk.bf16.gmra.mxu1 %vm357_vm0, %v5605_v19 }
  0x7c   : > { %4575 = vmatprep.mubr.msk.bf16.mxu1 %vm357_vm0, %v5607_v5 }
  0x81   : > { %4612 = vmatmul.mubr.msk.bf16.gmra.mxu0 %vm357_vm0, %v5617_v35 }
  0x82   : > { %4615 = vmatprep.mubr.msk.bf16.mxu0 %vm357_vm0, %v5619_v40 }
  0x83   : > { %4576 = vmatmul.mubr.msk.bf16.gmra.mxu1 %vm357_vm0, %v5621_v41 }
  0x84   : > { %4579 = vmatprep.mubr.msk.bf16.mxu1 %vm357_vm0, %v5623_v46 }
  0x89   : > { %4616 = vmatmul.mubr.msk.bf16.gmra.mxu0 %vm357_vm0, %v5633_v58 }
  0x8a   : > { %4619 = vmatprep.mubr.msk.bf16.mxu0 %vm357_vm0, %v5635_v6 }
  0x8b   : > { %4580 = vmatmul.mubr.msk.bf16.gmra.mxu1 %vm357_vm0, %v5637_v7 }
  0x8c   : > { %4583 = vmatprep.mubr.msk.bf16.mxu1 %vm357_vm0, %v5639_v9 }
  0x91   : > { %4620 = vmatmul.mubr.msk.bf16.gmra.mxu0 %vm357_vm0, %v5649_v23 }
  0x92   : > { %4663 = vmatprep.mubr.msk.bf16.mxu0 %vm357_vm0, %v5409_v47  ;;  %v467_v47 = vld [vmem:[%s6769_s2 + $0xa8] sm:$0xff] }
  0x93   : > { %4584 = vmatmul.mubr.msk.bf16.gmra.mxu1 %vm357_vm0, %v5651_v24  ;;  %v1921_v48 = vpack.c.bf16 %v467_v47, %v466_v34 }
  0x94   : > { %4627 = vmatprep.mubr.msk.bf16.mxu1 %vm357_vm0, %v5517_v63  ;;  %v480_v63 = vld [vmem:[%s6769_s2 + $0x110] sm:$0xff] }
  0x95   : > { %v2796_v51 = vpack.c.bf16 %v481_v37, %v480_v63 }
  0x99   : > { %4664 = vmatmul.mubr.msk.bf16.vlgmr.msra.gmra.mxu0 %vm357_vm0, %v5430_v62  ;;  %v2505_v62 = vpack.c.bf16 %v477_v50, %v476_v49  ;;  %v2458_v49 = vld [vmem:[#allocation2 + $0x49] sm:$0xff]  ;;  %v2459_v50 = vld [vmem:[#allocation2 + $0x51] sm:$0xff] }
  0x9a   : > { %4732 = vmatpush3.bf16.msra.mxu0 %v5542_v20  ;;  %4667 = vmatprep.mubr.msk.bf16.mxu0 %vm357_vm0, %v5441_v8  ;;  %v1322_v8 = vld [vmem:[#allocation2 + $0x188] sm:$0xff] }
  0x9b   : > { %4628 = vmatmul.mubr.msk.bf16.vlgmr.msra.gmra.mxu1 %vm357_vm0, %v5519_v1  ;;  %4733 = vmatprep.subr.bf16.mxu0 %v2213_v36 }
  0x9c   : > { %4696 = vmatpush3.bf16.msra.mxu1 %v5551_v25  ;;  %4631 = vmatprep.mubr.msk.bf16.mxu1 %vm357_vm0, %v5555_v29 }
  0x9d   : > { %4697 = vmatprep.subr.bf16.mxu1 %v1921_v48 }
  0x9e   : > { %4734 = vmatpush3.bf16.msra.mxu0 %v2213_v36  ;;  %v5865_v36 = vpack.c.bf16 %v1904_v14, %v1903_v10  ;;  %v2464_v14 = vld [vmem:[#allocation2 + $0x91] sm:$0xff] }
  0x9f   : > { %4803 = vmatprep.subr.bf16.mxu0 %v2796_v51 }
  0xa0   : > { %4698 = vmatpush3.bf16.msra.mxu1 %v1921_v48 }
  0xa1   : > { %4668 = vmatmul.mubr.msk.bf16.gmra.mxu0 %vm357_vm0, %v5447_v13  ;;  %4767 = vmatprep.subr.bf16.mxu1 %v2505_v62 }
  0xa2   : > { %4671 = vmatprep.mubr.msk.bf16.mxu0 %vm357_vm0, %v5475_v27  ;;  %v479_v27 = vld [vmem:[%s6769_s2 + $0x108] sm:$0xff] }
  0xa3   : > { %4632 = vmatmul.mubr.msk.bf16.gmra.mxu1 %vm357_vm0, %v5558_v12 }
  0xa4   : > { %4635 = vmatprep.mubr.msk.bf16.mxu1 %vm357_vm0, %v5573_v44 }
  0xa9   : > { %4672 = vmatmul.mubr.msk.bf16.gmra.mxu0 %vm357_vm0, %v5477_v28  ;;  %v474_v28 = vld [vmem:[%s6769_s2 + $0xe0] sm:$0xff] }
  0xaa   : > { %4675 = vmatprep.mubr.msk.bf16.mxu0 %vm357_vm0, %v5491_v39 }
  0xab   : > { %4636 = vmatmul.mubr.msk.bf16.gmra.mxu1 %vm357_vm0, %v5575_v45 }
  0xac   : > { %4639 = vmatprep.mubr.msk.bf16.mxu1 %vm357_vm0, %v5589_v61 }
  0xb1   : > { %4676 = vmatmul.mubr.msk.bf16.gmra.mxu0 %vm357_vm0, %v5413_v52  ;;  %v1612_v52 = vld [vmem:[#allocation2 + $0x181] sm:$0xff] }
  0xb2   : > { %4679 = vmatprep.mubr.msk.bf16.mxu0 %vm357_vm0, %v5422_v57  ;;  %v1613_v57 = vld [vmem:[#allocation2 + $0x189] sm:$0xff] }
  0xb3   : > { %4640 = vmatmul.mubr.msk.bf16.gmra.mxu1 %vm357_vm0, %v5591_v0  ;;  %v5743_v13 = vpack.c.bf16 %v1613_v57, %v1612_v52  ;;  %v2460_v52 = vld [vmem:[#allocation2 + $0x61] sm:$0xff]  ;;  %v2461_v57 = vld [vmem:[#allocation2 + $0x69] sm:$0xff] }
  0xb4   : > { %4643 = vmatprep.mubr.msk.bf16.mxu1 %vm357_vm0, %v5605_v19 }
  0xb9   : > { %4680 = vmatmul.mubr.msk.bf16.gmra.mxu0 %vm357_vm0, %v5434_v2  ;;  %v1321_v2 = vld [vmem:[#allocation2 + $0x180] sm:$0xff] }
  0xba   : > { %4683 = vmatprep.mubr.msk.bf16.mxu0 %vm357_vm0, %v5452_v16  ;;  %v1338_v16 = vpack.c.bf16 %v1322_v8, %v1321_v2  ;;  %v2489_v8 = vpack.c.bf16 %v2459_v50, %v2458_v49 }
  0xbb   : > { %4644 = vmatmul.mubr.msk.bf16.gmra.mxu1 %vm357_vm0, %v5607_v5 }
  0xbc   : > { %4647 = vmatprep.mubr.msk.bf16.mxu1 %vm357_vm0, %v5621_v41 }
  0xc1   : > { %4684 = vmatmul.mubr.msk.bf16.gmra.mxu0 %vm357_vm0, %v5459_v18  ;;  %v478_v18 = vld [vmem:[%s6769_s2 + $0x100] sm:$0xff] }
  0xc2   : > { %4687 = vmatprep.mubr.msk.bf16.mxu0 %vm357_vm0, %v5479_v30  ;;  %v475_v30 = vld [vmem:[%s6769_s2 + $0xe8] sm:$0xff] }
  0xc3   : > { %4648 = vmatmul.mubr.msk.bf16.gmra.mxu1 %vm357_vm0, %v5623_v46  ;;  %v2504_v39 = vpack.c.bf16 %v475_v30, %v474_v28 }
  0xc4   : > { %4651 = vmatprep.mubr.msk.bf16.mxu1 %vm357_vm0, %v5637_v7 }
  0xc9   : > { %4688 = vmatmul.mubr.msk.bf16.gmra.mxu0 %vm357_vm0, %v5481_v32  ;;  %v2795_v32 = vpack.c.bf16 %v479_v27, %v478_v18 }
  0xca   : > { %4691 = vmatprep.mubr.msk.bf16.mxu0 %vm357_vm0, %v5493_v43 }
  0xcb   : > { %4652 = vmatmul.mubr.msk.bf16.gmra.mxu1 %vm357_vm0, %v5639_v9 }
  0xcc   : > { %4655 = vmatprep.mubr.msk.bf16.mxu1 %vm357_vm0, %v5651_v24 }
  0xd1   : > { %4692 = vmatmul.mubr.msk.bf16.gmra.mxu0 %vm357_vm0, %v5743_v13 }
  0xd2   : > { %4735 = vmatprep.mubr.msk.bf16.mxu0 %vm357_vm0, %v5519_v1 }
  0xd3   : > { %4656 = vmatmul.mubr.msk.bf16.gmra.mxu1 %vm357_vm0, %v1338_v16 }
  0xd4   : > { %4699 = vmatprep.mubr.msk.bf16.mxu1 %vm357_vm0, %v5507_v55 }
  0xd9   : > { %4736 = vmatmul.mubr.msk.bf16.vlgmr.msra.gmra.mxu0 %vm357_vm0, %v5555_v29 }
  0xda   : > { %4804 = vmatpush3.bf16.msra.mxu0 %v2796_v51  ;;  %4739 = vmatprep.mubr.msk.bf16.mxu0 %vm357_vm0, %v5558_v12 }
  0xdb   : > { %4700 = vmatmul.mubr.msk.bf16.vlgmr.msra.gmra.mxu1 %vm357_vm0, %v5509_v59  ;;  %4805 = vmatprep.subr.bf16.mxu0 %v2795_v32 }
  0xdc   : > { %4768 = vmatpush3.bf16.msra.mxu1 %v2505_v62  ;;  %4703 = vmatprep.mubr.msk.bf16.mxu1 %vm357_vm0, %v5549_v22 }
  0xdd   : > { %4769 = vmatprep.subr.bf16.mxu1 %v2504_v39 }
  0xde   : > { %4806 = vmatpush3.bf16.msra.mxu0 %v2795_v32 }
  0xe0   : > { %4770 = vmatpush3.bf16.msra.mxu1 %v2504_v39  ;;  %v2462_v39 = vld [vmem:[#allocation2 + $0x79] sm:$0xff] }
  0xe1   : > { %4740 = vmatmul.mubr.msk.bf16.gmra.mxu0 %vm357_vm0, %v5573_v44 }
  0xe2   : > { %4743 = vmatprep.mubr.msk.bf16.mxu0 %vm357_vm0, %v5575_v45 }
  0xe3   : > { %4704 = vmatmul.mubr.msk.bf16.gmra.mxu1 %vm357_vm0, %v5553_v26 }
  0xe4   : > { %4707 = vmatprep.mubr.msk.bf16.mxu1 %vm357_vm0, %v5569_v38 }
  0xe9   : > { %4744 = vmatmul.mubr.msk.bf16.gmra.mxu0 %vm357_vm0, %v5589_v61 }
  0xea   : > { %4747 = vmatprep.mubr.msk.bf16.mxu0 %vm357_vm0, %v5591_v0 }
  0xeb   : > { %4708 = vmatmul.mubr.msk.bf16.gmra.mxu1 %vm357_vm0, %v5571_v42 }
  0xec   : > { %4711 = vmatprep.mubr.msk.bf16.mxu1 %vm357_vm0, %v5585_v54 }
  0xf1   : > { %4748 = vmatmul.mubr.msk.bf16.gmra.mxu0 %vm357_vm0, %v5605_v19 }
  0xf2   : > { %4751 = vmatprep.mubr.msk.bf16.mxu0 %vm357_vm0, %v5607_v5 }
  0xf3   : > { %4712 = vmatmul.mubr.msk.bf16.gmra.mxu1 %vm357_vm0, %v5587_v60 }
  0xf4   : > { %4715 = vmatprep.mubr.msk.bf16.mxu1 %vm357_vm0, %v5601_v11 }
  0xf9   : > { %v5796_v43 = vpop.f32.mrf.mxu0  ;;  %4752 = vmatmul.mubr.msk.bf16.gmra.mxu0 %vm357_vm0, %v5621_v41 }
  0xfa   : > { %4755 = vmatprep.mubr.msk.bf16.mxu0 %vm357_vm0, %v5623_v46 }
  0xfb   : > { %v5802_v55 = vpop.f32.mrf.mxu1  ;;  %4716 = vmatmul.mubr.msk.bf16.gmra.mxu1 %vm357_vm0, %v5603_v17  ;;  %v5806_v1 = vpop.f32.mrf.mxu0 }
  0xfc   : > { %4719 = vmatprep.mubr.msk.bf16.mxu1 %vm357_vm0, %v5617_v35 }
  0xfd   : > { %v5810_v20 = vpop.f32.mrf.mxu1  ;;  %v5812_v25 = vpop.f32.mrf.mxu0 }
  0xff   : > { %v5814_v29 = vpop.f32.mrf.mxu1  ;;  %v5816_v12 = vpop.f32.mrf.mxu0 }
 0x101   : > { %v5818_v44 = vpop.f32.mrf.mxu1  ;;  %v5820_v45 = vpop.f32.mrf.mxu0  ;;  %4756 = vmatmul.mubr.msk.bf16.gmra.mxu0 %vm357_vm0, %v5637_v7 }
 0x102   : > { %4759 = vmatprep.mubr.msk.bf16.mxu0 %vm357_vm0, %v5639_v9 }
 0x103   : > { %v5826_v61 = vpop.f32.mrf.mxu1  ;;  %4720 = vmatmul.mubr.msk.bf16.gmra.mxu1 %vm357_vm0, %v5619_v40  ;;  %v5830_v0 = vpop.f32.mrf.mxu0 }
 0x104   : > { %4723 = vmatprep.mubr.msk.bf16.mxu1 %vm357_vm0, %v5633_v58 }
 0x105   : > { %v5834_v19 = vpop.f32.mrf.mxu1  ;;  %v5836_v5 = vpop.f32.mrf.mxu0 }
 0x107   : > { %v5838_v41 = vpop.f32.mrf.mxu1  ;;  %v5840_v46 = vpop.f32.mrf.mxu0 }
 0x109   : > { %v5842_v53 = vpop.f32.mrf.mxu1  ;;  %v5844_v56 = vpop.f32.mrf.mxu0  ;;  %4760 = vmatmul.mubr.msk.bf16.gmra.mxu0 %vm357_vm0, %v5651_v24  ;;  %v2212_v24 = vpack.c.bf16 %v2196_v4, %v2195_v3  ;;  %v2463_v3 = vld [vmem:[#allocation2 + $0x81] sm:$0xff] }
 0x10a   : > { %4763 = vmatprep.mubr.msk.bf16.mxu0 %vm357_vm0, %v1338_v16  ;;  %v2490_v16 = vpack.c.bf16 %v2461_v57, %v2460_v52 }
 0x10b   : > { %v5849_v7 = vpop.f32.mrf.mxu1  ;;  %4724 = vmatmul.mubr.msk.bf16.gmra.mxu1 %vm357_vm0, %v5635_v6  ;;  %v5853_v9 = vpop.f32.mrf.mxu0  ;;  %v2488_v6 = vpack.c.bf16 %v2457_v33, %v2456_v31 }
 0x10c   : > { %4727 = vmatprep.mubr.msk.bf16.mxu1 %vm357_vm0, %v5649_v23 }
 0x10d   : > { %v5857_v15 = vpop.f32.mrf.mxu1  ;;  %v5859_v21 = vpop.f32.mrf.mxu0 }
 0x10f   : > { %v5861_v34 = vpop.f32.mrf.mxu1  ;;  %v5863_v47 = vpop.f32.mrf.mxu0 }
 0x111   : > { %v5867_v63 = vpop.f32.mrf.mxu1  ;;  %v5869_v37 = vpop.f32.mrf.mxu0  ;;  %4764 = vmatmul.mubr.msk.bf16.gmra.mxu0 %vm357_vm0, %v2212_v24  ;;  %v2465_v24 = vld [vmem:[#allocation2 + $0x99] sm:$0xff] }
 0x112   : > { %4807 = vmatprep.mubr.msk.bf16.mxu0 %vm357_vm0, %v5509_v59  ;;  %v2492_v50 = vpack.c.bf16 %v2465_v24, %v2464_v14 }
 0x113   : > { %v5874_v23 = vpop.f32.mrf.mxu1  ;;  %4728 = vmatmul.mubr.msk.bf16.gmra.mxu1 %vm357_vm0, %v5865_v36  ;;  %v5878_v48 = vpop.f32.mrf.mxu0 }
 0x114   : > { %4771 = vmatprep.mubr.msk.bf16.mxu1 %vm357_vm0, %v2488_v6  ;;  %v2491_v6 = vpack.c.bf16 %v2463_v3, %v2462_v39  ;;  %v2469_v3 = vld [vmem:[#allocation2 + $0xc9] sm:$0xff] }
 0x115   : > { %v5881_v51 = vpop.f32.mrf.mxu1  ;;  %v5883_v62 = vpop.f32.mrf.mxu0 }
 0x117   : > { %v5885_v2 = vpop.f32.mrf.mxu1  ;;  %v5887_v59 = vpop.f32.mrf.mxu0 }
 0x119   : > { %v5889_v18 = vpop.f32.mrf.mxu1  ;;  %v4593_v27 = vpop.f32.mrf.mxu0  ;;  %4808 = vmatmul.mubr.msk.bf16.vlgmr.msra.gmra.mxu0 %vm357_vm0, %v5549_v22 }
 0x11a   : > { %4811 = vmatprep.mubr.msk.bf16.mxu0 %vm357_vm0, %v5553_v26 }
 0x11b   : > { %v4557_v28 = vpop.f32.mrf.mxu1  ;;  %4772 = vmatmul.mubr.msk.bf16.vlgmr.msra.gmra.mxu1 %vm357_vm0, %v2489_v8  ;;  %v1132_v30 = vpop.f32.mrf.mxu0 }
 0x11c   : > { %v882_v32 = vadd.f32 %v4557_v28, %v5796_v43  ;;  %4775 = vmatprep.mubr.msk.bf16.mxu1 %vm357_vm0, %v2490_v16  ;;  %v2466_v28 = vld [vmem:[#allocation2 + $0xa9] sm:$0xff] }
 0x11d   : > { %v873_v4 = vpop.f32.mrf.mxu1  ;;  %v4594_v10 = vpop.f32.mrf.mxu0 }
 0x11e   : > { %v874_v31 = vadd.f32 %v873_v4, %v5806_v1  ;;  %v5899_v22 = vadd.f32 %v4593_v27, %v882_v32 }
 0x11f   : > { %v4558_v33 = vpop.f32.mrf.mxu1  ;;  %v1135_v26 = vpop.f32.mrf.mxu0 }
 0x120   : > { %v885_v49 = vadd.f32 %v4558_v33, %v5812_v25  ;;  %v5902_v52 = vadd.f32 %v1132_v30, %v874_v31  ;;  %v2467_v30 = vld [vmem:[#allocation2 + $0xb1] sm:$0xff] }
 0x121   : > { %v876_v43 = vpop.f32.mrf.mxu1  ;;  %v4597_v57 = vpop.f32.mrf.mxu0  ;;  %4812 = vmatmul.mubr.msk.bf16.gmra.mxu0 %vm357_vm0, %v5569_v38  ;;  %v2493_v24 = vpack.c.bf16 %v2467_v30, %v2466_v28  ;;  %v2472_v28 = vld [vmem:[#allocation2 + $0xf1] sm:$0xff]  ;;  %v2473_v30 = vld [vmem:[#allocation2 + $0xf9] sm:$0xff] }
 0x122   : > { %v877_v8 = vadd.f32 %v876_v43, %v5816_v12  ;;  %4815 = vmatprep.mubr.msk.bf16.mxu0 %vm357_vm0, %v5571_v42  ;;  %v5909_v1 = vadd.f32 %v4594_v10, %v885_v49  ;;  %v2468_v12 = vld [vmem:[#allocation2 + $0xc1] sm:$0xff] }
 0x123   : > { %v4561_v16 = vpop.f32.mrf.mxu1  ;;  %4776 = vmatmul.mubr.msk.bf16.gmra.mxu1 %vm357_vm0, %v2491_v6  ;;  %v1148_v27 = vpop.f32.mrf.mxu0 }
 0x124   : > { %v898_v25 = vadd.f32 %v4561_v16, %v5820_v45  ;;  %4779 = vmatprep.mubr.msk.bf16.mxu1 %vm357_vm0, %v2492_v50  ;;  %v5914_v32 = vadd.f32 %v1135_v26, %v877_v8  ;;  %v2494_v45 = vpack.c.bf16 %v2469_v3, %v2468_v12  ;;  %v3079_v50 = vld [vmem:[%s6771_s4 + $0x10] sm:$0xff]  ;;  %v2471_v8 = vld [vmem:[#allocation2 + $0xe1] sm:$0xff] }
 0x125   : > { %v889_v38 = vpop.f32.mrf.mxu1  ;;  %v4598_v39 = vpop.f32.mrf.mxu0 }
 0x126   : > { %v890_v42 = vadd.f32 %v889_v38, %v5830_v0  ;;  %v5917_v4 = vadd.f32 %v4597_v57, %v898_v25 }
 0x127   : > { %v4562_v10 = vpop.f32.mrf.mxu1  ;;  %v1151_v14 = vpop.f32.mrf.mxu0 }
 0x128   : > { %v901_v31 = vadd.f32 %v4562_v10, %v5836_v5  ;;  %v5920_v33 = vadd.f32 %v1148_v27, %v890_v42  ;;  %v3080_v5 = vld [vmem:[%s6771_s4 + $0x18] sm:$0xff]  ;;  %v2496_v10 = vpack.c.bf16 %v2473_v30, %v2472_v28 }
 0x129   : > { %v892_v6 = vpop.f32.mrf.mxu1  ;;  %v4601_v49 = vpop.f32.mrf.mxu0  ;;  %4816 = vmatmul.mubr.msk.bf16.gmra.mxu0 %vm357_vm0, %v5585_v54  ;;  %v3098_v54 = vpack.c.bf16 %v3080_v5, %v3079_v50  ;;  %v2475_v50 = vld [vmem:[#allocation2 + $0x111] sm:$0xff] }
 0x12a   : > { %v893_v26 = vadd.f32 %v892_v6, %v5840_v46  ;;  %4819 = vmatprep.mubr.msk.bf16.mxu0 %vm357_vm0, %v5587_v60  ;;  %v5927_v0 = vadd.f32 %v4598_v39, %v901_v31  ;;  %v2470_v60 = vld [vmem:[#allocation2 + $0xd9] sm:$0xff] }
 0x12b   : > { %v4565_v43 = vpop.f32.mrf.mxu1  ;;  %4780 = vmatmul.mubr.msk.bf16.gmra.mxu1 %vm357_vm0, %v2493_v24  ;;  %v1164_v57 = vpop.f32.mrf.mxu0  ;;  %4839 = vmatprep.subr.bf16.mxu1 %v3098_v54  ;;  %v2495_v42 = vpack.c.bf16 %v2471_v8, %v2470_v60 }
 0x12c   : > { %v914_v46 = vadd.f32 %v4565_v43, %v5844_v56  ;;  %4783 = vmatprep.mubr.msk.bf16.mxu1 %vm357_vm0, %v2494_v45  ;;  %v5938_v16 = vadd.f32 %v1151_v14, %v893_v26  ;;  %4840 = vmatpush3.bf16.msra.mxu1 %v3098_v54  ;;  %v2474_v26 = vld [vmem:[#allocation2 + $0x109] sm:$0xff] }
 0x12d   : > { %v905_v27 = vpop.f32.mrf.mxu1  ;;  %v4602_v25 = vpop.f32.mrf.mxu0  ;;  %v2497_v8 = vpack.c.bf16 %v2475_v50, %v2474_v26 }
 0x12e   : > { %v906_v38 = vadd.f32 %v905_v27, %v5853_v9  ;;  %v5941_v39 = vadd.f32 %v4601_v49, %v914_v46 }
 0x12f   : > { %v4566_v12 = vpop.f32.mrf.mxu1  ;;  %v1167_v3 = vpop.f32.mrf.mxu0 }
 0x130   : > { %v917_v56 = vadd.f32 %v4566_v12, %v5859_v21  ;;  %v5944_v24 = vadd.f32 %v1164_v57, %v906_v38  ;;  %v2477_v57 = vld [vmem:[#allocation2 + $0x129] sm:$0xff] }
 0x131   : > { %v908_v14 = vpop.f32.mrf.mxu1  ;;  %v4605_v31 = vpop.f32.mrf.mxu0  ;;  %4820 = vmatmul.mubr.msk.bf16.gmra.mxu0 %vm357_vm0, %v5601_v11 }
 0x132   : > { %v909_v45 = vadd.f32 %v908_v14, %v5863_v47  ;;  %4823 = vmatprep.mubr.msk.bf16.mxu0 %vm357_vm0, %v5603_v17  ;;  %v5951_v9 = vadd.f32 %v4602_v25, %v917_v56  ;;  %v2476_v47 = vld [vmem:[#allocation2 + $0x121] sm:$0xff] }
 0x133   : > { %v4569_v6 = vpop.f32.mrf.mxu1  ;;  %4784 = vmatmul.mubr.msk.bf16.gmra.mxu1 %vm357_vm0, %v2495_v42  ;;  %v1180_v49 = vpop.f32.mrf.mxu0  ;;  %v2772_v42 = vld [vmem:[#allocation2 + $0x15a] sm:$0xff] }
 0x134   : > { %v930_v21 = vadd.f32 %v4569_v6, %v5869_v37  ;;  %4787 = vmatprep.mubr.msk.bf16.mxu1 %vm357_vm0, %v2496_v10  ;;  %v5956_v5 = vadd.f32 %v1167_v3, %v909_v45  ;;  %v2498_v37 = vpack.c.bf16 %v2477_v57, %v2476_v47  ;;  %v2478_v10 = vld [vmem:[#allocation2 + $0x139] sm:$0xff]  ;;  %v2479_v14 = vld [vmem:[#allocation2 + $0x141] sm:$0xff]  ;;  %v2480_v45 = vld [vmem:[#allocation2 + $0x151] sm:$0xff] }
 0x135   : > { %v921_v11 = vpop.f32.mrf.mxu1  ;;  %v4606_v43 = vpop.f32.mrf.mxu0 }
 0x136   : > { %v922_v17 = vadd.f32 %v921_v11, %v5878_v48  ;;  %v5959_v54 = vadd.f32 %v4605_v31, %v930_v21  ;;  %v2499_v11 = vpack.c.bf16 %v2479_v14, %v2478_v10 }
 0x137   : > { %v4570_v46 = vpop.f32.mrf.mxu1  ;;  %v1183_v60 = vpop.f32.mrf.mxu0 }
 0x138   : > { %v933_v27 = vadd.f32 %v4570_v46, %v5883_v62  ;;  %v5962_v25 = vadd.f32 %v1180_v49, %v922_v17  ;;  %v2771_v62 = vld [vmem:[#allocation2 + $0x152] sm:$0xff] }
 0x139   : > { %v924_v28 = vpop.f32.mrf.mxu1  ;;  %v4609_v30 = vpop.f32.mrf.mxu0  ;;  %4824 = vmatmul.mubr.msk.bf16.gmra.mxu0 %vm357_vm0, %v5617_v35  ;;  %v2791_v49 = vpack.c.bf16 %v2772_v42, %v2771_v62  ;;  %v2774_v46 = vld [vmem:[#allocation2 + $0x172] sm:$0xff] }
 0x13a   : > { %v925_v38 = vadd.f32 %v924_v28, %v5887_v59  ;;  %4827 = vmatprep.mubr.msk.bf16.mxu0 %vm357_vm0, %v5619_v40  ;;  %v5969_v48 = vadd.f32 %v4606_v43, %v933_v27  ;;  %v2481_v40 = vld [vmem:[#allocation2 + $0x159] sm:$0xff]  ;;  %v2483_v28 = vld [vmem:[#allocation2 + $0x171] sm:$0xff] }
 0x13b   : > { %v4573_v12 = vpop.f32.mrf.mxu1  ;;  %4788 = vmatmul.mubr.msk.bf16.gmra.mxu1 %vm357_vm0, %v2497_v8  ;;  %v1196_v3 = vpop.f32.mrf.mxu0  ;;  %v2500_v43 = vpack.c.bf16 %v2481_v40, %v2480_v45  ;;  %v3077_v40 = vld [vmem:[%s6771_s4] sm:$0xff] }
 0x13c   : > { %v946_v56 = vadd.f32 %v4573_v12, %v5802_v55  ;;  %4791 = vmatprep.mubr.msk.bf16.mxu1 %vm357_vm0, %v2498_v37  ;;  %v5974_v35 = vadd.f32 %v1183_v60, %v925_v38  ;;  %v2482_v37 = vld [vmem:[#allocation2 + $0x169] sm:$0xff] }
 0x13d   : > { %v937_v59 = vpop.f32.mrf.mxu1  ;;  %v4610_v31 = vpop.f32.mrf.mxu0 }
 0x13e   : > { %v938_v6 = vadd.f32 %v937_v59, %v5810_v20  ;;  %v5977_v21 = vadd.f32 %v4609_v30, %v946_v56  ;;  %v2773_v20 = vld [vmem:[#allocation2 + $0x16a] sm:$0xff]  ;;  %v2501_v56 = vpack.c.bf16 %v2483_v28, %v2482_v37 }
 0x13f   : > { %v4574_v26 = vpop.f32.mrf.mxu1  ;;  %v5979_v50 = vpop.f32.mrf.mxu0  ;;  %v2792_v12 = vpack.c.bf16 %v2774_v46, %v2773_v20 }
 0x140   : > { %v949_v55 = vadd.f32 %v4574_v26, %v5814_v29  ;;  %v5982_v47 = vadd.f32 %v1196_v3, %v938_v6 }
 0x141   : > { %v5984_v57 = vpop.f32.mrf.mxu1  ;;  %v4613_v17 = vpop.f32.mrf.mxu0  ;;  %4828 = vmatmul.mubr.msk.bf16.gmra.mxu0 %vm357_vm0, %v5633_v58 }
 0x142   : > { %4831 = vmatprep.mubr.msk.bf16.mxu0 %vm357_vm0, %v2791_v49  ;;  %v5989_v60 = vadd.f32 %v4610_v31, %v949_v55  ;;  %v2777_v31 = vld [vmem:[#allocation2 + $0x19a] sm:$0xff] }
 0x143   : > { %v4577_v8 = vpop.f32.mrf.mxu1  ;;  %4792 = vmatmul.mubr.msk.bf16.gmra.mxu1 %vm357_vm0, %v2499_v11  ;;  %v1212_v27 = vpop.f32.mrf.mxu0  ;;  %v2487_v55 = vld [vmem:[#allocation2 + $0x1a1] sm:$0xff] }
 0x144   : > { %v962_v29 = vadd.f32 %v4577_v8, %v5826_v61  ;;  %4795 = vmatprep.mubr.msk.bf16.mxu1 %vm357_vm0, %v2500_v43 }
 0x145   : > { %v953_v30 = vpop.f32.mrf.mxu1  ;;  %v4614_v38 = vpop.f32.mrf.mxu0 }
 0x146   : > { %v954_v58 = vadd.f32 %v953_v30, %v5834_v19  ;;  %v5995_v3 = vadd.f32 %v4613_v17, %v962_v29  ;;  %v2778_v19 = vld [vmem:[#allocation2 + $0x1a2] sm:$0xff] }
 0x147   : > { %v4578_v62 = vpop.f32.mrf.mxu1  ;;  %v5997_v42 = vpop.f32.mrf.mxu0  ;;  %v2794_v20 = vpack.c.bf16 %v2778_v19, %v2777_v31 }
 0x148   : > { %v965_v10 = vadd.f32 %v4578_v62, %v5838_v41  ;;  %v6000_v14 = vadd.f32 %v1212_v27, %v954_v58  ;;  %v3078_v41 = vld [vmem:[%s6771_s4 + $0x8] sm:$0xff] }
 0x149   : > { %v6002_v61 = vpop.f32.mrf.mxu1  ;;  %v4617_v59 = vpop.f32.mrf.mxu0  ;;  %4832 = vmatmul.mubr.msk.bf16.gmra.mxu0 %vm357_vm0, %v2792_v12  ;;  %v3097_v26 = vpack.c.bf16 %v3078_v41, %v3077_v40 }
 0x14a   : > { %4835 = vmatprep.mubr.msk.bf16.mxu0 %vm357_vm0, %v5865_v36  ;;  %v6007_v45 = vadd.f32 %v4614_v38, %v965_v10  ;;  %v2486_v36 = vld [vmem:[#allocation2 + $0x199] sm:$0xff] }
 0x14b   : > { %v4581_v6 = vpop.f32.mrf.mxu1  ;;  %4796 = vmatmul.mubr.msk.bf16.gmra.mxu1 %vm357_vm0, %v2501_v56  ;;  %v1228_v49 = vpop.f32.mrf.mxu0  ;;  %4841 = vmatprep.subr.bf16.mxu1 %v3097_v26  ;;  %v2503_v37 = vpack.c.bf16 %v2487_v55, %v2486_v36 }
 0x14c   : > { %v978_v11 = vadd.f32 %v4581_v6, %v5849_v7  ;;  %4799 = vmatprep.mubr.msk.bf16.mxu1 %vm357_vm0, %v5743_v13  ;;  %4842 = vmatpush3.bf16.msra.mxu1 %v3097_v26 }
 0x14d   : > { %v969_v43 = vpop.f32.mrf.mxu1  ;;  %v4618_v17 = vpop.f32.mrf.mxu0 }
 0x14e   : > { %v970_v46 = vadd.f32 %v969_v43, %v5857_v15  ;;  %v6020_v8 = vadd.f32 %v4617_v59, %v978_v11 }
 0x14f   : > { %v4582_v27 = vpop.f32.mrf.mxu1  ;;  %v6022_v29 = vpop.f32.mrf.mxu0 }
 0x150   : > { %v981_v7 = vadd.f32 %v4582_v27, %v5861_v34  ;;  %v6025_v28 = vadd.f32 %v1228_v49, %v970_v46 }
 0x151   : > { %v6027_v13 = vpop.f32.mrf.mxu1  ;;  %v4621_v30 = vpop.f32.mrf.mxu0  ;;  %4836 = vmatmul.mubr.msk.bf16.gmra.mxu0 %vm357_vm0, %v2794_v20 }
 0x152   : > { %v6030_v38 = vadd.f32 %v4618_v17, %v981_v7 }
 0x153   : > { %v4585_v12 = vpop.f32.mrf.mxu1  ;;  %4800 = vmatmul.mubr.msk.bf16.gmra.mxu1 %vm357_vm0, %v2503_v37  ;;  %v1244_v15 = vpop.f32.mrf.mxu0 }
 0x154   : > { %v994_v58 = vadd.f32 %v4585_v12, %v5874_v23 }
 0x155   : > { %v985_v62 = vpop.f32.mrf.mxu1  ;;  %v4622_v56 = vpop.f32.mrf.mxu0 }
 0x156   : > { %v986_v10 = vadd.f32 %v985_v62, %v5881_v51  ;;  %v6035_v34 = vadd.f32 %v4621_v30, %v994_v58 }
 0x157   : > { %v4586_v59 = vpop.f32.mrf.mxu1  ;;  %v6037_v31 = vpop.f32.mrf.mxu0 }
 0x158   : > { %v997_v19 = vadd.f32 %v4586_v59, %v5885_v2  ;;  %v6040_v40 = vadd.f32 %v1244_v15, %v986_v10 }
 0x159   : > { %v6042_v41 = vpop.f32.mrf.mxu1  ;;  %v4665_v6 = vpop.f32.mrf.mxu0 }
 0x15a   : > { %v6044_v49 = vadd.f32 %v4622_v56, %v997_v19 }
 0x15b   : > { %v4629_v26 = vpop.f32.mrf.mxu1  ;;  %v1714_v23 = vpop.f32.mrf.mxu0 }
 0x15c   : > { %v1552_v11 = vadd.f32 %v4629_v26, %v5899_v22 }
 0x15d   : > { %v1423_v36 = vpop.f32.mrf.mxu1  ;;  %v4666_v51 = vpop.f32.mrf.mxu0 }
 0x15e   : > { %v1550_v55 = vadd.f32 %v1423_v36, %v5902_v52  ;;  %v6048_v43 = vadd.f32 %v4665_v6, %v1552_v11 }
 0x15f   : > { %v4630_v17 = vpop.f32.mrf.mxu1  ;;  %v6050_v20 = vpop.f32.mrf.mxu0 }
 0x160   : > { %v1553_v2 = vadd.f32 %v4630_v17, %v5909_v1  ;;  %v6053_v46 = vadd.f32 %v1714_v23, %v1550_v55 }
 0x161   : > { %v6055_v27 = vpop.f32.mrf.mxu1  ;;  %v4669_v37 = vpop.f32.mrf.mxu0 }
 0x162   : > { %v6057_v7 = vadd.f32 %v4666_v51, %v1553_v2 }
 0x163   : > { %v4633_v30 = vpop.f32.mrf.mxu1  ;;  %v1730_v22 = vpop.f32.mrf.mxu0 }
 0x164   : > { %v1556_v12 = vadd.f32 %v4633_v30, %v5917_v4 }
 0x165   : > { %v1439_v15 = vpop.f32.mrf.mxu1  ;;  %v4670_v52 = vpop.f32.mrf.mxu0 }
 0x166   : > { %v1554_v58 = vadd.f32 %v1439_v15, %v5920_v33  ;;  %v6061_v62 = vadd.f32 %v4669_v37, %v1556_v12 }
 0x167   : > { %v4634_v56 = vpop.f32.mrf.mxu1  ;;  %v6063_v10 = vpop.f32.mrf.mxu0 }
 0x168   : > { %v1557_v1 = vadd.f32 %v4634_v56, %v5927_v0  ;;  %v6066_v59 = vadd.f32 %v1730_v22, %v1554_v58 }
 0x169   : > { %v6068_v19 = vpop.f32.mrf.mxu1  ;;  %v4673_v6 = vpop.f32.mrf.mxu0 }
 0x16a   : > { %v6070_v26 = vadd.f32 %v4670_v52, %v1557_v1 }
 0x16b   : > { %v4637_v23 = vpop.f32.mrf.mxu1  ;;  %v1746_v4 = vpop.f32.mrf.mxu0 }
 0x16c   : > { %v1560_v11 = vadd.f32 %v4637_v23, %v5941_v39 }
 0x16d   : > { %v1455_v36 = vpop.f32.mrf.mxu1  ;;  %v4674_v33 = vpop.f32.mrf.mxu0 }
 0x16e   : > { %v1558_v51 = vadd.f32 %v1455_v36, %v5944_v24  ;;  %v6074_v55 = vadd.f32 %v4673_v6, %v1560_v11 }
 0x16f   : > { %v4638_v17 = vpop.f32.mrf.mxu1  ;;  %v6076_v2 = vpop.f32.mrf.mxu0 }
 0x170   : > { %v1561_v0 = vadd.f32 %v4638_v17, %v5951_v9  ;;  %v6079_v37 = vadd.f32 %v1746_v4, %v1558_v51  ;;  %v941_v17 = vadd.f32 %v5984_v57, %v5818_v44 }
 0x171   : > { %v6081_v30 = vpop.f32.mrf.mxu1  ;;  %v4677_v22 = vpop.f32.mrf.mxu0 }
 0x172   : > { %v6083_v12 = vadd.f32 %v4674_v33, %v1561_v0 }
 0x173   : > { %v4641_v15 = vpop.f32.mrf.mxu1  ;;  %v1762_v39 = vpop.f32.mrf.mxu0 }
 0x174   : > { %v1564_v52 = vadd.f32 %v4641_v15, %v5959_v54 }
 0x175   : > { %v1471_v58 = vpop.f32.mrf.mxu1  ;;  %v4678_v24 = vpop.f32.mrf.mxu0 }
 0x176   : > { %v1562_v56 = vadd.f32 %v1471_v58, %v5962_v25  ;;  %v6087_v1 = vadd.f32 %v4677_v22, %v1564_v52 }
 0x177   : > { %v4642_v6 = vpop.f32.mrf.mxu1  ;;  %v6089_v23 = vpop.f32.mrf.mxu0 }
 0x178   : > { %6778 = vst [vmem:[#allocation6_spill] sm:$0xff] %v6089_v23  ;;  %v1565_v9 = vadd.f32 %v4642_v6, %v5969_v48  ;;  %v6092_v4 = vadd.f32 %v1762_v39, %v1562_v56 }
 0x179   : > { %v6094_v11 = vpop.f32.mrf.mxu1  ;;  %v4681_v36 = vpop.f32.mrf.mxu0 }
 0x17a   : > { %v6096_v33 = vadd.f32 %v4678_v24, %v1565_v9  ;;  %v1276_v24 = vadd.f32 %v5979_v50, %v941_v17 }
 0x17b   : > { %v4645_v51 = vpop.f32.mrf.mxu1  ;;  %v1778_v54 = vpop.f32.mrf.mxu0 }
 0x17c   : > { %v1568_v25 = vadd.f32 %v4645_v51, %v5977_v21 }
 0x17d   : > { %v1487_v0 = vpop.f32.mrf.mxu1  ;;  %v4682_v22 = vpop.f32.mrf.mxu0 }
 0x17e   : > { %v1566_v15 = vadd.f32 %v1487_v0, %v5982_v47  ;;  %v6102_v52 = vadd.f32 %v4681_v36, %v1568_v25  ;;  %v957_v47 = vadd.f32 %v6002_v61, %v5842_v53 }
 0x17f   : > { %v4646_v48 = vpop.f32.mrf.mxu1  ;;  %v1781_v39 = vpop.f32.mrf.mxu0 }
 0x180   : > { %v1569_v58 = vadd.f32 %v4646_v48, %v5989_v60  ;;  %v6106_v56 = vadd.f32 %v1778_v54, %v1566_v15  ;;  %v1280_v15 = vadd.f32 %v5997_v42, %v957_v47 }
 0x181   : > { %v1490_v6 = vpop.f32.mrf.mxu1  ;;  %v4685_v9 = vpop.f32.mrf.mxu0 }
 0x182   : > { %v1567_v23 = vadd.f32 %v1490_v6, %v1276_v24  ;;  %v6108_v44 = vadd.f32 %v4682_v22, %v1569_v58 }
 0x183   : > { %v4649_v21 = vpop.f32.mrf.mxu1  ;;  %v1794_v57 = vpop.f32.mrf.mxu0 }
 0x184   : > { %v1572_v36 = vadd.f32 %v4649_v21, %v5995_v3  ;;  %v6113_v51 = vadd.f32 %v1781_v39, %v1567_v23 }
 0x185   : > { %v1503_v25 = vpop.f32.mrf.mxu1  ;;  %v4686_v60 = vpop.f32.mrf.mxu0 }
 0x186   : > { %6779 = vst [vmem:[#allocation7_spill] sm:$0xff] %v6113_v51  ;;  %v1570_v50 = vadd.f32 %v1503_v25, %v6000_v14  ;;  %v6116_v54 = vadd.f32 %v4685_v9, %v1572_v36  ;;  %v973_v14 = vadd.f32 %v6027_v13, %v5867_v63 }
 0x187   : > { %v4650_v17 = vpop.f32.mrf.mxu1  ;;  %v1797_v0 = vpop.f32.mrf.mxu0 }
 0x188   : > { %v1573_v22 = vadd.f32 %v4650_v17, %v6007_v45  ;;  %v6120_v48 = vadd.f32 %v1794_v57, %v1570_v50  ;;  %v1284_v25 = vadd.f32 %v6022_v29, %v973_v14 }
 0x189   : > { %v1506_v58 = vpop.f32.mrf.mxu1  ;;  %v4689_v53 = vpop.f32.mrf.mxu0 }
 0x18a   : > { %v1571_v61 = vadd.f32 %v1506_v58, %v1280_v15  ;;  %v6122_v3 = vadd.f32 %v4686_v60, %v1573_v22 }
 0x18b   : > { %v4653_v23 = vpop.f32.mrf.mxu1  ;;  %v1810_v39 = vpop.f32.mrf.mxu0 }
 0x18c   : > { %v1576_v24 = vadd.f32 %v4653_v23, %v6020_v8  ;;  %v6127_v6 = vadd.f32 %v1797_v0, %v1571_v61 }
 0x18d   : > { %v1519_v9 = vpop.f32.mrf.mxu1  ;;  %v4690_v45 = vpop.f32.mrf.mxu0 }
 0x18e   : > { %6780 = vst [vmem:[#allocation8_spill] sm:$0xff] %v6127_v6  ;;  %v1574_v42 = vadd.f32 %v1519_v9, %v6025_v28  ;;  %v6130_v21 = vadd.f32 %v4689_v53, %v1576_v24  ;;  %v989_v28 = vadd.f32 %v6042_v41, %v5889_v18 }
 0x18f   : > { %v4654_v57 = vpop.f32.mrf.mxu1  ;;  %v1813_v47 = vpop.f32.mrf.mxu0 }
 0x190   : > { %v1577_v36 = vadd.f32 %v4654_v57, %v6030_v38  ;;  %v6134_v60 = vadd.f32 %v1810_v39, %v1574_v42  ;;  %v1288_v14 = vadd.f32 %v6037_v31, %v989_v28 }
 0x191   : > { %v1522_v50 = vpop.f32.mrf.mxu1  ;;  %v4693_v63 = vpop.f32.mrf.mxu0 }
 0x192   : > { %v1575_v13 = vadd.f32 %v1522_v50, %v1284_v25  ;;  %v6136_v8 = vadd.f32 %v4690_v45, %v1577_v36 }
 0x193   : > { %v4657_v17 = vpop.f32.mrf.mxu1  ;;  %v1826_v0 = vpop.f32.mrf.mxu0 }
 0x194   : > { %v1580_v22 = vadd.f32 %v4657_v17, %v6035_v34  ;;  %v6141_v15 = vadd.f32 %v1813_v47, %v1575_v13 }
 0x195   : > { %v1535_v58 = vpop.f32.mrf.mxu1  ;;  %v4694_v38 = vpop.f32.mrf.mxu0 }
 0x196   : > { %6781 = vst [vmem:[#allocation9_spill] sm:$0xff] %v6141_v15  ;;  %v1578_v29 = vadd.f32 %v1535_v58, %v6040_v40  ;;  %v6144_v53 = vadd.f32 %v4693_v63, %v1580_v22 }
 0x197   : > { %v4658_v61 = vpop.f32.mrf.mxu1  ;;  %v1829_v23 = vpop.f32.mrf.mxu0 }
 0x198   : > { %v1581_v39 = vadd.f32 %v4658_v61, %v6044_v49  ;;  %v6148_v24 = vadd.f32 %v1826_v0, %v1578_v29 }
 0x199   : > { %v1538_v9 = vpop.f32.mrf.mxu1  ;;  %v4737_v18 = vpop.f32.mrf.mxu0 }
 0x19a   : > { %v1579_v41 = vadd.f32 %v1538_v9, %v1288_v14  ;;  %v6150_v34 = vadd.f32 %v4694_v38, %v1581_v39 }
 0x19b   : > { %v4701_v45 = vpop.f32.mrf.mxu1  ;;  %v2297_v42 = vpop.f32.mrf.mxu0 }
 0x19c   : > { %v2134_v57 = vadd.f32 %v4701_v45, %v6048_v43  ;;  %v6153_v40 = vadd.f32 %v1829_v23, %v1579_v41 }
 0x19d   : > { %v2005_v47 = vpop.f32.mrf.mxu1  ;;  %v6155_v36 = vpop.f32.mrf.mxu0 }
 0x19e   : > { %6782 = vst [vmem:[#allocation10_spill] sm:$0xff] %v6153_v40  ;;  %v2132_v49 = vadd.f32 %v2005_v47, %v6053_v46  ;;  %v6158_v25 = vadd.f32 %v4737_v18, %v2134_v57 }
 0x19f   : > { %v6160_v31 = vpop.f32.mrf.mxu1  ;;  %v6162_v50 = vpop.f32.mrf.mxu0 }
 0x1a0   : > { %v6164_v63 = vadd.f32 %v2297_v42, %v2132_v49 }
 0x1a1   : > { %v6166_v13 = vpop.f32.mrf.mxu1  ;;  %v4741_v17 = vpop.f32.mrf.mxu0 }
 0x1a3   : > { %v4705_v0 = vpop.f32.mrf.mxu1  ;;  %v2313_v43 = vpop.f32.mrf.mxu0 }
 0x1a4   : > { %v2138_v28 = vadd.f32 %v4705_v0, %v6061_v62 }
 0x1a5   : > { %v2021_v22 = vpop.f32.mrf.mxu1  ;;  %v6169_v58 = vpop.f32.mrf.mxu0 }
 0x1a6   : > { %v2136_v46 = vadd.f32 %v2021_v22, %v6066_v59  ;;  %v6172_v38 = vadd.f32 %v4741_v17, %v2138_v28  ;;  %v3413_v22 = vld [vmem:[%s6773_s6 + $0x10] sm:$0xff] }
 0x1a7   : > { %v6174_v29 = vpop.f32.mrf.mxu1  ;;  %v6176_v61 = vpop.f32.mrf.mxu0 }
 0x1a8   : > { %v6178_v23 = vadd.f32 %v2313_v43, %v2136_v46  ;;  %v3411_v46 = vld [vmem:[%s6773_s6] sm:$0xff] }
 0x1a9   : > { %v6180_v39 = vpop.f32.mrf.mxu1  ;;  %v4745_v14 = vpop.f32.mrf.mxu0 }
 0x1ab   : > { %v4709_v9 = vpop.f32.mrf.mxu1  ;;  %v2329_v18 = vpop.f32.mrf.mxu0 }
 0x1ac   : > { %v2142_v62 = vadd.f32 %v4709_v9, %v6074_v55 }
 0x1ad   : > { %v2037_v41 = vpop.f32.mrf.mxu1  ;;  %v6183_v45 = vpop.f32.mrf.mxu0 }
 0x1ae   : > { %v2140_v59 = vadd.f32 %v2037_v41, %v6079_v37  ;;  %v6186_v42 = vadd.f32 %v4745_v14, %v2142_v62  ;;  %v3414_v37 = vld [vmem:[%s6773_s6 + $0x18] sm:$0xff]  ;;  %v3412_v62 = vld [vmem:[%s6773_s6 + $0x8] sm:$0xff] }
 0x1af   : > { %v6188_v57 = vpop.f32.mrf.mxu1  ;;  %v6190_v47 = vpop.f32.mrf.mxu0 }
 0x1b0   : > { %6783 = vst [vmem:[#allocation11_spill] sm:$0xff] %v6190_v47  ;;  %v6192_v49 = vadd.f32 %v2329_v18, %v2140_v59  ;;  %v3432_v18 = vpack.c.bf16 %v3414_v37, %v3413_v22  ;;  %v3431_v59 = vpack.c.bf16 %v3412_v62, %v3411_v46 }
 0x1b1   : > { %v6194_v17 = vpop.f32.mrf.mxu1  ;;  %v4749_v0 = vpop.f32.mrf.mxu0 }
 0x1b2   : > { %4875 = vmatprep.subr.bf16.mxu0 %v3432_v18 }
 0x1b3   : > { %v4713_v43 = vpop.f32.mrf.mxu1  ;;  %v2345_v28 = vpop.f32.mrf.mxu0  ;;  %4876 = vmatpush3.bf16.msra.mxu0 %v3432_v18 }
 0x1b4   : > { %v2146_v55 = vadd.f32 %v4713_v43, %v6087_v1  ;;  %4877 = vmatprep.subr.bf16.mxu0 %v3431_v59 }
 0x1b5   : > { %v2053_v14 = vpop.f32.mrf.mxu1  ;;  %v4750_v9 = vpop.f32.mrf.mxu0 }
 0x1b6   : > { %v2144_v1 = vadd.f32 %v2053_v14, %v6092_v4  ;;  %v6210_v41 = vadd.f32 %v4749_v0, %v2146_v55 }
 0x1b7   : > { %v4714_v43 = vpop.f32.mrf.mxu1  ;;  %v6212_v40 = vpop.f32.mrf.mxu0  ;;  %4878 = vmatpush3.bf16.msra.mxu0 %v3431_v59 }
 0x1b8   : > { %v2147_v15 = vadd.f32 %v4714_v43, %v6096_v33  ;;  %v6215_v6 = vadd.f32 %v2345_v28, %v2144_v1 }
 0x1b9   : > { %v6217_v51 = vpop.f32.mrf.mxu1  ;;  %v4753_v22 = vpop.f32.mrf.mxu0 }
 0x1ba   : > { %v6219_v37 = vadd.f32 %v4750_v9, %v2147_v15 }
 0x1bb   : > { %v4717_v47 = vpop.f32.mrf.mxu1  ;;  %v2361_v4 = vpop.f32.mrf.mxu0 }
 0x1bc   : > { %6784 = vst [vmem:[#allocation12_spill] sm:$0xff] %v6219_v37  ;;  %v2150_v0 = vadd.f32 %v4717_v47, %v6102_v52 }
 0x1bd   : > { %v2069_v55 = vpop.f32.mrf.mxu1  ;;  %v4754_v46 = vpop.f32.mrf.mxu0 }
 0x1be   : > { %v2148_v14 = vadd.f32 %v2069_v55, %v6106_v56  ;;  %v6223_v62 = vadd.f32 %v4753_v22, %v2150_v0 }
 0x1bf   : > { %v4718_v33 = vpop.f32.mrf.mxu1  ;;  %v6225_v28 = vpop.f32.mrf.mxu0 }
 0x1c0   : > { %6785 = vst [vmem:[#allocation13_spill] sm:$0xff] %v6225_v28  ;;  %v2151_v18 = vadd.f32 %v4718_v33, %v6108_v44  ;;  %v6228_v1 = vadd.f32 %v2361_v4, %v2148_v14 }
 0x1c1   : > { %v6230_v15 = vpop.f32.mrf.mxu1  ;;  %v4757_v9 = vpop.f32.mrf.mxu0 }
 0x1c2   : > { %v6232_v43 = vadd.f32 %v4754_v46, %v2151_v18 }
 0x1c3   : > { %v4721_v52 = vpop.f32.mrf.mxu1  ;;  %v2377_v47 = vpop.f32.mrf.mxu0 }
 0x1c4   : > { %6786 = vst [vmem:[#allocation14_spill] sm:$0xff] %v6232_v43  ;;  %v2154_v59 = vadd.f32 %v4721_v52, %v6116_v54 }
 0x1c5   : > { %v2085_v37 = vpop.f32.mrf.mxu1  ;;  %v4758_v56 = vpop.f32.mrf.mxu0 }
 0x1c6   : > { %v2152_v22 = vadd.f32 %v2085_v37, %v6120_v48  ;;  %v6236_v0 = vadd.f32 %v4757_v9, %v2154_v59 }
 0x1c7   : > { %v4722_v55 = vpop.f32.mrf.mxu1  ;;  %v6238_v28 = vpop.f32.mrf.mxu0 }
 0x1c8   : > { %6787 = vst [vmem:[#allocation15_spill] sm:$0xff] %v6238_v28  ;;  %v2155_v44 = vadd.f32 %v4722_v55, %v6122_v3  ;;  %v6241_v4 = vadd.f32 %v2377_v47, %v2152_v22 }
 0x1c9   : > { %v6243_v14 = vpop.f32.mrf.mxu1  ;;  %v4761_v46 = vpop.f32.mrf.mxu0 }
 0x1ca   : > { %v6245_v33 = vadd.f32 %v4758_v56, %v2155_v44 }
 0x1cb   : > { %v4725_v18 = vpop.f32.mrf.mxu1  ;;  %v2393_v54 = vpop.f32.mrf.mxu0 }
 0x1cc   : > { %6788 = vst [vmem:[#allocation16_spill] sm:$0xff] %v6245_v33  ;;  %v2158_v52 = vadd.f32 %v4725_v18, %v6130_v21 }
 0x1cd   : > { %v2101_v43 = vpop.f32.mrf.mxu1  ;;  %v4762_v48 = vpop.f32.mrf.mxu0 }
 0x1ce   : > { %v2156_v37 = vadd.f32 %v2101_v43, %v6134_v60  ;;  %v6249_v9 = vadd.f32 %v4761_v46, %v2158_v52  ;;  %v1551_v43 = vadd.f32 %v6055_v27, %v5914_v32 }
 0x1cf   : > { %v4726_v59 = vpop.f32.mrf.mxu1  ;;  %v6251_v28 = vpop.f32.mrf.mxu0 }
 0x1d0   : > { %v2159_v3 = vadd.f32 %v4726_v59, %v6136_v8  ;;  %v6254_v47 = vadd.f32 %v2393_v54, %v2156_v37 }
 0x1d1   : > { %v6256_v22 = vpop.f32.mrf.mxu1  ;;  %v4765_v56 = vpop.f32.mrf.mxu0 }
 0x1d2   : > { %v6258_v55 = vadd.f32 %v4762_v48, %v2159_v3 }
 0x1d3   : > { %v4729_v44 = vpop.f32.mrf.mxu1  ;;  %v2409_v21 = vpop.f32.mrf.mxu0 }
 0x1d4   : > { %v2162_v18 = vadd.f32 %v4729_v44, %v6144_v53  ;;  %v2135_v53 = vadd.f32 %v6160_v31, %v6057_v7  ;;  %v1842_v44 = vadd.f32 %v6050_v20, %v1551_v43 }
 0x1d5   : > { %v2117_v33 = vpop.f32.mrf.mxu1  ;;  %v4766_v60 = vpop.f32.mrf.mxu0 }
 0x1d6   : > { %v2160_v46 = vadd.f32 %v2117_v33, %v6148_v24  ;;  %v6264_v52 = vadd.f32 %v4765_v56, %v2162_v18  ;;  %v2133_v33 = vadd.f32 %v6166_v13, %v1842_v44 }
 0x1d7   : > { %v4730_v8 = vpop.f32.mrf.mxu1  ;;  %v6266_v54 = vpop.f32.mrf.mxu0 }
 0x1d8   : > { %v2163_v37 = vadd.f32 %v4730_v8, %v6150_v34  ;;  %v6269_v48 = vadd.f32 %v2409_v21, %v2160_v46  ;;  %v1555_v34 = vadd.f32 %v6068_v19, %v5938_v16  ;;  %v2427_v8 = vadd.f32 %v6155_v36, %v2135_v53 }
 0x1d9   : > { %v6271_v59 = vpop.f32.mrf.mxu1  ;;  %v4809_v3 = vpop.f32.mrf.mxu0  ;;  %v2425_v43 = vadd.f32 %v6162_v50, %v2133_v33 }
 0x1da   : > { %v6276_v32 = vadd.f32 %v4766_v60, %v2163_v37  ;;  %v1846_v37 = vadd.f32 %v6063_v10, %v1555_v34 }
 0x1db   : > { %v4773_v27 = vpop.f32.mrf.mxu1  ;;  %v2879_v24 = vpop.f32.mrf.mxu0 }
 0x1dc   : > { %v2717_v56 = vadd.f32 %v4773_v27, %v6158_v25  ;;  %v6289_v25 = vld [vmem:[%s6770_s3] ss:$0 sm:$0xff]  ;;  %v2137_v27 = vadd.f32 %v6180_v39, %v1846_v37 }
 0x1dd   : > { %v2588_v21 = vpop.f32.mrf.mxu1  ;;  %v4810_v18 = vpop.f32.mrf.mxu0 }
 0x1de   : > { %v2715_v46 = vadd.f32 %v2588_v21, %v6164_v63  ;;  %v3008_v20 = vadd.f32 %v4809_v3, %v2717_v56  ;;  %v2139_v63 = vadd.f32 %v6174_v29, %v6070_v26  ;;  %v1559_v56 = vadd.f32 %v6081_v30, %v5956_v5 }
 0x1df   : > { %v4774_v7 = vpop.f32.mrf.mxu1  ;;  %v2882_v31 = vpop.f32.mrf.mxu0 }
 0x1e0   : > { %v2718_v60 = vadd.f32 %v4774_v7, %v2427_v8  ;;  %v3006_v13 = vadd.f32 %v2879_v24, %v2715_v46  ;;  %v6295_v50 = vadd.f32 %v6289_v25, %v3008_v20 }
 0x1e1   : > { %v2591_v16 = vpop.f32.mrf.mxu1  ;;  %v4813_v19 = vpop.f32.mrf.mxu0 }
 0x1e2   : > { %v3009_v36 = vadd.f32 %v4810_v18, %v2718_v60  ;;  %v2716_v53 = vadd.f32 %v2591_v16, %v2425_v43  ;;  %v6304_v24 = vadd.f32 %v6289_v25, %v3006_v13  ;;  %v2431_v18 = vadd.f32 %v6169_v58, %v2139_v63 }
 0x1e3   : > { %v4777_v44 = vpop.f32.mrf.mxu1  ;;  %v2895_v3 = vpop.f32.mrf.mxu0  ;;  %v1850_v43 = vadd.f32 %v6076_v2, %v1559_v56  ;;  %v2143_v58 = vadd.f32 %v6188_v57, %v6083_v12  ;;  %v1563_v12 = vadd.f32 %v6094_v11, %v5974_v35 }
 0x1e4   : > { %v6298_v10 = vadd.f32 %v6289_v25, %v3009_v36  ;;  %v3007_v33 = vadd.f32 %v2882_v31, %v2716_v53  ;;  %v2721_v34 = vadd.f32 %v4777_v44, %v6172_v38  ;;  %v2429_v31 = vadd.f32 %v6176_v61, %v2137_v27 }
 0x1e5   : > { %v2604_v26 = vpop.f32.mrf.mxu1  ;;  %v4814_v29 = vpop.f32.mrf.mxu0  ;;  %v2435_v56 = vadd.f32 %v6183_v45, %v2143_v58 }
 0x1e6   : > { %v3082_v39 = vpack.c.bf16 %v6298_v10, %v6295_v50  ;;  %v6309_v21 = vadd.f32 %v6289_v25, %v3007_v33  ;;  %v2719_v46 = vadd.f32 %v2604_v26, %v6178_v23  ;;  %v3012_v30 = vadd.f32 %v4813_v19, %v2721_v34 }
 0x1e7   : > { %v4778_v8 = vpop.f32.mrf.mxu1  ;;  %v2898_v7 = vpop.f32.mrf.mxu0  ;;  %v2141_v19 = vadd.f32 %v6194_v17, %v1850_v43 }
 0x1e8   : > { %v3081_v5 = vpack.c.bf16 %v6309_v21, %v6304_v24  ;;  %v2722_v38 = vadd.f32 %v4778_v8, %v2431_v18  ;;  %v3010_v37 = vadd.f32 %v2895_v3, %v2719_v46  ;;  %v6323_v61 = vadd.f32 %v6289_v25, %v3012_v30  ;;  %v6790_v8 = vld [vmem:[#allocation6_spill] sm:$0xff] }
 0x1e9   : > { %v2607_v20 = vpop.f32.mrf.mxu1  ;;  %v4817_v60 = vpop.f32.mrf.mxu0 }
 0x1ea   : > { %v3013_v16 = vadd.f32 %v4814_v29, %v2722_v38  ;;  %v2720_v13 = vadd.f32 %v2607_v20, %v2429_v31  ;;  %4843 = vmatprep.mubr.msk.bf16.mxu1 %vm357_vm0, %v3081_v5  ;;  %v6332_v57 = vadd.f32 %v6289_v25, %v3010_v37  ;;  %v6789_v29 = vld [vmem:[#allocation11_spill] sm:$0xff] }
 0x1eb   : > { %v4781_v23 = vpop.f32.mrf.mxu1  ;;  %4844 = vmatmul.mubr.msk.bf16.vlgmr.msra.gmra.mxu1 %vm357_vm0, %v3082_v39  ;;  %v2911_v63 = vpop.f32.mrf.mxu0  ;;  %v2433_v35 = vadd.f32 %v6789_v29, %v2141_v19 }
 0x1ec   : > { %v6326_v36 = vadd.f32 %v6289_v25, %v3013_v16  ;;  %v3011_v2 = vadd.f32 %v2898_v7, %v2720_v13  ;;  %v2725_v53 = vadd.f32 %v4781_v23, %v6186_v42  ;;  %v1854_v7 = vadd.f32 %v6790_v8, %v1563_v12 }
 0x1ed   : > { %v2620_v44 = vpop.f32.mrf.mxu1  ;;  %v4818_v3 = vpop.f32.mrf.mxu0 }
 0x1ee   : > { %v3084_v17 = vpack.c.bf16 %v6326_v36, %v6323_v61  ;;  %v6337_v27 = vadd.f32 %v6289_v25, %v3011_v2  ;;  %v2723_v33 = vadd.f32 %v2620_v44, %v6192_v49  ;;  %v3016_v11 = vadd.f32 %v4817_v60, %v2725_v53 }
 0x1ef   : > { %v4782_v34 = vpop.f32.mrf.mxu1  ;;  %v2914_v42 = vpop.f32.mrf.mxu0  ;;  %v2145_v31 = vadd.f32 %v6217_v51, %v1854_v7 }
 0x1f0   : > { %v3083_v26 = vpack.c.bf16 %v6337_v27, %v6332_v57  ;;  %v2726_v39 = vadd.f32 %v4782_v34, %v2435_v56  ;;  %v3014_v5 = vadd.f32 %v2911_v63, %v2723_v33  ;;  %v6349_v43 = vadd.f32 %v6289_v25, %v3016_v11 }
 0x1f1   : > { %v2623_v18 = vpop.f32.mrf.mxu1  ;;  %v4821_v46 = vpop.f32.mrf.mxu0  ;;  %v2437_v44 = vadd.f32 %v6212_v40, %v2145_v31 }
 0x1f2   : > { %v2724_v30 = vadd.f32 %v2623_v18, %v2433_v35  ;;  %4847 = vmatprep.mubr.msk.bf16.mxu1 %vm357_vm0, %v3083_v26  ;;  %v3017_v49 = vadd.f32 %v4818_v3, %v2726_v39  ;;  %v6355_v13 = vadd.f32 %v6289_v25, %v3014_v5  ;;  %v6791_v3 = vld [vmem:[#allocation12_spill] sm:$0xff]  ;;  %v6792_v26 = vld [vmem:[#allocation7_spill] sm:$0xff] }
 0x1f3   : > { %v4785_v38 = vpop.f32.mrf.mxu1  ;;  %4848 = vmatmul.mubr.msk.bf16.gmra.mxu1 %vm357_vm0, %v3084_v17  ;;  %v2927_v45 = vpop.f32.mrf.mxu0  ;;  %v2149_v29 = vadd.f32 %v6230_v15, %v6792_v26 }
 0x1f4   : > { %v3015_v20 = vadd.f32 %v2914_v42, %v2724_v30  ;;  %v6352_v60 = vadd.f32 %v6289_v25, %v3017_v49  ;;  %v2729_v23 = vadd.f32 %v4785_v38, %v6210_v41  ;;  %v6793_v38 = vld [vmem:[#allocation13_spill] sm:$0xff] }
 0x1f5   : > { %v2636_v37 = vpop.f32.mrf.mxu1  ;;  %v4822_v16 = vpop.f32.mrf.mxu0 }
 0x1f6   : > { %v6358_v58 = vadd.f32 %v6289_v25, %v3015_v20  ;;  %v3086_v51 = vpack.c.bf16 %v6352_v60, %v6349_v43  ;;  %v2727_v63 = vadd.f32 %v2636_v37, %v6215_v6  ;;  %v3020_v56 = vadd.f32 %v4821_v46, %v2729_v23 }
 0x1f7   : > { %v4786_v19 = vpop.f32.mrf.mxu1  ;;  %v2930_v2 = vpop.f32.mrf.mxu0 }
 0x1f8   : > { %v3085_v53 = vpack.c.bf16 %v6358_v58, %v6355_v13  ;;  %v2730_v12 = vadd.f32 %v4786_v19, %v6791_v3  ;;  %v3018_v41 = vadd.f32 %v2927_v45, %v2727_v63  ;;  %v6374_v8 = vadd.f32 %v6289_v25, %v3020_v56 }
 0x1f9   : > { %v2639_v17 = vpop.f32.mrf.mxu1  ;;  %v4825_v33 = vpop.f32.mrf.mxu0  ;;  %v2441_v45 = vadd.f32 %v6793_v38, %v2149_v29 }
 0x1fa   : > { %v2728_v34 = vadd.f32 %v2639_v17, %v2437_v44  ;;  %4851 = vmatprep.mubr.msk.bf16.mxu1 %vm357_vm0, %v3085_v53  ;;  %v3021_v35 = vadd.f32 %v4822_v16, %v2730_v12  ;;  %v6383_v5 = vadd.f32 %v6289_v25, %v3018_v41  ;;  %v6795_v53 = vld [vmem:[#allocation8_spill] sm:$0xff] }
 0x1fb   : > { %v4789_v42 = vpop.f32.mrf.mxu1  ;;  %4852 = vmatmul.mubr.msk.bf16.gmra.mxu1 %vm357_vm0, %v3086_v51  ;;  %v2943_v6 = vpop.f32.mrf.mxu0  ;;  %v6794_v51 = vld [vmem:[#allocation14_spill] sm:$0xff]  ;;  %v2153_v44 = vadd.f32 %v6243_v14, %v6795_v53 }
 0x1fc   : > { %v3019_v11 = vadd.f32 %v2930_v2, %v2728_v34  ;;  %v2733_v40 = vadd.f32 %v4789_v42, %v6223_v62  ;;  %v6377_v46 = vadd.f32 %v6289_v25, %v3021_v35 }
 0x1fd   : > { %v2652_v39 = vpop.f32.mrf.mxu1  ;;  %v4826_v18 = vpop.f32.mrf.mxu0 }
 0x1fe   : > { %v6380_v7 = vadd.f32 %v6289_v25, %v3019_v11  ;;  %v2731_v15 = vadd.f32 %v2652_v39, %v6228_v1  ;;  %v3088_v62 = vpack.c.bf16 %v6377_v46, %v6374_v8  ;;  %v3024_v20 = vadd.f32 %v4825_v33, %v2733_v40  ;;  %v6796_v40 = vld [vmem:[#allocation15_spill] sm:$0xff] }
 0x1ff   : > { %v4790_v30 = vpop.f32.mrf.mxu1  ;;  %v2946_v49 = vpop.f32.mrf.mxu0  ;;  %v2445_v39 = vadd.f32 %v6796_v40, %v2153_v44 }
 0x200   : > { %v3087_v31 = vpack.c.bf16 %v6380_v7, %v6383_v5  ;;  %v3022_v23 = vadd.f32 %v2943_v6, %v2731_v15  ;;  %v2734_v63 = vadd.f32 %v4790_v30, %v6794_v51  ;;  %v6397_v17 = vadd.f32 %v6289_v25, %v3024_v20  ;;  %v6798_v20 = vld [vmem:[#allocation9_spill] sm:$0xff] }
 0x201   : > { %v2655_v37 = vpop.f32.mrf.mxu1  ;;  %v4829_v16 = vpop.f32.mrf.mxu0 }
 0x202   : > { %v2732_v19 = vadd.f32 %v2655_v37, %v2441_v45  ;;  %4855 = vmatprep.mubr.msk.bf16.mxu1 %vm357_vm0, %v3087_v31  ;;  %v3025_v3 = vadd.f32 %v4826_v18, %v2734_v63  ;;  %v6400_v34 = vadd.f32 %v6289_v25, %v3022_v23  ;;  %v2157_v37 = vadd.f32 %v6256_v22, %v6798_v20 }
 0x203   : > { %v4793_v1 = vpop.f32.mrf.mxu1  ;;  %v2959_v2 = vpop.f32.mrf.mxu0  ;;  %4856 = vmatmul.mubr.msk.bf16.gmra.mxu1 %vm357_vm0, %v3088_v62 }
 0x204   : > { %v3023_v12 = vadd.f32 %v2946_v49, %v2732_v19  ;;  %v6403_v41 = vadd.f32 %v6289_v25, %v3025_v3  ;;  %v2737_v14 = vadd.f32 %v4793_v1, %v6236_v0  ;;  %v6797_v49 = vld [vmem:[#allocation16_spill] sm:$0xff] }
 0x205   : > { %v2668_v33 = vpop.f32.mrf.mxu1  ;;  %v4830_v56 = vpop.f32.mrf.mxu0 }
 0x206   : > { %v6406_v42 = vadd.f32 %v6289_v25, %v3023_v12  ;;  %v2735_v6 = vadd.f32 %v2668_v33, %v6241_v4  ;;  %v3090_v35 = vpack.c.bf16 %v6403_v41, %v6397_v17  ;;  %v3028_v30 = vadd.f32 %v4829_v16, %v2737_v14 }
 0x207   : > { %v4794_v26 = vpop.f32.mrf.mxu1  ;;  %v2962_v29 = vpop.f32.mrf.mxu0 }
 0x208   : > { %v3089_v11 = vpack.c.bf16 %v6406_v42, %v6400_v34  ;;  %v2738_v62 = vadd.f32 %v4794_v26, %v6797_v49  ;;  %v3026_v0 = vadd.f32 %v2959_v2, %v2735_v6  ;;  %v6421_v19 = vadd.f32 %v6289_v25, %v3028_v30  ;;  %v6799_v49 = vld [vmem:[#allocation10_spill] sm:$0xff] }
 0x209   : > { %v2671_v18 = vpop.f32.mrf.mxu1  ;;  %v4833_v15 = vpop.f32.mrf.mxu0 }
 0x20a   : > { %v2736_v38 = vadd.f32 %v2671_v18, %v2445_v39  ;;  %4859 = vmatprep.mubr.msk.bf16.mxu1 %vm357_vm0, %v3089_v11  ;;  %v3029_v31 = vadd.f32 %v4830_v56, %v2738_v62  ;;  %v6427_v1 = vadd.f32 %v6289_v25, %v3026_v0  ;;  %v2449_v56 = vadd.f32 %v6251_v28, %v2157_v37 }
 0x20b   : > { %v4797_v4 = vpop.f32.mrf.mxu1  ;;  %v2975_v45 = vpop.f32.mrf.mxu0  ;;  %4860 = vmatmul.mubr.msk.bf16.gmra.mxu1 %vm357_vm0, %v3090_v35  ;;  %v2161_v28 = vadd.f32 %v6271_v59, %v6799_v49 }
 0x20c   : > { %v3027_v23 = vadd.f32 %v2962_v29, %v2736_v38  ;;  %v6424_v16 = vadd.f32 %v6289_v25, %v3029_v31  ;;  %v2741_v53 = vadd.f32 %v4797_v4, %v6249_v9 }
 0x20d   : > { %v2684_v51 = vpop.f32.mrf.mxu1  ;;  %v4834_v63 = vpop.f32.mrf.mxu0 }
 0x20e   : > { %v6430_v2 = vadd.f32 %v6289_v25, %v3027_v23  ;;  %v2739_v44 = vadd.f32 %v2684_v51, %v6254_v47  ;;  %v3092_v12 = vpack.c.bf16 %v6424_v16, %v6421_v19  ;;  %v3032_v26 = vadd.f32 %v4833_v15, %v2741_v53 }
 0x20f   : > { %v4798_v22 = vpop.f32.mrf.mxu1  ;;  %v2978_v3 = vpop.f32.mrf.mxu0  ;;  %v2453_v23 = vadd.f32 %v6266_v54, %v2161_v28 }
 0x210   : > { %v3091_v33 = vpack.c.bf16 %v6430_v2, %v6427_v1  ;;  %v3030_v29 = vadd.f32 %v2975_v45, %v2739_v44  ;;  %v2742_v35 = vadd.f32 %v4798_v22, %v6258_v55  ;;  %v6446_v15 = vadd.f32 %v6289_v25, %v3032_v26  ;;  %v3678_v26 = vld [vmem:[%s6486_s24 + $0xe8] sm:$0xff] }
 0x211   : > { %v2687_v14 = vpop.f32.mrf.mxu1  ;;  %v4837_v6 = vpop.f32.mrf.mxu0 }
 0x212   : > { %v2740_v11 = vadd.f32 %v2687_v14, %v2449_v56  ;;  %4863 = vmatprep.mubr.msk.bf16.mxu1 %vm357_vm0, %v3091_v33  ;;  %v3033_v47 = vadd.f32 %v4834_v63, %v2742_v35  ;;  %v6449_v55 = vadd.f32 %v6289_v25, %v3030_v29 }
 0x213   : > { %v4801_v9 = vpop.f32.mrf.mxu1  ;;  %4864 = vmatmul.mubr.msk.bf16.gmra.mxu1 %vm357_vm0, %v3092_v12  ;;  %v2991_v18 = vpop.f32.mrf.mxu0 }
 0x214   : > { %v3031_v40 = vadd.f32 %v2978_v3, %v2740_v11  ;;  %v2745_v39 = vadd.f32 %v4801_v9, %v6264_v52  ;;  %v6452_v62 = vadd.f32 %v6289_v25, %v3033_v47  ;;  %v6494_v11 = vld [vmem:[%s6772_s5] ss:$0 sm:$0xff] }
 0x215   : > { %v2700_v30 = vpop.f32.mrf.mxu1  ;;  %v4838_v20 = vpop.f32.mrf.mxu0 }
 0x216   : > { %v6455_v38 = vadd.f32 %v6289_v25, %v3031_v40  ;;  %v2743_v52 = vadd.f32 %v2700_v30, %v6269_v48  ;;  %v3094_v59 = vpack.c.bf16 %v6452_v62, %v6446_v15  ;;  %v3036_v31 = vadd.f32 %v4837_v6, %v2745_v39 }
 0x217   : > { %v4802_v0 = vpop.f32.mrf.mxu1  ;;  %v2994_v44 = vpop.f32.mrf.mxu0 }
 0x218   : > { %v2746_v4 = vadd.f32 %v4802_v0, %v6276_v32  ;;  %v3093_v45 = vpack.c.bf16 %v6455_v38, %v6449_v55  ;;  %v3034_v63 = vadd.f32 %v2991_v18, %v2743_v52  ;;  %v6467_v48 = vadd.f32 %v6289_v25, %v3036_v31 }
 0x219   : > { %v2703_v37 = vpop.f32.mrf.mxu1 }
 0x21a   : > { %v3037_v51 = vadd.f32 %v4838_v20, %v2746_v4  ;;  %4867 = vmatprep.mubr.msk.bf16.mxu1 %vm357_vm0, %v3093_v45  ;;  %v2744_v53 = vadd.f32 %v2703_v37, %v2453_v23  ;;  %v6475_v54 = vadd.f32 %v6289_v25, %v3034_v63 }
 0x21b   : > { %4868 = vmatmul.mubr.msk.bf16.gmra.mxu1 %vm357_vm0, %v3094_v59 }
 0x21c   : > { %v6470_v32 = vadd.f32 %v6289_v25, %v3037_v51  ;;  %v3035_v22 = vadd.f32 %v2994_v44, %v2744_v53 }
 0x21e   : > { %v3096_v3 = vpack.c.bf16 %v6470_v32, %v6467_v48  ;;  %v3074_v12 = vadd.f32 %v6289_v25, %v3035_v22 }
 0x220   : > { %v3095_v33 = vpack.c.bf16 %v3074_v12, %v6475_v54  ;;  %v4306_v56 = vmul.f32 -1.442695, %v3074_v12 }
 0x222   : > { %4957 = vpow2.f32 %v4306_v56  ;;  %4871 = vmatprep.mubr.msk.bf16.mxu1 %vm357_vm0, %v3095_v33 }
 0x223   : > { %4872 = vmatmul.mubr.msk.bf16.gmra.mxu1 %vm357_vm0, %v3096_v3 }
 0x22f   : > { %v4958_v14 = vpop.eup %4957 }
 0x230   : > { %v3806_v6 = vadd.f32 1.0, %v4958_v14 }
 0x232   : > { %4959 = vrcp.f32 %v3806_v6 }
 0x23f   : > { %v4960_v25 = vpop.eup %4959 }
 0x240   : > { %v6489_v29 = vmul.f32 %v4960_v25, %v3678_v26 }
 0x2ab   : > { %v4845_v35 = vpop.f32.mrf.mxu1 }
 0x2ac   : > { %v3197_v40 = vadd.f32 %v4845_v35, %v6494_v11 }
 0x2ad   : > { %v3188_v9 = vpop.f32.mrf.mxu1 }
 0x2ae   : > { %v3189_v47 = vadd.f32 %v6494_v11, %v3188_v9  ;;  %v3349_v52 = vmul.f32 0.1, %v3197_v40  ;;  %vm3317_vm4 = vcmp.ge.f32.partialorder %v3197_v40, 0.0 }
 0x2af   : > { %v4846_v39 = vpop.f32.mrf.mxu1 }
 0x2b0   : > { %v3200_v18 = vadd.f32 %v4846_v39, %v6494_v11  ;;  %v3347_v49 = vmul.f32 0.1, %v3189_v47  ;;  %vm3315_vm3 = vcmp.ge.f32.partialorder %v3189_v47, 0.0  ;;  %v3381_v51 = vsel %vm3317_vm4, %v3197_v40, %v3349_v52 }
 0x2b1   : > { %v3191_v30 = vpop.f32.mrf.mxu1 }
 0x2b2   : > { %vm3318_vm2 = vcmp.ge.f32.partialorder %v3200_v18, 0.0  ;;  %v3350_v28 = vmul.f32 0.1, %v3200_v18  ;;  %v3192_v0 = vadd.f32 %v6494_v11, %v3191_v30  ;;  %v3379_v20 = vsel %vm3315_vm3, %v3189_v47, %v3347_v49 }
 0x2b3   : > { %v4849_v4 = vpop.f32.mrf.mxu1 }
 0x2b4   : > { %vm3316_vm5 = vcmp.ge.f32.partialorder %v3192_v0, 0.0  ;;  %v3348_v59 = vmul.f32 0.1, %v3192_v0  ;;  %v3382_v45 = vsel %vm3318_vm2, %v3200_v18, %v3350_v28  ;;  %v3213_v53 = vadd.f32 %v4849_v4, %v6494_v11 }
 0x2b5   : > { %v3204_v31 = vpop.f32.mrf.mxu1  ;;  %v3416_v22 = vpack.c.bf16 %v3382_v45, %v3381_v51 }
 0x2b6   : > { %v3380_v37 = vsel %vm3316_vm5, %v3192_v0, %v3348_v59  ;;  %v3205_v23 = vadd.f32 %v6494_v11, %v3204_v31  ;;  %v3353_v6 = vmul.f32 0.1, %v3213_v53  ;;  %vm3321_vm8 = vcmp.ge.f32.partialorder %v3213_v53, 0.0 }
 0x2b7   : > { %v3415_v63 = vpack.c.bf16 %v3380_v37, %v3379_v20  ;;  %v4850_v44 = vpop.f32.mrf.mxu1 }
 0x2b8   : > { %v3216_v3 = vadd.f32 %v4850_v44, %v6494_v11  ;;  %v3351_v33 = vmul.f32 0.1, %v3205_v23  ;;  %vm3319_vm7 = vcmp.ge.f32.partialorder %v3205_v23, 0.0  ;;  %v3385_v18 = vsel %vm3321_vm8, %v3213_v53, %v3353_v6 }
 0x2b9   : > { %v3207_v12 = vpop.f32.mrf.mxu1  ;;  %4879 = vmatprep.mubr.msk.bf16.mxu0 %vm357_vm0, %v3415_v63 }
 0x2ba   : > { %vm3322_vm6 = vcmp.ge.f32.partialorder %v3216_v3, 0.0  ;;  %v3354_v56 = vmul.f32 0.1, %v3216_v3  ;;  %v3208_v14 = vadd.f32 %v6494_v11, %v3207_v12  ;;  %4880 = vmatmul.mubr.msk.bf16.vlgmr.msra.gmra.mxu0 %vm357_vm0, %v3416_v22  ;;  %v3383_v47 = vsel %vm3319_vm7, %v3205_v23, %v3351_v33 }
 0x2bb   : > { %v4853_v26 = vpop.f32.mrf.mxu1 }
 0x2bc   : > { %vm3320_vm9 = vcmp.ge.f32.partialorder %v3208_v14, 0.0  ;;  %v3352_v25 = vmul.f32 0.1, %v3208_v14  ;;  %v3386_v35 = vsel %vm3322_vm6, %v3216_v3, %v3354_v56  ;;  %v3229_v49 = vadd.f32 %v4853_v26, %v6494_v11 }
 0x2bd   : > { %v3220_v9 = vpop.f32.mrf.mxu1  ;;  %v3418_v0 = vpack.c.bf16 %v3386_v35, %v3385_v18 }
 0x2be   : > { %v3384_v40 = vsel %vm3320_vm9, %v3208_v14, %v3352_v25  ;;  %v3221_v39 = vadd.f32 %v6494_v11, %v3220_v9  ;;  %v3357_v20 = vmul.f32 0.1, %v3229_v49  ;;  %vm3325_vm12 = vcmp.ge.f32.partialorder %v3229_v49, 0.0 }
 0x2bf   : > { %v3417_v30 = vpack.c.bf16 %v3384_v40, %v3383_v47  ;;  %v4854_v28 = vpop.f32.mrf.mxu1 }
 0x2c0   : > { %v3232_v52 = vadd.f32 %v4854_v28, %v6494_v11  ;;  %v3355_v59 = vmul.f32 0.1, %v3221_v39  ;;  %vm3323_vm11 = vcmp.ge.f32.partialorder %v3221_v39, 0.0  ;;  %v3389_v22 = vsel %vm3325_vm12, %v3229_v49, %v3357_v20 }
 0x2c1   : > { %v3223_v4 = vpop.f32.mrf.mxu1  ;;  %4883 = vmatprep.mubr.msk.bf16.mxu0 %vm357_vm0, %v3417_v30 }
 0x2c2   : > { %vm3326_vm10 = vcmp.ge.f32.partialorder %v3232_v52, 0.0  ;;  %v3358_v45 = vmul.f32 0.1, %v3232_v52  ;;  %v3224_v31 = vadd.f32 %v6494_v11, %v3223_v4  ;;  %4884 = vmatmul.mubr.msk.bf16.gmra.mxu0 %vm357_vm0, %v3418_v0  ;;  %v3387_v63 = vsel %vm3323_vm11, %v3221_v39, %v3355_v59 }
 0x2c3   : > { %v4857_v23 = vpop.f32.mrf.mxu1 }
 0x2c4   : > { %vm3324_vm13 = vcmp.ge.f32.partialorder %v3224_v31, 0.0  ;;  %v3356_v37 = vmul.f32 0.1, %v3224_v31  ;;  %v3390_v51 = vsel %vm3326_vm10, %v3232_v52, %v3358_v45  ;;  %v3245_v56 = vadd.f32 %v4857_v23, %v6494_v11 }
 0x2c5   : > { %v3236_v44 = vpop.f32.mrf.mxu1  ;;  %v3420_v33 = vpack.c.bf16 %v3390_v51, %v3389_v22 }
 0x2c6   : > { %v3388_v53 = vsel %vm3324_vm13, %v3224_v31, %v3356_v37  ;;  %v3237_v12 = vadd.f32 %v6494_v11, %v3236_v44  ;;  %v3361_v47 = vmul.f32 0.1, %v3245_v56  ;;  %vm3329_vm1 = vcmp.ge.f32.partialorder %v3245_v56, 0.0 }
 0x2c7   : > { %v3419_v3 = vpack.c.bf16 %v3388_v53, %v3387_v63  ;;  %v4858_v14 = vpop.f32.mrf.mxu1 }
 0x2c8   : > { %v3248_v6 = vadd.f32 %v4858_v14, %v6494_v11  ;;  %v3359_v25 = vmul.f32 0.1, %v3237_v12  ;;  %vm3327_vm15 = vcmp.ge.f32.partialorder %v3237_v12, 0.0  ;;  %v3393_v52 = vsel %vm3329_vm1, %v3245_v56, %v3361_v47 }
 0x2c9   : > { %4887 = vmatprep.mubr.msk.bf16.mxu0 %vm357_vm0, %v3419_v3  ;;  %v3239_v26 = vpop.f32.mrf.mxu1 }
 0x2ca   : > { %4888 = vmatmul.mubr.msk.bf16.gmra.mxu0 %vm357_vm0, %v3420_v33  ;;  %vm3330_vm14 = vcmp.ge.f32.partialorder %v3248_v6, 0.0  ;;  %v3362_v35 = vmul.f32 0.1, %v3248_v6  ;;  %v3240_v9 = vadd.f32 %v6494_v11, %v3239_v26  ;;  %v3391_v49 = vsel %vm3327_vm15, %v3237_v12, %v3359_v25 }
 0x2cb   : > { %v4861_v40 = vpop.f32.mrf.mxu1 }
 0x2cc   : > { %vm3328_vm2 = vcmp.ge.f32.partialorder %v3240_v9, 0.0  ;;  %v3360_v39 = vmul.f32 0.1, %v3240_v9  ;;  %v3394_v18 = vsel %vm3330_vm14, %v3248_v6, %v3362_v35  ;;  %v3261_v59 = vadd.f32 %v4861_v40, %v6494_v11 }
 0x2cd   : > { %v3252_v30 = vpop.f32.mrf.mxu1  ;;  %v3422_v31 = vpack.c.bf16 %v3394_v18, %v3393_v52 }
 0x2ce   : > { %v3392_v28 = vsel %vm3328_vm2, %v3240_v9, %v3360_v39  ;;  %v3253_v0 = vadd.f32 %v6494_v11, %v3252_v30  ;;  %v3365_v53 = vmul.f32 0.1, %v3261_v59  ;;  %vm3333_vm5 = vcmp.ge.f32.partialorder %v3261_v59, 0.0 }
 0x2cf   : > { %v3421_v4 = vpack.c.bf16 %v3392_v28, %v3391_v49  ;;  %v4862_v45 = vpop.f32.mrf.mxu1 }
 0x2d0   : > { %v3264_v20 = vadd.f32 %v4862_v45, %v6494_v11  ;;  %v3363_v23 = vmul.f32 0.1, %v3253_v0  ;;  %vm3331_vm4 = vcmp.ge.f32.partialorder %v3253_v0, 0.0  ;;  %v3397_v6 = vsel %vm3333_vm5, %v3261_v59, %v3365_v53 }
 0x2d1   : > { %v3255_v37 = vpop.f32.mrf.mxu1  ;;  %4891 = vmatprep.mubr.msk.bf16.mxu0 %vm357_vm0, %v3421_v4 }
 0x2d2   : > { %vm3334_vm3 = vcmp.ge.f32.partialorder %v3264_v20, 0.0  ;;  %v3366_v51 = vmul.f32 0.1, %v3264_v20  ;;  %v3256_v63 = vadd.f32 %v6494_v11, %v3255_v37  ;;  %4892 = vmatmul.mubr.msk.bf16.gmra.mxu0 %vm357_vm0, %v3422_v31  ;;  %v3395_v33 = vsel %vm3331_vm4, %v3253_v0, %v3363_v23 }
 0x2d3   : > { %v4865_v44 = vpop.f32.mrf.mxu1 }
 0x2d4   : > { %vm3332_vm6 = vcmp.ge.f32.partialorder %v3256_v63, 0.0  ;;  %v3364_v22 = vmul.f32 0.1, %v3256_v63  ;;  %v3398_v3 = vsel %vm3334_vm3, %v3264_v20, %v3366_v51  ;;  %v3277_v25 = vadd.f32 %v4865_v44, %v6494_v11 }
 0x2d5   : > { %v3268_v12 = vpop.f32.mrf.mxu1  ;;  %v3424_v9 = vpack.c.bf16 %v3398_v3, %v3397_v6 }
 0x2d6   : > { %v3396_v56 = vsel %vm3332_vm6, %v3256_v63, %v3364_v22  ;;  %v3269_v14 = vadd.f32 %v6494_v11, %v3268_v12  ;;  %v3369_v49 = vmul.f32 0.1, %v3277_v25  ;;  %vm3337_vm9 = vcmp.ge.f32.partialorder %v3277_v25, 0.0 }
 0x2d7   : > { %v3423_v26 = vpack.c.bf16 %v3396_v56, %v3395_v33  ;;  %v4866_v35 = vpop.f32.mrf.mxu1 }
 0x2d8   : > { %v3280_v47 = vadd.f32 %v4866_v35, %v6494_v11  ;;  %v3367_v39 = vmul.f32 0.1, %v3269_v14  ;;  %vm3335_vm8 = vcmp.ge.f32.partialorder %v3269_v14, 0.0  ;;  %v3401_v20 = vsel %vm3337_vm9, %v3277_v25, %v3369_v49 }
 0x2d9   : > { %v3271_v40 = vpop.f32.mrf.mxu1  ;;  %4895 = vmatprep.mubr.msk.bf16.mxu0 %vm357_vm0, %v3423_v26 }
 0x2da   : > { %vm3338_vm7 = vcmp.ge.f32.partialorder %v3280_v47, 0.0  ;;  %v3370_v18 = vmul.f32 0.1, %v3280_v47  ;;  %v3272_v30 = vadd.f32 %v6494_v11, %v3271_v40  ;;  %4896 = vmatmul.mubr.msk.bf16.gmra.mxu0 %vm357_vm0, %v3424_v9  ;;  %v3399_v59 = vsel %vm3335_vm8, %v3269_v14, %v3367_v39 }
 0x2db   : > { %v4869_v28 = vpop.f32.mrf.mxu1 }
 0x2dc   : > { %vm3336_vm10 = vcmp.ge.f32.partialorder %v3272_v30, 0.0  ;;  %v3368_v0 = vmul.f32 0.1, %v3272_v30  ;;  %v3402_v52 = vsel %vm3338_vm7, %v3280_v47, %v3370_v18  ;;  %v3293_v23 = vadd.f32 %v4869_v28, %v6494_v11 }
 0x2dd   : > { %v3284_v4 = vpop.f32.mrf.mxu1  ;;  %v3426_v63 = vpack.c.bf16 %v3402_v52, %v3401_v20 }
 0x2de   : > { %v3400_v45 = vsel %vm3336_vm10, %v3272_v30, %v3368_v0  ;;  %v3285_v31 = vadd.f32 %v6494_v11, %v3284_v4  ;;  %v3373_v33 = vmul.f32 0.1, %v3293_v23  ;;  %vm3341_vm13 = vcmp.ge.f32.partialorder %v3293_v23, 0.0 }
 0x2df   : > { %v3425_v37 = vpack.c.bf16 %v3400_v45, %v3399_v59  ;;  %v4870_v51 = vpop.f32.mrf.mxu1 }
 0x2e0   : > { %v3296_v53 = vadd.f32 %v4870_v51, %v6494_v11  ;;  %v3371_v22 = vmul.f32 0.1, %v3285_v31  ;;  %vm3339_vm12 = vcmp.ge.f32.partialorder %v3285_v31, 0.0  ;;  %v3405_v9 = vsel %vm3341_vm13, %v3293_v23, %v3373_v33 }
 0x2e1   : > { %v3287_v44 = vpop.f32.mrf.mxu1  ;;  %4899 = vmatprep.mubr.msk.bf16.mxu0 %vm357_vm0, %v3425_v37  ;;  %v4284_v33 = vmul.f32 -1.442695, %v6326_v36 }
 0x2e2   : > { %vm3342_vm11 = vcmp.ge.f32.partialorder %v3296_v53, 0.0  ;;  %v3374_v3 = vmul.f32 0.1, %v3296_v53  ;;  %v3288_v12 = vadd.f32 %v6494_v11, %v3287_v44  ;;  %4900 = vmatmul.mubr.msk.bf16.gmra.mxu0 %vm357_vm0, %v3426_v63  ;;  %v3403_v26 = vsel %vm3339_vm12, %v3285_v31, %v3371_v22 }
 0x2e3   : > { %v4873_v14 = vpop.f32.mrf.mxu1  ;;  %v4277_v44 = vmul.f32 -1.442695, %v6304_v24  ;;  %v4278_v22 = vmul.f32 -1.442695, %v6309_v21  ;;  %v4288_v21 = vmul.f32 -1.442695, %v6352_v60 }
 0x2e4   : > { %vm3340_vm14 = vcmp.ge.f32.partialorder %v3288_v12, 0.0  ;;  %v3372_v56 = vmul.f32 0.1, %v3288_v12  ;;  %v3406_v6 = vsel %vm3342_vm11, %v3296_v53, %v3374_v3  ;;  %v3309_v18 = vadd.f32 %v4873_v14, %v6494_v11 }
 0x2e5   : > { %v3300_v35 = vpop.f32.mrf.mxu1  ;;  %v3428_v39 = vpack.c.bf16 %v3406_v6, %v3405_v9  ;;  %v4279_v53 = vmul.f32 -1.442695, %v6295_v50  ;;  %v4283_v3 = vmul.f32 -1.442695, %v6323_v61  ;;  %v4287_v50 = vmul.f32 -1.442695, %v6349_v43 }
 0x2e6   : > { %v3404_v25 = vsel %vm3340_vm14, %v3288_v12, %v3372_v56  ;;  %v3301_v40 = vadd.f32 %v6494_v11, %v3300_v35  ;;  %v3377_v59 = vmul.f32 0.1, %v3309_v18  ;;  %vm3345_vm2 = vcmp.ge.f32.partialorder %v3309_v18, 0.0 }
 0x2e7   : > { %v3427_v47 = vpack.c.bf16 %v3404_v25, %v3403_v26  ;;  %v4874_v30 = vpop.f32.mrf.mxu1  ;;  %4961 = vpow2.f32 %v4279_v53  ;;  %v4281_v12 = vmul.f32 -1.442695, %v6332_v57  ;;  %v4282_v56 = vmul.f32 -1.442695, %v6337_v27 }
 0x2e8   : > { %v3312_v49 = vadd.f32 %v4874_v30, %v6494_v11  ;;  %v3375_v0 = vmul.f32 0.1, %v3301_v40  ;;  %vm3343_vm1 = vcmp.ge.f32.partialorder %v3301_v40, 0.0  ;;  %v3409_v23 = vsel %vm3345_vm2, %v3309_v18, %v3377_v59 }
 0x2e9   : > { %4903 = vmatprep.mubr.msk.bf16.mxu0 %vm357_vm0, %v3427_v47  ;;  %v3303_v28 = vpop.f32.mrf.mxu1  ;;  %4963 = vpow2.f32 %v4277_v44  ;;  %v4286_v61 = vmul.f32 -1.442695, %v6358_v58  ;;  %v4291_v27 = vmul.f32 -1.442695, %v6374_v8  ;;  %v4289_v43 = vmul.f32 -1.442695, %v6383_v5 }
 0x2ea   : > { %4904 = vmatmul.mubr.msk.bf16.gmra.mxu0 %vm357_vm0, %v3428_v39  ;;  %vm3346_vm15 = vcmp.ge.f32.partialorder %v3312_v49, 0.0  ;;  %v3378_v52 = vmul.f32 0.1, %v3312_v49  ;;  %v3304_v4 = vadd.f32 %v6494_v11, %v3303_v28  ;;  %v3407_v20 = vsel %vm3343_vm1, %v3301_v40, %v3375_v0  ;;  %v3649_v44 = vld [vmem:[%s6486_s24] sm:$0xff] }
 0x2eb   : > { %v4280_v11 = vmul.f32 -1.442695, %v6298_v10  ;;  %v4285_v10 = vmul.f32 -1.442695, %v6355_v13  ;;  %v4292_v60 = vmul.f32 -1.442695, %v6377_v46 }
 0x2ec   : > { %vm3344_vm3 = vcmp.ge.f32.partialorder %v3304_v4, 0.0  ;;  %v3376_v45 = vmul.f32 0.1, %v3304_v4  ;;  %v3410_v31 = vsel %vm3346_vm15, %v3312_v49, %v3378_v52  ;;  %v4290_v58 = vmul.f32 -1.442695, %v6380_v7 }
 0x2ed   : > { %v3430_v63 = vpack.c.bf16 %v3410_v31, %v3409_v23  ;;  %4965 = vpow2.f32 %v4280_v11  ;;  %v4295_v8 = vmul.f32 -1.442695, %v6397_v17  ;;  %v4293_v39 = vmul.f32 -1.442695, %v6400_v34 }
 0x2ee   : > { %v3408_v37 = vsel %vm3344_vm3, %v3304_v4, %v3376_v45  ;;  %4967 = vpow2.f32 %v4278_v22  ;;  %v4296_v0 = vmul.f32 -1.442695, %v6403_v41  ;;  %v4299_v41 = vmul.f32 -1.442695, %v6421_v19 }
 0x2ef   : > { %v3429_v51 = vpack.c.bf16 %v3408_v37, %v3407_v20  ;;  %4969 = vpow2.f32 %v4283_v3  ;;  %v4294_v37 = vmul.f32 -1.442695, %v6406_v42  ;;  %v4297_v22 = vmul.f32 -1.442695, %v6427_v1 }
 0x2f0   : > { %4971 = vpow2.f32 %v4281_v12  ;;  %v4300_v19 = vmul.f32 -1.442695, %v6424_v16 }
 0x2f1   : > { %4907 = vmatprep.mubr.msk.bf16.mxu0 %vm357_vm0, %v3429_v51  ;;  %4973 = vpow2.f32 %v4284_v33  ;;  %v3651_v51 = vld [vmem:[%s6486_s24 + $0x10] sm:$0xff]  ;;  %v3652_v33 = vld [vmem:[%s6486_s24 + $0x18] sm:$0xff] }
 0x2f2   : > { %4908 = vmatmul.mubr.msk.bf16.gmra.mxu0 %vm357_vm0, %v3430_v63  ;;  %4975 = vpow2.f32 %v4282_v56 }
 0x2f3   : > { %4977 = vpow2.f32 %v4287_v50  ;;  %v6574_v50 = vld [vmem:[%s6774_s7] ss:$0 sm:$0xff] }
 0x2f4   : > { %v4962_v24 = vpop.eup %4961  ;;  %4979 = vpow2.f32 %v4285_v10 }
 0x2f5   : > { %v3779_v57 = vadd.f32 1.0, %v4962_v24  ;;  %4981 = vpow2.f32 %v4288_v21  ;;  %v3650_v21 = vld [vmem:[%s6486_s24 + $0x8] sm:$0xff] }
 0x2f6   : > { %v4964_v14 = vpop.eup %4963  ;;  %4983 = vpow2.f32 %v4286_v61 }
 0x2f7   : > { %v3777_v6 = vadd.f32 1.0, %v4964_v14  ;;  %4985 = vrcp.f32 %v3779_v57 }
 0x2f8   : > { %4987 = vpow2.f32 %v4291_v27  ;;  %v4298_v27 = vmul.f32 -1.442695, %v6430_v2 }
 0x2f9   : > { %4989 = vrcp.f32 %v3777_v6 }
 0x2fa   : > { %v4966_v36 = vpop.eup %4965  ;;  %4991 = vpow2.f32 %v4289_v43 }
 0x2fb   : > { %v4968_v26 = vpop.eup %4967  ;;  %v3780_v13 = vadd.f32 1.0, %v4966_v36 }
 0x2fc   : > { %v4970_v25 = vpop.eup %4969  ;;  %v3778_v35 = vadd.f32 1.0, %v4968_v26 }
 0x2fd   : > { %v4972_v9 = vpop.eup %4971  ;;  %4993 = vrcp.f32 %v3780_v13  ;;  %v3783_v40 = vadd.f32 1.0, %v4970_v25 }
 0x2fe   : > { %v4974_v47 = vpop.eup %4973  ;;  %4995 = vpow2.f32 %v4292_v60  ;;  %v3781_v18 = vadd.f32 1.0, %v4972_v9 }
 0x2ff   : > { %v4976_v5 = vpop.eup %4975  ;;  %4997 = vpow2.f32 %v4290_v58  ;;  %v3784_v30 = vadd.f32 1.0, %v4974_v47 }
 0x300   : > { %4999 = vrcp.f32 %v3778_v35  ;;  %v4978_v46 = vpop.eup %4977  ;;  %v3782_v7 = vadd.f32 1.0, %v4976_v5  ;;  %v3655_v35 = vld [vmem:[%s6486_s24 + $0x30] sm:$0xff] }
 0x301   : > { %5001 = vpow2.f32 %v4295_v8  ;;  %v4980_v49 = vpop.eup %4979  ;;  %v3787_v52 = vadd.f32 1.0, %v4978_v46  ;;  %v4303_v8 = vmul.f32 -1.442695, %v6446_v15  ;;  %v3653_v46 = vld [vmem:[%s6486_s24 + $0x20] sm:$0xff] }
 0x302   : > { %5003 = vrcp.f32 %v3783_v40  ;;  %v4982_v28 = vpop.eup %4981  ;;  %v3785_v4 = vadd.f32 1.0, %v4980_v49 }
 0x303   : > { %5005 = vpow2.f32 %v4293_v39  ;;  %v4984_v17 = vpop.eup %4983  ;;  %v3788_v34 = vadd.f32 1.0, %v4982_v28 }
 0x304   : > { %5007 = vrcp.f32 %v3781_v18  ;;  %v4986_v59 = vpop.eup %4985  ;;  %v3786_v31 = vadd.f32 1.0, %v4984_v17 }
 0x305   : > { %5009 = vrcp.f32 %v3784_v30  ;;  %v4988_v45 = vpop.eup %4987  ;;  %v3875_v42 = vmul.f32 %v4986_v59, %v3651_v51 }
 0x306   : > { %5011 = vrcp.f32 %v3782_v7  ;;  %v4990_v20 = vpop.eup %4989  ;;  %v3791_v53 = vadd.f32 1.0, %v4988_v45 }
 0x307   : > { %5013 = vpow2.f32 %v4296_v0  ;;  %v4992_v23 = vpop.eup %4991  ;;  %v3873_v10 = vmul.f32 %v4990_v20, %v3649_v44  ;;  %v3907_v43 = vmul.f32 2.0, %v3875_v42  ;;  %v4301_v0 = vmul.f32 -1.442695, %v6449_v55 }
 0x308   : > { %5015 = vrcp.f32 %v3787_v52  ;;  %v3789_v12 = vadd.f32 1.0, %v4992_v23 }
 0x309   : > { %5017 = vrcp.f32 %v3785_v4  ;;  %v3905_v25 = vmul.f32 2.0, %v3873_v10  ;;  %v3656_v4 = vld [vmem:[%s6486_s24 + $0x38] sm:$0xff] }
 0x30a   : > { %v4994_v63 = vpop.eup %4993  ;;  %5019 = vrcp.f32 %v3788_v34 }
 0x30b   : > { %v4996_v11 = vpop.eup %4995  ;;  %5021 = vrcp.f32 %v3786_v31  ;;  %v3876_v36 = vmul.f32 %v4994_v63, %v3652_v33 }
 0x30c   : > { %v4998_v3 = vpop.eup %4997  ;;  %5023 = vpow2.f32 %v4294_v37  ;;  %v3792_v1 = vadd.f32 1.0, %v4996_v11 }
 0x30d   : > { %v5000_v56 = vpop.eup %4999  ;;  %5025 = vpow2.f32 %v4299_v41  ;;  %v3790_v14 = vadd.f32 1.0, %v4998_v3  ;;  %v3908_v18 = vmul.f32 2.0, %v3876_v36  ;;  %v3654_v41 = vld [vmem:[%s6486_s24 + $0x28] sm:$0xff] }
 0x30e   : > { %v5002_v24 = vpop.eup %5001  ;;  %5027 = vrcp.f32 %v3791_v53  ;;  %v3874_v58 = vmul.f32 %v5000_v56, %v3650_v21 }
 0x30f   : > { %v5004_v61 = vpop.eup %5003  ;;  %5029 = vpow2.f32 %v4297_v22  ;;  %v3795_v13 = vadd.f32 1.0, %v5002_v24  ;;  %v4304_v22 = vmul.f32 -1.442695, %v6452_v62 }
 0x310   : > { %v5006_v16 = vpop.eup %5005  ;;  %5031 = vrcp.f32 %v3789_v12  ;;  %v3879_v7 = vmul.f32 %v5004_v61, %v3655_v35  ;;  %v3906_v52 = vmul.f32 2.0, %v3874_v58  ;;  %v3659_v12 = vld [vmem:[%s6486_s24 + $0x50] sm:$0xff]  ;;  %v3657_v61 = vld [vmem:[%s6486_s24 + $0x40] sm:$0xff] }
 0x311   : > { %v5008_v26 = vpop.eup %5007  ;;  %5033 = vpow2.f32 %v4300_v19  ;;  %v3793_v5 = vadd.f32 1.0, %v5006_v16 }
 0x312   : > { %v5010_v9 = vpop.eup %5009  ;;  %5035 = vrcp.f32 %v3792_v1  ;;  %v3877_v31 = vmul.f32 %v5008_v26, %v3653_v46  ;;  %v3911_v53 = vmul.f32 2.0, %v3879_v7  ;;  %v4302_v1 = vmul.f32 -1.442695, %v6455_v38  ;;  %v3660_v26 = vld [vmem:[%s6486_s24 + $0x58] sm:$0xff] }
 0x313   : > { %v5012_v2 = vpop.eup %5011  ;;  %5037 = vrcp.f32 %v3790_v14  ;;  %v3880_v44 = vmul.f32 %v5010_v9, %v3656_v4 }
 0x314   : > { %v5014_v30 = vpop.eup %5013  ;;  %5039 = vpow2.f32 %v4298_v27  ;;  %v3909_v19 = vmul.f32 2.0, %v3877_v31  ;;  %v3878_v10 = vmul.f32 %v5012_v2, %v3654_v41 }
 0x315   : > { %v5016_v28 = vpop.eup %5015  ;;  %5041 = vrcp.f32 %v3795_v13  ;;  %v3796_v37 = vadd.f32 1.0, %v5014_v30  ;;  %v3912_v36 = vmul.f32 2.0, %v3880_v44 }
 0x316   : > { %v5018_v59 = vpop.eup %5017  ;;  %5043 = vpow2.f32 %v4303_v8  ;;  %v3883_v16 = vmul.f32 %v5016_v28, %v3659_v12  ;;  %v4305_v8 = vmul.f32 -1.442695, %v6475_v54  ;;  %v3662_v12 = vld [vmem:[%s6486_s24 + $0x68] sm:$0xff] }
 0x317   : > { %v5020_v20 = vpop.eup %5019  ;;  %5045 = vrcp.f32 %v3793_v5  ;;  %v3881_v58 = vmul.f32 %v5018_v59, %v3657_v61 }
 0x318   : > { %v5022_v55 = vpop.eup %5021  ;;  %5047 = vpow2.f32 %v4301_v0 }
 0x319   : > { %v5024_v11 = vpop.eup %5023  ;;  %5049 = vrcp.f32 %v3796_v37  ;;  %v3913_v0 = vmul.f32 2.0, %v3881_v58  ;;  %v3661_v37 = vld [vmem:[%s6486_s24 + $0x60] sm:$0xff] }
 0x31a   : > { %v5026_v42 = vpop.eup %5025  ;;  %5051 = vpow2.f32 %v4304_v22  ;;  %v3794_v9 = vadd.f32 1.0, %v5024_v11 }
 0x31b   : > { %v5028_v24 = vpop.eup %5027  ;;  %5053 = vpow2.f32 %v4302_v1  ;;  %v3799_v30 = vadd.f32 1.0, %v5026_v42 }
 0x31c   : > { %v5030_v14 = vpop.eup %5029 }
 0x31d   : > { %v5032_v27 = vpop.eup %5031  ;;  %v3797_v59 = vadd.f32 1.0, %v5030_v14 }
 0x31e   : > { %v5034_v13 = vpop.eup %5033 }
 0x31f   : > { %v5036_v35 = vpop.eup %5035 }
 0x37a   : > { %v4881_v57 = vpop.f32.mrf.mxu0 }
 0x37b   : > { %v3531_v6 = vadd.f32 %v4881_v57, %v6574_v50 }
 0x37c   : > { %v3522_v60 = vpop.f32.mrf.mxu0 }
 0x37d   : > { %v3939_v47 = vadd.f32 %v3907_v43, %v3531_v6  ;;  %v3523_v40 = vadd.f32 %v6574_v50, %v3522_v60  ;;  %v4307_v6 = vmul.f32 -1.442695, %v6467_v48  ;;  %v5038_v48 = vpop.eup %5037 }
 0x37e   : > { %v4882_v39 = vpop.f32.mrf.mxu0  ;;  %v5040_v46 = vpop.eup %5039  ;;  %v3886_v14 = vmul.f32 %v5038_v48, %v3662_v12 }
 0x37f   : > { %3971 = vst.msk [vmem:[%s6588_s18 + $0x10] sm:$0xff] %vm357_vm0, %v3939_v47  ;;  %v3937_v49 = vadd.f32 %v3905_v25, %v3523_v40  ;;  %v3534_v15 = vadd.f32 %v4882_v39, %v6574_v50  ;;  %v3910_v25 = vmul.f32 2.0, %v3878_v10  ;;  %v3658_v40 = vld [vmem:[%s6486_s24 + $0x48] sm:$0xff]  ;;  %v3915_v39 = vmul.f32 2.0, %v3883_v16  ;;  %v5042_v7 = vpop.eup %5041 }
 0x380   : > { %v3525_v17 = vpop.f32.mrf.mxu0  ;;  %5055 = vpow2.f32 %v4307_v6  ;;  %v5044_v4 = vpop.eup %5043  ;;  %v3798_v41 = vadd.f32 1.0, %v5040_v46  ;;  %v3665_v6 = vld [vmem:[%s6486_s24 + $0x80] sm:$0xff] }
 0x381   : > { %3969 = vst.msk [vmem:[%s6588_s18] sm:$0xff] %vm357_vm0, %v3937_v49  ;;  %v3940_v34 = vadd.f32 %v3908_v18, %v3534_v15  ;;  %v3526_v45 = vadd.f32 %v6574_v50, %v3525_v17  ;;  %v3884_v18 = vmul.f32 %v5020_v20, %v3660_v26  ;;  %v4308_v49 = vmul.f32 -1.442695, %v6470_v32 }
 0x382   : > { %v4885_v23 = vpop.f32.mrf.mxu0  ;;  %v3882_v17 = vmul.f32 %v5022_v55, %v3658_v40  ;;  %5057 = vrcp.f32 %v3794_v9 }
 0x383   : > { %3972 = vst.msk [vmem:[%s6588_s18 + $0x18] sm:$0xff] %vm357_vm0, %v3940_v34  ;;  %v3938_v51 = vadd.f32 %v3906_v52, %v3526_v45  ;;  %v3547_v63 = vadd.f32 %v4885_v23, %v6574_v50  ;;  %v3663_v52 = vld [vmem:[%s6486_s24 + $0x70] sm:$0xff]  ;;  %v5046_v45 = vpop.eup %5045  ;;  %5059 = vpow2.f32 %v4305_v8  ;;  %v3916_v20 = vmul.f32 2.0, %v3884_v18 }
 0x384   : > { %v3538_v3 = vpop.f32.mrf.mxu0  ;;  %5061 = vrcp.f32 %v3799_v30  ;;  %v3800_v23 = vadd.f32 1.0, %v5034_v13  ;;  %v3914_v22 = vmul.f32 2.0, %v3882_v17  ;;  %v3889_v40 = vmul.f32 %v5046_v45, %v3665_v6  ;;  %v3666_v30 = vld [vmem:[%s6486_s24 + $0x88] sm:$0xff] }
 0x385   : > { %3970 = vst.msk [vmem:[%s6588_s18 + $0x8] sm:$0xff] %vm357_vm0, %v3938_v51  ;;  %v3943_v33 = vadd.f32 %v3911_v53, %v3547_v63  ;;  %v3539_v56 = vadd.f32 %v6574_v50, %v3538_v3  ;;  %v3887_v51 = vmul.f32 %v5028_v24, %v3663_v52  ;;  %v3664_v63 = vld [vmem:[%s6486_s24 + $0x78] sm:$0xff]  ;;  %v5048_v53 = vpop.eup %5047  ;;  %5063 = vpow2.f32 %v4308_v49 }
 0x386   : > { %v4886_v21 = vpop.f32.mrf.mxu0  ;;  %5065 = vrcp.f32 %v3797_v59  ;;  %v3885_v3 = vmul.f32 %v5032_v27, %v3661_v37  ;;  %v5050_v42 = vpop.eup %5049  ;;  %v3888_v10 = vmul.f32 %v5036_v35, %v3664_v63  ;;  %v3668_v35 = vld [vmem:[%s6486_s24 + $0x98] sm:$0xff]  ;;  %v3921_v52 = vmul.f32 2.0, %v3889_v40 }
 0x387   : > { %3975 = vst.msk [vmem:[%s6588_s18 + $0x30] sm:$0xff] %vm357_vm0, %v3943_v33  ;;  %v3941_v62 = vadd.f32 %v3909_v19, %v3539_v56  ;;  %v3550_v57 = vadd.f32 %v4886_v21, %v6574_v50  ;;  %v3803_v33 = vadd.f32 1.0, %v5044_v4  ;;  %5067 = vrcp.f32 %v3800_v23  ;;  %v5052_v21 = vpop.eup %5051  ;;  %v3671_v4 = vld [vmem:[%s6486_s24 + $0xb0] sm:$0xff]  ;;  %v3669_v23 = vld [vmem:[%s6486_s24 + $0xa0] sm:$0xff] }
 0x388   : > { %v3541_v43 = vpop.f32.mrf.mxu0  ;;  %v3919_v1 = vmul.f32 2.0, %v3887_v51  ;;  %5069 = vrcp.f32 %v3798_v41  ;;  %v3917_v27 = vmul.f32 2.0, %v3885_v3  ;;  %v3920_v13 = vmul.f32 2.0, %v3888_v10  ;;  %v3670_v10 = vld [vmem:[%s6486_s24 + $0xa8] sm:$0xff] }
 0x389   : > { %3973 = vst.msk [vmem:[%s6588_s18 + $0x20] sm:$0xff] %vm357_vm0, %v3941_v62  ;;  %v3944_v38 = vadd.f32 %v3912_v36, %v3550_v57  ;;  %v3542_v60 = vadd.f32 %v6574_v50, %v3541_v43  ;;  %v3667_v62 = vld [vmem:[%s6486_s24 + $0x90] sm:$0xff]  ;;  %v3801_v57 = vadd.f32 1.0, %v5048_v53  ;;  %v5054_v43 = vpop.eup %5053  ;;  %5071 = vrcp.f32 %v3803_v33 }
 0x38a   : > { %v4889_v47 = vpop.f32.mrf.mxu0  ;;  %v3891_v58 = vmul.f32 %v5042_v7, %v3667_v62  ;;  %v3802_v48 = vadd.f32 1.0, %v5054_v43  ;;  %v3892_v46 = vmul.f32 %v5050_v42, %v3668_v35 }
 0x38b   : > { %3976 = vst.msk [vmem:[%s6588_s18 + $0x38] sm:$0xff] %vm357_vm0, %v3944_v38  ;;  %v3942_v2 = vadd.f32 %v3910_v25, %v3542_v60  ;;  %v3563_v5 = vadd.f32 %v4889_v47, %v6574_v50  ;;  %v3804_v38 = vadd.f32 1.0, %v5052_v21  ;;  %v3918_v47 = vmul.f32 2.0, %v3886_v14 }
 0x38c   : > { %v3554_v15 = vpop.f32.mrf.mxu0  ;;  %5073 = vrcp.f32 %v3801_v57  ;;  %v3924_v51 = vmul.f32 2.0, %v3892_v46  ;;  %v3675_v57 = vld [vmem:[%s6486_s24 + $0xd0] sm:$0xff] }
 0x38d   : > { %3974 = vst.msk [vmem:[%s6588_s18 + $0x28] sm:$0xff] %vm357_vm0, %v3942_v2  ;;  %v3947_v54 = vadd.f32 %v3915_v39, %v3563_v5  ;;  %v3555_v28 = vadd.f32 %v6574_v50, %v3554_v15  ;;  %v5056_v9 = vpop.eup %5055  ;;  %5075 = vrcp.f32 %v3804_v38 }
 0x38e   : > { %v4890_v34 = vpop.f32.mrf.mxu0  ;;  %5077 = vrcp.f32 %v3802_v48 }
 0x38f   : > { %3979 = vst.msk [vmem:[%s6588_s18 + $0x50] sm:$0xff] %vm357_vm0, %v3947_v54  ;;  %v3945_v32 = vadd.f32 %v3913_v0, %v3555_v28  ;;  %v3566_v31 = vadd.f32 %v4890_v34, %v6574_v50  ;;  %v5058_v39 = vpop.eup %5057  ;;  %v3923_v54 = vmul.f32 2.0, %v3891_v58  ;;  %v3807_v0 = vadd.f32 1.0, %v5056_v9 }
 0x390   : > { %v3557_v55 = vpop.f32.mrf.mxu0  ;;  %v5060_v49 = vpop.eup %5059 }
 0x391   : > { %3977 = vst.msk [vmem:[%s6588_s18 + $0x40] sm:$0xff] %vm357_vm0, %v3945_v32  ;;  %v3948_v44 = vadd.f32 %v3916_v20, %v3566_v31  ;;  %v3558_v11 = vadd.f32 %v6574_v50, %v3557_v55  ;;  %v5062_v28 = vpop.eup %5061  ;;  %v3890_v32 = vmul.f32 %v5058_v39, %v3666_v30  ;;  %v3805_v20 = vadd.f32 1.0, %v5060_v49 }
 0x392   : > { %v4893_v19 = vpop.f32.mrf.mxu0  ;;  %v5064_v59 = vpop.eup %5063  ;;  %v3895_v63 = vmul.f32 %v5062_v28, %v3671_v4  ;;  %5079 = vrcp.f32 %v3807_v0  ;;  %v3679_v4 = vld [vmem:[%s6486_s24 + $0xf0] sm:$0xff] }
 0x393   : > { %3980 = vst.msk [vmem:[%s6588_s18 + $0x58] sm:$0xff] %vm357_vm0, %v3948_v44  ;;  %v3946_v56 = vadd.f32 %v3914_v22, %v3558_v11  ;;  %v3579_v24 = vadd.f32 %v4893_v19, %v6574_v50  ;;  %v5066_v31 = vpop.eup %5065  ;;  %v3808_v44 = vadd.f32 1.0, %v5064_v59  ;;  %v3672_v22 = vld [vmem:[%s6486_s24 + $0xb8] sm:$0xff]  ;;  %v3922_v33 = vmul.f32 2.0, %v3890_v32 }
 0x394   : > { %v3570_v61 = vpop.f32.mrf.mxu0  ;;  %v5068_v53 = vpop.eup %5067  ;;  %5081 = vrcp.f32 %v3805_v20  ;;  %v3677_v20 = vld [vmem:[%s6486_s24 + $0xe0] sm:$0xff] }
 0x395   : > { %3978 = vst.msk [vmem:[%s6588_s18 + $0x48] sm:$0xff] %vm357_vm0, %v3946_v56  ;;  %v3951_v36 = vadd.f32 %v3919_v1, %v3579_v24  ;;  %v3571_v16 = vadd.f32 %v6574_v50, %v3570_v61  ;;  %v5070_v3 = vpop.eup %5069  ;;  %v3893_v56 = vmul.f32 %v5066_v31, %v3669_v23  ;;  %v3927_v61 = vmul.f32 2.0, %v3895_v63 }
 0x396   : > { %v4894_v26 = vpop.f32.mrf.mxu0  ;;  %v5072_v24 = vpop.eup %5071  ;;  %v3896_v14 = vmul.f32 %v5068_v53, %v3672_v22  ;;  %5083 = vrcp.f32 %v3808_v44  ;;  %v3894_v6 = vmul.f32 %v5070_v3, %v3670_v10  ;;  %v3680_v53 = vld [vmem:[%s6486_s24 + $0xf8] sm:$0xff] }
 0x397   : > { %3983 = vst.msk [vmem:[%s6588_s18 + $0x70] sm:$0xff] %vm357_vm0, %v3951_v36  ;;  %v3949_v60 = vadd.f32 %v3917_v27, %v3571_v16  ;;  %v3582_v25 = vadd.f32 %v4894_v26, %v6574_v50  ;;  %v3925_v27 = vmul.f32 2.0, %v3893_v56  ;;  %v3899_v58 = vmul.f32 %v5072_v24, %v3675_v57 }
 0x398   : > { %v3573_v8 = vpop.f32.mrf.mxu0  ;;  %v3926_v48 = vmul.f32 2.0, %v3894_v6 }
 0x399   : > { %3981 = vst.msk [vmem:[%s6588_s18 + $0x60] sm:$0xff] %vm357_vm0, %v3949_v60  ;;  %v3952_v2 = vadd.f32 %v3920_v13, %v3582_v25  ;;  %v3574_v5 = vadd.f32 %v6574_v50, %v3573_v8  ;;  %v5074_v43 = vpop.eup %5073  ;;  %v3673_v13 = vld [vmem:[%s6486_s24 + $0xc0] sm:$0xff]  ;;  %v3928_v25 = vmul.f32 2.0, %v3896_v14  ;;  %v3676_v8 = vld [vmem:[%s6486_s24 + $0xd8] sm:$0xff]  ;;  %v3931_v49 = vmul.f32 2.0, %v3899_v58 }
 0x39a   : > { %v4897_v18 = vpop.f32.mrf.mxu0  ;;  %v5076_v35 = vpop.eup %5075 }
 0x39b   : > { %3984 = vst.msk [vmem:[%s6588_s18 + $0x78] sm:$0xff] %vm357_vm0, %v3952_v2  ;;  %v3950_v15 = vadd.f32 %v3918_v47, %v3574_v5  ;;  %v3595_v7 = vadd.f32 %v4897_v18, %v6574_v50  ;;  %v3897_v2 = vmul.f32 %v5074_v43, %v3673_v13  ;;  %v5078_v5 = vpop.eup %5077  ;;  %v3674_v18 = vld [vmem:[%s6486_s24 + $0xc8] sm:$0xff]  ;;  %s5085_s24 = scalar_lea.vmem %s6719_s22, 4096 }
 0x39c   : > { %v3586_v17 = vpop.f32.mrf.mxu0  ;;  %p5086_p11 = scmp.ne.s32.totalorder %s6719_s22, %s5085_s24  ;;  %p5093_p1 = scmp.lt.s32.totalorder %s5091_s21, %s5085_s24 }
 0x39d   : > { %3982 = vst.msk [vmem:[%s6588_s18 + $0x68] sm:$0xff] %vm357_vm0, %v3950_v15  ;;  %v3955_v34 = vadd.f32 %v3923_v54, %v3595_v7  ;;  %v3587_v45 = vadd.f32 %v6574_v50, %v3586_v17  ;;  %v3900_v15 = vmul.f32 %v5076_v35, %v3676_v8  ;;  %v3929_v17 = vmul.f32 2.0, %v3897_v2 }
 0x39e   : > { %v4898_v37 = vpop.f32.mrf.mxu0  ;;  %p5087_p12 = pnand %p5086_p11, %p5234_p5  ;;  %p5094_p2 = por %p5093_p1, %p5092_p0 }
 0x39f   : > { %3987 = vst.msk [vmem:[%s6588_s18 + $0x90] sm:$0xff] %vm357_vm0, %v3955_v34  ;;  %v3953_v41 = vadd.f32 %v3921_v52, %v3587_v45  ;;  %v3598_v55 = vadd.f32 %v4898_v37, %v6574_v50  ;;  %v5080_v54 = vpop.eup %5079  ;;  %v3898_v52 = vmul.f32 %v5078_v5, %v3674_v18  ;;  %v3932_v31 = vmul.f32 2.0, %v3900_v15 }
 0x3a0   : > { %v3589_v11 = vpop.f32.mrf.mxu0  ;;  %v3903_v23 = vmul.f32 %v5080_v54, %v3679_v4  ;;  %p5088_p13 = pneg %p5087_p12 }
 0x3a1   : > { %3985 = vst.msk [vmem:[%s6588_s18 + $0x80] sm:$0xff] %vm357_vm0, %v3953_v41  ;;  %v3956_v12 = vadd.f32 %v3924_v51, %v3598_v55  ;;  %v3590_v42 = vadd.f32 %v6574_v50, %v3589_v11  ;;  %v5082_v34 = vpop.eup %5081  ;;  %v3930_v63 = vmul.f32 2.0, %v3898_v52 }
 0x3a2   : > { %v4901_v19 = vpop.f32.mrf.mxu0  ;;  %v3901_v44 = vmul.f32 %v5082_v34, %v3677_v20  ;;  %p5095_p3 = pnand %p5094_p2, %p5088_p13 }
 0x3a3   : > { %3988 = vst.msk [vmem:[%s6588_s18 + $0x98] sm:$0xff] %vm357_vm0, %v3956_v12  ;;  %v3954_v1 = vadd.f32 %v3922_v33, %v3590_v42  ;;  %v3611_v21 = vadd.f32 %v4901_v19, %v6574_v50  ;;  %v5084_v41 = vpop.eup %5083  ;;  %v3935_v12 = vmul.f32 2.0, %v3903_v23 }
 0x3a4   : > { %v3602_v62 = vpop.f32.mrf.mxu0  ;;  %v3904_v42 = vmul.f32 %v5084_v41, %v3680_v53  ;;  %v3933_v10 = vmul.f32 2.0, %v3901_v44 }
 0x3a5   : > { %3986 = vst.msk [vmem:[%s6588_s18 + $0x88] sm:$0xff] %vm357_vm0, %v3954_v1  ;;  %v3959_v36 = vadd.f32 %v3927_v61, %v3611_v21  ;;  %v3603_v16 = vadd.f32 %v6574_v50, %v3602_v62 }
 0x3a6   : > { %v4902_v26 = vpop.f32.mrf.mxu0  ;;  %v3936_v61 = vmul.f32 2.0, %v3904_v42 }
 0x3a7   : > { %3991 = vst.msk [vmem:[%s6588_s18 + $0xb0] sm:$0xff] %vm357_vm0, %v3959_v36  ;;  %v3957_v38 = vadd.f32 %v3925_v27, %v3603_v16  ;;  %v3614_v60 = vadd.f32 %v4902_v26, %v6574_v50  ;;  %v3934_v36 = vmul.f32 2.0, %v6489_v29 }
 0x3a8   : > { %v3605_v9 = vpop.f32.mrf.mxu0 }
 0x3a9   : > { %3989 = vst.msk [vmem:[%s6588_s18 + $0xa0] sm:$0xff] %vm357_vm0, %v3957_v38  ;;  %v3960_v47 = vadd.f32 %v3928_v25, %v3614_v60  ;;  %v3606_v40 = vadd.f32 %v6574_v50, %v3605_v9 }
 0x3aa   : > { %v4905_v39 = vpop.f32.mrf.mxu0 }
 0x3ab   : > { %3992 = vst.msk [vmem:[%s6588_s18 + $0xb8] sm:$0xff] %vm357_vm0, %v3960_v47  ;;  %v3958_v46 = vadd.f32 %v3926_v48, %v3606_v40  ;;  %v3627_v30 = vadd.f32 %v4905_v39, %v6574_v50 }
 0x3ac   : > { %v3618_v7 = vpop.f32.mrf.mxu0 }
 0x3ad   : > { %3990 = vst.msk [vmem:[%s6588_s18 + $0xa8] sm:$0xff] %vm357_vm0, %v3958_v46  ;;  %v3963_v28 = vadd.f32 %v3931_v49, %v3627_v30  ;;  %v3619_v0 = vadd.f32 %v6574_v50, %v3618_v7 }
 0x3ae   : > { %v4906_v59 = vpop.f32.mrf.mxu0 }
 0x3af   : > { %3995 = vst.msk [vmem:[%s6588_s18 + $0xd0] sm:$0xff] %vm357_vm0, %v3963_v28  ;;  %v3961_v45 = vadd.f32 %v3929_v17, %v3619_v0  ;;  %v3630_v32 = vadd.f32 %v4906_v59, %v6574_v50 }
 0x3b0   : > { %v3621_v37 = vpop.f32.mrf.mxu0 }
 0x3b1   : > { %3993 = vst.msk [vmem:[%s6588_s18 + $0xc0] sm:$0xff] %vm357_vm0, %v3961_v45  ;;  %v3964_v55 = vadd.f32 %v3932_v31, %v3630_v32  ;;  %v3622_v51 = vadd.f32 %v6574_v50, %v3621_v37 }
 0x3b2   : > { %v4909_v22 = vpop.f32.mrf.mxu0 }
 0x3b3   : > { %3996 = vst.msk [vmem:[%s6588_s18 + $0xd8] sm:$0xff] %vm357_vm0, %v3964_v55  ;;  %v3962_v11 = vadd.f32 %v3930_v63, %v3622_v51  ;;  %v3643_v3 = vadd.f32 %v4909_v22, %v6574_v50 }
 0x3b4   : > { %v3634_v33 = vpop.f32.mrf.mxu0 }
 0x3b5   : > { %3994 = vst.msk [vmem:[%s6588_s18 + $0xc8] sm:$0xff] %vm357_vm0, %v3962_v11  ;;  %v3967_v56 = vadd.f32 %v3935_v12, %v3643_v3  ;;  %v3635_v19 = vadd.f32 %v6574_v50, %v3634_v33 }
 0x3b6   : > { %v4910_v24 = vpop.f32.mrf.mxu0 }
 0x3b7   : > { %3999 = vst.msk [vmem:[%s6588_s18 + $0xf0] sm:$0xff] %vm357_vm0, %v3967_v56  ;;  %v3965_v1 = vadd.f32 %v3933_v10, %v3635_v19  ;;  %v3646_v21 = vadd.f32 %v4910_v24, %v6574_v50 }
 0x3b8   : > { %v3637_v14 = vpop.f32.mrf.mxu0 }
 0x3b9   : > { %3997 = vst.msk [vmem:[%s6588_s18 + $0xe0] sm:$0xff] %vm357_vm0, %v3965_v1  ;;  %v3968_v62 = vadd.f32 %v3936_v61, %v3646_v21  ;;  %v3638_v57 = vadd.f32 %v6574_v50, %v3637_v14 }
 0x3bb   : > { %4000 = vst.msk [vmem:[%s6588_s18 + $0xf8] sm:$0xff] %vm357_vm0, %v3968_v62  ;;  %v3966_v16 = vadd.f32 %v3934_v36, %v3638_v57 }
 0x3bd   : > { %3998 = vst.msk [vmem:[%s6588_s18 + $0xe8] sm:$0xff] %vm357_vm0, %v3966_v16 }
 0x3be   : > { %5098 = shalt.err (!%p5095_p3)
}
 0x3bf   : > { %s5099_s20 = scalar_lea.hbm %s6717_s26, 4096  ;;  %s5103_s18 = scalar_lea.hbm %s6775_s8, 8192 }
 0x3c0   : > { %p5100_p4 = scmp.ne.s32.totalorder %s6717_s26, %s5099_s20  ;;  %p5104_p9 = scmp.lt.s32.totalorder %s6717_s26, %s6775_s8 }
 0x3c1   : > { %p5105_p10 = scmp.lt.s32.totalorder %s5103_s18, %s5099_s20 }
 0x3c2   : > { %p5101_p7 = pnand %p5100_p4, %p5234_p5 }
 0x3c3   : > { %p5106_p11 = por %p5105_p10, %p5104_p9 }
 0x3c4   : > { %p5102_p8 = pneg %p5101_p7 }
 0x3c6   : > { %p5107_p12 = pnand %p5106_p11, %p5102_p8 }
 0x3c8   : > { %5110 = shalt.err (!%p5107_p12)
}
 0x3c9   : > { %s5149_s25 = smov 128   ;;  %s5150_s24 = smov 8  }
 0x3ca   : > { %4915 = dma.vmem_to_hbm [thread:$0]  (%p5234_p5), %s6719_s22, 4096, %s6717_s26, %s6727_s9, %s5149_s25, %s5149_s25, %s5150_s24  }
 0x3cb PF: > { %p4921_p13 = scmp.ge.s32.totalorder %s5145_s30, 2  ;;  %s4030_s10 = sand.u32 1, %s5133_s27  }
 0x3cc   : > { %s4031_s12 = scalar_lea.sflag [#allocation4], %s4030_s10 }
 0x3cd   : > { %p4918_p0 = pnand %p4921_p13, %p5238_p6 }
 0x3cf   : > { %p4919_p1 = pneg %p4918_p0 }
 0x3d1   : > { %5128 = dma.done.wait (%p4919_p1), %s4031_s12, 4096  }
 0x3d2   : > { %5130 = vsyncadd (%p4919_p1), %s4031_s12, 4294963200  ;;  %p18_p2 = scmp.ge.s32.totalorder %s5221_s11, 4   ;;  %s6800_s27 = smov %s5137_s28 }
 0x3d3   : > { %s6801_s28 = smov %s5141_s29  ;;  %s6802_s29 = smov %s5232_s14 }
 0x3d4   : > { %s6803_s30 = smov %s5221_s11  ;;  %20 = sbr.rel (!%p18_p2) target bundleno = 3 (0x3), region = 92 }
 0x3d9   :  { %4036 = vsyncpa [#allocation4], 1 }
 0x3da   :  { %4038 = vsyncpa [#allocation4 + $0x1], 1 }

</bundles_post_ra>
